<compile_context>
chip_gen: v7x
topology: tpu7x:2x2x1
jax: 0.10.0
libtpu: 0.0.40
codegen_flags: <defaults>
</compile_context>

<pallas_src>
import jax
import jax.numpy as jnp
from jax.experimental import pallas as pl
from jax.experimental.pallas import tpu as pltpu


# ---------------------------------------------------------------------------
# Fused Pallas kernel: conv3x3 -> BN -> LeakyReLU -> conv3x3 -> BN -> +x
# ---------------------------------------------------------------------------
def _resblock_kernel(x_ref, w1_ref, w2_ref, g1_ref, b1_ref, g2_ref, b2_ref,
                     o_ref, xp_ref):
    """x_ref:(N,H,W,C) NHWC; w*_ref:(3,3,C,C) HWIO; g*/b*:(1,C);
    o_ref:(N,H,W,C); xp_ref: VMEM scratch (N,H+2,W+2,C) f32 (padded input,
    reused for both convs -- the zero halo is written only once)."""
    N, H, W, C = x_ref.shape
    M = N * H * W
    inv_m = 1.0 / M
    eps = 1e-5

    # Zero the scratch once; only the interior is rewritten afterwards, so the
    # 1-pixel halo stays zero for both convolutions.
    xp_ref[...] = jnp.zeros_like(xp_ref)

    def conv3x3(w_ref):
        # 3x3 / stride 1 / SAME conv on the padded scratch.
        # The 3 dx (sublane) shifted slabs are loaded once and reused across
        # the 3 dy taps (dy slices a major dim -> cheap).
        acc = jnp.zeros((M, C), jnp.float32)
        for dx in range(3):
            slab = xp_ref[:, :, dx:dx + W, :]                # (N, H+2, W, C)
            for dy in range(3):
                patch = slab[:, dy:dy + H].reshape(M, C)     # layout-preserving
                acc = acc + jnp.dot(patch,
                                    w_ref[dy, dx].astype(jnp.float32),
                                    preferred_element_type=jnp.float32)
        return acc                                           # (M, C) f32

    def bn_scale_shift(y, g_ref, b_ref):
        # Training-mode BatchNorm2d: per-batch mean, biased variance.
        mean = jnp.sum(y, axis=0, keepdims=True) * inv_m              # (1, C)
        d = y - mean
        var = jnp.sum(d * d, axis=0, keepdims=True) * inv_m           # (1, C)
        inv_std = jax.lax.rsqrt(var + eps)
        # One Newton step so accuracy matches the f32 reference even if the
        # hardware rsqrt is an approximation.
        inv_std = inv_std * (1.5 - 0.5 * (var + eps) * inv_std * inv_std)
        scale = g_ref[...] * inv_std
        shift = b_ref[...] - mean * scale
        return scale, shift

    xf = x_ref[...].astype(jnp.float32)                      # (N, H, W, C)

    # ---- conv1 -> BN1 -> LeakyReLU(0.2) ----
    xp_ref[:, 1:1 + H, 1:1 + W, :] = xf
    y1 = conv3x3(w1_ref)                                     # (M, C)
    s1, sh1 = bn_scale_shift(y1, g1_ref, b1_ref)
    z1 = y1 * s1 + sh1
    a1 = jnp.where(z1 >= 0.0, z1, 0.2 * z1)

    # ---- conv2 -> BN2 -> + residual ----
    xp_ref[:, 1:1 + H, 1:1 + W, :] = a1.reshape(N, H, W, C)
    y2 = conv3x3(w2_ref)
    s2, sh2 = bn_scale_shift(y2, g2_ref, b2_ref)
    out = y2 * s2 + sh2 + xf.reshape(M, C)

    o_ref[...] = out.reshape(N, H, W, C).astype(o_ref.dtype)


# ---------------------------------------------------------------------------
# pallas_call wrapper
# ---------------------------------------------------------------------------
def _resblock_pallas(x_nhwc, w1, w2, g1, b1, g2, b2):
    N, H, W, C = x_nhwc.shape
    full = pl.BlockSpec((N, H, W, C), lambda i: (0, 0, 0, 0))
    wspec = pl.BlockSpec((3, 3, C, C), lambda i: (0, 0, 0, 0))
    cspec = pl.BlockSpec((1, C), lambda i: (0, 0))
    return pl.pallas_call(
        _resblock_kernel,
        out_shape=jax.ShapeDtypeStruct((N, H, W, C), x_nhwc.dtype),
        grid=(1,),
        in_specs=[full, wspec, wspec, cspec, cspec, cspec, cspec],
        out_specs=full,
        scratch_shapes=[pltpu.VMEM((N, H + 2, W + 2, C), jnp.float32)],
        compiler_params=pltpu.CompilerParams(
            dimension_semantics=("arbitrary",)),
    )(x_nhwc, w1, w2,
      g1.reshape(1, C), b1.reshape(1, C),
      g2.reshape(1, C), b2.reshape(1, C))


def basic_res_block(x_nchw, params):
    w1, w2, g1, b1, g2, b2 = params
    x = jnp.transpose(x_nchw, (0, 2, 3, 1))          # NCHW -> NHWC (wrapper)
    out = _resblock_pallas(x, w1, w2, g1, b1, g2, b2)
    return jnp.transpose(out, (0, 3, 1, 2))          # NHWC -> NCHW


# ---------------------------------------------------------------------------
# Pure-JAX reference (for correctness check)
# ---------------------------------------------------------------------------
def basic_res_block_ref(x_nchw, params):
    w1, w2, g1, b1, g2, b2 = params
    x = jnp.transpose(x_nchw, (0, 2, 3, 1))
    dn = ("NHWC", "HWIO", "NHWC")

    def conv(a, w):
        return jax.lax.conv_general_dilated(a, w, (1, 1), "SAME",
                                            dimension_numbers=dn)

    def bn(y, g, b, eps=1e-5):
        m = jnp.mean(y, axis=(0, 1, 2))
        v = jnp.mean((y - m) ** 2, axis=(0, 1, 2))
        return (y - m) / jnp.sqrt(v + eps) * g + b

    y = bn(conv(x, w1), g1, b1)
    y = jnp.where(y >= 0, y, 0.2 * y)
    y = bn(conv(y, w2), g2, b2)
    return jnp.transpose(y + x, (0, 3, 1, 2))


# ---------------------------------------------------------------------------
# main
# ---------------------------------------------------------------------------
if __name__ == "__main__":
    N, C, H, W = 2, 4, 16, 16
    key = jax.random.PRNGKey(0)
    kx, kw1, kw2 = jax.random.split(key, 3)

    x = jax.random.normal(kx, (N, C, H, W), dtype=jnp.float32)

    # conv3x3 weights stored as (kh, kw, cin, cout); torch-like init bound
    fan_in = C * 3 * 3
    bound = 1.0 / (fan_in ** 0.5)
    w1 = jax.random.uniform(kw1, (3, 3, C, C), jnp.float32, -bound, bound)
    w2 = jax.random.uniform(kw2, (3, 3, C, C), jnp.float32, -bound, bound)
    gamma1 = jnp.ones((C,), jnp.float32)
    beta1 = jnp.zeros((C,), jnp.float32)
    gamma2 = jnp.ones((C,), jnp.float32)
    beta2 = jnp.zeros((C,), jnp.float32)
    params = (w1, w2, gamma1, beta1, gamma2, beta2)

    fwd = jax.jit(basic_res_block)
    out = jax.block_until_ready(fwd(x, params))
    ref = jax.block_until_ready(basic_res_block_ref(x, params))

    assert out.shape == (N, C, H, W)
    err = float(jnp.max(jnp.abs(out - ref)))
    assert err < 1e-3, f"max abs err {err}"
    print("KERNEL_OK")
</pallas_src>

<mosaic_0001>
module attributes {stable_mosaic.version = 11 : i64} {
  func.func @_resblock_kernel(%arg0: i32, %arg1: memref<2x16x16x4xf32, #tpu.memory_space<vmem>>, %arg2: memref<3x3x4x4xf32, #tpu.memory_space<vmem>>, %arg3: memref<3x3x4x4xf32, #tpu.memory_space<vmem>>, %arg4: memref<1x4xf32, #tpu.memory_space<vmem>>, %arg5: memref<1x4xf32, #tpu.memory_space<vmem>>, %arg6: memref<1x4xf32, #tpu.memory_space<vmem>>, %arg7: memref<1x4xf32, #tpu.memory_space<vmem>>, %arg8: memref<2x16x16x4xf32, #tpu.memory_space<vmem>>, %arg9: memref<2x18x18x4xf32, #tpu.memory_space<vmem>>) attributes {dimension_semantics = [#tpu.dimension_semantics<arbitrary>], iteration_bounds = array<i64: 1>, scalar_prefetch = 0 : i64, scratch_operands = 1 : i64, tpu.core_type = #tpu.core_type<tc>, window_params = [{pipeline_mode = #tpu.pipeline_mode<synchronous>, transform_indices = @transform_0, window_bounds = array<i64: 2, 16, 16, 4>}, {pipeline_mode = #tpu.pipeline_mode<synchronous>, transform_indices = @transform_1, window_bounds = array<i64: 3, 3, 4, 4>}, {pipeline_mode = #tpu.pipeline_mode<synchronous>, transform_indices = @transform_2, window_bounds = array<i64: 3, 3, 4, 4>}, {pipeline_mode = #tpu.pipeline_mode<synchronous>, transform_indices = @transform_3, window_bounds = array<i64: 1, 4>}, {pipeline_mode = #tpu.pipeline_mode<synchronous>, transform_indices = @transform_4, window_bounds = array<i64: 1, 4>}, {pipeline_mode = #tpu.pipeline_mode<synchronous>, transform_indices = @transform_5, window_bounds = array<i64: 1, 4>}, {pipeline_mode = #tpu.pipeline_mode<synchronous>, transform_indices = @transform_6, window_bounds = array<i64: 1, 4>}, {pipeline_mode = #tpu.pipeline_mode<synchronous>, transform_indices = @transform_7, window_bounds = array<i64: 2, 16, 16, 4>}]} {
    %cst = arith.constant 0.000000e+00 : f32
    %0 = vector.broadcast %cst : f32 to vector<2x18x18x4xf32>
    %c0 = arith.constant 0 : index
    %c0_0 = arith.constant 0 : index
    %c0_1 = arith.constant 0 : index
    %c0_2 = arith.constant 0 : index
    %1 = vector.load %arg9[%c0, %c0_0, %c0_1, %c0_2] : memref<2x18x18x4xf32, #tpu.memory_space<vmem>>, vector<2x18x18x4xf32>
    tpu.vector_store %arg9[%c0, %c0_0, %c0_1, %c0_2], %0 {strides = array<i32>} : memref<2x18x18x4xf32, #tpu.memory_space<vmem>>, vector<2x18x18x4xf32>,
    %c0_3 = arith.constant 0 : index
    %c0_4 = arith.constant 0 : index
    %c0_5 = arith.constant 0 : index
    %c0_6 = arith.constant 0 : index
    %2 = vector.load %arg1[%c0_3, %c0_4, %c0_5, %c0_6] : memref<2x16x16x4xf32, #tpu.memory_space<vmem>>, vector<2x16x16x4xf32>
    %c0_7 = arith.constant 0 : index
    %c1 = arith.constant 1 : index
    %c1_8 = arith.constant 1 : index
    %c0_9 = arith.constant 0 : index
    %3 = vector.load %arg9[%c0_7, %c1, %c1_8, %c0_9] : memref<2x18x18x4xf32, #tpu.memory_space<vmem>>, vector<2x16x16x4xf32>
    tpu.vector_store %arg9[%c0_7, %c1, %c1_8, %c0_9], %2 {strides = array<i32>} : memref<2x18x18x4xf32, #tpu.memory_space<vmem>>, vector<2x16x16x4xf32>,
    %cst_10 = arith.constant 0.000000e+00 : f32
    %4 = vector.broadcast %cst_10 : f32 to vector<512x4xf32>
    %c0_11 = arith.constant 0 : index
    %c0_12 = arith.constant 0 : index
    %c0_13 = arith.constant 0 : index
    %c0_14 = arith.constant 0 : index
    %5 = vector.load %arg9[%c0_11, %c0_12, %c0_13, %c0_14] : memref<2x18x18x4xf32, #tpu.memory_space<vmem>>, vector<2x18x16x4xf32>
    %6 = vector.extract_strided_slice %5 {offsets = [0, 0, 0, 0], sizes = [2, 16, 16, 4], strides = [1, 1, 1, 1]} : vector<2x18x16x4xf32> to vector<2x16x16x4xf32>
    %7 = vector.shape_cast %6 : vector<2x16x16x4xf32> to vector<512x4xf32>
    %c0_15 = arith.constant 0 : index
    %c0_16 = arith.constant 0 : index
    %c0_17 = arith.constant 0 : index
    %c0_18 = arith.constant 0 : index
    %8 = vector.load %arg2[%c0_15, %c0_16, %c0_17, %c0_18] : memref<3x3x4x4xf32, #tpu.memory_space<vmem>>, vector<1x1x4x4xf32>
    %9 = vector.shape_cast %8 : vector<1x1x4x4xf32> to vector<4x4xf32>
    %cst_19 = arith.constant dense<0.000000e+00> : vector<512x4xf32>
    %10 = tpu.matmul %7, %9, %cst_19 {dimension_numbers = #tpu.dot_dimension_numbers<[1], [0], [0], [1], [0, 0, 1, 1], [], []>} : vector<512x4xf32>, vector<4x4xf32>, vector<512x4xf32> -> vector<512x4xf32>
    %11 = arith.addf %4, %10 : vector<512x4xf32>
    %12 = vector.extract_strided_slice %5 {offsets = [0, 1, 0, 0], sizes = [2, 16, 16, 4], strides = [1, 1, 1, 1]} : vector<2x18x16x4xf32> to vector<2x16x16x4xf32>
    %13 = vector.shape_cast %12 : vector<2x16x16x4xf32> to vector<512x4xf32>
    %c1_20 = arith.constant 1 : index
    %c0_21 = arith.constant 0 : index
    %c0_22 = arith.constant 0 : index
    %c0_23 = arith.constant 0 : index
    %14 = vector.load %arg2[%c1_20, %c0_21, %c0_22, %c0_23] : memref<3x3x4x4xf32, #tpu.memory_space<vmem>>, vector<1x1x4x4xf32>
    %15 = vector.shape_cast %14 : vector<1x1x4x4xf32> to vector<4x4xf32>
    %cst_24 = arith.constant dense<0.000000e+00> : vector<512x4xf32>
    %16 = tpu.matmul %13, %15, %cst_24 {dimension_numbers = #tpu.dot_dimension_numbers<[1], [0], [0], [1], [0, 0, 1, 1], [], []>} : vector<512x4xf32>, vector<4x4xf32>, vector<512x4xf32> -> vector<512x4xf32>
    %17 = arith.addf %11, %16 : vector<512x4xf32>
    %18 = vector.extract_strided_slice %5 {offsets = [0, 2, 0, 0], sizes = [2, 16, 16, 4], strides = [1, 1, 1, 1]} : vector<2x18x16x4xf32> to vector<2x16x16x4xf32>
    %19 = vector.shape_cast %18 : vector<2x16x16x4xf32> to vector<512x4xf32>
    %c2 = arith.constant 2 : index
    %c0_25 = arith.constant 0 : index
    %c0_26 = arith.constant 0 : index
    %c0_27 = arith.constant 0 : index
    %20 = vector.load %arg2[%c2, %c0_25, %c0_26, %c0_27] : memref<3x3x4x4xf32, #tpu.memory_space<vmem>>, vector<1x1x4x4xf32>
    %21 = vector.shape_cast %20 : vector<1x1x4x4xf32> to vector<4x4xf32>
    %cst_28 = arith.constant dense<0.000000e+00> : vector<512x4xf32>
    %22 = tpu.matmul %19, %21, %cst_28 {dimension_numbers = #tpu.dot_dimension_numbers<[1], [0], [0], [1], [0, 0, 1, 1], [], []>} : vector<512x4xf32>, vector<4x4xf32>, vector<512x4xf32> -> vector<512x4xf32>
    %23 = arith.addf %17, %22 : vector<512x4xf32>
    %c0_29 = arith.constant 0 : index
    %c0_30 = arith.constant 0 : index
    %c1_31 = arith.constant 1 : index
    %c0_32 = arith.constant 0 : index
    %24 = vector.load %arg9[%c0_29, %c0_30, %c1_31, %c0_32] : memref<2x18x18x4xf32, #tpu.memory_space<vmem>>, vector<2x18x16x4xf32>
    %25 = vector.extract_strided_slice %24 {offsets = [0, 0, 0, 0], sizes = [2, 16, 16, 4], strides = [1, 1, 1, 1]} : vector<2x18x16x4xf32> to vector<2x16x16x4xf32>
    %26 = vector.shape_cast %25 : vector<2x16x16x4xf32> to vector<512x4xf32>
    %c0_33 = arith.constant 0 : index
    %c1_34 = arith.constant 1 : index
    %c0_35 = arith.constant 0 : index
    %c0_36 = arith.constant 0 : index
    %27 = vector.load %arg2[%c0_33, %c1_34, %c0_35, %c0_36] : memref<3x3x4x4xf32, #tpu.memory_space<vmem>>, vector<1x1x4x4xf32>
    %28 = vector.shape_cast %27 : vector<1x1x4x4xf32> to vector<4x4xf32>
    %cst_37 = arith.constant dense<0.000000e+00> : vector<512x4xf32>
    %29 = tpu.matmul %26, %28, %cst_37 {dimension_numbers = #tpu.dot_dimension_numbers<[1], [0], [0], [1], [0, 0, 1, 1], [], []>} : vector<512x4xf32>, vector<4x4xf32>, vector<512x4xf32> -> vector<512x4xf32>
    %30 = arith.addf %23, %29 : vector<512x4xf32>
    %31 = vector.extract_strided_slice %24 {offsets = [0, 1, 0, 0], sizes = [2, 16, 16, 4], strides = [1, 1, 1, 1]} : vector<2x18x16x4xf32> to vector<2x16x16x4xf32>
    %32 = vector.shape_cast %31 : vector<2x16x16x4xf32> to vector<512x4xf32>
    %c1_38 = arith.constant 1 : index
    %c1_39 = arith.constant 1 : index
    %c0_40 = arith.constant 0 : index
    %c0_41 = arith.constant 0 : index
    %33 = vector.load %arg2[%c1_38, %c1_39, %c0_40, %c0_41] : memref<3x3x4x4xf32, #tpu.memory_space<vmem>>, vector<1x1x4x4xf32>
    %34 = vector.shape_cast %33 : vector<1x1x4x4xf32> to vector<4x4xf32>
    %cst_42 = arith.constant dense<0.000000e+00> : vector<512x4xf32>
    %35 = tpu.matmul %32, %34, %cst_42 {dimension_numbers = #tpu.dot_dimension_numbers<[1], [0], [0], [1], [0, 0, 1, 1], [], []>} : vector<512x4xf32>, vector<4x4xf32>, vector<512x4xf32> -> vector<512x4xf32>
    %36 = arith.addf %30, %35 : vector<512x4xf32>
    %37 = vector.extract_strided_slice %24 {offsets = [0, 2, 0, 0], sizes = [2, 16, 16, 4], strides = [1, 1, 1, 1]} : vector<2x18x16x4xf32> to vector<2x16x16x4xf32>
    %38 = vector.shape_cast %37 : vector<2x16x16x4xf32> to vector<512x4xf32>
    %c2_43 = arith.constant 2 : index
    %c1_44 = arith.constant 1 : index
    %c0_45 = arith.constant 0 : index
    %c0_46 = arith.constant 0 : index
    %39 = vector.load %arg2[%c2_43, %c1_44, %c0_45, %c0_46] : memref<3x3x4x4xf32, #tpu.memory_space<vmem>>, vector<1x1x4x4xf32>
    %40 = vector.shape_cast %39 : vector<1x1x4x4xf32> to vector<4x4xf32>
    %cst_47 = arith.constant dense<0.000000e+00> : vector<512x4xf32>
    %41 = tpu.matmul %38, %40, %cst_47 {dimension_numbers = #tpu.dot_dimension_numbers<[1], [0], [0], [1], [0, 0, 1, 1], [], []>} : vector<512x4xf32>, vector<4x4xf32>, vector<512x4xf32> -> vector<512x4xf32>
    %42 = arith.addf %36, %41 : vector<512x4xf32>
    %c0_48 = arith.constant 0 : index
    %c0_49 = arith.constant 0 : index
    %c2_50 = arith.constant 2 : index
    %c0_51 = arith.constant 0 : index
    %43 = vector.load %arg9[%c0_48, %c0_49, %c2_50, %c0_51] : memref<2x18x18x4xf32, #tpu.memory_space<vmem>>, vector<2x18x16x4xf32>
    %44 = vector.extract_strided_slice %43 {offsets = [0, 0, 0, 0], sizes = [2, 16, 16, 4], strides = [1, 1, 1, 1]} : vector<2x18x16x4xf32> to vector<2x16x16x4xf32>
    %45 = vector.shape_cast %44 : vector<2x16x16x4xf32> to vector<512x4xf32>
    %c0_52 = arith.constant 0 : index
    %c2_53 = arith.constant 2 : index
    %c0_54 = arith.constant 0 : index
    %c0_55 = arith.constant 0 : index
    %46 = vector.load %arg2[%c0_52, %c2_53, %c0_54, %c0_55] : memref<3x3x4x4xf32, #tpu.memory_space<vmem>>, vector<1x1x4x4xf32>
    %47 = vector.shape_cast %46 : vector<1x1x4x4xf32> to vector<4x4xf32>
    %cst_56 = arith.constant dense<0.000000e+00> : vector<512x4xf32>
    %48 = tpu.matmul %45, %47, %cst_56 {dimension_numbers = #tpu.dot_dimension_numbers<[1], [0], [0], [1], [0, 0, 1, 1], [], []>} : vector<512x4xf32>, vector<4x4xf32>, vector<512x4xf32> -> vector<512x4xf32>
    %49 = arith.addf %42, %48 : vector<512x4xf32>
    %50 = vector.extract_strided_slice %43 {offsets = [0, 1, 0, 0], sizes = [2, 16, 16, 4], strides = [1, 1, 1, 1]} : vector<2x18x16x4xf32> to vector<2x16x16x4xf32>
    %51 = vector.shape_cast %50 : vector<2x16x16x4xf32> to vector<512x4xf32>
    %c1_57 = arith.constant 1 : index
    %c2_58 = arith.constant 2 : index
    %c0_59 = arith.constant 0 : index
    %c0_60 = arith.constant 0 : index
    %52 = vector.load %arg2[%c1_57, %c2_58, %c0_59, %c0_60] : memref<3x3x4x4xf32, #tpu.memory_space<vmem>>, vector<1x1x4x4xf32>
    %53 = vector.shape_cast %52 : vector<1x1x4x4xf32> to vector<4x4xf32>
    %cst_61 = arith.constant dense<0.000000e+00> : vector<512x4xf32>
    %54 = tpu.matmul %51, %53, %cst_61 {dimension_numbers = #tpu.dot_dimension_numbers<[1], [0], [0], [1], [0, 0, 1, 1], [], []>} : vector<512x4xf32>, vector<4x4xf32>, vector<512x4xf32> -> vector<512x4xf32>
    %55 = arith.addf %49, %54 : vector<512x4xf32>
    %56 = vector.extract_strided_slice %43 {offsets = [0, 2, 0, 0], sizes = [2, 16, 16, 4], strides = [1, 1, 1, 1]} : vector<2x18x16x4xf32> to vector<2x16x16x4xf32>
    %57 = vector.shape_cast %56 : vector<2x16x16x4xf32> to vector<512x4xf32>
    %c2_62 = arith.constant 2 : index
    %c2_63 = arith.constant 2 : index
    %c0_64 = arith.constant 0 : index
    %c0_65 = arith.constant 0 : index
    %58 = vector.load %arg2[%c2_62, %c2_63, %c0_64, %c0_65] : memref<3x3x4x4xf32, #tpu.memory_space<vmem>>, vector<1x1x4x4xf32>
    %59 = vector.shape_cast %58 : vector<1x1x4x4xf32> to vector<4x4xf32>
    %cst_66 = arith.constant dense<0.000000e+00> : vector<512x4xf32>
    %60 = tpu.matmul %57, %59, %cst_66 {dimension_numbers = #tpu.dot_dimension_numbers<[1], [0], [0], [1], [0, 0, 1, 1], [], []>} : vector<512x4xf32>, vector<4x4xf32>, vector<512x4xf32> -> vector<512x4xf32>
    %61 = arith.addf %55, %60 : vector<512x4xf32>
    %cst_67 = arith.constant dense<0.000000e+00> : vector<4xf32>
    %62 = vector.multi_reduction <add>, %61, %cst_67 [0] : vector<512x4xf32> to vector<4xf32>
    %63 = vector.shape_cast %62 : vector<4xf32> to vector<1x4xf32>
    %cst_68 = arith.constant 0.001953125 : f32
    %64 = vector.broadcast %cst_68 : f32 to vector<1x4xf32>
    %65 = arith.mulf %63, %64 : vector<1x4xf32>
    %66 = vector.broadcast %65 : vector<1x4xf32> to vector<512x4xf32>
    %67 = arith.subf %61, %66 : vector<512x4xf32>
    %68 = arith.mulf %67, %67 : vector<512x4xf32>
    %cst_69 = arith.constant dense<0.000000e+00> : vector<4xf32>
    %69 = vector.multi_reduction <add>, %68, %cst_69 [0] : vector<512x4xf32> to vector<4xf32>
    %70 = vector.shape_cast %69 : vector<4xf32> to vector<1x4xf32>
    %cst_70 = arith.constant 0.001953125 : f32
    %71 = vector.broadcast %cst_70 : f32 to vector<1x4xf32>
    %72 = arith.mulf %70, %71 : vector<1x4xf32>
    %cst_71 = arith.constant 9.99999974E-6 : f32
    %73 = vector.broadcast %cst_71 : f32 to vector<1x4xf32>
    %74 = arith.addf %72, %73 : vector<1x4xf32>
    %75 = math.rsqrt %74 : vector<1x4xf32>
    %cst_72 = arith.constant 9.99999974E-6 : f32
    %76 = vector.broadcast %cst_72 : f32 to vector<1x4xf32>
    %77 = arith.addf %72, %76 : vector<1x4xf32>
    %cst_73 = arith.constant 5.000000e-01 : f32
    %78 = vector.broadcast %cst_73 : f32 to vector<1x4xf32>
    %79 = arith.mulf %78, %77 : vector<1x4xf32>
    %80 = arith.mulf %79, %75 : vector<1x4xf32>
    %81 = arith.mulf %80, %75 : vector<1x4xf32>
    %cst_74 = arith.constant 1.500000e+00 : f32
    %82 = vector.broadcast %cst_74 : f32 to vector<1x4xf32>
    %83 = arith.subf %82, %81 : vector<1x4xf32>
    %84 = arith.mulf %75, %83 : vector<1x4xf32>
    %c0_75 = arith.constant 0 : index
    %c0_76 = arith.constant 0 : index
    %85 = vector.load %arg4[%c0_75, %c0_76] : memref<1x4xf32, #tpu.memory_space<vmem>>, vector<1x4xf32>
    %86 = arith.mulf %85, %84 : vector<1x4xf32>
    %c0_77 = arith.constant 0 : index
    %c0_78 = arith.constant 0 : index
    %87 = vector.load %arg5[%c0_77, %c0_78] : memref<1x4xf32, #tpu.memory_space<vmem>>, vector<1x4xf32>
    %88 = arith.mulf %65, %86 : vector<1x4xf32>
    %89 = arith.subf %87, %88 : vector<1x4xf32>
    %90 = vector.broadcast %86 : vector<1x4xf32> to vector<512x4xf32>
    %91 = arith.mulf %61, %90 : vector<512x4xf32>
    %92 = vector.broadcast %89 : vector<1x4xf32> to vector<512x4xf32>
    %93 = arith.addf %91, %92 : vector<512x4xf32>
    %cst_79 = arith.constant 0.000000e+00 : f32
    %94 = vector.broadcast %cst_79 : f32 to vector<512x4xf32>
    %95 = arith.cmpf oge, %93, %94 : vector<512x4xf32>
    %cst_80 = arith.constant 2.000000e-01 : f32
    %96 = vector.broadcast %cst_80 : f32 to vector<512x4xf32>
    %97 = arith.mulf %96, %93 : vector<512x4xf32>
    %98 = arith.select %95, %93, %97 : vector<512x4xi1>, vector<512x4xf32>
    %99 = vector.shape_cast %98 : vector<512x4xf32> to vector<2x16x16x4xf32>
    %c0_81 = arith.constant 0 : index
    %c1_82 = arith.constant 1 : index
    %c1_83 = arith.constant 1 : index
    %c0_84 = arith.constant 0 : index
    %100 = vector.load %arg9[%c0_81, %c1_82, %c1_83, %c0_84] : memref<2x18x18x4xf32, #tpu.memory_space<vmem>>, vector<2x16x16x4xf32>
    tpu.vector_store %arg9[%c0_81, %c1_82, %c1_83, %c0_84], %99 {strides = array<i32>} : memref<2x18x18x4xf32, #tpu.memory_space<vmem>>, vector<2x16x16x4xf32>,
    %cst_85 = arith.constant 0.000000e+00 : f32
    %101 = vector.broadcast %cst_85 : f32 to vector<512x4xf32>
    %c0_86 = arith.constant 0 : index
    %c0_87 = arith.constant 0 : index
    %c0_88 = arith.constant 0 : index
    %c0_89 = arith.constant 0 : index
    %102 = vector.load %arg9[%c0_86, %c0_87, %c0_88, %c0_89] : memref<2x18x18x4xf32, #tpu.memory_space<vmem>>, vector<2x18x16x4xf32>
    %103 = vector.extract_strided_slice %102 {offsets = [0, 0, 0, 0], sizes = [2, 16, 16, 4], strides = [1, 1, 1, 1]} : vector<2x18x16x4xf32> to vector<2x16x16x4xf32>
    %104 = vector.shape_cast %103 : vector<2x16x16x4xf32> to vector<512x4xf32>
    %c0_90 = arith.constant 0 : index
    %c0_91 = arith.constant 0 : index
    %c0_92 = arith.constant 0 : index
    %c0_93 = arith.constant 0 : index
    %105 = vector.load %arg3[%c0_90, %c0_91, %c0_92, %c0_93] : memref<3x3x4x4xf32, #tpu.memory_space<vmem>>, vector<1x1x4x4xf32>
    %106 = vector.shape_cast %105 : vector<1x1x4x4xf32> to vector<4x4xf32>
    %cst_94 = arith.constant dense<0.000000e+00> : vector<512x4xf32>
    %107 = tpu.matmul %104, %106, %cst_94 {dimension_numbers = #tpu.dot_dimension_numbers<[1], [0], [0], [1], [0, 0, 1, 1], [], []>} : vector<512x4xf32>, vector<4x4xf32>, vector<512x4xf32> -> vector<512x4xf32>
    %108 = arith.addf %101, %107 : vector<512x4xf32>
    %109 = vector.extract_strided_slice %102 {offsets = [0, 1, 0, 0], sizes = [2, 16, 16, 4], strides = [1, 1, 1, 1]} : vector<2x18x16x4xf32> to vector<2x16x16x4xf32>
    %110 = vector.shape_cast %109 : vector<2x16x16x4xf32> to vector<512x4xf32>
    %c1_95 = arith.constant 1 : index
    %c0_96 = arith.constant 0 : index
    %c0_97 = arith.constant 0 : index
    %c0_98 = arith.constant 0 : index
    %111 = vector.load %arg3[%c1_95, %c0_96, %c0_97, %c0_98] : memref<3x3x4x4xf32, #tpu.memory_space<vmem>>, vector<1x1x4x4xf32>
    %112 = vector.shape_cast %111 : vector<1x1x4x4xf32> to vector<4x4xf32>
    %cst_99 = arith.constant dense<0.000000e+00> : vector<512x4xf32>
    %113 = tpu.matmul %110, %112, %cst_99 {dimension_numbers = #tpu.dot_dimension_numbers<[1], [0], [0], [1], [0, 0, 1, 1], [], []>} : vector<512x4xf32>, vector<4x4xf32>, vector<512x4xf32> -> vector<512x4xf32>
    %114 = arith.addf %108, %113 : vector<512x4xf32>
    %115 = vector.extract_strided_slice %102 {offsets = [0, 2, 0, 0], sizes = [2, 16, 16, 4], strides = [1, 1, 1, 1]} : vector<2x18x16x4xf32> to vector<2x16x16x4xf32>
    %116 = vector.shape_cast %115 : vector<2x16x16x4xf32> to vector<512x4xf32>
    %c2_100 = arith.constant 2 : index
    %c0_101 = arith.constant 0 : index
    %c0_102 = arith.constant 0 : index
    %c0_103 = arith.constant 0 : index
    %117 = vector.load %arg3[%c2_100, %c0_101, %c0_102, %c0_103] : memref<3x3x4x4xf32, #tpu.memory_space<vmem>>, vector<1x1x4x4xf32>
    %118 = vector.shape_cast %117 : vector<1x1x4x4xf32> to vector<4x4xf32>
    %cst_104 = arith.constant dense<0.000000e+00> : vector<512x4xf32>
    %119 = tpu.matmul %116, %118, %cst_104 {dimension_numbers = #tpu.dot_dimension_numbers<[1], [0], [0], [1], [0, 0, 1, 1], [], []>} : vector<512x4xf32>, vector<4x4xf32>, vector<512x4xf32> -> vector<512x4xf32>
    %120 = arith.addf %114, %119 : vector<512x4xf32>
    %c0_105 = arith.constant 0 : index
    %c0_106 = arith.constant 0 : index
    %c1_107 = arith.constant 1 : index
    %c0_108 = arith.constant 0 : index
    %121 = vector.load %arg9[%c0_105, %c0_106, %c1_107, %c0_108] : memref<2x18x18x4xf32, #tpu.memory_space<vmem>>, vector<2x18x16x4xf32>
    %122 = vector.extract_strided_slice %121 {offsets = [0, 0, 0, 0], sizes = [2, 16, 16, 4], strides = [1, 1, 1, 1]} : vector<2x18x16x4xf32> to vector<2x16x16x4xf32>
    %123 = vector.shape_cast %122 : vector<2x16x16x4xf32> to vector<512x4xf32>
    %c0_109 = arith.constant 0 : index
    %c1_110 = arith.constant 1 : index
    %c0_111 = arith.constant 0 : index
    %c0_112 = arith.constant 0 : index
    %124 = vector.load %arg3[%c0_109, %c1_110, %c0_111, %c0_112] : memref<3x3x4x4xf32, #tpu.memory_space<vmem>>, vector<1x1x4x4xf32>
    %125 = vector.shape_cast %124 : vector<1x1x4x4xf32> to vector<4x4xf32>
    %cst_113 = arith.constant dense<0.000000e+00> : vector<512x4xf32>
    %126 = tpu.matmul %123, %125, %cst_113 {dimension_numbers = #tpu.dot_dimension_numbers<[1], [0], [0], [1], [0, 0, 1, 1], [], []>} : vector<512x4xf32>, vector<4x4xf32>, vector<512x4xf32> -> vector<512x4xf32>
    %127 = arith.addf %120, %126 : vector<512x4xf32>
    %128 = vector.extract_strided_slice %121 {offsets = [0, 1, 0, 0], sizes = [2, 16, 16, 4], strides = [1, 1, 1, 1]} : vector<2x18x16x4xf32> to vector<2x16x16x4xf32>
    %129 = vector.shape_cast %128 : vector<2x16x16x4xf32> to vector<512x4xf32>
    %c1_114 = arith.constant 1 : index
    %c1_115 = arith.constant 1 : index
    %c0_116 = arith.constant 0 : index
    %c0_117 = arith.constant 0 : index
    %130 = vector.load %arg3[%c1_114, %c1_115, %c0_116, %c0_117] : memref<3x3x4x4xf32, #tpu.memory_space<vmem>>, vector<1x1x4x4xf32>
    %131 = vector.shape_cast %130 : vector<1x1x4x4xf32> to vector<4x4xf32>
    %cst_118 = arith.constant dense<0.000000e+00> : vector<512x4xf32>
    %132 = tpu.matmul %129, %131, %cst_118 {dimension_numbers = #tpu.dot_dimension_numbers<[1], [0], [0], [1], [0, 0, 1, 1], [], []>} : vector<512x4xf32>, vector<4x4xf32>, vector<512x4xf32> -> vector<512x4xf32>
    %133 = arith.addf %127, %132 : vector<512x4xf32>
    %134 = vector.extract_strided_slice %121 {offsets = [0, 2, 0, 0], sizes = [2, 16, 16, 4], strides = [1, 1, 1, 1]} : vector<2x18x16x4xf32> to vector<2x16x16x4xf32>
    %135 = vector.shape_cast %134 : vector<2x16x16x4xf32> to vector<512x4xf32>
    %c2_119 = arith.constant 2 : index
    %c1_120 = arith.constant 1 : index
    %c0_121 = arith.constant 0 : index
    %c0_122 = arith.constant 0 : index
    %136 = vector.load %arg3[%c2_119, %c1_120, %c0_121, %c0_122] : memref<3x3x4x4xf32, #tpu.memory_space<vmem>>, vector<1x1x4x4xf32>
    %137 = vector.shape_cast %136 : vector<1x1x4x4xf32> to vector<4x4xf32>
    %cst_123 = arith.constant dense<0.000000e+00> : vector<512x4xf32>
    %138 = tpu.matmul %135, %137, %cst_123 {dimension_numbers = #tpu.dot_dimension_numbers<[1], [0], [0], [1], [0, 0, 1, 1], [], []>} : vector<512x4xf32>, vector<4x4xf32>, vector<512x4xf32> -> vector<512x4xf32>
    %139 = arith.addf %133, %138 : vector<512x4xf32>
    %c0_124 = arith.constant 0 : index
    %c0_125 = arith.constant 0 : index
    %c2_126 = arith.constant 2 : index
    %c0_127 = arith.constant 0 : index
    %140 = vector.load %arg9[%c0_124, %c0_125, %c2_126, %c0_127] : memref<2x18x18x4xf32, #tpu.memory_space<vmem>>, vector<2x18x16x4xf32>
    %141 = vector.extract_strided_slice %140 {offsets = [0, 0, 0, 0], sizes = [2, 16, 16, 4], strides = [1, 1, 1, 1]} : vector<2x18x16x4xf32> to vector<2x16x16x4xf32>
    %142 = vector.shape_cast %141 : vector<2x16x16x4xf32> to vector<512x4xf32>
    %c0_128 = arith.constant 0 : index
    %c2_129 = arith.constant 2 : index
    %c0_130 = arith.constant 0 : index
    %c0_131 = arith.constant 0 : index
    %143 = vector.load %arg3[%c0_128, %c2_129, %c0_130, %c0_131] : memref<3x3x4x4xf32, #tpu.memory_space<vmem>>, vector<1x1x4x4xf32>
    %144 = vector.shape_cast %143 : vector<1x1x4x4xf32> to vector<4x4xf32>
    %cst_132 = arith.constant dense<0.000000e+00> : vector<512x4xf32>
    %145 = tpu.matmul %142, %144, %cst_132 {dimension_numbers = #tpu.dot_dimension_numbers<[1], [0], [0], [1], [0, 0, 1, 1], [], []>} : vector<512x4xf32>, vector<4x4xf32>, vector<512x4xf32> -> vector<512x4xf32>
    %146 = arith.addf %139, %145 : vector<512x4xf32>
    %147 = vector.extract_strided_slice %140 {offsets = [0, 1, 0, 0], sizes = [2, 16, 16, 4], strides = [1, 1, 1, 1]} : vector<2x18x16x4xf32> to vector<2x16x16x4xf32>
    %148 = vector.shape_cast %147 : vector<2x16x16x4xf32> to vector<512x4xf32>
    %c1_133 = arith.constant 1 : index
    %c2_134 = arith.constant 2 : index
    %c0_135 = arith.constant 0 : index
    %c0_136 = arith.constant 0 : index
    %149 = vector.load %arg3[%c1_133, %c2_134, %c0_135, %c0_136] : memref<3x3x4x4xf32, #tpu.memory_space<vmem>>, vector<1x1x4x4xf32>
    %150 = vector.shape_cast %149 : vector<1x1x4x4xf32> to vector<4x4xf32>
    %cst_137 = arith.constant dense<0.000000e+00> : vector<512x4xf32>
    %151 = tpu.matmul %148, %150, %cst_137 {dimension_numbers = #tpu.dot_dimension_numbers<[1], [0], [0], [1], [0, 0, 1, 1], [], []>} : vector<512x4xf32>, vector<4x4xf32>, vector<512x4xf32> -> vector<512x4xf32>
    %152 = arith.addf %146, %151 : vector<512x4xf32>
    %153 = vector.extract_strided_slice %140 {offsets = [0, 2, 0, 0], sizes = [2, 16, 16, 4], strides = [1, 1, 1, 1]} : vector<2x18x16x4xf32> to vector<2x16x16x4xf32>
    %154 = vector.shape_cast %153 : vector<2x16x16x4xf32> to vector<512x4xf32>
    %c2_138 = arith.constant 2 : index
    %c2_139 = arith.constant 2 : index
    %c0_140 = arith.constant 0 : index
    %c0_141 = arith.constant 0 : index
    %155 = vector.load %arg3[%c2_138, %c2_139, %c0_140, %c0_141] : memref<3x3x4x4xf32, #tpu.memory_space<vmem>>, vector<1x1x4x4xf32>
    %156 = vector.shape_cast %155 : vector<1x1x4x4xf32> to vector<4x4xf32>
    %cst_142 = arith.constant dense<0.000000e+00> : vector<512x4xf32>
    %157 = tpu.matmul %154, %156, %cst_142 {dimension_numbers = #tpu.dot_dimension_numbers<[1], [0], [0], [1], [0, 0, 1, 1], [], []>} : vector<512x4xf32>, vector<4x4xf32>, vector<512x4xf32> -> vector<512x4xf32>
    %158 = arith.addf %152, %157 : vector<512x4xf32>
    %cst_143 = arith.constant dense<0.000000e+00> : vector<4xf32>
    %159 = vector.multi_reduction <add>, %158, %cst_143 [0] : vector<512x4xf32> to vector<4xf32>
    %160 = vector.shape_cast %159 : vector<4xf32> to vector<1x4xf32>
    %cst_144 = arith.constant 0.001953125 : f32
    %161 = vector.broadcast %cst_144 : f32 to vector<1x4xf32>
    %162 = arith.mulf %160, %161 : vector<1x4xf32>
    %163 = vector.broadcast %162 : vector<1x4xf32> to vector<512x4xf32>
    %164 = arith.subf %158, %163 : vector<512x4xf32>
    %165 = arith.mulf %164, %164 : vector<512x4xf32>
    %cst_145 = arith.constant dense<0.000000e+00> : vector<4xf32>
    %166 = vector.multi_reduction <add>, %165, %cst_145 [0] : vector<512x4xf32> to vector<4xf32>
    %167 = vector.shape_cast %166 : vector<4xf32> to vector<1x4xf32>
    %cst_146 = arith.constant 0.001953125 : f32
    %168 = vector.broadcast %cst_146 : f32 to vector<1x4xf32>
    %169 = arith.mulf %167, %168 : vector<1x4xf32>
    %cst_147 = arith.constant 9.99999974E-6 : f32
    %170 = vector.broadcast %cst_147 : f32 to vector<1x4xf32>
    %171 = arith.addf %169, %170 : vector<1x4xf32>
    %172 = math.rsqrt %171 : vector<1x4xf32>
    %cst_148 = arith.constant 9.99999974E-6 : f32
    %173 = vector.broadcast %cst_148 : f32 to vector<1x4xf32>
    %174 = arith.addf %169, %173 : vector<1x4xf32>
    %cst_149 = arith.constant 5.000000e-01 : f32
    %175 = vector.broadcast %cst_149 : f32 to vector<1x4xf32>
    %176 = arith.mulf %175, %174 : vector<1x4xf32>
    %177 = arith.mulf %176, %172 : vector<1x4xf32>
    %178 = arith.mulf %177, %172 : vector<1x4xf32>
    %cst_150 = arith.constant 1.500000e+00 : f32
    %179 = vector.broadcast %cst_150 : f32 to vector<1x4xf32>
    %180 = arith.subf %179, %178 : vector<1x4xf32>
    %181 = arith.mulf %172, %180 : vector<1x4xf32>
    %c0_151 = arith.constant 0 : index
    %c0_152 = arith.constant 0 : index
    %182 = vector.load %arg6[%c0_151, %c0_152] : memref<1x4xf32, #tpu.memory_space<vmem>>, vector<1x4xf32>
    %183 = arith.mulf %182, %181 : vector<1x4xf32>
    %c0_153 = arith.constant 0 : index
    %c0_154 = arith.constant 0 : index
    %184 = vector.load %arg7[%c0_153, %c0_154] : memref<1x4xf32, #tpu.memory_space<vmem>>, vector<1x4xf32>
    %185 = arith.mulf %162, %183 : vector<1x4xf32>
    %186 = arith.subf %184, %185 : vector<1x4xf32>
    %187 = vector.broadcast %183 : vector<1x4xf32> to vector<512x4xf32>
    %188 = arith.mulf %158, %187 : vector<512x4xf32>
    %189 = vector.broadcast %186 : vector<1x4xf32> to vector<512x4xf32>
    %190 = arith.addf %188, %189 : vector<512x4xf32>
    %191 = vector.shape_cast %2 : vector<2x16x16x4xf32> to vector<512x4xf32>
    %192 = arith.addf %190, %191 : vector<512x4xf32>
    %193 = vector.shape_cast %192 : vector<512x4xf32> to vector<2x16x16x4xf32>
    %c0_155 = arith.constant 0 : index
    %c0_156 = arith.constant 0 : index
    %c0_157 = arith.constant 0 : index
    %c0_158 = arith.constant 0 : index
    %194 = vector.load %arg8[%c0_155, %c0_156, %c0_157, %c0_158] : memref<2x16x16x4xf32, #tpu.memory_space<vmem>>, vector<2x16x16x4xf32>
    tpu.vector_store %arg8[%c0_155, %c0_156, %c0_157, %c0_158], %193 {strides = array<i32>} : memref<2x16x16x4xf32, #tpu.memory_space<vmem>>, vector<2x16x16x4xf32>,
    return
  }
  func.func @transform_0(%arg0: i32) -> (i32, i32, i32, i32) {
    %c0_i32 = arith.constant 0 : i32
    %c0_i32_0 = arith.constant 0 : i32
    %c0_i32_1 = arith.constant 0 : i32
    %c0_i32_2 = arith.constant 0 : i32
    %c0_i32_3 = arith.constant 0 : i32
    return %c0_i32, %c0_i32_0, %c0_i32_1, %c0_i32_2 : i32, i32, i32, i32
  }
  func.func @transform_1(%arg0: i32) -> (i32, i32, i32, i32) {
    %c0_i32 = arith.constant 0 : i32
    %c0_i32_0 = arith.constant 0 : i32
    %c0_i32_1 = arith.constant 0 : i32
    %c0_i32_2 = arith.constant 0 : i32
    %c0_i32_3 = arith.constant 0 : i32
    return %c0_i32, %c0_i32_0, %c0_i32_1, %c0_i32_2 : i32, i32, i32, i32
  }
  func.func @transform_2(%arg0: i32) -> (i32, i32, i32, i32) {
    %c0_i32 = arith.constant 0 : i32
    %c0_i32_0 = arith.constant 0 : i32
    %c0_i32_1 = arith.constant 0 : i32
    %c0_i32_2 = arith.constant 0 : i32
    %c0_i32_3 = arith.constant 0 : i32
    return %c0_i32, %c0_i32_0, %c0_i32_1, %c0_i32_2 : i32, i32, i32, i32
  }
  func.func @transform_3(%arg0: i32) -> (i32, i32) {
    %c0_i32 = arith.constant 0 : i32
    %c0_i32_0 = arith.constant 0 : i32
    %c0_i32_1 = arith.constant 0 : i32
    return %c0_i32, %c0_i32_0 : i32, i32
  }
  func.func @transform_4(%arg0: i32) -> (i32, i32) {
    %c0_i32 = arith.constant 0 : i32
    %c0_i32_0 = arith.constant 0 : i32
    %c0_i32_1 = arith.constant 0 : i32
    return %c0_i32, %c0_i32_0 : i32, i32
  }
  func.func @transform_5(%arg0: i32) -> (i32, i32) {
    %c0_i32 = arith.constant 0 : i32
    %c0_i32_0 = arith.constant 0 : i32
    %c0_i32_1 = arith.constant 0 : i32
    return %c0_i32, %c0_i32_0 : i32, i32
  }
  func.func @transform_6(%arg0: i32) -> (i32, i32) {
    %c0_i32 = arith.constant 0 : i32
    %c0_i32_0 = arith.constant 0 : i32
    %c0_i32_1 = arith.constant 0 : i32
    return %c0_i32, %c0_i32_0 : i32, i32
  }
  func.func @transform_7(%arg0: i32) -> (i32, i32, i32, i32) {
    %c0_i32 = arith.constant 0 : i32
    %c0_i32_0 = arith.constant 0 : i32
    %c0_i32_1 = arith.constant 0 : i32
    %c0_i32_2 = arith.constant 0 : i32
    %c0_i32_3 = arith.constant 0 : i32
    return %c0_i32, %c0_i32_0, %c0_i32_1, %c0_i32_2 : i32, i32, i32, i32
  }
}

</mosaic_0001>

<bundles_post_ra>
// kernel: basic_res_block.1
= control target key start
LH: loop header
LB: loop body
LE: loop exit
PB: predicated region body
PF: predicated region fallthrough
CT: control target
= control target key end

     0   :  { %vm23441_vm0 = vcmask 1043456   ;;  %vm26_vm1 = vcmask 31744   ;;  %vm29_vm2 = vcmask 25600   ;;  %v16541_v1 = vmov 0.0   ;;  %s23306_s1 = inlined_call_operand.vmem [shape: f32[3,3,4,4], index: 1, kind: input, shape index: {}]   ;;  %s23307_s0 = inlined_call_operand.vmem [shape: f32[2,16,16,4], index: 0, kind: input, shape index: {}]   ;;  %s23308_s2 = inlined_call_operand.vmem [shape: f32[3,3,4,4], index: 2, kind: input, shape index: {}]   ;;  %s23309_s3 = inlined_call_operand.vmem [shape: f32[1,4], index: 3, kind: input, shape index: {}]   ;;  %s23310_s4 = inlined_call_operand.vmem [shape: f32[1,4], index: 4, kind: input, shape index: {}]   ;;  %s23311_s5 = inlined_call_operand.vmem [shape: f32[1,4], index: 5, kind: input, shape index: {}]   ;;  %s23312_s6 = inlined_call_operand.vmem [shape: f32[1,4], index: 6, kind: input, shape index: {}]   ;;  %s23313_s7 = inlined_call_operand.vmem [shape: f32[2,16,16,4], index: 7, kind: output, shape index: {}]  }
   0x1   :  { %v16585_v0 = vld [vmem:[%s23306_s1 + $0xc] sm:$0xf]  ;;  %31 = vst.msk [vmem:[#allocation2 + $0x18] sm:$0xff] %vm26_vm1, %v16541_v1  ;;  %32 = vst.msk [vmem:[#allocation2 + $0x20] sm:$0xff] %vm26_vm1, %v16541_v1  ;;  %v16594_v2 = vld [vmem:[%s23307_s0] sm:$0xff] }
   0x2   :  { %23496 = vst [vmem:[#allocation3_spill] sm:$0xff] %v16594_v2  ;;  %27 = vst.msk [vmem:[#allocation2] sm:$0xff] %vm26_vm1, %v16541_v1  ;;  %v16739_v3 = vld [vmem:[%s23306_s1] sm:$0xf]  ;;  %13748 = vmatprep.subr.msk.mxu0 %vm23441_vm0, %v16585_v0  ;;  %v16820_v4 = vld [vmem:[%s23307_s0 + $0x8] sm:$0xff] }
   0x3   :  { %28 = vst.msk [vmem:[#allocation2 + $0x8] sm:$0xff] %vm26_vm1, %v16541_v1  ;;  %34 = vst.msk [vmem:[#allocation2 + $0x30] sm:$0xff] %vm26_vm1, %v16541_v1  ;;  %v16825_v5 = vld [vmem:[%s23307_s0 + $0x10] sm:$0xff]  ;;  %v16830_v6 = vld [vmem:[%s23307_s0 + $0x18] sm:$0xff]  ;;  %13749 = vmatpush3.msk.msra.mxu0 %vm23441_vm0, %v16585_v0 }
   0x4   :  { %35 = vst.msk [vmem:[#allocation2 + $0x38] sm:$0xff] %vm26_vm1, %v16541_v1  ;;  %37 = vst.msk [vmem:[#allocation2 + $0x48] sm:$0xff] %vm26_vm1, %v16541_v1  ;;  %v16843_v7 = vld [vmem:[%s23307_s0 + $0x20] sm:$0xff]  ;;  %v16848_v8 = vld [vmem:[%s23307_s0 + $0x28] sm:$0xff]  ;;  %13846 = vmatprep.subr.msk.mxu0 %vm23441_vm0, %v16739_v3 }
   0x5   :  { %38 = vst.msk [vmem:[#allocation2 + $0x50] sm:$0xff] %vm26_vm1, %v16541_v1  ;;  %40 = vst.msk [vmem:[#allocation2 + $0x60] sm:$0xff] %vm26_vm1, %v16541_v1  ;;  %v16853_v9 = vld [vmem:[%s23307_s0 + $0x30] sm:$0xff]  ;;  %v16866_v10 = vld [vmem:[%s23307_s0 + $0x38] sm:$0xff] }
   0x6   :  { %41 = vst.msk [vmem:[#allocation2 + $0x68] sm:$0xff] %vm26_vm1, %v16541_v1  ;;  %43 = vst.msk [vmem:[#allocation2 + $0x78] sm:$0xff] %vm26_vm1, %v16541_v1  ;;  %v16871_v11 = vld [vmem:[%s23307_s0 + $0x40] sm:$0xff]  ;;  %v16876_v12 = vld [vmem:[%s23307_s0 + $0x48] sm:$0xff] }
   0x7   :  { %44 = vst.msk [vmem:[#allocation2 + $0x80] sm:$0xff] %vm26_vm1, %v16541_v1  ;;  %46 = vst.msk [vmem:[#allocation2 + $0x90] sm:$0xff] %vm26_vm1, %v16541_v1  ;;  %v16887_v13 = vld [vmem:[%s23307_s0 + $0x50] sm:$0xff]  ;;  %v16892_v14 = vld [vmem:[%s23307_s0 + $0x58] sm:$0xff] }
   0x8   :  { %47 = vst.msk [vmem:[#allocation2 + $0x98] sm:$0xff] %vm26_vm1, %v16541_v1  ;;  %49 = vst.msk [vmem:[#allocation2 + $0xa8] sm:$0xff] %vm26_vm1, %v16541_v1  ;;  %v16897_v15 = vld [vmem:[%s23307_s0 + $0x60] sm:$0xff]  ;;  %v16908_v16 = vld [vmem:[%s23307_s0 + $0x68] sm:$0xff] }
   0x9   :  { %50 = vst.msk [vmem:[#allocation2 + $0xb0] sm:$0xff] %vm26_vm1, %v16541_v1  ;;  %52 = vst.msk [vmem:[#allocation2 + $0xc0] sm:$0xff] %vm26_vm1, %v16541_v1  ;;  %v16913_v17 = vld [vmem:[%s23307_s0 + $0x70] sm:$0xff]  ;;  %v16918_v18 = vld [vmem:[%s23307_s0 + $0x78] sm:$0xff] }
   0xa   :  { %53 = vst.msk [vmem:[#allocation2 + $0xc8] sm:$0xff] %vm26_vm1, %v16541_v1  ;;  %55 = vst.msk [vmem:[#allocation2 + $0xd8] sm:$0xff] %vm26_vm1, %v16541_v1  ;;  %v16929_v19 = vld [vmem:[%s23307_s0 + $0x80] sm:$0xff]  ;;  %v16934_v20 = vld [vmem:[%s23307_s0 + $0x88] sm:$0xff] }
   0xb   :  { %56 = vst.msk [vmem:[#allocation2 + $0xe0] sm:$0xff] %vm26_vm1, %v16541_v1  ;;  %58 = vst.msk [vmem:[#allocation2 + $0xf0] sm:$0xff] %vm26_vm1, %v16541_v1  ;;  %v16939_v21 = vld [vmem:[%s23307_s0 + $0x90] sm:$0xff]  ;;  %v16950_v22 = vld [vmem:[%s23307_s0 + $0x98] sm:$0xff] }
   0xc   :  { %59 = vst.msk [vmem:[#allocation2 + $0xf8] sm:$0xff] %vm26_vm1, %v16541_v1  ;;  %61 = vst.msk [vmem:[#allocation2 + $0x108] sm:$0xff] %vm26_vm1, %v16541_v1  ;;  %v16955_v23 = vld [vmem:[%s23307_s0 + $0xa0] sm:$0xff]  ;;  %v16960_v24 = vld [vmem:[%s23307_s0 + $0xa8] sm:$0xff] }
   0xd   :  { %62 = vst.msk [vmem:[#allocation2 + $0x110] sm:$0xff] %vm26_vm1, %v16541_v1  ;;  %64 = vst.msk [vmem:[#allocation2 + $0x120] sm:$0xff] %vm26_vm1, %v16541_v1  ;;  %v16973_v26 = vld [vmem:[%s23307_s0 + $0xb0] sm:$0xff]  ;;  %v16978_v27 = vld [vmem:[%s23307_s0 + $0xb8] sm:$0xff] }
   0xe   :  { %65 = vst.msk [vmem:[#allocation2 + $0x128] sm:$0xff] %vm26_vm1, %v16541_v1  ;;  %67 = vst.msk [vmem:[#allocation2 + $0x138] sm:$0xff] %vm26_vm1, %v16541_v1  ;;  %v17011_v34 = vld [vmem:[%s23307_s0 + $0xc0] sm:$0xff]  ;;  %v17020_v36 = vld [vmem:[%s23307_s0 + $0xc8] sm:$0xff] }
   0xf   :  { %68 = vst.msk [vmem:[#allocation2 + $0x140] sm:$0xff] %vm26_vm1, %v16541_v1  ;;  %70 = vst.msk [vmem:[#allocation2 + $0x150] sm:$0xff] %vm26_vm1, %v16541_v1  ;;  %v17025_v37 = vld [vmem:[%s23307_s0 + $0xd0] sm:$0xff]  ;;  %v17030_v38 = vld [vmem:[%s23307_s0 + $0xd8] sm:$0xff] }
  0x10   :  { %71 = vst.msk [vmem:[#allocation2 + $0x158] sm:$0xff] %vm26_vm1, %v16541_v1  ;;  %73 = vst.msk [vmem:[#allocation2 + $0x168] sm:$0xff] %vm26_vm1, %v16541_v1  ;;  %v17045_v40 = vld [vmem:[%s23307_s0 + $0xe0] sm:$0xff]  ;;  %v17050_v41 = vld [vmem:[%s23307_s0 + $0xe8] sm:$0xff] }
  0x11   :  { %74 = vst.msk [vmem:[#allocation2 + $0x170] sm:$0xff] %vm26_vm1, %v16541_v1  ;;  %76 = vst.msk [vmem:[#allocation2 + $0x180] sm:$0xff] %vm26_vm1, %v16541_v1  ;;  %v17055_v42 = vld [vmem:[%s23307_s0 + $0xf0] sm:$0xff]  ;;  %v17068_v43 = vld [vmem:[%s23307_s0 + $0xf8] sm:$0xff] }
  0x12   :  { %77 = vst.msk [vmem:[#allocation2 + $0x188] sm:$0xff] %vm26_vm1, %v16541_v1  ;;  %79 = vst.msk [vmem:[#allocation2 + $0x198] sm:$0xff] %vm26_vm1, %v16541_v1  ;;  %v17073_v44 = vld [vmem:[%s23307_s0 + $0x100] sm:$0xff]  ;;  %v17078_v45 = vld [vmem:[%s23307_s0 + $0x108] sm:$0xff] }
  0x13   :  { %80 = vst.msk [vmem:[#allocation2 + $0x1a0] sm:$0xff] %vm26_vm1, %v16541_v1  ;;  %82 = vst.msk [vmem:[#allocation2 + $0x1b0] sm:$0xff] %vm26_vm1, %v16541_v1  ;;  %v17089_v46 = vld [vmem:[%s23307_s0 + $0x110] sm:$0xff]  ;;  %v17094_v47 = vld [vmem:[%s23307_s0 + $0x118] sm:$0xff] }
  0x14   :  { %83 = vst.msk [vmem:[#allocation2 + $0x1b8] sm:$0xff] %vm26_vm1, %v16541_v1  ;;  %85 = vst.msk [vmem:[#allocation2 + $0x1c8] sm:$0xff] %vm26_vm1, %v16541_v1  ;;  %v17099_v48 = vld [vmem:[%s23307_s0 + $0x120] sm:$0xff]  ;;  %v17112_v50 = vld [vmem:[%s23307_s0 + $0x128] sm:$0xff] }
  0x15   :  { %86 = vst.msk [vmem:[#allocation2 + $0x1d0] sm:$0xff] %vm26_vm1, %v16541_v1  ;;  %88 = vst.msk [vmem:[#allocation2 + $0x1e0] sm:$0xff] %vm26_vm1, %v16541_v1  ;;  %v17117_v51 = vld [vmem:[%s23307_s0 + $0x130] sm:$0xff]  ;;  %v17122_v52 = vld [vmem:[%s23307_s0 + $0x138] sm:$0xff] }
  0x16   :  { %89 = vst.msk [vmem:[#allocation2 + $0x1e8] sm:$0xff] %vm26_vm1, %v16541_v1  ;;  %91 = vst.msk [vmem:[#allocation2 + $0x1f8] sm:$0xff] %vm26_vm1, %v16541_v1  ;;  %v17135_v53 = vld [vmem:[%s23307_s0 + $0x140] sm:$0xff]  ;;  %v17140_v54 = vld [vmem:[%s23307_s0 + $0x148] sm:$0xff] }
  0x17   :  { %92 = vst.msk [vmem:[#allocation2 + $0x200] sm:$0xff] %vm26_vm1, %v16541_v1  ;;  %94 = vst.msk [vmem:[#allocation2 + $0x210] sm:$0xff] %vm26_vm1, %v16541_v1  ;;  %v17145_v55 = vld [vmem:[%s23307_s0 + $0x150] sm:$0xff]  ;;  %v17158_v56 = vld [vmem:[%s23307_s0 + $0x158] sm:$0xff] }
  0x18   :  { %95 = vst.msk [vmem:[#allocation2 + $0x218] sm:$0xff] %vm26_vm1, %v16541_v1  ;;  %97 = vst.msk [vmem:[#allocation2 + $0x228] sm:$0xff] %vm26_vm1, %v16541_v1  ;;  %v17163_v57 = vld [vmem:[%s23307_s0 + $0x160] sm:$0xff]  ;;  %v17168_v58 = vld [vmem:[%s23307_s0 + $0x168] sm:$0xff] }
  0x19   :  { %98 = vst.msk [vmem:[#allocation2 + $0x230] sm:$0xff] %vm26_vm1, %v16541_v1  ;;  %100 = vst.msk [vmem:[#allocation2 + $0x240] sm:$0xff] %vm26_vm1, %v16541_v1  ;;  %v17181_v60 = vld [vmem:[%s23307_s0 + $0x170] sm:$0xff]  ;;  %v17186_v61 = vld [vmem:[%s23307_s0 + $0x178] sm:$0xff] }
  0x1a   :  { %101 = vst.msk [vmem:[#allocation2 + $0x248] sm:$0xff] %vm26_vm1, %v16541_v1  ;;  %103 = vst.msk [vmem:[#allocation2 + $0x258] sm:$0xff] %vm26_vm1, %v16541_v1 }
  0x1b   :  { %104 = vst.msk [vmem:[#allocation2 + $0x260] sm:$0xff] %vm26_vm1, %v16541_v1  ;;  %106 = vst.msk [vmem:[#allocation2 + $0x270] sm:$0xff] %vm26_vm1, %v16541_v1 }
  0x1c   :  { %107 = vst.msk [vmem:[#allocation2 + $0x278] sm:$0xff] %vm26_vm1, %v16541_v1  ;;  %109 = vst.msk [vmem:[#allocation2 + $0x288] sm:$0xff] %vm26_vm1, %v16541_v1 }
  0x1d   :  { %110 = vst.msk [vmem:[#allocation2 + $0x290] sm:$0xff] %vm26_vm1, %v16541_v1  ;;  %112 = vst.msk [vmem:[#allocation2 + $0x2a0] sm:$0xff] %vm26_vm1, %v16541_v1 }
  0x1e   :  { %113 = vst.msk [vmem:[#allocation2 + $0x2a8] sm:$0xff] %vm26_vm1, %v16541_v1  ;;  %115 = vst.msk [vmem:[#allocation2 + $0x2b8] sm:$0xff] %vm26_vm1, %v16541_v1 }
  0x1f   :  { %116 = vst.msk [vmem:[#allocation2 + $0x2c0] sm:$0xff] %vm26_vm1, %v16541_v1  ;;  %118 = vst.msk [vmem:[#allocation2 + $0x2d0] sm:$0xff] %vm26_vm1, %v16541_v1 }
  0x20   :  { %119 = vst.msk [vmem:[#allocation2 + $0x2d8] sm:$0xff] %vm26_vm1, %v16541_v1  ;;  %121 = vst.msk [vmem:[#allocation2 + $0x2e8] sm:$0xff] %vm26_vm1, %v16541_v1 }
  0x21   :  { %122 = vst.msk [vmem:[#allocation2 + $0x2f0] sm:$0xff] %vm26_vm1, %v16541_v1  ;;  %124 = vst.msk [vmem:[#allocation2 + $0x300] sm:$0xff] %vm26_vm1, %v16541_v1 }
  0x22   :  { %125 = vst.msk [vmem:[#allocation2 + $0x308] sm:$0xff] %vm26_vm1, %v16541_v1  ;;  %127 = vst.msk [vmem:[#allocation2 + $0x318] sm:$0xff] %vm26_vm1, %v16541_v1 }
  0x23   :  { %128 = vst.msk [vmem:[#allocation2 + $0x320] sm:$0xff] %vm26_vm1, %v16541_v1  ;;  %130 = vst.msk [vmem:[#allocation2 + $0x330] sm:$0xff] %vm26_vm1, %v16541_v1 }
  0x24   :  { %131 = vst.msk [vmem:[#allocation2 + $0x338] sm:$0xff] %vm26_vm1, %v16541_v1  ;;  %133 = vst.msk [vmem:[#allocation2 + $0x348] sm:$0xff] %vm26_vm1, %v16541_v1 }
  0x25   :  { %134 = vst.msk [vmem:[#allocation2 + $0x350] sm:$0xff] %vm26_vm1, %v16541_v1  ;;  %201 = vst.msk [vmem:[#allocation2 + $0x19] sm:$0xff] %vm26_vm1, %v16594_v2 }
  0x26   :  { %33 = vst.msk [vmem:[#allocation2 + $0x28] sm:$0x3] %vm29_vm2, %v16541_v1  ;;  %30 = vst.msk [vmem:[#allocation2 + $0x10] sm:$0x3] %vm29_vm2, %v16541_v1 }
  0x27   :  { %36 = vst.msk [vmem:[#allocation2 + $0x40] sm:$0x3] %vm29_vm2, %v16541_v1  ;;  %39 = vst.msk [vmem:[#allocation2 + $0x58] sm:$0x3] %vm29_vm2, %v16541_v1 }
  0x28   :  { %42 = vst.msk [vmem:[#allocation2 + $0x70] sm:$0x3] %vm29_vm2, %v16541_v1  ;;  %45 = vst.msk [vmem:[#allocation2 + $0x88] sm:$0x3] %vm29_vm2, %v16541_v1 }
  0x29   :  { %48 = vst.msk [vmem:[#allocation2 + $0xa0] sm:$0x3] %vm29_vm2, %v16541_v1  ;;  %51 = vst.msk [vmem:[#allocation2 + $0xb8] sm:$0x3] %vm29_vm2, %v16541_v1 }
  0x2a   :  { %54 = vst.msk [vmem:[#allocation2 + $0xd0] sm:$0x3] %vm29_vm2, %v16541_v1  ;;  %57 = vst.msk [vmem:[#allocation2 + $0xe8] sm:$0x3] %vm29_vm2, %v16541_v1 }
  0x2b   :  { %60 = vst.msk [vmem:[#allocation2 + $0x100] sm:$0x3] %vm29_vm2, %v16541_v1  ;;  %63 = vst.msk [vmem:[#allocation2 + $0x118] sm:$0x3] %vm29_vm2, %v16541_v1 }
  0x2c   :  { %66 = vst.msk [vmem:[#allocation2 + $0x130] sm:$0x3] %vm29_vm2, %v16541_v1  ;;  %69 = vst.msk [vmem:[#allocation2 + $0x148] sm:$0x3] %vm29_vm2, %v16541_v1  ;;  %v16962_v25 = vld [vmem:[#allocation2 + $0x18] sm:$0xff] }
  0x2d   :  { %72 = vst.msk [vmem:[#allocation2 + $0x160] sm:$0x3] %vm29_vm2, %v16541_v1  ;;  %75 = vst.msk [vmem:[#allocation2 + $0x178] sm:$0x3] %vm29_vm2, %v16541_v1  ;;  %13750 = vmatprep.mubr.msk.f32.mxu0 %vm26_vm1, %v16962_v25 }
  0x2e   :  { %78 = vst.msk [vmem:[#allocation2 + $0x190] sm:$0x3] %vm29_vm2, %v16541_v1  ;;  %81 = vst.msk [vmem:[#allocation2 + $0x1a8] sm:$0x3] %vm29_vm2, %v16541_v1 }
  0x2f   :  { %84 = vst.msk [vmem:[#allocation2 + $0x1c0] sm:$0x3] %vm29_vm2, %v16541_v1  ;;  %87 = vst.msk [vmem:[#allocation2 + $0x1d8] sm:$0x3] %vm29_vm2, %v16541_v1 }
  0x30   :  { %90 = vst.msk [vmem:[#allocation2 + $0x1f0] sm:$0x3] %vm29_vm2, %v16541_v1  ;;  %93 = vst.msk [vmem:[#allocation2 + $0x208] sm:$0x3] %vm29_vm2, %v16541_v1 }
  0x31   :  { %96 = vst.msk [vmem:[#allocation2 + $0x220] sm:$0x3] %vm29_vm2, %v16541_v1  ;;  %99 = vst.msk [vmem:[#allocation2 + $0x238] sm:$0x3] %vm29_vm2, %v16541_v1 }
  0x32   :  { %102 = vst.msk [vmem:[#allocation2 + $0x250] sm:$0x3] %vm29_vm2, %v16541_v1  ;;  %105 = vst.msk [vmem:[#allocation2 + $0x268] sm:$0x3] %vm29_vm2, %v16541_v1 }
  0x33   :  { %108 = vst.msk [vmem:[#allocation2 + $0x280] sm:$0x3] %vm29_vm2, %v16541_v1  ;;  %111 = vst.msk [vmem:[#allocation2 + $0x298] sm:$0x3] %vm29_vm2, %v16541_v1 }
  0x34   :  { %114 = vst.msk [vmem:[#allocation2 + $0x2b0] sm:$0x3] %vm29_vm2, %v16541_v1  ;;  %117 = vst.msk [vmem:[#allocation2 + $0x2c8] sm:$0x3] %vm29_vm2, %v16541_v1 }
  0x35   :  { %120 = vst.msk [vmem:[#allocation2 + $0x2e0] sm:$0x3] %vm29_vm2, %v16541_v1  ;;  %123 = vst.msk [vmem:[#allocation2 + $0x2f8] sm:$0x3] %vm29_vm2, %v16541_v1 }
  0x36   :  { %126 = vst.msk [vmem:[#allocation2 + $0x310] sm:$0x3] %vm29_vm2, %v16541_v1  ;;  %129 = vst.msk [vmem:[#allocation2 + $0x328] sm:$0x3] %vm29_vm2, %v16541_v1 }
  0x37   :  { %132 = vst.msk [vmem:[#allocation2 + $0x340] sm:$0x3] %vm29_vm2, %v16541_v1  ;;  %135 = vst.msk [vmem:[#allocation2 + $0x358] sm:$0x3] %vm29_vm2, %v16541_v1 }
  0x38   :  { %23497 = vst [vmem:[#allocation4_spill] sm:$0xff] %v16820_v4  ;;  %23498 = vst [vmem:[#allocation5_spill] sm:$0xff] %v16825_v5 }
  0x39   :  { %23499 = vst [vmem:[#allocation6_spill] sm:$0xff] %v16830_v6  ;;  %202 = vst.msk [vmem:[#allocation2 + $0x21] sm:$0xff] %vm26_vm1, %v16820_v4 }
  0x3a   :  { %203 = vst.msk [vmem:[#allocation2 + $0x31] sm:$0xff] %vm26_vm1, %v16825_v5  ;;  %204 = vst.msk [vmem:[#allocation2 + $0x39] sm:$0xff] %vm26_vm1, %v16830_v6 }
  0x3b   :  { %23500 = vst [vmem:[#allocation7_spill] sm:$0xff] %v16843_v7  ;;  %23501 = vst [vmem:[#allocation8_spill] sm:$0xff] %v16848_v8 }
  0x3c   :  { %23502 = vst [vmem:[#allocation9_spill] sm:$0xff] %v16853_v9  ;;  %205 = vst.msk [vmem:[#allocation2 + $0x49] sm:$0xff] %vm26_vm1, %v16843_v7 }
  0x3d   :  { %206 = vst.msk [vmem:[#allocation2 + $0x51] sm:$0xff] %vm26_vm1, %v16848_v8  ;;  %207 = vst.msk [vmem:[#allocation2 + $0x61] sm:$0xff] %vm26_vm1, %v16853_v9 }
  0x3e   :  { %23503 = vst [vmem:[#allocation10_spill] sm:$0xff] %v16866_v10  ;;  %23504 = vst [vmem:[#allocation11_spill] sm:$0xff] %v16871_v11 }
  0x3f   :  { %23505 = vst [vmem:[#allocation12_spill] sm:$0xff] %v16876_v12  ;;  %208 = vst.msk [vmem:[#allocation2 + $0x69] sm:$0xff] %vm26_vm1, %v16866_v10 }
  0x40   :  { %209 = vst.msk [vmem:[#allocation2 + $0x79] sm:$0xff] %vm26_vm1, %v16871_v11  ;;  %210 = vst.msk [vmem:[#allocation2 + $0x81] sm:$0xff] %vm26_vm1, %v16876_v12  ;;  %v16982_v28 = vld [vmem:[#allocation2 + $0x20] sm:$0xff] }
  0x41   :  { %23506 = vst [vmem:[#allocation13_spill] sm:$0xff] %v16887_v13  ;;  %23507 = vst [vmem:[#allocation14_spill] sm:$0xff] %v16892_v14  ;;  %v16984_v29 = vld [vmem:[#allocation2 + $0x30] sm:$0xff]  ;;  %13751 = vmatmul.mubr.msk.f32.vlgmr.msra.gmra.mrb[0].mxu0 %vm26_vm1, %v16982_v28  ;;  %v16996_v30 = vld [vmem:[#allocation2 + $0x38] sm:$0xff] }
  0x42   :  { %23508 = vst [vmem:[#allocation15_spill] sm:$0xff] %v16897_v15  ;;  %211 = vst.msk [vmem:[#allocation2 + $0x91] sm:$0xff] %vm26_vm1, %v16887_v13  ;;  %13847 = vmatpush3.msk.msra.mxu0 %vm23441_vm0, %v16739_v3  ;;  %13753 = vmatprep.mubr.msk.f32.mxu0 %vm26_vm1, %v16984_v29  ;;  %v17211_v3 = vld [vmem:[%s23307_s0 + $0x180] sm:$0xff] }
  0x43   :  { %212 = vst.msk [vmem:[#allocation2 + $0x99] sm:$0xff] %vm26_vm1, %v16892_v14  ;;  %213 = vst.msk [vmem:[#allocation2 + $0xa9] sm:$0xff] %vm26_vm1, %v16897_v15  ;;  %v16998_v31 = vld [vmem:[#allocation2 + $0x48] sm:$0xff] }
  0x44   :  { %23509 = vst [vmem:[#allocation16_spill] sm:$0xff] %v16908_v16  ;;  %23510 = vst [vmem:[#allocation17_spill] sm:$0xff] %v16913_v17  ;;  %v17004_v32 = vld [vmem:[#allocation2 + $0x50] sm:$0xff]  ;;  %v17006_v33 = vld [vmem:[#allocation2 + $0x60] sm:$0xff] }
  0x45   :  { %23511 = vst [vmem:[#allocation18_spill] sm:$0xff] %v16918_v18  ;;  %214 = vst.msk [vmem:[#allocation2 + $0xb1] sm:$0xff] %vm26_vm1, %v16908_v16  ;;  %13754 = vmatmul.mubr.msk.f32.gmra.mrb[2].mxu0 %vm26_vm1, %v16996_v30 }
  0x46   :  { %215 = vst.msk [vmem:[#allocation2 + $0xc1] sm:$0xff] %vm26_vm1, %v16913_v17  ;;  %216 = vst.msk [vmem:[#allocation2 + $0xc9] sm:$0xff] %vm26_vm1, %v16918_v18  ;;  %13756 = vmatprep.mubr.msk.f32.mxu0 %vm26_vm1, %v16998_v31  ;;  %v17013_v35 = vld [vmem:[#allocation2 + $0x68] sm:$0xff] }
  0x47   :  { %23512 = vst [vmem:[#allocation19_spill] sm:$0xff] %v16929_v19  ;;  %23513 = vst [vmem:[#allocation20_spill] sm:$0xff] %v16934_v20  ;;  %v17034_v39 = vld [vmem:[#allocation2 + $0x78] sm:$0xff]  ;;  %v17101_v49 = vld [vmem:[#allocation2 + $0x80] sm:$0xff] }
  0x48   :  { %23514 = vst [vmem:[#allocation21_spill] sm:$0xff] %v16939_v21  ;;  %217 = vst.msk [vmem:[#allocation2 + $0xd9] sm:$0xff] %vm26_vm1, %v16929_v19 }
  0x49   :  { %218 = vst.msk [vmem:[#allocation2 + $0xe1] sm:$0xff] %vm26_vm1, %v16934_v20  ;;  %219 = vst.msk [vmem:[#allocation2 + $0xf1] sm:$0xff] %vm26_vm1, %v16939_v21  ;;  %13757 = vmatmul.mubr.msk.f32.gmra.mrb[4].mxu0 %vm26_vm1, %v17004_v32  ;;  %v17170_v59 = vld [vmem:[#allocation2 + $0x90] sm:$0xff] }
  0x4a   :  { %23515 = vst [vmem:[#allocation22_spill] sm:$0xff] %v16950_v22  ;;  %23516 = vst [vmem:[#allocation23_spill] sm:$0xff] %v16955_v23  ;;  %13759 = vmatprep.mubr.msk.f32.mxu0 %vm26_vm1, %v17006_v33  ;;  %v17196_v62 = vld [vmem:[#allocation2 + $0x98] sm:$0xff]  ;;  %v17198_v63 = vld [vmem:[#allocation2 + $0xa8] sm:$0xff] }
  0x4b   :  { %23517 = vst [vmem:[#allocation24_spill] sm:$0xff] %v16960_v24  ;;  %220 = vst.msk [vmem:[#allocation2 + $0xf9] sm:$0xff] %vm26_vm1, %v16950_v22 }
  0x4c   :  { %221 = vst.msk [vmem:[#allocation2 + $0x109] sm:$0xff] %vm26_vm1, %v16955_v23  ;;  %222 = vst.msk [vmem:[#allocation2 + $0x111] sm:$0xff] %vm26_vm1, %v16960_v24  ;;  %v17204_v0 = vld [vmem:[#allocation2 + $0xb0] sm:$0xff] }
  0x4d   :  { %23518 = vst [vmem:[#allocation25_spill] sm:$0xff] %v16973_v26  ;;  %23519 = vst [vmem:[#allocation26_spill] sm:$0xff] %v16978_v27  ;;  %13760 = vmatmul.mubr.msk.f32.gmra.mrb[6].mxu0 %vm26_vm1, %v17013_v35  ;;  %v17206_v1 = vld [vmem:[#allocation2 + $0xc0] sm:$0xff] }
  0x4e   :  { %223 = vst.msk [vmem:[#allocation2 + $0x121] sm:$0xff] %vm26_vm1, %v16973_v26  ;;  %224 = vst.msk [vmem:[#allocation2 + $0x129] sm:$0xff] %vm26_vm1, %v16978_v27  ;;  %13762 = vmatprep.mubr.msk.f32.mxu0 %vm26_vm1, %v17034_v39 }
  0x4f   :  { %23520 = vst [vmem:[#allocation27_spill] sm:$0xff] %v17011_v34  ;;  %225 = vst.msk [vmem:[#allocation2 + $0x139] sm:$0xff] %vm26_vm1, %v17011_v34 }
  0x50   :  { %23521 = vst [vmem:[#allocation28_spill] sm:$0xff] %v17020_v36  ;;  %23522 = vst [vmem:[#allocation29_spill] sm:$0xff] %v17025_v37 }
  0x51   :  { %23523 = vst [vmem:[#allocation30_spill] sm:$0xff] %v17030_v38  ;;  %226 = vst.msk [vmem:[#allocation2 + $0x141] sm:$0xff] %vm26_vm1, %v17020_v36  ;;  %13763 = vmatmul.mubr.msk.f32.gmra.mrb[8].mxu0 %vm26_vm1, %v17101_v49 }
  0x52   :  { %227 = vst.msk [vmem:[#allocation2 + $0x151] sm:$0xff] %vm26_vm1, %v17025_v37  ;;  %228 = vst.msk [vmem:[#allocation2 + $0x159] sm:$0xff] %vm26_vm1, %v17030_v38  ;;  %13765 = vmatprep.mubr.msk.f32.mxu0 %vm26_vm1, %v17170_v59 }
  0x53   :  { %23524 = vst [vmem:[#allocation31_spill] sm:$0xff] %v17045_v40  ;;  %23525 = vst [vmem:[#allocation32_spill] sm:$0xff] %v17050_v41 }
  0x54   :  { %23526 = vst [vmem:[#allocation33_spill] sm:$0xff] %v17055_v42  ;;  %229 = vst.msk [vmem:[#allocation2 + $0x169] sm:$0xff] %vm26_vm1, %v17045_v40 }
  0x55   :  { %230 = vst.msk [vmem:[#allocation2 + $0x171] sm:$0xff] %vm26_vm1, %v17050_v41  ;;  %231 = vst.msk [vmem:[#allocation2 + $0x181] sm:$0xff] %vm26_vm1, %v17055_v42  ;;  %13766 = vmatmul.mubr.msk.f32.gmra.mrb[10].mxu0 %vm26_vm1, %v17196_v62 }
  0x56   :  { %23527 = vst [vmem:[#allocation34_spill] sm:$0xff] %v17068_v43  ;;  %23528 = vst [vmem:[#allocation35_spill] sm:$0xff] %v17073_v44  ;;  %13768 = vmatprep.mubr.msk.f32.mxu0 %vm26_vm1, %v17198_v63 }
  0x57   :  { %23529 = vst [vmem:[#allocation36_spill] sm:$0xff] %v17078_v45  ;;  %232 = vst.msk [vmem:[#allocation2 + $0x189] sm:$0xff] %vm26_vm1, %v17068_v43 }
  0x58   :  { %233 = vst.msk [vmem:[#allocation2 + $0x1c9] sm:$0xff] %vm26_vm1, %v17073_v44  ;;  %234 = vst.msk [vmem:[#allocation2 + $0x1d1] sm:$0xff] %vm26_vm1, %v17078_v45 }
  0x59   :  { %23530 = vst [vmem:[#allocation37_spill] sm:$0xff] %v17089_v46  ;;  %23531 = vst [vmem:[#allocation38_spill] sm:$0xff] %v17094_v47  ;;  %13769 = vmatmul.mubr.msk.f32.gmra.mrb[12].mxu0 %vm26_vm1, %v17204_v0 }
  0x5a   :  { %23532 = vst [vmem:[#allocation39_spill] sm:$0xff] %v17099_v48  ;;  %235 = vst.msk [vmem:[#allocation2 + $0x1e1] sm:$0xff] %vm26_vm1, %v17089_v46  ;;  %13771 = vmatprep.mubr.msk.f32.mxu0 %vm26_vm1, %v17206_v1 }
  0x5b   :  { %236 = vst.msk [vmem:[#allocation2 + $0x1e9] sm:$0xff] %vm26_vm1, %v17094_v47  ;;  %237 = vst.msk [vmem:[#allocation2 + $0x1f9] sm:$0xff] %vm26_vm1, %v17099_v48  ;;  %v17373_v48 = vld [vmem:[#allocation2 + $0x150] sm:$0xff]  ;;  %v17379_v47 = vld [vmem:[#allocation2 + $0x158] sm:$0xff] }
  0x5c   :  { %23533 = vst [vmem:[#allocation40_spill] sm:$0xff] %v17112_v50  ;;  %23534 = vst [vmem:[#allocation41_spill] sm:$0xff] %v17117_v51  ;;  %v17381_v46 = vld [vmem:[#allocation2 + $0x168] sm:$0xff]  ;;  %v17387_v45 = vld [vmem:[#allocation2 + $0x170] sm:$0xff] }
  0x5d   :  { %23535 = vst [vmem:[#allocation42_spill] sm:$0xff] %v17122_v52  ;;  %238 = vst.msk [vmem:[#allocation2 + $0x201] sm:$0xff] %vm26_vm1, %v17112_v50  ;;  %v17371_v50 = vld [vmem:[#allocation2 + $0x140] sm:$0xff] }
  0x5e   :  { %239 = vst.msk [vmem:[#allocation2 + $0x211] sm:$0xff] %vm26_vm1, %v17117_v51  ;;  %240 = vst.msk [vmem:[#allocation2 + $0x219] sm:$0xff] %vm26_vm1, %v17122_v52  ;;  %v17363_v52 = vld [vmem:[#allocation2 + $0x128] sm:$0xff]  ;;  %v17365_v51 = vld [vmem:[#allocation2 + $0x138] sm:$0xff] }
  0x5f   :  { %23536 = vst [vmem:[#allocation43_spill] sm:$0xff] %v17135_v53  ;;  %23537 = vst [vmem:[#allocation44_spill] sm:$0xff] %v17140_v54  ;;  %v17389_v44 = vld [vmem:[#allocation2 + $0x180] sm:$0xff]  ;;  %v17395_v43 = vld [vmem:[#allocation2 + $0x188] sm:$0xff] }
  0x60   :  { %23538 = vst [vmem:[#allocation45_spill] sm:$0xff] %v17145_v55  ;;  %241 = vst.msk [vmem:[#allocation2 + $0x229] sm:$0xff] %vm26_vm1, %v17135_v53  ;;  %v17357_v53 = vld [vmem:[#allocation2 + $0x120] sm:$0xff]  ;;  %v17397_v42 = vld [vmem:[#allocation2 + $0x1c8] sm:$0xff] }
  0x61   :  { %242 = vst.msk [vmem:[#allocation2 + $0x231] sm:$0xff] %vm26_vm1, %v17140_v54  ;;  %243 = vst.msk [vmem:[#allocation2 + $0x241] sm:$0xff] %vm26_vm1, %v17145_v55  ;;  %v17250_v55 = vld [vmem:[%s23307_s0 + $0x1a8] sm:$0xff]  ;;  %v17355_v54 = vld [vmem:[#allocation2 + $0x110] sm:$0xff] }
  0x62   :  { %23539 = vst [vmem:[#allocation46_spill] sm:$0xff] %v17158_v56  ;;  %23540 = vst [vmem:[#allocation47_spill] sm:$0xff] %v17163_v57  ;;  %v17403_v41 = vld [vmem:[#allocation2 + $0x1d0] sm:$0xff]  ;;  %v17405_v40 = vld [vmem:[#allocation2 + $0x1e0] sm:$0xff] }
  0x63   :  { %23541 = vst [vmem:[#allocation48_spill] sm:$0xff] %v17168_v58  ;;  %244 = vst.msk [vmem:[#allocation2 + $0x249] sm:$0xff] %vm26_vm1, %v17158_v56  ;;  %v17234_v56 = vld [vmem:[#allocation2 + $0xd8] sm:$0xff]  ;;  %v17411_v38 = vld [vmem:[#allocation2 + $0x1e8] sm:$0xff] }
  0x64   :  { %245 = vst.msk [vmem:[#allocation2 + $0x259] sm:$0xff] %vm26_vm1, %v17163_v57  ;;  %246 = vst.msk [vmem:[#allocation2 + $0x261] sm:$0xff] %vm26_vm1, %v17168_v58  ;;  %v17225_v58 = vld [vmem:[%s23307_s0 + $0x190] sm:$0xff]  ;;  %v17230_v57 = vld [vmem:[%s23307_s0 + $0x198] sm:$0xff] }
  0x65   :  { %23542 = vst [vmem:[#allocation49_spill] sm:$0xff] %v17181_v60  ;;  %23543 = vst [vmem:[#allocation50_spill] sm:$0xff] %v17186_v61  ;;  %v17413_v37 = vld [vmem:[#allocation2 + $0x1f8] sm:$0xff]  ;;  %v17419_v36 = vld [vmem:[#allocation2 + $0x200] sm:$0xff] }
  0x66   :  { %247 = vst.msk [vmem:[#allocation2 + $0x271] sm:$0xff] %vm26_vm1, %v17181_v60  ;;  %248 = vst.msk [vmem:[#allocation2 + $0x279] sm:$0xff] %vm26_vm1, %v17186_v61  ;;  %v17213_v61 = vld [vmem:[#allocation2 + $0xc8] sm:$0xff]  ;;  %v17421_v34 = vld [vmem:[#allocation2 + $0x210] sm:$0xff] }
  0x67   :  { %23544 = vst [vmem:[#allocation51_spill] sm:$0xff] %v17211_v3  ;;  %249 = vst.msk [vmem:[#allocation2 + $0x289] sm:$0xff] %vm26_vm1, %v17211_v3  ;;  %v17220_v60 = vld [vmem:[%s23307_s0 + $0x188] sm:$0xff]  ;;  %v17245_v3 = vld [vmem:[%s23307_s0 + $0x1a0] sm:$0xff]  ;;  %13772 = vmatmul.mubr.msk.f32.gmra.mrb[14].mxu0 %vm26_vm1, %v17213_v61 }
  0x68   :  { %23545 = vst [vmem:[#allocation52_spill] sm:$0xff] %v17220_v60  ;;  %23546 = vst [vmem:[#allocation53_spill] sm:$0xff] %v17225_v58  ;;  %13774 = vmatprep.mubr.msk.f32.mxu0 %vm26_vm1, %v17234_v56  ;;  %v17427_v27 = vld [vmem:[#allocation2 + $0x218] sm:$0xff]  ;;  %v17429_v26 = vld [vmem:[#allocation2 + $0x228] sm:$0xff] }
  0x69   :  { %23547 = vst [vmem:[#allocation54_spill] sm:$0xff] %v17230_v57  ;;  %250 = vst.msk [vmem:[#allocation2 + $0x291] sm:$0xff] %vm26_vm1, %v17220_v60  ;;  %v17255_v60 = vld [vmem:[%s23307_s0 + $0x1b0] sm:$0xff]  ;;  %v17437_v23 = vld [vmem:[#allocation2 + $0x240] sm:$0xff] }
  0x6a   :  { %251 = vst.msk [vmem:[#allocation2 + $0x2a1] sm:$0xff] %vm26_vm1, %v17225_v58  ;;  %252 = vst.msk [vmem:[#allocation2 + $0x2a9] sm:$0xff] %vm26_vm1, %v17230_v57  ;;  %v17268_v57 = vld [vmem:[%s23307_s0 + $0x1b8] sm:$0xff]  ;;  %v17273_v58 = vld [vmem:[%s23307_s0 + $0x1c0] sm:$0xff] }
  0x6b   :  { %23548 = vst [vmem:[#allocation55_spill] sm:$0xff] %v17245_v3  ;;  %23549 = vst [vmem:[#allocation56_spill] sm:$0xff] %v17250_v55  ;;  %v17435_v24 = vld [vmem:[#allocation2 + $0x230] sm:$0xff]  ;;  %v17443_v22 = vld [vmem:[#allocation2 + $0x248] sm:$0xff] }
  0x6c   :  { %23550 = vst [vmem:[#allocation57_spill] sm:$0xff] %v17255_v60  ;;  %253 = vst.msk [vmem:[#allocation2 + $0x2b9] sm:$0xff] %vm26_vm1, %v17245_v3  ;;  %v17278_v3 = vld [vmem:[%s23307_s0 + $0x1c8] sm:$0xff]  ;;  %v17445_v21 = vld [vmem:[#allocation2 + $0x258] sm:$0xff] }
  0x6d   :  { %254 = vst.msk [vmem:[#allocation2 + $0x2c1] sm:$0xff] %vm26_vm1, %v17250_v55  ;;  %255 = vst.msk [vmem:[#allocation2 + $0x2d1] sm:$0xff] %vm26_vm1, %v17255_v60  ;;  %v17289_v60 = vld [vmem:[%s23307_s0 + $0x1d0] sm:$0xff]  ;;  %v17294_v55 = vld [vmem:[%s23307_s0 + $0x1d8] sm:$0xff] }
  0x6e   :  { %23551 = vst [vmem:[#allocation58_spill] sm:$0xff] %v17268_v57  ;;  %23552 = vst [vmem:[#allocation59_spill] sm:$0xff] %v17273_v58  ;;  %v17451_v20 = vld [vmem:[#allocation2 + $0x260] sm:$0xff]  ;;  %v17453_v19 = vld [vmem:[#allocation2 + $0x270] sm:$0xff] }
  0x6f   :  { %23553 = vst [vmem:[#allocation60_spill] sm:$0xff] %v17278_v3  ;;  %256 = vst.msk [vmem:[#allocation2 + $0x2d9] sm:$0xff] %vm26_vm1, %v17268_v57  ;;  %v17299_v57 = vld [vmem:[%s23307_s0 + $0x1e0] sm:$0xff]  ;;  %v17459_v18 = vld [vmem:[#allocation2 + $0x278] sm:$0xff] }
  0x70   :  { %257 = vst.msk [vmem:[#allocation2 + $0x2e9] sm:$0xff] %vm26_vm1, %v17273_v58  ;;  %258 = vst.msk [vmem:[#allocation2 + $0x2f1] sm:$0xff] %vm26_vm1, %v17278_v3  ;;  %v17310_v3 = vld [vmem:[%s23307_s0 + $0x1e8] sm:$0xff]  ;;  %v17315_v58 = vld [vmem:[%s23307_s0 + $0x1f0] sm:$0xff] }
  0x71   :  { %23554 = vst [vmem:[#allocation61_spill] sm:$0xff] %v17289_v60  ;;  %23555 = vst [vmem:[#allocation62_spill] sm:$0xff] %v17294_v55  ;;  %v17461_v17 = vld [vmem:[#allocation2 + $0x288] sm:$0xff]  ;;  %v17467_v16 = vld [vmem:[#allocation2 + $0x290] sm:$0xff] }
  0x72   :  { %23556 = vst [vmem:[#allocation63_spill] sm:$0xff] %v17299_v57  ;;  %259 = vst.msk [vmem:[#allocation2 + $0x301] sm:$0xff] %vm26_vm1, %v17289_v60  ;;  %v17320_v60 = vld [vmem:[%s23307_s0 + $0x1f8] sm:$0xff]  ;;  %v17469_v15 = vld [vmem:[#allocation2 + $0x2a0] sm:$0xff] }
  0x73   :  { %260 = vst.msk [vmem:[#allocation2 + $0x309] sm:$0xff] %vm26_vm1, %v17294_v55  ;;  %261 = vst.msk [vmem:[#allocation2 + $0x319] sm:$0xff] %vm26_vm1, %v17299_v57  ;;  %v17333_v57 = vld [vmem:[%s23306_s1 + $0x18] sm:$0xf]  ;;  %v17337_v55 = vld [vmem:[#allocation2 + $0xe0] sm:$0xff] }
  0x74   :  { %23557 = vst [vmem:[#allocation64_spill] sm:$0xff] %v17310_v3  ;;  %23558 = vst [vmem:[#allocation65_spill] sm:$0xff] %v17315_v58  ;;  %13944 = vmatprep.subr.msk.mxu0 %vm23441_vm0, %v17333_v57  ;;  %13775 = vmatmul.mubr.msk.f32.gmra.mrb[16].mxu0 %vm26_vm1, %v17337_v55  ;;  %v17475_v14 = vld [vmem:[#allocation2 + $0x2a8] sm:$0xff]  ;;  %v17477_v13 = vld [vmem:[#allocation2 + $0x2b8] sm:$0xff] }
  0x75   :  { %23559 = vst [vmem:[#allocation66_spill] sm:$0xff] %v17320_v60  ;;  %262 = vst.msk [vmem:[#allocation2 + $0x321] sm:$0xff] %vm26_vm1, %v17310_v3  ;;  %v17341_v3 = vld [vmem:[#allocation2 + $0xf0] sm:$0xff]  ;;  %v17483_v12 = vld [vmem:[#allocation2 + $0x2c0] sm:$0xff] }
  0x76   :  { %263 = vst.msk [vmem:[#allocation2 + $0x331] sm:$0xff] %vm26_vm1, %v17315_v58  ;;  %264 = vst.msk [vmem:[#allocation2 + $0x339] sm:$0xff] %vm26_vm1, %v17320_v60  ;;  %13777 = vmatprep.mubr.msk.f32.mxu0 %vm26_vm1, %v17341_v3  ;;  %v17347_v60 = vld [vmem:[#allocation2 + $0xf8] sm:$0xff]  ;;  %v17349_v58 = vld [vmem:[#allocation2 + $0x108] sm:$0xff] }
  0x77   :  { %23560 = vst [vmem:[#allocation67_spill] sm:$0xff] %v17389_v44  ;;  %23561 = vst [vmem:[#allocation68_spill] sm:$0xff] %v17395_v43  ;;  %v17485_v11 = vld [vmem:[#allocation2 + $0x2d0] sm:$0xff]  ;;  %v17491_v10 = vld [vmem:[#allocation2 + $0x2d8] sm:$0xff] }
  0x78   :  { %13778 = vmatmul.mubr.msk.f32.gmra.mrb[18].mxu0 %vm26_vm1, %v17347_v60  ;;  %v17493_v9 = vld [vmem:[#allocation2 + $0x2e8] sm:$0xff]  ;;  %v17499_v8 = vld [vmem:[#allocation2 + $0x2f0] sm:$0xff] }
  0x79   :  { %13780 = vmatprep.mubr.msk.f32.mxu0 %vm26_vm1, %v17349_v58  ;;  %v17501_v7 = vld [vmem:[#allocation2 + $0x300] sm:$0xff] }
  0x7a   :  { %v17507_v6 = vld [vmem:[#allocation2 + $0x308] sm:$0xff]  ;;  %v17509_v5 = vld [vmem:[#allocation2 + $0x318] sm:$0xff] }
  0x7b   :  { %23562 = vst [vmem:[#allocation69_spill] sm:$0xff] %v17507_v6  ;;  %23563 = vst [vmem:[#allocation70_spill] sm:$0xff] %v17509_v5 }
  0x7c   :  { %13781 = vmatmul.mubr.msk.f32.gmra.mrb[20].mxu0 %vm26_vm1, %v17355_v54  ;;  %v17515_v4 = vld [vmem:[#allocation2 + $0x320] sm:$0xff] }
  0x7d   :  { %13783 = vmatprep.mubr.msk.f32.mxu0 %vm26_vm1, %v17357_v53  ;;  %v17517_v2 = vld [vmem:[#allocation2 + $0x330] sm:$0xff] }
  0x80   :  { %13784 = vmatmul.mubr.msk.f32.gmra.mrb[22].mxu0 %vm26_vm1, %v17363_v52 }
  0x81   :  { %13786 = vmatprep.mubr.msk.f32.mxu0 %vm26_vm1, %v17365_v51 }
  0x84   :  { %13787 = vmatmul.mubr.msk.f32.gmra.mrb[24].mxu0 %vm26_vm1, %v17371_v50 }
  0x85   :  { %13789 = vmatprep.mubr.msk.f32.mxu0 %vm26_vm1, %v17373_v48 }
  0x88   :  { %13790 = vmatmul.mubr.msk.f32.gmra.mrb[26].mxu0 %vm26_vm1, %v17379_v47 }
  0x89   :  { %13792 = vmatprep.mubr.msk.f32.mxu0 %vm26_vm1, %v17381_v46 }
  0x8c   :  { %13793 = vmatmul.mubr.msk.f32.gmra.mrb[28].mxu0 %vm26_vm1, %v17387_v45 }
  0x8d   :  { %13795 = vmatprep.mubr.msk.f32.mxu0 %vm26_vm1, %v17389_v44  ;;  %v265_v44 = vld [vmem:[#allocation2] sm:$0xff] }
  0x90   :  { %13796 = vmatmul.mubr.msk.f32.gmra.mrb[30].mxu0 %vm26_vm1, %v17395_v43  ;;  %v17523_v43 = vld [vmem:[#allocation2 + $0x338] sm:$0xff] }
  0x91   :  { %13798 = vmatprep.mubr.msk.f32.mxu0 %vm26_vm1, %v17397_v42 }
  0x94   :  { %13799 = vmatmul.mubr.msk.f32.gmra.mrb[32].mxu0 %vm26_vm1, %v17403_v41 }
  0x95   :  { %13801 = vmatprep.mubr.msk.f32.mxu0 %vm26_vm1, %v17405_v40 }
  0x98   :  { %13802 = vmatmul.mubr.msk.f32.gmra.mrb[34].mxu0 %vm26_vm1, %v17411_v38 }
  0x99   :  { %13804 = vmatprep.mubr.msk.f32.mxu0 %vm26_vm1, %v17413_v37 }
  0x9c   :  { %13805 = vmatmul.mubr.msk.f32.gmra.mrb[36].mxu0 %vm26_vm1, %v17419_v36 }
  0x9d   :  { %13807 = vmatprep.mubr.msk.f32.mxu0 %vm26_vm1, %v17421_v34 }
  0xa0   :  { %13808 = vmatmul.mubr.msk.f32.gmra.mrb[38].mxu0 %vm26_vm1, %v17427_v27 }
  0xa1   :  { %13810 = vmatprep.mubr.msk.f32.mxu0 %vm26_vm1, %v17429_v26 }
  0xa4   :  { %13811 = vmatmul.mubr.msk.f32.gmra.mrb[40].mxu0 %vm26_vm1, %v17435_v24 }
  0xa5   :  { %13813 = vmatprep.mubr.msk.f32.mxu0 %vm26_vm1, %v17437_v23 }
  0xa8   :  { %13814 = vmatmul.mubr.msk.f32.gmra.mrb[42].mxu0 %vm26_vm1, %v17443_v22 }
  0xa9   :  { %13816 = vmatprep.mubr.msk.f32.mxu0 %vm26_vm1, %v17445_v21 }
  0xac   :  { %13817 = vmatmul.mubr.msk.f32.gmra.mrb[44].mxu0 %vm26_vm1, %v17451_v20 }
  0xad   :  { %13819 = vmatprep.mubr.msk.f32.mxu0 %vm26_vm1, %v17453_v19 }
  0xb0   :  { %13820 = vmatmul.mubr.msk.f32.gmra.mrb[46].mxu0 %vm26_vm1, %v17459_v18 }
  0xb1   :  { %13822 = vmatprep.mubr.msk.f32.mxu0 %vm26_vm1, %v17461_v17 }
  0xb4   :  { %13823 = vmatmul.mubr.msk.f32.gmra.mrb[48].mxu0 %vm26_vm1, %v17467_v16 }
  0xb5   :  { %13825 = vmatprep.mubr.msk.f32.mxu0 %vm26_vm1, %v17469_v15 }
  0xb8   :  { %13826 = vmatmul.mubr.msk.f32.gmra.mrb[50].mxu0 %vm26_vm1, %v17475_v14 }
  0xb9   :  { %13828 = vmatprep.mubr.msk.f32.mxu0 %vm26_vm1, %v17477_v13 }
  0xbc   :  { %13829 = vmatmul.mubr.msk.f32.gmra.mrb[52].mxu0 %vm26_vm1, %v17483_v12 }
  0xbd   :  { %13831 = vmatprep.mubr.msk.f32.mxu0 %vm26_vm1, %v17485_v11 }
  0xc0   :  { %13832 = vmatmul.mubr.msk.f32.gmra.mrb[54].mxu0 %vm26_vm1, %v17491_v10 }
  0xc1   :  { %13834 = vmatprep.mubr.msk.f32.mxu0 %vm26_vm1, %v17493_v9 }
  0xc4   :  { %13835 = vmatmul.mubr.msk.f32.gmra.mrb[56].mxu0 %vm26_vm1, %v17499_v8 }
  0xc5   :  { %13837 = vmatprep.mubr.msk.f32.mxu0 %vm26_vm1, %v17501_v7 }
  0xc8   :  { %13838 = vmatmul.mubr.msk.f32.gmra.mrb[58].mxu0 %vm26_vm1, %v17507_v6  ;;  %v266_v6 = vld [vmem:[#allocation2 + $0x8] sm:$0xff] }
  0xc9   :  { %13840 = vmatprep.mubr.msk.f32.mxu0 %vm26_vm1, %v17509_v5  ;;  %v17531_v5 = vld [vmem:[%s23306_s1 + $0x4] sm:$0xf] }
  0xcc   :  { %13841 = vmatmul.mubr.msk.f32.gmra.mrb[60].mxu0 %vm26_vm1, %v17515_v4 }
  0xcd   :  { %13843 = vmatprep.mubr.msk.f32.mxu0 %vm26_vm1, %v17517_v2 }
  0xd0   :  { %13844 = vmatmul.mubr.msk.f32.gmra.mrb[62].mxu0 %vm26_vm1, %v17523_v43 }
  0xd1   :  { %13848 = vmatprep.mubr.msk.f32.mxu0 %vm26_vm1, %v265_v44  ;;  %v17912_v44 = vld [vmem:[#allocation2 + $0x159] sm:$0xff] }
  0xd4   :  { %13849 = vmatmul.mubr.msk.f32.vlgmr.msra.gmra.mrb[0].mxu0 %vm26_vm1, %v266_v6  ;;  %v301_v6 = vld [vmem:[#allocation2 + $0x1b0] sm:$0xff] }
  0xd5   :  { %13945 = vmatpush3.msk.msra.mxu0 %vm23441_vm0, %v17333_v57  ;;  %13851 = vmatprep.mubr.msk.f32.mxu0 %vm26_vm1, %v16962_v25  ;;  %v302_v25 = vld [vmem:[#allocation2 + $0x1b8] sm:$0xff]  ;;  %v17956_v57 = vld [vmem:[#allocation2 + $0x229] sm:$0xff] }
  0xd6   :  { %14042 = vmatprep.subr.msk.mxu0 %vm23441_vm0, %v17531_v5 }
  0xd8   :  { %13852 = vmatmul.mubr.msk.f32.gmra.mrb[2].mxu0 %vm26_vm1, %v16982_v28  ;;  %v23564_v28 = vld [vmem:[#allocation69_spill] sm:$0xff] }
  0xd9   :  { %13854 = vmatprep.mubr.msk.f32.mxu0 %vm26_vm1, %v16984_v29 }
  0xdc   :  { %13855 = vmatmul.mubr.msk.f32.gmra.mrb[4].mxu0 %vm26_vm1, %v16996_v30 }
  0xdd   :  { %13857 = vmatprep.mubr.msk.f32.mxu0 %vm26_vm1, %v16998_v31 }
  0xe0   :  { %13858 = vmatmul.mubr.msk.f32.gmra.mrb[6].mxu0 %vm26_vm1, %v17004_v32 }
  0xe1   :  { %13860 = vmatprep.mubr.msk.f32.mxu0 %vm26_vm1, %v17006_v33 }
  0xe4   :  { %13861 = vmatmul.mubr.msk.f32.gmra.mrb[8].mxu0 %vm26_vm1, %v17013_v35 }
  0xe5   :  { %13863 = vmatprep.mubr.msk.f32.mxu0 %vm26_vm1, %v17034_v39 }
  0xe8   :  { %13864 = vmatmul.mubr.msk.f32.gmra.mrb[10].mxu0 %vm26_vm1, %v17101_v49 }
  0xe9   :  { %13866 = vmatprep.mubr.msk.f32.mxu0 %vm26_vm1, %v17170_v59 }
  0xec   :  { %13867 = vmatmul.mubr.msk.f32.gmra.mrb[12].mxu0 %vm26_vm1, %v17196_v62 }
  0xed   :  { %13869 = vmatprep.mubr.msk.f32.mxu0 %vm26_vm1, %v17198_v63 }
  0xf0   :  { %13870 = vmatmul.mubr.msk.f32.gmra.mrb[14].mxu0 %vm26_vm1, %v17204_v0 }
  0xf1   :  { %13872 = vmatprep.mubr.msk.f32.mxu0 %vm26_vm1, %v17206_v1 }
  0xf4   :  { %13873 = vmatmul.mubr.msk.f32.gmra.mrb[16].mxu0 %vm26_vm1, %v17213_v61 }
  0xf5   :  { %13875 = vmatprep.mubr.msk.f32.mxu0 %vm26_vm1, %v17234_v56 }
  0xf8   :  { %13876 = vmatmul.mubr.msk.f32.gmra.mrb[18].mxu0 %vm26_vm1, %v17337_v55 }
  0xf9   :  { %13878 = vmatprep.mubr.msk.f32.mxu0 %vm26_vm1, %v17341_v3 }
  0xfc   :  { %13879 = vmatmul.mubr.msk.f32.gmra.mrb[20].mxu0 %vm26_vm1, %v17347_v60 }
  0xfd   :  { %13881 = vmatprep.mubr.msk.f32.mxu0 %vm26_vm1, %v17349_v58 }
 0x100   :  { %13882 = vmatmul.mubr.msk.f32.gmra.mrb[22].mxu0 %vm26_vm1, %v17355_v54 }
 0x101   :  { %13884 = vmatprep.mubr.msk.f32.mxu0 %vm26_vm1, %v17357_v53 }
 0x104   :  { %13885 = vmatmul.mubr.msk.f32.gmra.mrb[24].mxu0 %vm26_vm1, %v17363_v52 }
 0x105   :  { %13887 = vmatprep.mubr.msk.f32.mxu0 %vm26_vm1, %v17365_v51 }
 0x108   :  { %13888 = vmatmul.mubr.msk.f32.gmra.mrb[26].mxu0 %vm26_vm1, %v17371_v50 }
 0x109   :  { %13890 = vmatprep.mubr.msk.f32.mxu0 %vm26_vm1, %v17373_v48 }
 0x10c   :  { %13891 = vmatmul.mubr.msk.f32.gmra.mrb[28].mxu0 %vm26_vm1, %v17379_v47 }
 0x10d   :  { %13893 = vmatprep.mubr.msk.f32.mxu0 %vm26_vm1, %v17381_v46 }
 0x110   :  { %13894 = vmatmul.mubr.msk.f32.gmra.mrb[30].mxu0 %vm26_vm1, %v17387_v45 }
 0x111   :  { %13896 = vmatprep.mubr.msk.f32.mxu0 %vm26_vm1, %v301_v6  ;;  %v17996_v6 = vld [vmem:[#allocation2 + $0x2a1] sm:$0xff] }
 0x114   :  { %13897 = vmatmul.mubr.msk.f32.gmra.mrb[32].mxu0 %vm26_vm1, %v302_v25  ;;  %v18002_v25 = vld [vmem:[#allocation2 + $0x2a9] sm:$0xff] }
 0x115   :  { %13899 = vmatprep.mubr.msk.f32.mxu0 %vm26_vm1, %v17397_v42  ;;  %v17665_v42 = vld [vmem:[%s23306_s1 + $0x10] sm:$0xf] }
 0x118   :  { %13900 = vmatmul.mubr.msk.f32.gmra.mrb[34].mxu0 %vm26_vm1, %v17403_v41  ;;  %v23565_v41 = vld [vmem:[#allocation70_spill] sm:$0xff] }
 0x119   :  { %13902 = vmatprep.mubr.msk.f32.mxu0 %vm26_vm1, %v17405_v40 }
 0x11c   :  { %13903 = vmatmul.mubr.msk.f32.gmra.mrb[36].mxu0 %vm26_vm1, %v17411_v38 }
 0x11d   :  { %13905 = vmatprep.mubr.msk.f32.mxu0 %vm26_vm1, %v17413_v37 }
 0x120   :  { %13906 = vmatmul.mubr.msk.f32.gmra.mrb[38].mxu0 %vm26_vm1, %v17419_v36 }
 0x121   :  { %13908 = vmatprep.mubr.msk.f32.mxu0 %vm26_vm1, %v17421_v34 }
 0x124   :  { %13909 = vmatmul.mubr.msk.f32.gmra.mrb[40].mxu0 %vm26_vm1, %v17427_v27 }
 0x125   :  { %13911 = vmatprep.mubr.msk.f32.mxu0 %vm26_vm1, %v17429_v26 }
 0x128   :  { %13912 = vmatmul.mubr.msk.f32.gmra.mrb[42].mxu0 %vm26_vm1, %v17435_v24 }
 0x129   :  { %13914 = vmatprep.mubr.msk.f32.mxu0 %vm26_vm1, %v17437_v23 }
 0x12c   :  { %13915 = vmatmul.mubr.msk.f32.gmra.mrb[44].mxu0 %vm26_vm1, %v17443_v22 }
 0x12d   :  { %13917 = vmatprep.mubr.msk.f32.mxu0 %vm26_vm1, %v17445_v21 }
 0x130   :  { %13918 = vmatmul.mubr.msk.f32.gmra.mrb[46].mxu0 %vm26_vm1, %v17451_v20 }
 0x131   :  { %13920 = vmatprep.mubr.msk.f32.mxu0 %vm26_vm1, %v17453_v19 }
 0x134   :  { %13921 = vmatmul.mubr.msk.f32.gmra.mrb[48].mxu0 %vm26_vm1, %v17459_v18 }
 0x135   :  { %13923 = vmatprep.mubr.msk.f32.mxu0 %vm26_vm1, %v17461_v17 }
 0x138   :  { %13924 = vmatmul.mubr.msk.f32.gmra.mrb[50].mxu0 %vm26_vm1, %v17467_v16 }
 0x139   :  { %13926 = vmatprep.mubr.msk.f32.mxu0 %vm26_vm1, %v17469_v15 }
 0x13c   :  { %13927 = vmatmul.mubr.msk.f32.gmra.mrb[52].mxu0 %vm26_vm1, %v17475_v14 }
 0x13d   :  { %13929 = vmatprep.mubr.msk.f32.mxu0 %vm26_vm1, %v17477_v13 }
 0x140   :  { %13930 = vmatmul.mubr.msk.f32.gmra.mrb[54].mxu0 %vm26_vm1, %v17483_v12 }
 0x141   :  { %13932 = vmatprep.mubr.msk.f32.mxu0 %vm26_vm1, %v17485_v11 }
 0x144   :  { %13933 = vmatmul.mubr.msk.f32.gmra.mrb[56].mxu0 %vm26_vm1, %v17491_v10 }
 0x145   :  { %13935 = vmatprep.mubr.msk.f32.mxu0 %vm26_vm1, %v17493_v9 }
 0x148   :  { %13936 = vmatmul.mubr.msk.f32.gmra.mrb[58].mxu0 %vm26_vm1, %v17499_v8 }
 0x149   :  { %13938 = vmatprep.mubr.msk.f32.mxu0 %vm26_vm1, %v17501_v7 }
 0x14c   :  { %13939 = vmatmul.mubr.msk.f32.gmra.mrb[60].mxu0 %vm26_vm1, %v23564_v28 }
 0x14d   :  { %13941 = vmatprep.mubr.msk.f32.mxu0 %vm26_vm1, %v23565_v41 }
 0x150   :  { %13942 = vmatmul.mubr.msk.f32.gmra.mrb[62].mxu0 %vm26_vm1, %v17515_v4 }
 0x151   :  { %13946 = vmatprep.mubr.msk.f32.mxu0 %vm26_vm1, %v16984_v29  ;;  %v299_v29 = vld [vmem:[#allocation2 + $0x198] sm:$0xff] }
 0x154   :  { %13947 = vmatmul.mubr.msk.f32.vlgmr.msra.gmra.mrb[0].mxu0 %vm26_vm1, %v16996_v30  ;;  %v23567_v30 = vld [vmem:[#allocation68_spill] sm:$0xff] }
 0x155   :  { %14043 = vmatpush3.msk.msra.mxu0 %vm23441_vm0, %v17531_v5  ;;  %13949 = vmatprep.mubr.msk.f32.mxu0 %vm26_vm1, %v16998_v31  ;;  %v23566_v5 = vld [vmem:[#allocation67_spill] sm:$0xff] }
 0x156   :  { %14140 = vmatprep.subr.msk.mxu0 %vm23441_vm0, %v17665_v42  ;;  %v300_v31 = vld [vmem:[#allocation2 + $0x1a0] sm:$0xff] }
 0x158   :  { %13950 = vmatmul.mubr.msk.f32.gmra.mrb[2].mxu0 %vm26_vm1, %v17004_v32  ;;  %v17872_v32 = vld [vmem:[#allocation2 + $0xe1] sm:$0xff] }
 0x159   :  { %13952 = vmatprep.mubr.msk.f32.mxu0 %vm26_vm1, %v17006_v33  ;;  %v17874_v33 = vld [vmem:[#allocation2 + $0xf1] sm:$0xff] }
 0x15c   :  { %13953 = vmatmul.mubr.msk.f32.gmra.mrb[4].mxu0 %vm26_vm1, %v17013_v35  ;;  %v17882_v35 = vld [vmem:[#allocation2 + $0x109] sm:$0xff] }
 0x15d   :  { %13955 = vmatprep.mubr.msk.f32.mxu0 %vm26_vm1, %v17034_v39  ;;  %v17898_v39 = vld [vmem:[#allocation2 + $0x139] sm:$0xff] }
 0x160   :  { %13956 = vmatmul.mubr.msk.f32.gmra.mrb[6].mxu0 %vm26_vm1, %v17101_v49  ;;  %v17925_v49 = vld [vmem:[#allocation2 + $0x1c9] sm:$0xff] }
 0x161   :  { %13958 = vmatprep.mubr.msk.f32.mxu0 %vm26_vm1, %v17170_v59  ;;  %v17964_v59 = vld [vmem:[#allocation2 + $0x241] sm:$0xff] }
 0x164   :  { %13959 = vmatmul.mubr.msk.f32.gmra.mrb[8].mxu0 %vm26_vm1, %v17196_v62  ;;  %v17978_v62 = vld [vmem:[#allocation2 + $0x261] sm:$0xff] }
 0x165   :  { %13961 = vmatprep.mubr.msk.f32.mxu0 %vm26_vm1, %v17198_v63  ;;  %v17980_v63 = vld [vmem:[#allocation2 + $0x271] sm:$0xff] }
 0x168   :  { %13962 = vmatmul.mubr.msk.f32.gmra.mrb[10].mxu0 %vm26_vm1, %v17204_v0  ;;  %v17986_v0 = vld [vmem:[#allocation2 + $0x279] sm:$0xff] }
 0x169   :  { %13964 = vmatprep.mubr.msk.f32.mxu0 %vm26_vm1, %v17206_v1  ;;  %v17988_v1 = vld [vmem:[#allocation2 + $0x289] sm:$0xff] }
 0x16c   :  { %13965 = vmatmul.mubr.msk.f32.gmra.mrb[12].mxu0 %vm26_vm1, %v17213_v61  ;;  %v17972_v61 = vld [vmem:[#allocation2 + $0x259] sm:$0xff] }
 0x16d   :  { %13967 = vmatprep.mubr.msk.f32.mxu0 %vm26_vm1, %v17234_v56  ;;  %v17954_v56 = vld [vmem:[#allocation2 + $0x219] sm:$0xff] }
 0x170   :  { %13968 = vmatmul.mubr.msk.f32.gmra.mrb[14].mxu0 %vm26_vm1, %v17337_v55  ;;  %v17948_v55 = vld [vmem:[#allocation2 + $0x211] sm:$0xff] }
 0x171   :  { %13970 = vmatprep.mubr.msk.f32.mxu0 %vm26_vm1, %v17341_v3  ;;  %v17994_v3 = vld [vmem:[#allocation2 + $0x291] sm:$0xff] }
 0x174   :  { %13971 = vmatmul.mubr.msk.f32.gmra.mrb[16].mxu0 %vm26_vm1, %v17347_v60  ;;  %v17970_v60 = vld [vmem:[#allocation2 + $0x249] sm:$0xff] }
 0x175   :  { %13973 = vmatprep.mubr.msk.f32.mxu0 %vm26_vm1, %v17349_v58  ;;  %v17962_v58 = vld [vmem:[#allocation2 + $0x231] sm:$0xff] }
 0x178   :  { %13974 = vmatmul.mubr.msk.f32.gmra.mrb[18].mxu0 %vm26_vm1, %v17355_v54  ;;  %v17946_v54 = vld [vmem:[#allocation2 + $0x201] sm:$0xff] }
 0x179   :  { %13976 = vmatprep.mubr.msk.f32.mxu0 %vm26_vm1, %v17357_v53  ;;  %v17940_v53 = vld [vmem:[#allocation2 + $0x1f9] sm:$0xff] }
 0x17c   :  { %13977 = vmatmul.mubr.msk.f32.gmra.mrb[20].mxu0 %vm26_vm1, %v17363_v52  ;;  %v17938_v52 = vld [vmem:[#allocation2 + $0x1e9] sm:$0xff] }
 0x17d   :  { %13979 = vmatprep.mubr.msk.f32.mxu0 %vm26_vm1, %v17365_v51  ;;  %v17932_v51 = vld [vmem:[#allocation2 + $0x1e1] sm:$0xff] }
 0x180   :  { %13980 = vmatmul.mubr.msk.f32.gmra.mrb[22].mxu0 %vm26_vm1, %v17371_v50  ;;  %v17930_v50 = vld [vmem:[#allocation2 + $0x1d1] sm:$0xff] }
 0x181   :  { %13982 = vmatprep.mubr.msk.f32.mxu0 %vm26_vm1, %v17373_v48  ;;  %v1824_v48 = vld [vmem:[#allocation2 + $0x1b9] sm:$0xff] }
 0x184   :  { %13983 = vmatmul.mubr.msk.f32.gmra.mrb[24].mxu0 %vm26_vm1, %v17379_v47  ;;  %v1823_v47 = vld [vmem:[#allocation2 + $0x1b1] sm:$0xff] }
 0x185   :  { %13985 = vmatprep.mubr.msk.f32.mxu0 %vm26_vm1, %v17381_v46  ;;  %v17920_v46 = vld [vmem:[#allocation2 + $0x171] sm:$0xff] }
 0x188   :  { %13986 = vmatmul.mubr.msk.f32.gmra.mrb[26].mxu0 %vm26_vm1, %v17387_v45  ;;  %v17914_v45 = vld [vmem:[#allocation2 + $0x169] sm:$0xff] }
 0x189   :  { %13988 = vmatprep.mubr.msk.f32.mxu0 %vm26_vm1, %v23566_v5  ;;  %v18018_v5 = vld [vmem:[#allocation2 + $0x2d9] sm:$0xff] }
 0x18c   :  { %13989 = vmatmul.mubr.msk.f32.gmra.mrb[28].mxu0 %vm26_vm1, %v23567_v30  ;;  %v18026_v30 = vld [vmem:[#allocation2 + $0x2f1] sm:$0xff] }
 0x18d   :  { %13991 = vmatprep.mubr.msk.f32.mxu0 %vm26_vm1, %v299_v29  ;;  %v18020_v29 = vld [vmem:[#allocation2 + $0x2e9] sm:$0xff] }
 0x190   :  { %13992 = vmatmul.mubr.msk.f32.gmra.mrb[30].mxu0 %vm26_vm1, %v300_v31  ;;  %v18028_v31 = vld [vmem:[#allocation2 + $0x301] sm:$0xff] }
 0x191   :  { %13994 = vmatprep.mubr.msk.f32.mxu0 %vm26_vm1, %v17405_v40  ;;  %v17904_v40 = vld [vmem:[#allocation2 + $0x141] sm:$0xff] }
 0x194   :  { %13995 = vmatmul.mubr.msk.f32.gmra.mrb[32].mxu0 %vm26_vm1, %v17411_v38  ;;  %v17896_v38 = vld [vmem:[#allocation2 + $0x129] sm:$0xff] }
 0x195   :  { %13997 = vmatprep.mubr.msk.f32.mxu0 %vm26_vm1, %v17413_v37  ;;  %v17890_v37 = vld [vmem:[#allocation2 + $0x121] sm:$0xff] }
 0x198   :  { %13998 = vmatmul.mubr.msk.f32.gmra.mrb[34].mxu0 %vm26_vm1, %v17419_v36  ;;  %v17888_v36 = vld [vmem:[#allocation2 + $0x111] sm:$0xff] }
 0x199   :  { %14000 = vmatprep.mubr.msk.f32.mxu0 %vm26_vm1, %v17421_v34  ;;  %v17880_v34 = vld [vmem:[#allocation2 + $0xf9] sm:$0xff] }
 0x19c   :  { %14001 = vmatmul.mubr.msk.f32.gmra.mrb[36].mxu0 %vm26_vm1, %v17427_v27  ;;  %v17866_v27 = vld [vmem:[#allocation2 + $0xd9] sm:$0xff] }
 0x19d   :  { %14003 = vmatprep.mubr.msk.f32.mxu0 %vm26_vm1, %v17429_v26  ;;  %v17864_v26 = vld [vmem:[#allocation2 + $0xc9] sm:$0xff] }
 0x1a0   :  { %14004 = vmatmul.mubr.msk.f32.gmra.mrb[38].mxu0 %vm26_vm1, %v17435_v24  ;;  %v17858_v24 = vld [vmem:[#allocation2 + $0xc1] sm:$0xff] }
 0x1a1   :  { %14006 = vmatprep.mubr.msk.f32.mxu0 %vm26_vm1, %v17437_v23  ;;  %v17856_v23 = vld [vmem:[#allocation2 + $0xb1] sm:$0xff] }
 0x1a4   :  { %14007 = vmatmul.mubr.msk.f32.gmra.mrb[40].mxu0 %vm26_vm1, %v17443_v22  ;;  %v17850_v22 = vld [vmem:[#allocation2 + $0xa9] sm:$0xff] }
 0x1a5   :  { %14009 = vmatprep.mubr.msk.f32.mxu0 %vm26_vm1, %v17445_v21  ;;  %v17848_v21 = vld [vmem:[#allocation2 + $0x99] sm:$0xff] }
 0x1a8   :  { %14010 = vmatmul.mubr.msk.f32.gmra.mrb[42].mxu0 %vm26_vm1, %v17451_v20  ;;  %v17842_v20 = vld [vmem:[#allocation2 + $0x91] sm:$0xff] }
 0x1a9   :  { %14012 = vmatprep.mubr.msk.f32.mxu0 %vm26_vm1, %v17453_v19  ;;  %v17840_v19 = vld [vmem:[#allocation2 + $0x81] sm:$0xff] }
 0x1ac   :  { %14013 = vmatmul.mubr.msk.f32.gmra.mrb[44].mxu0 %vm26_vm1, %v17459_v18  ;;  %v17834_v18 = vld [vmem:[#allocation2 + $0x79] sm:$0xff] }
 0x1ad   :  { %14015 = vmatprep.mubr.msk.f32.mxu0 %vm26_vm1, %v17461_v17  ;;  %v17832_v17 = vld [vmem:[#allocation2 + $0x69] sm:$0xff] }
 0x1b0   :  { %14016 = vmatmul.mubr.msk.f32.gmra.mrb[46].mxu0 %vm26_vm1, %v17467_v16  ;;  %v17826_v16 = vld [vmem:[#allocation2 + $0x61] sm:$0xff] }
 0x1b1   :  { %14018 = vmatprep.mubr.msk.f32.mxu0 %vm26_vm1, %v17469_v15  ;;  %v17824_v15 = vld [vmem:[#allocation2 + $0x51] sm:$0xff] }
 0x1b4   :  { %14019 = vmatmul.mubr.msk.f32.gmra.mrb[48].mxu0 %vm26_vm1, %v17475_v14  ;;  %v17818_v14 = vld [vmem:[#allocation2 + $0x49] sm:$0xff] }
 0x1b5   :  { %14021 = vmatprep.mubr.msk.f32.mxu0 %vm26_vm1, %v17477_v13  ;;  %v17816_v13 = vld [vmem:[#allocation2 + $0x39] sm:$0xff] }
 0x1b8   :  { %14022 = vmatmul.mubr.msk.f32.gmra.mrb[50].mxu0 %vm26_vm1, %v17483_v12  ;;  %v17808_v12 = vld [vmem:[#allocation2 + $0x31] sm:$0xff] }
 0x1b9   :  { %14024 = vmatprep.mubr.msk.f32.mxu0 %vm26_vm1, %v17485_v11  ;;  %v17794_v11 = vld [vmem:[#allocation2 + $0x19] sm:$0xff] }
 0x1bc   :  { %14025 = vmatmul.mubr.msk.f32.gmra.mrb[52].mxu0 %vm26_vm1, %v17491_v10  ;;  %v335_v10 = vld [vmem:[#allocation2 + $0x348] sm:$0xff] }
 0x1bd   :  { %14027 = vmatprep.mubr.msk.f32.mxu0 %vm26_vm1, %v17493_v9  ;;  %v1788_v9 = vld [vmem:[#allocation2 + $0x9] sm:$0xff] }
 0x1c0   :  { %14028 = vmatmul.mubr.msk.f32.gmra.mrb[54].mxu0 %vm26_vm1, %v17499_v8  ;;  %v336_v8 = vld [vmem:[#allocation2 + $0x350] sm:$0xff] }
 0x1c1   :  { %14030 = vmatprep.mubr.msk.f32.mxu0 %vm26_vm1, %v17501_v7  ;;  %v1787_v7 = vld [vmem:[#allocation2 + $0x1] sm:$0xff] }
 0x1c4   :  { %14031 = vmatmul.mubr.msk.f32.gmra.mrb[56].mxu0 %vm26_vm1, %v23564_v28  ;;  %v18004_v28 = vld [vmem:[#allocation2 + $0x2b9] sm:$0xff] }
 0x1c5   :  { %14033 = vmatprep.mubr.msk.f32.mxu0 %vm26_vm1, %v23565_v41  ;;  %v18010_v41 = vld [vmem:[#allocation2 + $0x2c1] sm:$0xff] }
 0x1c8   :  { %14034 = vmatmul.mubr.msk.f32.gmra.mrb[58].mxu0 %vm26_vm1, %v17515_v4  ;;  %v17799_v4 = vld [vmem:[%s23306_s1 + $0x1c] sm:$0xf] }
 0x1c9   :  { %14036 = vmatprep.mubr.msk.f32.mxu0 %vm26_vm1, %v17517_v2  ;;  %v17806_v2 = vld [vmem:[#allocation2 + $0x21] sm:$0xff] }
 0x1cc   :  { %14037 = vmatmul.mubr.msk.f32.gmra.mrb[60].mxu0 %vm26_vm1, %v17523_v43  ;;  %v17906_v43 = vld [vmem:[#allocation2 + $0x151] sm:$0xff] }
 0x1cd   :  { %14039 = vmatprep.mubr.msk.f32.mxu0 %vm26_vm1, %v335_v10  ;;  %v18034_v10 = vld [vmem:[#allocation2 + $0x309] sm:$0xff] }
 0x1d0   :  { %14040 = vmatmul.mubr.msk.f32.gmra.mrb[62].mxu0 %vm26_vm1, %v336_v8  ;;  %v18036_v8 = vld [vmem:[#allocation2 + $0x319] sm:$0xff] }
 0x1d1   :  { %14044 = vmatprep.mubr.msk.f32.mxu0 %vm26_vm1, %v1787_v7  ;;  %v18042_v7 = vld [vmem:[#allocation2 + $0x321] sm:$0xff] }
 0x1d4   :  { %14045 = vmatmul.mubr.msk.f32.vlgmr.msra.gmra.mrb[0].mxu0 %vm26_vm1, %v1788_v9  ;;  %v18051_v9 = vld [vmem:[%s23306_s1 + $0x8] sm:$0xf] }
 0x1d5   :  { %14141 = vmatpush3.msk.msra.mxu0 %vm23441_vm0, %v17665_v42  ;;  %14047 = vmatprep.mubr.msk.f32.mxu0 %vm26_vm1, %v17794_v11  ;;  %v18012_v42 = vld [vmem:[#allocation2 + $0x2d1] sm:$0xff] }
 0x1d6   :  { %14238 = vmatprep.subr.msk.mxu0 %vm23441_vm0, %v17799_v4 }
 0x1d8   :  { %14048 = vmatmul.mubr.msk.f32.gmra.mrb[2].mxu0 %vm26_vm1, %v17806_v2 }
 0x1d9   :  { %14050 = vmatprep.mubr.msk.f32.mxu0 %vm26_vm1, %v17808_v12 }
 0x1dc   :  { %14051 = vmatmul.mubr.msk.f32.gmra.mrb[4].mxu0 %vm26_vm1, %v17816_v13 }
 0x1dd   :  { %14053 = vmatprep.mubr.msk.f32.mxu0 %vm26_vm1, %v17818_v14 }
 0x1e0   :  { %14054 = vmatmul.mubr.msk.f32.gmra.mrb[6].mxu0 %vm26_vm1, %v17824_v15 }
 0x1e1   :  { %14056 = vmatprep.mubr.msk.f32.mxu0 %vm26_vm1, %v17826_v16 }
 0x1e4   :  { %14057 = vmatmul.mubr.msk.f32.gmra.mrb[8].mxu0 %vm26_vm1, %v17832_v17 }
 0x1e5   :  { %14059 = vmatprep.mubr.msk.f32.mxu0 %vm26_vm1, %v17834_v18 }
 0x1e8   :  { %14060 = vmatmul.mubr.msk.f32.gmra.mrb[10].mxu0 %vm26_vm1, %v17840_v19 }
 0x1e9   :  { %14062 = vmatprep.mubr.msk.f32.mxu0 %vm26_vm1, %v17842_v20 }
 0x1ec   :  { %14063 = vmatmul.mubr.msk.f32.gmra.mrb[12].mxu0 %vm26_vm1, %v17848_v21 }
 0x1ed   :  { %14065 = vmatprep.mubr.msk.f32.mxu0 %vm26_vm1, %v17850_v22 }
 0x1f0   :  { %14066 = vmatmul.mubr.msk.f32.gmra.mrb[14].mxu0 %vm26_vm1, %v17856_v23 }
 0x1f1   :  { %14068 = vmatprep.mubr.msk.f32.mxu0 %vm26_vm1, %v17858_v24 }
 0x1f4   :  { %14069 = vmatmul.mubr.msk.f32.gmra.mrb[16].mxu0 %vm26_vm1, %v17864_v26 }
 0x1f5   :  { %14071 = vmatprep.mubr.msk.f32.mxu0 %vm26_vm1, %v17866_v27 }
 0x1f8   :  { %14072 = vmatmul.mubr.msk.f32.gmra.mrb[18].mxu0 %vm26_vm1, %v17872_v32 }
 0x1f9   :  { %14074 = vmatprep.mubr.msk.f32.mxu0 %vm26_vm1, %v17874_v33 }
 0x1fc   :  { %14075 = vmatmul.mubr.msk.f32.gmra.mrb[20].mxu0 %vm26_vm1, %v17880_v34 }
 0x1fd   :  { %14077 = vmatprep.mubr.msk.f32.mxu0 %vm26_vm1, %v17882_v35 }
 0x200   :  { %14078 = vmatmul.mubr.msk.f32.gmra.mrb[22].mxu0 %vm26_vm1, %v17888_v36 }
 0x201   :  { %14080 = vmatprep.mubr.msk.f32.mxu0 %vm26_vm1, %v17890_v37 }
 0x204   :  { %14081 = vmatmul.mubr.msk.f32.gmra.mrb[24].mxu0 %vm26_vm1, %v17896_v38 }
 0x205   :  { %14083 = vmatprep.mubr.msk.f32.mxu0 %vm26_vm1, %v17898_v39 }
 0x208   :  { %14084 = vmatmul.mubr.msk.f32.gmra.mrb[26].mxu0 %vm26_vm1, %v17904_v40 }
 0x209   :  { %14086 = vmatprep.mubr.msk.f32.mxu0 %vm26_vm1, %v17906_v43 }
 0x20c   :  { %14087 = vmatmul.mubr.msk.f32.gmra.mrb[28].mxu0 %vm26_vm1, %v17912_v44 }
 0x20d   :  { %14089 = vmatprep.mubr.msk.f32.mxu0 %vm26_vm1, %v17914_v45 }
 0x210   :  { %14090 = vmatmul.mubr.msk.f32.gmra.mrb[30].mxu0 %vm26_vm1, %v17920_v46 }
 0x211   :  { %14092 = vmatprep.mubr.msk.f32.mxu0 %vm26_vm1, %v1823_v47  ;;  %v18187_v47 = vld [vmem:[#allocation2 + $0x339] sm:$0xff] }
 0x214   :  { %14093 = vmatmul.mubr.msk.f32.gmra.mrb[32].mxu0 %vm26_vm1, %v1824_v48  ;;  %v18196_v48 = vld [vmem:[%s23306_s1 + $0x14] sm:$0xf] }
 0x215   :  { %14095 = vmatprep.mubr.msk.f32.mxu0 %vm26_vm1, %v17925_v49 }
 0x218   :  { %14096 = vmatmul.mubr.msk.f32.gmra.mrb[34].mxu0 %vm26_vm1, %v17930_v50 }
 0x219   :  { %14098 = vmatprep.mubr.msk.f32.mxu0 %vm26_vm1, %v17932_v51 }
 0x21c   :  { %14099 = vmatmul.mubr.msk.f32.gmra.mrb[36].mxu0 %vm26_vm1, %v17938_v52 }
 0x21d   :  { %14101 = vmatprep.mubr.msk.f32.mxu0 %vm26_vm1, %v17940_v53 }
 0x220   :  { %14102 = vmatmul.mubr.msk.f32.gmra.mrb[38].mxu0 %vm26_vm1, %v17946_v54 }
 0x221   :  { %14104 = vmatprep.mubr.msk.f32.mxu0 %vm26_vm1, %v17948_v55 }
 0x224   :  { %14105 = vmatmul.mubr.msk.f32.gmra.mrb[40].mxu0 %vm26_vm1, %v17954_v56 }
 0x225   :  { %14107 = vmatprep.mubr.msk.f32.mxu0 %vm26_vm1, %v17956_v57 }
 0x228   :  { %14108 = vmatmul.mubr.msk.f32.gmra.mrb[42].mxu0 %vm26_vm1, %v17962_v58 }
 0x229   :  { %14110 = vmatprep.mubr.msk.f32.mxu0 %vm26_vm1, %v17964_v59 }
 0x22c   :  { %14111 = vmatmul.mubr.msk.f32.gmra.mrb[44].mxu0 %vm26_vm1, %v17970_v60 }
 0x22d   :  { %14113 = vmatprep.mubr.msk.f32.mxu0 %vm26_vm1, %v17972_v61 }
 0x230   :  { %14114 = vmatmul.mubr.msk.f32.gmra.mrb[46].mxu0 %vm26_vm1, %v17978_v62 }
 0x231   :  { %14116 = vmatprep.mubr.msk.f32.mxu0 %vm26_vm1, %v17980_v63 }
 0x234   :  { %14117 = vmatmul.mubr.msk.f32.gmra.mrb[48].mxu0 %vm26_vm1, %v17986_v0 }
 0x235   :  { %14119 = vmatprep.mubr.msk.f32.mxu0 %vm26_vm1, %v17988_v1 }
 0x238   :  { %14120 = vmatmul.mubr.msk.f32.gmra.mrb[50].mxu0 %vm26_vm1, %v17994_v3 }
 0x239   :  { %14122 = vmatprep.mubr.msk.f32.mxu0 %vm26_vm1, %v17996_v6 }
 0x23c   :  { %14123 = vmatmul.mubr.msk.f32.gmra.mrb[52].mxu0 %vm26_vm1, %v18002_v25 }
 0x23d   :  { %14125 = vmatprep.mubr.msk.f32.mxu0 %vm26_vm1, %v18004_v28 }
 0x240   :  { %14126 = vmatmul.mubr.msk.f32.gmra.mrb[54].mxu0 %vm26_vm1, %v18010_v41 }
 0x241   :  { %14128 = vmatprep.mubr.msk.f32.mxu0 %vm26_vm1, %v18012_v42 }
 0x244   :  { %14129 = vmatmul.mubr.msk.f32.gmra.mrb[56].mxu0 %vm26_vm1, %v18018_v5 }
 0x245   :  { %14131 = vmatprep.mubr.msk.f32.mxu0 %vm26_vm1, %v18020_v29 }
 0x248   :  { %14132 = vmatmul.mubr.msk.f32.gmra.mrb[58].mxu0 %vm26_vm1, %v18026_v30 }
 0x249   :  { %14134 = vmatprep.mubr.msk.f32.mxu0 %vm26_vm1, %v18028_v31 }
 0x24c   :  { %14135 = vmatmul.mubr.msk.f32.gmra.mrb[60].mxu0 %vm26_vm1, %v18034_v10 }
 0x24d   :  { %14137 = vmatprep.mubr.msk.f32.mxu0 %vm26_vm1, %v18036_v8 }
 0x250   :  { %14138 = vmatmul.mubr.msk.f32.gmra.mrb[62].mxu0 %vm26_vm1, %v18042_v7 }
 0x251   :  { %14142 = vmatprep.mubr.msk.f32.mxu0 %vm26_vm1, %v17794_v11  ;;  %v18113_v11 = vld [vmem:[#allocation2 + $0x181] sm:$0xff] }
 0x254   :  { %14143 = vmatmul.mubr.msk.f32.vlgmr.msra.gmra.mrb[0].mxu0 %vm26_vm1, %v17806_v2  ;;  %v18181_v2 = vld [vmem:[#allocation2 + $0x331] sm:$0xff] }
 0x255   :  { %14239 = vmatpush3.msk.msra.mxu0 %vm23441_vm0, %v17799_v4  ;;  %14145 = vmatprep.mubr.msk.f32.mxu0 %vm26_vm1, %v17808_v12  ;;  %v18119_v4 = vld [vmem:[#allocation2 + $0x189] sm:$0xff] }
 0x256   :  { %14336 = vmatprep.subr.msk.mxu0 %vm23441_vm0, %v18051_v9 }
 0x258   :  { %14146 = vmatmul.mubr.msk.f32.gmra.mrb[2].mxu0 %vm26_vm1, %v17816_v13 }
 0x259   :  { %14148 = vmatprep.mubr.msk.f32.mxu0 %vm26_vm1, %v17818_v14 }
 0x25c   :  { %14149 = vmatmul.mubr.msk.f32.gmra.mrb[4].mxu0 %vm26_vm1, %v17824_v15 }
 0x25d   :  { %14151 = vmatprep.mubr.msk.f32.mxu0 %vm26_vm1, %v17826_v16 }
 0x260   :  { %14152 = vmatmul.mubr.msk.f32.gmra.mrb[6].mxu0 %vm26_vm1, %v17832_v17 }
 0x261   :  { %14154 = vmatprep.mubr.msk.f32.mxu0 %vm26_vm1, %v17834_v18 }
 0x264   :  { %14155 = vmatmul.mubr.msk.f32.gmra.mrb[8].mxu0 %vm26_vm1, %v17840_v19 }
 0x265   :  { %14157 = vmatprep.mubr.msk.f32.mxu0 %vm26_vm1, %v17842_v20 }
 0x268   :  { %14158 = vmatmul.mubr.msk.f32.gmra.mrb[10].mxu0 %vm26_vm1, %v17848_v21 }
 0x269   :  { %14160 = vmatprep.mubr.msk.f32.mxu0 %vm26_vm1, %v17850_v22 }
 0x26c   :  { %14161 = vmatmul.mubr.msk.f32.gmra.mrb[12].mxu0 %vm26_vm1, %v17856_v23 }
 0x26d   :  { %14163 = vmatprep.mubr.msk.f32.mxu0 %vm26_vm1, %v17858_v24 }
 0x270   :  { %14164 = vmatmul.mubr.msk.f32.gmra.mrb[14].mxu0 %vm26_vm1, %v17864_v26 }
 0x271   :  { %14166 = vmatprep.mubr.msk.f32.mxu0 %vm26_vm1, %v17866_v27 }
 0x274   :  { %14167 = vmatmul.mubr.msk.f32.gmra.mrb[16].mxu0 %vm26_vm1, %v17872_v32 }
 0x275   :  { %14169 = vmatprep.mubr.msk.f32.mxu0 %vm26_vm1, %v17874_v33 }
 0x278   :  { %14170 = vmatmul.mubr.msk.f32.gmra.mrb[18].mxu0 %vm26_vm1, %v17880_v34 }
 0x279   :  { %14172 = vmatprep.mubr.msk.f32.mxu0 %vm26_vm1, %v17882_v35 }
 0x27c   :  { %14173 = vmatmul.mubr.msk.f32.gmra.mrb[20].mxu0 %vm26_vm1, %v17888_v36 }
 0x27d   :  { %14175 = vmatprep.mubr.msk.f32.mxu0 %vm26_vm1, %v17890_v37 }
 0x280   :  { %14176 = vmatmul.mubr.msk.f32.gmra.mrb[22].mxu0 %vm26_vm1, %v17896_v38 }
 0x281   :  { %14178 = vmatprep.mubr.msk.f32.mxu0 %vm26_vm1, %v17898_v39 }
 0x284   :  { %14179 = vmatmul.mubr.msk.f32.gmra.mrb[24].mxu0 %vm26_vm1, %v17904_v40 }
 0x285   :  { %14181 = vmatprep.mubr.msk.f32.mxu0 %vm26_vm1, %v17906_v43 }
 0x288   :  { %14182 = vmatmul.mubr.msk.f32.gmra.mrb[26].mxu0 %vm26_vm1, %v17912_v44 }
 0x289   :  { %14184 = vmatprep.mubr.msk.f32.mxu0 %vm26_vm1, %v17914_v45 }
 0x28c   :  { %14185 = vmatmul.mubr.msk.f32.gmra.mrb[28].mxu0 %vm26_vm1, %v17920_v46 }
 0x28d   :  { %14187 = vmatprep.mubr.msk.f32.mxu0 %vm26_vm1, %v18113_v11 }
 0x290   :  { %14188 = vmatmul.mubr.msk.f32.gmra.mrb[30].mxu0 %vm26_vm1, %v18119_v4 }
 0x291   :  { %14190 = vmatprep.mubr.msk.f32.mxu0 %vm26_vm1, %v17925_v49  ;;  %v18419_v49 = vld [vmem:[#allocation2 + $0x112] sm:$0xff] }
 0x294   :  { %14191 = vmatmul.mubr.msk.f32.gmra.mrb[32].mxu0 %vm26_vm1, %v17930_v50  ;;  %v18421_v50 = vld [vmem:[#allocation2 + $0x122] sm:$0xff] }
 0x295   :  { %14193 = vmatprep.mubr.msk.f32.mxu0 %vm26_vm1, %v17932_v51 }
 0x298   :  { %14194 = vmatmul.mubr.msk.f32.gmra.mrb[34].mxu0 %vm26_vm1, %v17938_v52 }
 0x299   :  { %14196 = vmatprep.mubr.msk.f32.mxu0 %vm26_vm1, %v17940_v53 }
 0x29c   :  { %14197 = vmatmul.mubr.msk.f32.gmra.mrb[36].mxu0 %vm26_vm1, %v17946_v54 }
 0x29d   :  { %14199 = vmatprep.mubr.msk.f32.mxu0 %vm26_vm1, %v17948_v55 }
 0x2a0   :  { %14200 = vmatmul.mubr.msk.f32.gmra.mrb[38].mxu0 %vm26_vm1, %v17954_v56 }
 0x2a1   :  { %14202 = vmatprep.mubr.msk.f32.mxu0 %vm26_vm1, %v17956_v57 }
 0x2a4   :  { %14203 = vmatmul.mubr.msk.f32.gmra.mrb[40].mxu0 %vm26_vm1, %v17962_v58 }
 0x2a5   :  { %14205 = vmatprep.mubr.msk.f32.mxu0 %vm26_vm1, %v17964_v59 }
 0x2a8   :  { %14206 = vmatmul.mubr.msk.f32.gmra.mrb[42].mxu0 %vm26_vm1, %v17970_v60 }
 0x2a9   :  { %14208 = vmatprep.mubr.msk.f32.mxu0 %vm26_vm1, %v17972_v61 }
 0x2ac   :  { %14209 = vmatmul.mubr.msk.f32.gmra.mrb[44].mxu0 %vm26_vm1, %v17978_v62 }
 0x2ad   :  { %14211 = vmatprep.mubr.msk.f32.mxu0 %vm26_vm1, %v17980_v63 }
 0x2b0   :  { %14212 = vmatmul.mubr.msk.f32.gmra.mrb[46].mxu0 %vm26_vm1, %v17986_v0 }
 0x2b1   :  { %14214 = vmatprep.mubr.msk.f32.mxu0 %vm26_vm1, %v17988_v1 }
 0x2b4   :  { %14215 = vmatmul.mubr.msk.f32.gmra.mrb[48].mxu0 %vm26_vm1, %v17994_v3 }
 0x2b5   :  { %14217 = vmatprep.mubr.msk.f32.mxu0 %vm26_vm1, %v17996_v6 }
 0x2b8   :  { %14218 = vmatmul.mubr.msk.f32.gmra.mrb[50].mxu0 %vm26_vm1, %v18002_v25 }
 0x2b9   :  { %14220 = vmatprep.mubr.msk.f32.mxu0 %vm26_vm1, %v18004_v28 }
 0x2bc   :  { %14221 = vmatmul.mubr.msk.f32.gmra.mrb[52].mxu0 %vm26_vm1, %v18010_v41 }
 0x2bd   :  { %14223 = vmatprep.mubr.msk.f32.mxu0 %vm26_vm1, %v18012_v42 }
 0x2c0   :  { %14224 = vmatmul.mubr.msk.f32.gmra.mrb[54].mxu0 %vm26_vm1, %v18018_v5 }
 0x2c1   :  { %14226 = vmatprep.mubr.msk.f32.mxu0 %vm26_vm1, %v18020_v29 }
 0x2c4   :  { %14227 = vmatmul.mubr.msk.f32.gmra.mrb[56].mxu0 %vm26_vm1, %v18026_v30 }
 0x2c5   :  { %14229 = vmatprep.mubr.msk.f32.mxu0 %vm26_vm1, %v18028_v31 }
 0x2c8   :  { %14230 = vmatmul.mubr.msk.f32.gmra.mrb[58].mxu0 %vm26_vm1, %v18034_v10 }
 0x2c9   :  { %14232 = vmatprep.mubr.msk.f32.mxu0 %vm26_vm1, %v18036_v8 }
 0x2cc   :  { %14233 = vmatmul.mubr.msk.f32.gmra.mrb[60].mxu0 %vm26_vm1, %v18042_v7 }
 0x2cd   :  { %14235 = vmatprep.mubr.msk.f32.mxu0 %vm26_vm1, %v18181_v2 }
 0x2d0   :  { %14236 = vmatmul.mubr.msk.f32.gmra.mrb[62].mxu0 %vm26_vm1, %v18187_v47 }
 0x2d1   :  { %14240 = vmatprep.mubr.msk.f32.mxu0 %vm26_vm1, %v17808_v12  ;;  %v1821_v12 = vld [vmem:[#allocation2 + $0x199] sm:$0xff] }
 0x2d4   :  { %14241 = vmatmul.mubr.msk.f32.vlgmr.msra.gmra.mrb[0].mxu0 %vm26_vm1, %v17816_v13  ;;  %v1822_v13 = vld [vmem:[#allocation2 + $0x1a1] sm:$0xff] }
 0x2d5   :  { %14337 = vmatpush3.msk.msra.mxu0 %vm23441_vm0, %v18051_v9  ;;  %14243 = vmatprep.mubr.msk.f32.mxu0 %vm26_vm1, %v17818_v14  ;;  %v1857_v14 = vld [vmem:[#allocation2 + $0x349] sm:$0xff] }
 0x2d6   :  { %14434 = vmatprep.subr.msk.mxu0 %vm23441_vm0, %v18196_v48  ;;  %v18533_v9 = vld [vmem:[#allocation2 + $0x2aa] sm:$0xff] }
 0x2d8   :  { %14244 = vmatmul.mubr.msk.f32.gmra.mrb[2].mxu0 %vm26_vm1, %v17824_v15  ;;  %v1858_v15 = vld [vmem:[#allocation2 + $0x351] sm:$0xff] }
 0x2d9   :  { %14246 = vmatprep.mubr.msk.f32.mxu0 %vm26_vm1, %v17826_v16  ;;  %v3437_v16 = vld [vmem:[#allocation2 + $0x2] sm:$0xff] }
 0x2dc   :  { %14247 = vmatmul.mubr.msk.f32.gmra.mrb[4].mxu0 %vm26_vm1, %v17832_v17  ;;  %v3438_v17 = vld [vmem:[#allocation2 + $0xa] sm:$0xff] }
 0x2dd   :  { %14249 = vmatprep.mubr.msk.f32.mxu0 %vm26_vm1, %v17834_v18  ;;  %v18325_v18 = vld [vmem:[#allocation2 + $0x1a] sm:$0xff] }
 0x2e0   :  { %14250 = vmatmul.mubr.msk.f32.gmra.mrb[6].mxu0 %vm26_vm1, %v17840_v19  ;;  %v18330_v19 = vld [vmem:[%s23306_s1 + $0x20] sm:$0xf] }
 0x2e1   :  { %14252 = vmatprep.mubr.msk.f32.mxu0 %vm26_vm1, %v17842_v20  ;;  %v18337_v20 = vld [vmem:[#allocation2 + $0x22] sm:$0xff] }
 0x2e4   :  { %14253 = vmatmul.mubr.msk.f32.gmra.mrb[8].mxu0 %vm26_vm1, %v17848_v21  ;;  %v18339_v21 = vld [vmem:[#allocation2 + $0x32] sm:$0xff] }
 0x2e5   :  { %14255 = vmatprep.mubr.msk.f32.mxu0 %vm26_vm1, %v17850_v22  ;;  %v18347_v22 = vld [vmem:[#allocation2 + $0x3a] sm:$0xff] }
 0x2e8   :  { %14256 = vmatmul.mubr.msk.f32.gmra.mrb[10].mxu0 %vm26_vm1, %v17856_v23  ;;  %v18349_v23 = vld [vmem:[#allocation2 + $0x4a] sm:$0xff] }
 0x2e9   :  { %14258 = vmatprep.mubr.msk.f32.mxu0 %vm26_vm1, %v17858_v24  ;;  %v18355_v24 = vld [vmem:[#allocation2 + $0x52] sm:$0xff] }
 0x2ec   :  { %14259 = vmatmul.mubr.msk.f32.gmra.mrb[12].mxu0 %vm26_vm1, %v17864_v26  ;;  %v18357_v26 = vld [vmem:[#allocation2 + $0x62] sm:$0xff] }
 0x2ed   :  { %14261 = vmatprep.mubr.msk.f32.mxu0 %vm26_vm1, %v17866_v27  ;;  %v18363_v27 = vld [vmem:[#allocation2 + $0x6a] sm:$0xff] }
 0x2f0   :  { %14262 = vmatmul.mubr.msk.f32.gmra.mrb[14].mxu0 %vm26_vm1, %v17872_v32  ;;  %v18365_v32 = vld [vmem:[#allocation2 + $0x7a] sm:$0xff] }
 0x2f1   :  { %14264 = vmatprep.mubr.msk.f32.mxu0 %vm26_vm1, %v17874_v33  ;;  %v18371_v33 = vld [vmem:[#allocation2 + $0x82] sm:$0xff] }
 0x2f4   :  { %14265 = vmatmul.mubr.msk.f32.gmra.mrb[16].mxu0 %vm26_vm1, %v17880_v34  ;;  %v18373_v34 = vld [vmem:[#allocation2 + $0x92] sm:$0xff] }
 0x2f5   :  { %14267 = vmatprep.mubr.msk.f32.mxu0 %vm26_vm1, %v17882_v35  ;;  %v18379_v35 = vld [vmem:[#allocation2 + $0x9a] sm:$0xff] }
 0x2f8   :  { %14268 = vmatmul.mubr.msk.f32.gmra.mrb[18].mxu0 %vm26_vm1, %v17888_v36  ;;  %v18381_v36 = vld [vmem:[#allocation2 + $0xaa] sm:$0xff] }
 0x2f9   :  { %14270 = vmatprep.mubr.msk.f32.mxu0 %vm26_vm1, %v17890_v37  ;;  %v18387_v37 = vld [vmem:[#allocation2 + $0xb2] sm:$0xff] }
 0x2fc   :  { %14271 = vmatmul.mubr.msk.f32.gmra.mrb[20].mxu0 %vm26_vm1, %v17896_v38  ;;  %v18389_v38 = vld [vmem:[#allocation2 + $0xc2] sm:$0xff] }
 0x2fd   :  { %14273 = vmatprep.mubr.msk.f32.mxu0 %vm26_vm1, %v17898_v39  ;;  %v18395_v39 = vld [vmem:[#allocation2 + $0xca] sm:$0xff] }
 0x300   :  { %14274 = vmatmul.mubr.msk.f32.gmra.mrb[22].mxu0 %vm26_vm1, %v17904_v40  ;;  %v18397_v40 = vld [vmem:[#allocation2 + $0xda] sm:$0xff] }
 0x301   :  { %14276 = vmatprep.mubr.msk.f32.mxu0 %vm26_vm1, %v17906_v43  ;;  %v18403_v43 = vld [vmem:[#allocation2 + $0xe2] sm:$0xff] }
 0x304   :  { %14277 = vmatmul.mubr.msk.f32.gmra.mrb[24].mxu0 %vm26_vm1, %v17912_v44  ;;  %v18405_v44 = vld [vmem:[#allocation2 + $0xf2] sm:$0xff] }
 0x305   :  { %14279 = vmatprep.mubr.msk.f32.mxu0 %vm26_vm1, %v17914_v45  ;;  %v18411_v45 = vld [vmem:[#allocation2 + $0xfa] sm:$0xff] }
 0x308   :  { %14280 = vmatmul.mubr.msk.f32.gmra.mrb[26].mxu0 %vm26_vm1, %v17920_v46  ;;  %v18413_v46 = vld [vmem:[#allocation2 + $0x10a] sm:$0xff] }
 0x309   :  { %14282 = vmatprep.mubr.msk.f32.mxu0 %vm26_vm1, %v18113_v11  ;;  %v18535_v11 = vld [vmem:[#allocation2 + $0x2ba] sm:$0xff] }
 0x30c   :  { %14283 = vmatmul.mubr.msk.f32.gmra.mrb[28].mxu0 %vm26_vm1, %v18119_v4  ;;  %v18541_v4 = vld [vmem:[#allocation2 + $0x2c2] sm:$0xff] }
 0x30d   :  { %14285 = vmatprep.mubr.msk.f32.mxu0 %vm26_vm1, %v1821_v12  ;;  %v18557_v12 = vld [vmem:[#allocation2 + $0x2f2] sm:$0xff] }
 0x310   :  { %14286 = vmatmul.mubr.msk.f32.gmra.mrb[30].mxu0 %vm26_vm1, %v1822_v13  ;;  %v18559_v13 = vld [vmem:[#allocation2 + $0x302] sm:$0xff] }
 0x311   :  { %14288 = vmatprep.mubr.msk.f32.mxu0 %vm26_vm1, %v17932_v51  ;;  %v18427_v51 = vld [vmem:[#allocation2 + $0x12a] sm:$0xff] }
 0x314   :  { %14289 = vmatmul.mubr.msk.f32.gmra.mrb[32].mxu0 %vm26_vm1, %v17938_v52  ;;  %v18429_v52 = vld [vmem:[#allocation2 + $0x13a] sm:$0xff] }
 0x315   :  { %14291 = vmatprep.mubr.msk.f32.mxu0 %vm26_vm1, %v17940_v53  ;;  %v18435_v53 = vld [vmem:[#allocation2 + $0x142] sm:$0xff] }
 0x318   :  { %14292 = vmatmul.mubr.msk.f32.gmra.mrb[34].mxu0 %vm26_vm1, %v17946_v54  ;;  %v18437_v54 = vld [vmem:[#allocation2 + $0x152] sm:$0xff] }
 0x319   :  { %14294 = vmatprep.mubr.msk.f32.mxu0 %vm26_vm1, %v17948_v55  ;;  %v18443_v55 = vld [vmem:[#allocation2 + $0x15a] sm:$0xff] }
 0x31c   :  { %14295 = vmatmul.mubr.msk.f32.gmra.mrb[36].mxu0 %vm26_vm1, %v17954_v56  ;;  %v18445_v56 = vld [vmem:[#allocation2 + $0x16a] sm:$0xff] }
 0x31d   :  { %14297 = vmatprep.mubr.msk.f32.mxu0 %vm26_vm1, %v17956_v57  ;;  %v18451_v57 = vld [vmem:[#allocation2 + $0x172] sm:$0xff] }
 0x320   :  { %14298 = vmatmul.mubr.msk.f32.gmra.mrb[38].mxu0 %vm26_vm1, %v17962_v58  ;;  %v3473_v58 = vld [vmem:[#allocation2 + $0x1b2] sm:$0xff] }
 0x321   :  { %14300 = vmatprep.mubr.msk.f32.mxu0 %vm26_vm1, %v17964_v59  ;;  %v3474_v59 = vld [vmem:[#allocation2 + $0x1ba] sm:$0xff] }
 0x324   :  { %14301 = vmatmul.mubr.msk.f32.gmra.mrb[40].mxu0 %vm26_vm1, %v17970_v60  ;;  %v18456_v60 = vld [vmem:[#allocation2 + $0x1ca] sm:$0xff] }
 0x325   :  { %14303 = vmatprep.mubr.msk.f32.mxu0 %vm26_vm1, %v17972_v61  ;;  %v18461_v61 = vld [vmem:[#allocation2 + $0x1d2] sm:$0xff] }
 0x328   :  { %14304 = vmatmul.mubr.msk.f32.gmra.mrb[42].mxu0 %vm26_vm1, %v17978_v62  ;;  %v18463_v62 = vld [vmem:[#allocation2 + $0x1e2] sm:$0xff] }
 0x329   :  { %14306 = vmatprep.mubr.msk.f32.mxu0 %vm26_vm1, %v17980_v63  ;;  %v18469_v63 = vld [vmem:[#allocation2 + $0x1ea] sm:$0xff] }
 0x32c   :  { %14307 = vmatmul.mubr.msk.f32.gmra.mrb[44].mxu0 %vm26_vm1, %v17986_v0  ;;  %v18471_v0 = vld [vmem:[#allocation2 + $0x1fa] sm:$0xff] }
 0x32d   :  { %14309 = vmatprep.mubr.msk.f32.mxu0 %vm26_vm1, %v17988_v1  ;;  %v18477_v1 = vld [vmem:[#allocation2 + $0x202] sm:$0xff] }
 0x330   :  { %14310 = vmatmul.mubr.msk.f32.gmra.mrb[46].mxu0 %vm26_vm1, %v17994_v3  ;;  %v18479_v3 = vld [vmem:[#allocation2 + $0x212] sm:$0xff] }
 0x331   :  { %14312 = vmatprep.mubr.msk.f32.mxu0 %vm26_vm1, %v17996_v6  ;;  %v18485_v6 = vld [vmem:[#allocation2 + $0x21a] sm:$0xff] }
 0x334   :  { %14313 = vmatmul.mubr.msk.f32.gmra.mrb[48].mxu0 %vm26_vm1, %v18002_v25  ;;  %v18487_v25 = vld [vmem:[#allocation2 + $0x22a] sm:$0xff] }
 0x335   :  { %14315 = vmatprep.mubr.msk.f32.mxu0 %vm26_vm1, %v18004_v28  ;;  %v18493_v28 = vld [vmem:[#allocation2 + $0x232] sm:$0xff] }
 0x338   :  { %14316 = vmatmul.mubr.msk.f32.gmra.mrb[50].mxu0 %vm26_vm1, %v18010_v41  ;;  %v18495_v41 = vld [vmem:[#allocation2 + $0x242] sm:$0xff] }
 0x339   :  { %14318 = vmatprep.mubr.msk.f32.mxu0 %vm26_vm1, %v18012_v42  ;;  %v18501_v42 = vld [vmem:[#allocation2 + $0x24a] sm:$0xff] }
 0x33c   :  { %14319 = vmatmul.mubr.msk.f32.gmra.mrb[52].mxu0 %vm26_vm1, %v18018_v5  ;;  %v18503_v5 = vld [vmem:[#allocation2 + $0x25a] sm:$0xff] }
 0x33d   :  { %14321 = vmatprep.mubr.msk.f32.mxu0 %vm26_vm1, %v18020_v29  ;;  %v18509_v29 = vld [vmem:[#allocation2 + $0x262] sm:$0xff] }
 0x340   :  { %14322 = vmatmul.mubr.msk.f32.gmra.mrb[54].mxu0 %vm26_vm1, %v18026_v30  ;;  %v18511_v30 = vld [vmem:[#allocation2 + $0x272] sm:$0xff] }
 0x341   :  { %14324 = vmatprep.mubr.msk.f32.mxu0 %vm26_vm1, %v18028_v31  ;;  %v18517_v31 = vld [vmem:[#allocation2 + $0x27a] sm:$0xff] }
 0x344   :  { %14325 = vmatmul.mubr.msk.f32.gmra.mrb[56].mxu0 %vm26_vm1, %v18034_v10  ;;  %v18519_v10 = vld [vmem:[#allocation2 + $0x28a] sm:$0xff] }
 0x345   :  { %14327 = vmatprep.mubr.msk.f32.mxu0 %vm26_vm1, %v18036_v8  ;;  %v18525_v8 = vld [vmem:[#allocation2 + $0x292] sm:$0xff] }
 0x348   :  { %14328 = vmatmul.mubr.msk.f32.gmra.mrb[58].mxu0 %vm26_vm1, %v18042_v7  ;;  %v18527_v7 = vld [vmem:[#allocation2 + $0x2a2] sm:$0xff] }
 0x349   :  { %14330 = vmatprep.mubr.msk.f32.mxu0 %vm26_vm1, %v18181_v2  ;;  %v18543_v2 = vld [vmem:[#allocation2 + $0x2d2] sm:$0xff] }
 0x34c   :  { %14331 = vmatmul.mubr.msk.f32.gmra.mrb[60].mxu0 %vm26_vm1, %v18187_v47  ;;  %v18549_v47 = vld [vmem:[#allocation2 + $0x2da] sm:$0xff] }
 0x34d   :  { %14333 = vmatprep.mubr.msk.f32.mxu0 %vm26_vm1, %v1857_v14  ;;  %v18565_v14 = vld [vmem:[#allocation2 + $0x30a] sm:$0xff] }
 0x350   :  { %14334 = vmatmul.mubr.msk.f32.gmra.mrb[62].mxu0 %vm26_vm1, %v1858_v15  ;;  %v18567_v15 = vld [vmem:[#allocation2 + $0x31a] sm:$0xff] }
 0x351   :  { %14338 = vmatprep.mubr.msk.f32.mxu0 %vm26_vm1, %v3437_v16  ;;  %v18573_v16 = vld [vmem:[#allocation2 + $0x322] sm:$0xff] }
 0x354   :  { %14339 = vmatmul.mubr.msk.f32.vlgmr.msra.gmra.mrb[0].mxu0 %vm26_vm1, %v3438_v17  ;;  %v18637_v17 = vld [vmem:[#allocation2 + $0x182] sm:$0xff] }
 0x355   :  { %14435 = vmatpush3.msk.msra.mxu0 %vm23441_vm0, %v18196_v48  ;;  %14341 = vmatprep.mubr.msk.f32.mxu0 %vm26_vm1, %v18325_v18  ;;  %v18551_v48 = vld [vmem:[#allocation2 + $0x2ea] sm:$0xff] }
 0x356   :  { %14532 = vmatprep.subr.msk.mxu0 %vm23441_vm0, %v18330_v19 }
 0x358   :  { %14342 = vmatmul.mubr.msk.f32.gmra.mrb[2].mxu0 %vm26_vm1, %v18337_v20 }
 0x359   :  { %14344 = vmatprep.mubr.msk.f32.mxu0 %vm26_vm1, %v18339_v21 }
 0x35c   :  { %14345 = vmatmul.mubr.msk.f32.gmra.mrb[4].mxu0 %vm26_vm1, %v18347_v22 }
 0x35d   :  { %14347 = vmatprep.mubr.msk.f32.mxu0 %vm26_vm1, %v18349_v23 }
 0x360   :  { %14348 = vmatmul.mubr.msk.f32.gmra.mrb[6].mxu0 %vm26_vm1, %v18355_v24 }
 0x361   :  { %14350 = vmatprep.mubr.msk.f32.mxu0 %vm26_vm1, %v18357_v26 }
 0x364   :  { %14351 = vmatmul.mubr.msk.f32.gmra.mrb[8].mxu0 %vm26_vm1, %v18363_v27 }
 0x365   :  { %14353 = vmatprep.mubr.msk.f32.mxu0 %vm26_vm1, %v18365_v32 }
 0x368   :  { %14354 = vmatmul.mubr.msk.f32.gmra.mrb[10].mxu0 %vm26_vm1, %v18371_v33 }
 0x369   :  { %14356 = vmatprep.mubr.msk.f32.mxu0 %vm26_vm1, %v18373_v34 }
 0x36c   :  { %14357 = vmatmul.mubr.msk.f32.gmra.mrb[12].mxu0 %vm26_vm1, %v18379_v35 }
 0x36d   :  { %14359 = vmatprep.mubr.msk.f32.mxu0 %vm26_vm1, %v18381_v36 }
 0x370   :  { %14360 = vmatmul.mubr.msk.f32.gmra.mrb[14].mxu0 %vm26_vm1, %v18387_v37 }
 0x371   :  { %14362 = vmatprep.mubr.msk.f32.mxu0 %vm26_vm1, %v18389_v38 }
 0x374   :  { %14363 = vmatmul.mubr.msk.f32.gmra.mrb[16].mxu0 %vm26_vm1, %v18395_v39 }
 0x375   :  { %14365 = vmatprep.mubr.msk.f32.mxu0 %vm26_vm1, %v18397_v40 }
 0x378   :  { %14366 = vmatmul.mubr.msk.f32.gmra.mrb[18].mxu0 %vm26_vm1, %v18403_v43 }
 0x379   :  { %14368 = vmatprep.mubr.msk.f32.mxu0 %vm26_vm1, %v18405_v44 }
 0x37c   :  { %14369 = vmatmul.mubr.msk.f32.gmra.mrb[20].mxu0 %vm26_vm1, %v18411_v45 }
 0x37d   :  { %14371 = vmatprep.mubr.msk.f32.mxu0 %vm26_vm1, %v18413_v46 }
 0x380   :  { %14372 = vmatmul.mubr.msk.f32.gmra.mrb[22].mxu0 %vm26_vm1, %v18419_v49 }
 0x381   :  { %14374 = vmatprep.mubr.msk.f32.mxu0 %vm26_vm1, %v18421_v50 }
 0x384   :  { %14375 = vmatmul.mubr.msk.f32.gmra.mrb[24].mxu0 %vm26_vm1, %v18427_v51 }
 0x385   :  { %14377 = vmatprep.mubr.msk.f32.mxu0 %vm26_vm1, %v18429_v52 }
 0x388   :  { %14378 = vmatmul.mubr.msk.f32.gmra.mrb[26].mxu0 %vm26_vm1, %v18435_v53 }
 0x389   :  { %14380 = vmatprep.mubr.msk.f32.mxu0 %vm26_vm1, %v18437_v54 }
 0x38c   :  { %14381 = vmatmul.mubr.msk.f32.gmra.mrb[28].mxu0 %vm26_vm1, %v18443_v55 }
 0x38d   :  { %14383 = vmatprep.mubr.msk.f32.mxu0 %vm26_vm1, %v18445_v56 }
 0x390   :  { %14384 = vmatmul.mubr.msk.f32.gmra.mrb[30].mxu0 %vm26_vm1, %v18451_v57 }
 0x391   :  { %14386 = vmatprep.mubr.msk.f32.mxu0 %vm26_vm1, %v3473_v58 }
 0x394   :  { %14387 = vmatmul.mubr.msk.f32.gmra.mrb[32].mxu0 %vm26_vm1, %v3474_v59 }
 0x395   :  { %14389 = vmatprep.mubr.msk.f32.mxu0 %vm26_vm1, %v18456_v60 }
 0x398   :  { %14390 = vmatmul.mubr.msk.f32.gmra.mrb[34].mxu0 %vm26_vm1, %v18461_v61 }
 0x399   :  { %14392 = vmatprep.mubr.msk.f32.mxu0 %vm26_vm1, %v18463_v62 }
 0x39c   :  { %14393 = vmatmul.mubr.msk.f32.gmra.mrb[36].mxu0 %vm26_vm1, %v18469_v63 }
 0x39d   :  { %14395 = vmatprep.mubr.msk.f32.mxu0 %vm26_vm1, %v18471_v0 }
 0x3a0   :  { %14396 = vmatmul.mubr.msk.f32.gmra.mrb[38].mxu0 %vm26_vm1, %v18477_v1 }
 0x3a1   :  { %14398 = vmatprep.mubr.msk.f32.mxu0 %vm26_vm1, %v18479_v3 }
 0x3a4   :  { %14399 = vmatmul.mubr.msk.f32.gmra.mrb[40].mxu0 %vm26_vm1, %v18485_v6 }
 0x3a5   :  { %14401 = vmatprep.mubr.msk.f32.mxu0 %vm26_vm1, %v18487_v25 }
 0x3a8   :  { %14402 = vmatmul.mubr.msk.f32.gmra.mrb[42].mxu0 %vm26_vm1, %v18493_v28 }
 0x3a9   :  { %14404 = vmatprep.mubr.msk.f32.mxu0 %vm26_vm1, %v18495_v41 }
 0x3ac   :  { %14405 = vmatmul.mubr.msk.f32.gmra.mrb[44].mxu0 %vm26_vm1, %v18501_v42 }
 0x3ad   :  { %14407 = vmatprep.mubr.msk.f32.mxu0 %vm26_vm1, %v18503_v5 }
 0x3b0   :  { %14408 = vmatmul.mubr.msk.f32.gmra.mrb[46].mxu0 %vm26_vm1, %v18509_v29 }
 0x3b1   :  { %14410 = vmatprep.mubr.msk.f32.mxu0 %vm26_vm1, %v18511_v30 }
 0x3b4   :  { %14411 = vmatmul.mubr.msk.f32.gmra.mrb[48].mxu0 %vm26_vm1, %v18517_v31 }
 0x3b5   :  { %14413 = vmatprep.mubr.msk.f32.mxu0 %vm26_vm1, %v18519_v10 }
 0x3b8   :  { %14414 = vmatmul.mubr.msk.f32.gmra.mrb[50].mxu0 %vm26_vm1, %v18525_v8 }
 0x3b9   :  { %14416 = vmatprep.mubr.msk.f32.mxu0 %vm26_vm1, %v18527_v7 }
 0x3bc   :  { %14417 = vmatmul.mubr.msk.f32.gmra.mrb[52].mxu0 %vm26_vm1, %v18533_v9 }
 0x3bd   :  { %14419 = vmatprep.mubr.msk.f32.mxu0 %vm26_vm1, %v18535_v11 }
 0x3c0   :  { %14420 = vmatmul.mubr.msk.f32.gmra.mrb[54].mxu0 %vm26_vm1, %v18541_v4 }
 0x3c1   :  { %14422 = vmatprep.mubr.msk.f32.mxu0 %vm26_vm1, %v18543_v2 }
 0x3c4   :  { %14423 = vmatmul.mubr.msk.f32.gmra.mrb[56].mxu0 %vm26_vm1, %v18549_v47 }
 0x3c5   :  { %14425 = vmatprep.mubr.msk.f32.mxu0 %vm26_vm1, %v18551_v48 }
 0x3c8   :  { %14426 = vmatmul.mubr.msk.f32.gmra.mrb[58].mxu0 %vm26_vm1, %v18557_v12 }
 0x3c9   :  { %14428 = vmatprep.mubr.msk.f32.mxu0 %vm26_vm1, %v18559_v13 }
 0x3cc   :  { %14429 = vmatmul.mubr.msk.f32.gmra.mrb[60].mxu0 %vm26_vm1, %v18565_v14 }
 0x3cd   :  { %14431 = vmatprep.mubr.msk.f32.mxu0 %vm26_vm1, %v18567_v15 }
 0x3d0   :  { %14432 = vmatmul.mubr.msk.f32.gmra.mrb[62].mxu0 %vm26_vm1, %v18573_v16 }
 0x3d1   :  { %14436 = vmatprep.mubr.msk.f32.mxu0 %vm26_vm1, %v18325_v18  ;;  %v18643_v18 = vld [vmem:[#allocation2 + $0x18a] sm:$0xff] }
 0x3d4   :  { %14437 = vmatmul.mubr.msk.f32.vlgmr.msra.gmra.mrb[0].mxu0 %vm26_vm1, %v18337_v20  ;;  %v18711_v20 = vld [vmem:[#allocation2 + $0x33a] sm:$0xff] }
 0x3d5   :  { %14533 = vmatpush3.msk.msra.mxu0 %vm23441_vm0, %v18330_v19  ;;  %14439 = vmatprep.mubr.msk.f32.mxu0 %vm26_vm1, %v18339_v21  ;;  %v18705_v19 = vld [vmem:[#allocation2 + $0x332] sm:$0xff] }
 0x3d8   :  { %14440 = vmatmul.mubr.msk.f32.gmra.mrb[2].mxu0 %vm26_vm1, %v18347_v22 }
 0x3d9   :  { %14442 = vmatprep.mubr.msk.f32.mxu0 %vm26_vm1, %v18349_v23 }
 0x3dc   :  { %14443 = vmatmul.mubr.msk.f32.gmra.mrb[4].mxu0 %vm26_vm1, %v18355_v24 }
 0x3dd   :  { %14445 = vmatprep.mubr.msk.f32.mxu0 %vm26_vm1, %v18357_v26 }
 0x3e0   :  { %14446 = vmatmul.mubr.msk.f32.gmra.mrb[6].mxu0 %vm26_vm1, %v18363_v27 }
 0x3e1   :  { %14448 = vmatprep.mubr.msk.f32.mxu0 %vm26_vm1, %v18365_v32 }
 0x3e4   :  { %14449 = vmatmul.mubr.msk.f32.gmra.mrb[8].mxu0 %vm26_vm1, %v18371_v33 }
 0x3e5   :  { %14451 = vmatprep.mubr.msk.f32.mxu0 %vm26_vm1, %v18373_v34 }
 0x3e8   :  { %14452 = vmatmul.mubr.msk.f32.gmra.mrb[10].mxu0 %vm26_vm1, %v18379_v35 }
 0x3e9   :  { %14454 = vmatprep.mubr.msk.f32.mxu0 %vm26_vm1, %v18381_v36 }
 0x3ec   :  { %14455 = vmatmul.mubr.msk.f32.gmra.mrb[12].mxu0 %vm26_vm1, %v18387_v37 }
 0x3ed   :  { %14457 = vmatprep.mubr.msk.f32.mxu0 %vm26_vm1, %v18389_v38 }
 0x3f0   :  { %14458 = vmatmul.mubr.msk.f32.gmra.mrb[14].mxu0 %vm26_vm1, %v18395_v39 }
 0x3f1   :  { %14460 = vmatprep.mubr.msk.f32.mxu0 %vm26_vm1, %v18397_v40 }
 0x3f4   :  { %14461 = vmatmul.mubr.msk.f32.gmra.mrb[16].mxu0 %vm26_vm1, %v18403_v43 }
 0x3f5   :  { %14463 = vmatprep.mubr.msk.f32.mxu0 %vm26_vm1, %v18405_v44 }
 0x3f8   :  { %14464 = vmatmul.mubr.msk.f32.gmra.mrb[18].mxu0 %vm26_vm1, %v18411_v45 }
 0x3f9   :  { %14466 = vmatprep.mubr.msk.f32.mxu0 %vm26_vm1, %v18413_v46 }
 0x3fc   :  { %14467 = vmatmul.mubr.msk.f32.gmra.mrb[20].mxu0 %vm26_vm1, %v18419_v49 }
 0x3fd   :  { %14469 = vmatprep.mubr.msk.f32.mxu0 %vm26_vm1, %v18421_v50 }
 0x400   :  { %14470 = vmatmul.mubr.msk.f32.gmra.mrb[22].mxu0 %vm26_vm1, %v18427_v51 }
 0x401   :  { %14472 = vmatprep.mubr.msk.f32.mxu0 %vm26_vm1, %v18429_v52 }
 0x404   :  { %14473 = vmatmul.mubr.msk.f32.gmra.mrb[24].mxu0 %vm26_vm1, %v18435_v53 }
 0x405   :  { %14475 = vmatprep.mubr.msk.f32.mxu0 %vm26_vm1, %v18437_v54 }
 0x408   :  { %14476 = vmatmul.mubr.msk.f32.gmra.mrb[26].mxu0 %vm26_vm1, %v18443_v55 }
 0x409   :  { %14478 = vmatprep.mubr.msk.f32.mxu0 %vm26_vm1, %v18445_v56 }
 0x40c   :  { %14479 = vmatmul.mubr.msk.f32.gmra.mrb[28].mxu0 %vm26_vm1, %v18451_v57 }
 0x40d   :  { %14481 = vmatprep.mubr.msk.f32.mxu0 %vm26_vm1, %v18637_v17 }
 0x410   :  { %14482 = vmatmul.mubr.msk.f32.gmra.mrb[30].mxu0 %vm26_vm1, %v18643_v18 }
 0x411   :  { %14484 = vmatprep.mubr.msk.f32.mxu0 %vm26_vm1, %v18456_v60 }
 0x414   :  { %14485 = vmatmul.mubr.msk.f32.gmra.mrb[32].mxu0 %vm26_vm1, %v18461_v61 }
 0x415   :  { %14487 = vmatprep.mubr.msk.f32.mxu0 %vm26_vm1, %v18463_v62 }
 0x418   :  { %14488 = vmatmul.mubr.msk.f32.gmra.mrb[34].mxu0 %vm26_vm1, %v18469_v63 }
 0x419   :  { %14490 = vmatprep.mubr.msk.f32.mxu0 %vm26_vm1, %v18471_v0 }
 0x41c   :  { %14491 = vmatmul.mubr.msk.f32.gmra.mrb[36].mxu0 %vm26_vm1, %v18477_v1 }
 0x41d   :  { %14493 = vmatprep.mubr.msk.f32.mxu0 %vm26_vm1, %v18479_v3 }
 0x420   :  { %14494 = vmatmul.mubr.msk.f32.gmra.mrb[38].mxu0 %vm26_vm1, %v18485_v6 }
 0x421   :  { %14496 = vmatprep.mubr.msk.f32.mxu0 %vm26_vm1, %v18487_v25 }
 0x424   :  { %14497 = vmatmul.mubr.msk.f32.gmra.mrb[40].mxu0 %vm26_vm1, %v18493_v28 }
 0x425   :  { %14499 = vmatprep.mubr.msk.f32.mxu0 %vm26_vm1, %v18495_v41 }
 0x428   :  { %14500 = vmatmul.mubr.msk.f32.gmra.mrb[42].mxu0 %vm26_vm1, %v18501_v42 }
 0x429   :  { %14502 = vmatprep.mubr.msk.f32.mxu0 %vm26_vm1, %v18503_v5 }
 0x42c   :  { %14503 = vmatmul.mubr.msk.f32.gmra.mrb[44].mxu0 %vm26_vm1, %v18509_v29 }
 0x42d   :  { %14505 = vmatprep.mubr.msk.f32.mxu0 %vm26_vm1, %v18511_v30 }
 0x430   :  { %14506 = vmatmul.mubr.msk.f32.gmra.mrb[46].mxu0 %vm26_vm1, %v18517_v31 }
 0x431   :  { %14508 = vmatprep.mubr.msk.f32.mxu0 %vm26_vm1, %v18519_v10 }
 0x434   :  { %14509 = vmatmul.mubr.msk.f32.gmra.mrb[48].mxu0 %vm26_vm1, %v18525_v8 }
 0x435   :  { %14511 = vmatprep.mubr.msk.f32.mxu0 %vm26_vm1, %v18527_v7 }
 0x438   :  { %14512 = vmatmul.mubr.msk.f32.gmra.mrb[50].mxu0 %vm26_vm1, %v18533_v9 }
 0x439   :  { %14514 = vmatprep.mubr.msk.f32.mxu0 %vm26_vm1, %v18535_v11 }
 0x43c   :  { %14515 = vmatmul.mubr.msk.f32.gmra.mrb[52].mxu0 %vm26_vm1, %v18541_v4 }
 0x43d   :  { %14517 = vmatprep.mubr.msk.f32.mxu0 %vm26_vm1, %v18543_v2 }
 0x440   :  { %14518 = vmatmul.mubr.msk.f32.gmra.mrb[54].mxu0 %vm26_vm1, %v18549_v47 }
 0x441   :  { %14520 = vmatprep.mubr.msk.f32.mxu0 %vm26_vm1, %v18551_v48 }
 0x444   :  { %14521 = vmatmul.mubr.msk.f32.gmra.mrb[56].mxu0 %vm26_vm1, %v18557_v12 }
 0x445   :  { %14523 = vmatprep.mubr.msk.f32.mxu0 %vm26_vm1, %v18559_v13 }
 0x448   :  { %14524 = vmatmul.mubr.msk.f32.gmra.mrb[58].mxu0 %vm26_vm1, %v18565_v14 }
 0x449   :  { %14526 = vmatprep.mubr.msk.f32.mxu0 %vm26_vm1, %v18567_v15 }
 0x44c   :  { %14527 = vmatmul.mubr.msk.f32.gmra.mrb[60].mxu0 %vm26_vm1, %v18573_v16 }
 0x44d   :  { %14529 = vmatprep.mubr.msk.f32.mxu0 %vm26_vm1, %v18705_v19 }
 0x450   :  { %14530 = vmatmul.mubr.msk.f32.gmra.mrb[62].mxu0 %vm26_vm1, %v18711_v20 }
 0x451   :  { %14534 = vmatprep.mubr.msk.f32.mxu0 %vm26_vm1, %v18339_v21  ;;  %v3471_v21 = vld [vmem:[#allocation2 + $0x19a] sm:$0xff] }
 0x454   :  { %14535 = vmatmul.mubr.msk.f32.vlgmr.msra.gmra.mrb[0].mxu0 %vm26_vm1, %v18347_v22  ;;  %v3472_v22 = vld [vmem:[#allocation2 + $0x1a2] sm:$0xff] }
 0x455   :  { %14537 = vmatprep.mubr.msk.f32.mxu0 %vm26_vm1, %v18349_v23  ;;  %v3507_v23 = vld [vmem:[#allocation2 + $0x34a] sm:$0xff] }
 0x458   :  { %14538 = vmatmul.mubr.msk.f32.gmra.mrb[2].mxu0 %vm26_vm1, %v18355_v24  ;;  %v3508_v24 = vld [vmem:[#allocation2 + $0x352] sm:$0xff] }
 0x459   :  { %14540 = vmatprep.mubr.msk.f32.mxu0 %vm26_vm1, %v18357_v26 }
 0x45c   :  { %14541 = vmatmul.mubr.msk.f32.gmra.mrb[4].mxu0 %vm26_vm1, %v18363_v27 }
 0x45d   :  { %14543 = vmatprep.mubr.msk.f32.mxu0 %vm26_vm1, %v18365_v32 }
 0x460   :  { %14544 = vmatmul.mubr.msk.f32.gmra.mrb[6].mxu0 %vm26_vm1, %v18371_v33 }
 0x461   :  { %14546 = vmatprep.mubr.msk.f32.mxu0 %vm26_vm1, %v18373_v34 }
 0x464   :  { %14547 = vmatmul.mubr.msk.f32.gmra.mrb[8].mxu0 %vm26_vm1, %v18379_v35 }
 0x465   :  { %14549 = vmatprep.mubr.msk.f32.mxu0 %vm26_vm1, %v18381_v36 }
 0x468   :  { %14550 = vmatmul.mubr.msk.f32.gmra.mrb[10].mxu0 %vm26_vm1, %v18387_v37 }
 0x469   :  { %14552 = vmatprep.mubr.msk.f32.mxu0 %vm26_vm1, %v18389_v38 }
 0x46c   :  { %14553 = vmatmul.mubr.msk.f32.gmra.mrb[12].mxu0 %vm26_vm1, %v18395_v39 }
 0x46d   :  { %14555 = vmatprep.mubr.msk.f32.mxu0 %vm26_vm1, %v18397_v40 }
 0x470   :  { %14556 = vmatmul.mubr.msk.f32.gmra.mrb[14].mxu0 %vm26_vm1, %v18403_v43 }
 0x471   :  { %14558 = vmatprep.mubr.msk.f32.mxu0 %vm26_vm1, %v18405_v44 }
 0x474   :  { %14559 = vmatmul.mubr.msk.f32.gmra.mrb[16].mxu0 %vm26_vm1, %v18411_v45 }
 0x475   :  { %14561 = vmatprep.mubr.msk.f32.mxu0 %vm26_vm1, %v18413_v46 }
 0x478   :  { %14562 = vmatmul.mubr.msk.f32.gmra.mrb[18].mxu0 %vm26_vm1, %v18419_v49 }
 0x479   :  { %14564 = vmatprep.mubr.msk.f32.mxu0 %vm26_vm1, %v18421_v50 }
 0x47c   :  { %14565 = vmatmul.mubr.msk.f32.gmra.mrb[20].mxu0 %vm26_vm1, %v18427_v51 }
 0x47d   :  { %14567 = vmatprep.mubr.msk.f32.mxu0 %vm26_vm1, %v18429_v52 }
 0x480   :  { %14568 = vmatmul.mubr.msk.f32.gmra.mrb[22].mxu0 %vm26_vm1, %v18435_v53 }
 0x481   :  { %14570 = vmatprep.mubr.msk.f32.mxu0 %vm26_vm1, %v18437_v54 }
 0x484   :  { %14571 = vmatmul.mubr.msk.f32.gmra.mrb[24].mxu0 %vm26_vm1, %v18443_v55 }
 0x485   :  { %14573 = vmatprep.mubr.msk.f32.mxu0 %vm26_vm1, %v18445_v56 }
 0x488   :  { %14574 = vmatmul.mubr.msk.f32.gmra.mrb[26].mxu0 %vm26_vm1, %v18451_v57 }
 0x489   :  { %14576 = vmatprep.mubr.msk.f32.mxu0 %vm26_vm1, %v18637_v17 }
 0x48c   :  { %14577 = vmatmul.mubr.msk.f32.gmra.mrb[28].mxu0 %vm26_vm1, %v18643_v18 }
 0x48d   :  { %14579 = vmatprep.mubr.msk.f32.mxu0 %vm26_vm1, %v3471_v21 }
 0x490   :  { %14580 = vmatmul.mubr.msk.f32.gmra.mrb[30].mxu0 %vm26_vm1, %v3472_v22 }
 0x491   :  { %14582 = vmatprep.mubr.msk.f32.mxu0 %vm26_vm1, %v18463_v62 }
 0x494   :  { %14583 = vmatmul.mubr.msk.f32.gmra.mrb[32].mxu0 %vm26_vm1, %v18469_v63 }
 0x495   :  { %14585 = vmatprep.mubr.msk.f32.mxu0 %vm26_vm1, %v18471_v0 }
 0x498   :  { %14586 = vmatmul.mubr.msk.f32.gmra.mrb[34].mxu0 %vm26_vm1, %v18477_v1 }
 0x499   :  { %14588 = vmatprep.mubr.msk.f32.mxu0 %vm26_vm1, %v18479_v3 }
 0x49c   :  { %14589 = vmatmul.mubr.msk.f32.gmra.mrb[36].mxu0 %vm26_vm1, %v18485_v6 }
 0x49d   :  { %14591 = vmatprep.mubr.msk.f32.mxu0 %vm26_vm1, %v18487_v25 }
 0x4a0   :  { %14592 = vmatmul.mubr.msk.f32.gmra.mrb[38].mxu0 %vm26_vm1, %v18493_v28 }
 0x4a1   :  { %14594 = vmatprep.mubr.msk.f32.mxu0 %vm26_vm1, %v18495_v41 }
 0x4a4   :  { %14595 = vmatmul.mubr.msk.f32.gmra.mrb[40].mxu0 %vm26_vm1, %v18501_v42 }
 0x4a5   :  { %14597 = vmatprep.mubr.msk.f32.mxu0 %vm26_vm1, %v18503_v5 }
 0x4a8   :  { %14598 = vmatmul.mubr.msk.f32.gmra.mrb[42].mxu0 %vm26_vm1, %v18509_v29 }
 0x4a9   :  { %14600 = vmatprep.mubr.msk.f32.mxu0 %vm26_vm1, %v18511_v30 }
 0x4ac   :  { %14601 = vmatmul.mubr.msk.f32.gmra.mrb[44].mxu0 %vm26_vm1, %v18517_v31 }
 0x4ad   :  { %14603 = vmatprep.mubr.msk.f32.mxu0 %vm26_vm1, %v18519_v10 }
 0x4b0   :  { %14604 = vmatmul.mubr.msk.f32.gmra.mrb[46].mxu0 %vm26_vm1, %v18525_v8 }
 0x4b1   :  { %14606 = vmatprep.mubr.msk.f32.mxu0 %vm26_vm1, %v18527_v7 }
 0x4b4   :  { %14607 = vmatmul.mubr.msk.f32.gmra.mrb[48].mxu0 %vm26_vm1, %v18533_v9 }
 0x4b5   :  { %14609 = vmatprep.mubr.msk.f32.mxu0 %vm26_vm1, %v18535_v11 }
 0x4b8   :  { %14610 = vmatmul.mubr.msk.f32.gmra.mrb[50].mxu0 %vm26_vm1, %v18541_v4 }
 0x4b9   :  { %14612 = vmatprep.mubr.msk.f32.mxu0 %vm26_vm1, %v18543_v2 }
 0x4bc   :  { %14613 = vmatmul.mubr.msk.f32.gmra.mrb[52].mxu0 %vm26_vm1, %v18549_v47 }
 0x4bd   :  { %14615 = vmatprep.mubr.msk.f32.mxu0 %vm26_vm1, %v18551_v48 }
 0x4c0   :  { %14616 = vmatmul.mubr.msk.f32.gmra.mrb[54].mxu0 %vm26_vm1, %v18557_v12 }
 0x4c1   :  { %14618 = vmatprep.mubr.msk.f32.mxu0 %vm26_vm1, %v18559_v13 }
 0x4c4   :  { %14619 = vmatmul.mubr.msk.f32.gmra.mrb[56].mxu0 %vm26_vm1, %v18565_v14 }
 0x4c5   :  { %14621 = vmatprep.mubr.msk.f32.mxu0 %vm26_vm1, %v18567_v15 }
 0x4c8   :  { %14622 = vmatmul.mubr.msk.f32.gmra.mrb[58].mxu0 %vm26_vm1, %v18573_v16 }
 0x4c9   :  { %14624 = vmatprep.mubr.msk.f32.mxu0 %vm26_vm1, %v18705_v19 }
 0x4cc   :  { %14625 = vmatmul.mubr.msk.f32.gmra.mrb[60].mxu0 %vm26_vm1, %v18711_v20 }
 0x4cd   :  { %14627 = vmatprep.mubr.msk.f32.mxu0 %vm26_vm1, %v3507_v23 }
 0x4d0   :  { %14628 = vmatmul.mubr.msk.f32.gmra.mrb[62].mxu0 %vm26_vm1, %v3508_v24 }
 0x527   :  { %v18839_v26 = vpop.f32.mrb[0].mxu0 }
 0x528   :  { %v5088_v27 = vsel %vm26_vm1, %v18839_v26, 0.0  ;;  %v18843_v32 = vpop.f32.mrb[1].mxu0 }
 0x529   :  { %v5087_v33 = vsel %vm26_vm1, %v18843_v32, 0.0 }
 0x52a   :  { %v5089_v34 = vadd.f32 %v5088_v27, %v5087_v33 }
 0x52b   :  { %v18847_v35 = vpop.f32.mrb[2].mxu0 }
 0x52c   :  { %23568 = vst [vmem:[#allocation69_spill] sm:$0xff] %v18847_v35  ;;  %v18849_v36 = vpop.f32.mrb[3].mxu0  ;;  %v5092_v39 = vsel %vm26_vm1, %v18847_v35, 0.0 }
 0x52d   :  { %23569 = vst [vmem:[#allocation70_spill] sm:$0xff] %v18849_v36  ;;  %v5090_v37 = vsel %vm26_vm1, %v18849_v36, 0.0 }
 0x52e   :  { %v5091_v38 = vadd.f32 %v5090_v37, %v5089_v34 }
 0x52f   :  { %v18855_v40 = vpop.f32.mrb[4].mxu0 }
 0x530   :  { %23570 = vst [vmem:[#allocation67_spill] sm:$0xff] %v18855_v40  ;;  %v5093_v43 = vadd.f32 %v5092_v39, %v5091_v38  ;;  %v18857_v44 = vpop.f32.mrb[5].mxu0  ;;  %v5096_v49 = vsel %vm26_vm1, %v18855_v40, 0.0 }
 0x531   :  { %23571 = vst [vmem:[#allocation68_spill] sm:$0xff] %v18857_v44  ;;  %v5094_v45 = vsel %vm26_vm1, %v18857_v44, 0.0 }
 0x532   :  { %v5095_v46 = vadd.f32 %v5094_v45, %v5093_v43 }
 0x533   :  { %v18863_v50 = vpop.f32.mrb[6].mxu0 }
 0x534   :  { %v18865_v51 = vpop.f32.mrb[7].mxu0  ;;  %v5097_v52 = vadd.f32 %v5096_v49, %v5095_v46  ;;  %v5100_v55 = vsel %vm26_vm1, %v18863_v50, 0.0 }
 0x535   :  { %v5098_v53 = vsel %vm26_vm1, %v18865_v51, 0.0 }
 0x536   :  { %v5099_v54 = vadd.f32 %v5098_v53, %v5097_v52 }
 0x537   :  { %v18871_v56 = vpop.f32.mrb[8].mxu0 }
 0x538   :  { %v18873_v57 = vpop.f32.mrb[9].mxu0  ;;  %v5101_v58 = vadd.f32 %v5100_v55, %v5099_v54  ;;  %v5104_v61 = vsel %vm26_vm1, %v18871_v56, 0.0 }
 0x539   :  { %v5102_v59 = vsel %vm26_vm1, %v18873_v57, 0.0 }
 0x53a   :  { %v5103_v60 = vadd.f32 %v5102_v59, %v5101_v58 }
 0x53b   :  { %v18879_v62 = vpop.f32.mrb[10].mxu0 }
 0x53c   :  { %v18881_v63 = vpop.f32.mrb[11].mxu0  ;;  %v5105_v0 = vadd.f32 %v5104_v61, %v5103_v60  ;;  %v5108_v6 = vsel %vm26_vm1, %v18879_v62, 0.0 }
 0x53d   :  { %v5106_v1 = vsel %vm26_vm1, %v18881_v63, 0.0 }
 0x53e   :  { %v5107_v3 = vadd.f32 %v5106_v1, %v5105_v0 }
 0x53f   :  { %v18887_v25 = vpop.f32.mrb[12].mxu0 }
 0x540   :  { %v18889_v28 = vpop.f32.mrb[13].mxu0  ;;  %v5109_v41 = vadd.f32 %v5108_v6, %v5107_v3  ;;  %v5112_v29 = vsel %vm26_vm1, %v18887_v25, 0.0 }
 0x541   :  { %v5110_v42 = vsel %vm26_vm1, %v18889_v28, 0.0 }
 0x542   :  { %v5111_v5 = vadd.f32 %v5110_v42, %v5109_v41 }
 0x543   :  { %v18895_v30 = vpop.f32.mrb[14].mxu0 }
 0x544   :  { %v18897_v31 = vpop.f32.mrb[15].mxu0  ;;  %v5113_v10 = vadd.f32 %v5112_v29, %v5111_v5  ;;  %v5116_v9 = vsel %vm26_vm1, %v18895_v30, 0.0 }
 0x545   :  { %v5114_v8 = vsel %vm26_vm1, %v18897_v31, 0.0 }
 0x546   :  { %v5115_v7 = vadd.f32 %v5114_v8, %v5113_v10 }
 0x547   :  { %v18903_v11 = vpop.f32.mrb[16].mxu0 }
 0x548   :  { %v18905_v4 = vpop.f32.mrb[17].mxu0  ;;  %v5117_v2 = vadd.f32 %v5116_v9, %v5115_v7  ;;  %v5120_v12 = vsel %vm26_vm1, %v18903_v11, 0.0 }
 0x549   :  { %v5118_v47 = vsel %vm26_vm1, %v18905_v4, 0.0 }
 0x54a   :  { %v5119_v48 = vadd.f32 %v5118_v47, %v5117_v2 }
 0x54b   :  { %v18911_v13 = vpop.f32.mrb[18].mxu0 }
 0x54c   :  { %v18913_v14 = vpop.f32.mrb[19].mxu0  ;;  %v5121_v15 = vadd.f32 %v5120_v12, %v5119_v48  ;;  %v5124_v18 = vsel %vm26_vm1, %v18911_v13, 0.0 }
 0x54d   :  { %v5122_v16 = vsel %vm26_vm1, %v18913_v14, 0.0 }
 0x54e   :  { %v5123_v17 = vadd.f32 %v5122_v16, %v5121_v15 }
 0x54f   :  { %v18919_v19 = vpop.f32.mrb[20].mxu0 }
 0x550   :  { %v18921_v20 = vpop.f32.mrb[21].mxu0  ;;  %v5125_v21 = vadd.f32 %v5124_v18, %v5123_v17  ;;  %v5128_v24 = vsel %vm26_vm1, %v18919_v19, 0.0 }
 0x551   :  { %v5126_v22 = vsel %vm26_vm1, %v18921_v20, 0.0 }
 0x552   :  { %v5127_v23 = vadd.f32 %v5126_v22, %v5125_v21 }
 0x553   :  { %v18927_v27 = vpop.f32.mrb[22].mxu0 }
 0x554   :  { %v18929_v33 = vpop.f32.mrb[23].mxu0  ;;  %v5129_v34 = vadd.f32 %v5128_v24, %v5127_v23  ;;  %v5132_v39 = vsel %vm26_vm1, %v18927_v27, 0.0 }
 0x555   :  { %v5130_v37 = vsel %vm26_vm1, %v18929_v33, 0.0 }
 0x556   :  { %v5131_v38 = vadd.f32 %v5130_v37, %v5129_v34 }
 0x557   :  { %v18935_v43 = vpop.f32.mrb[24].mxu0 }
 0x558   :  { %v18937_v45 = vpop.f32.mrb[25].mxu0  ;;  %v5133_v46 = vadd.f32 %v5132_v39, %v5131_v38  ;;  %v5136_v53 = vsel %vm26_vm1, %v18935_v43, 0.0 }
 0x559   :  { %v5134_v49 = vsel %vm26_vm1, %v18937_v45, 0.0 }
 0x55a   :  { %v5135_v52 = vadd.f32 %v5134_v49, %v5133_v46 }
 0x55b   :  { %v18943_v54 = vpop.f32.mrb[26].mxu0 }
 0x55c   :  { %v18945_v55 = vpop.f32.mrb[27].mxu0  ;;  %v5137_v58 = vadd.f32 %v5136_v53, %v5135_v52  ;;  %v5140_v61 = vsel %vm26_vm1, %v18943_v54, 0.0 }
 0x55d   :  { %v5138_v59 = vsel %vm26_vm1, %v18945_v55, 0.0 }
 0x55e   :  { %v5139_v60 = vadd.f32 %v5138_v59, %v5137_v58 }
 0x55f   :  { %v18951_v0 = vpop.f32.mrb[28].mxu0 }
 0x560   :  { %v18953_v1 = vpop.f32.mrb[29].mxu0  ;;  %v5141_v3 = vadd.f32 %v5140_v61, %v5139_v60  ;;  %v5144_v42 = vsel %vm26_vm1, %v18951_v0, 0.0 }
 0x561   :  { %v5142_v6 = vsel %vm26_vm1, %v18953_v1, 0.0 }
 0x562   :  { %v5143_v41 = vadd.f32 %v5142_v6, %v5141_v3 }
 0x563   :  { %v18959_v5 = vpop.f32.mrb[30].mxu0 }
 0x564   :  { %v18961_v29 = vpop.f32.mrb[31].mxu0  ;;  %v5145_v10 = vadd.f32 %v5144_v42, %v5143_v41  ;;  %v5148_v9 = vsel %vm26_vm1, %v18959_v5, 0.0 }
 0x565   :  { %v5146_v8 = vsel %vm26_vm1, %v18961_v29, 0.0 }
 0x566   :  { %v5147_v7 = vadd.f32 %v5146_v8, %v5145_v10 }
 0x567   :  { %v18967_v2 = vpop.f32.mrb[32].mxu0 }
 0x568   :  { %v18969_v47 = vpop.f32.mrb[33].mxu0  ;;  %v5149_v48 = vadd.f32 %v5148_v9, %v5147_v7  ;;  %v5152_v16 = vsel %vm26_vm1, %v18967_v2, 0.0 }
 0x569   :  { %v5150_v12 = vsel %vm26_vm1, %v18969_v47, 0.0 }
 0x56a   :  { %v5151_v15 = vadd.f32 %v5150_v12, %v5149_v48 }
 0x56b   :  { %v18975_v17 = vpop.f32.mrb[34].mxu0 }
 0x56c   :  { %v18977_v18 = vpop.f32.mrb[35].mxu0  ;;  %v5153_v21 = vadd.f32 %v5152_v16, %v5151_v15  ;;  %v5156_v24 = vsel %vm26_vm1, %v18975_v17, 0.0 }
 0x56d   :  { %v5154_v22 = vsel %vm26_vm1, %v18977_v18, 0.0 }
 0x56e   :  { %v5155_v23 = vadd.f32 %v5154_v22, %v5153_v21 }
 0x56f   :  { %v18983_v34 = vpop.f32.mrb[36].mxu0 }
 0x570   :  { %v18985_v37 = vpop.f32.mrb[37].mxu0  ;;  %v5157_v38 = vadd.f32 %v5156_v24, %v5155_v23  ;;  %v5160_v49 = vsel %vm26_vm1, %v18983_v34, 0.0 }
 0x571   :  { %v5158_v39 = vsel %vm26_vm1, %v18985_v37, 0.0 }
 0x572   :  { %v5159_v46 = vadd.f32 %v5158_v39, %v5157_v38 }
 0x573   :  { %v18991_v52 = vpop.f32.mrb[38].mxu0 }
 0x574   :  { %v18993_v53 = vpop.f32.mrb[39].mxu0  ;;  %v5161_v58 = vadd.f32 %v5160_v49, %v5159_v46  ;;  %v5164_v61 = vsel %vm26_vm1, %v18991_v52, 0.0 }
 0x575   :  { %v5162_v59 = vsel %vm26_vm1, %v18993_v53, 0.0 }
 0x576   :  { %v5163_v60 = vadd.f32 %v5162_v59, %v5161_v58 }
 0x577   :  { %v18999_v3 = vpop.f32.mrb[40].mxu0 }
 0x578   :  { %v19001_v6 = vpop.f32.mrb[41].mxu0  ;;  %v5165_v41 = vadd.f32 %v5164_v61, %v5163_v60  ;;  %v5168_v8 = vsel %vm26_vm1, %v18999_v3, 0.0 }
 0x579   :  { %v5166_v42 = vsel %vm26_vm1, %v19001_v6, 0.0 }
 0x57a   :  { %v5167_v10 = vadd.f32 %v5166_v42, %v5165_v41 }
 0x57b   :  { %v19007_v7 = vpop.f32.mrb[42].mxu0 }
 0x57c   :  { %v19009_v9 = vpop.f32.mrb[43].mxu0  ;;  %v5169_v48 = vadd.f32 %v5168_v8, %v5167_v10  ;;  %v5172_v16 = vsel %vm26_vm1, %v19007_v7, 0.0 }
 0x57d   :  { %v5170_v12 = vsel %vm26_vm1, %v19009_v9, 0.0 }
 0x57e   :  { %v5171_v15 = vadd.f32 %v5170_v12, %v5169_v48 }
 0x57f   :  { %v19015_v21 = vpop.f32.mrb[44].mxu0 }
 0x580   :  { %23572 = vst [vmem:[#allocation71_spill] sm:$0xff] %v19015_v21  ;;  %v19017_v22 = vpop.f32.mrb[45].mxu0  ;;  %v5173_v23 = vadd.f32 %v5172_v16, %v5171_v15  ;;  %v5176_v39 = vsel %vm26_vm1, %v19015_v21, 0.0 }
 0x581   :  { %23573 = vst [vmem:[#allocation72_spill] sm:$0xff] %v19017_v22  ;;  %v5174_v24 = vsel %vm26_vm1, %v19017_v22, 0.0 }
 0x582   :  { %v5175_v38 = vadd.f32 %v5174_v24, %v5173_v23 }
 0x583   :  { %v19023_v46 = vpop.f32.mrb[46].mxu0 }
 0x584   :  { %23574 = vst [vmem:[#allocation73_spill] sm:$0xff] %v19023_v46  ;;  %v19025_v49 = vpop.f32.mrb[47].mxu0  ;;  %v5177_v58 = vadd.f32 %v5176_v39, %v5175_v38  ;;  %v5180_v61 = vsel %vm26_vm1, %v19023_v46, 0.0 }
 0x585   :  { %23575 = vst [vmem:[#allocation74_spill] sm:$0xff] %v19025_v49  ;;  %v5178_v59 = vsel %vm26_vm1, %v19025_v49, 0.0 }
 0x586   :  { %v5179_v60 = vadd.f32 %v5178_v59, %v5177_v58 }
 0x587   :  { %v19031_v41 = vpop.f32.mrb[48].mxu0 }
 0x588   :  { %23576 = vst [vmem:[#allocation75_spill] sm:$0xff] %v19031_v41  ;;  %v19033_v42 = vpop.f32.mrb[49].mxu0  ;;  %v5181_v10 = vadd.f32 %v5180_v61, %v5179_v60  ;;  %v5184_v12 = vsel %vm26_vm1, %v19031_v41, 0.0 }
 0x589   :  { %23577 = vst [vmem:[#allocation76_spill] sm:$0xff] %v19033_v42  ;;  %v5182_v8 = vsel %vm26_vm1, %v19033_v42, 0.0 }
 0x58a   :  { %v5183_v48 = vadd.f32 %v5182_v8, %v5181_v10 }
 0x58b   :  { %v19039_v15 = vpop.f32.mrb[50].mxu0 }
 0x58c   :  { %23578 = vst [vmem:[#allocation77_spill] sm:$0xff] %v19039_v15  ;;  %v19041_v16 = vpop.f32.mrb[51].mxu0  ;;  %v5185_v23 = vadd.f32 %v5184_v12, %v5183_v48  ;;  %v5188_v39 = vsel %vm26_vm1, %v19039_v15, 0.0 }
 0x58d   :  { %23579 = vst [vmem:[#allocation78_spill] sm:$0xff] %v19041_v16  ;;  %v5186_v24 = vsel %vm26_vm1, %v19041_v16, 0.0 }
 0x58e   :  { %v5187_v38 = vadd.f32 %v5186_v24, %v5185_v23 }
 0x58f   :  { %v19047_v58 = vpop.f32.mrb[52].mxu0 }
 0x590   :  { %23580 = vst [vmem:[#allocation79_spill] sm:$0xff] %v19047_v58  ;;  %v19049_v59 = vpop.f32.mrb[53].mxu0  ;;  %v5189_v60 = vadd.f32 %v5188_v39, %v5187_v38  ;;  %v5192_v8 = vsel %vm26_vm1, %v19047_v58, 0.0 }
 0x591   :  { %23581 = vst [vmem:[#allocation80_spill] sm:$0xff] %v19049_v59  ;;  %v5190_v61 = vsel %vm26_vm1, %v19049_v59, 0.0 }
 0x592   :  { %v5191_v10 = vadd.f32 %v5190_v61, %v5189_v60 }
 0x593   :  { %v19055_v48 = vpop.f32.mrb[54].mxu0 }
 0x594   :  { %23582 = vst [vmem:[#allocation81_spill] sm:$0xff] %v19055_v48  ;;  %v19057_v12 = vpop.f32.mrb[55].mxu0  ;;  %v5193_v23 = vadd.f32 %v5192_v8, %v5191_v10  ;;  %v5196_v16 = vsel %vm26_vm1, %v19055_v48, 0.0 }
 0x595   :  { %23583 = vst [vmem:[#allocation82_spill] sm:$0xff] %v19057_v12  ;;  %v5194_v24 = vsel %vm26_vm1, %v19057_v12, 0.0 }
 0x596   :  { %v5195_v15 = vadd.f32 %v5194_v24, %v5193_v23 }
 0x597   :  { %v19063_v38 = vpop.f32.mrb[56].mxu0 }
 0x598   :  { %23584 = vst [vmem:[#allocation83_spill] sm:$0xff] %v19063_v38  ;;  %v19065_v39 = vpop.f32.mrb[57].mxu0  ;;  %v5197_v60 = vadd.f32 %v5196_v16, %v5195_v15  ;;  %v5200_v59 = vsel %vm26_vm1, %v19063_v38, 0.0 }
 0x599   :  { %23585 = vst [vmem:[#allocation84_spill] sm:$0xff] %v19065_v39  ;;  %v5198_v61 = vsel %vm26_vm1, %v19065_v39, 0.0 }
 0x59a   :  { %v5199_v58 = vadd.f32 %v5198_v61, %v5197_v60 }
 0x59b   :  { %v19071_v10 = vpop.f32.mrb[58].mxu0 }
 0x59c   :  { %23586 = vst [vmem:[#allocation85_spill] sm:$0xff] %v19071_v10  ;;  %v19073_v8 = vpop.f32.mrb[59].mxu0  ;;  %v5201_v23 = vadd.f32 %v5200_v59, %v5199_v58  ;;  %v5204_v12 = vsel %vm26_vm1, %v19071_v10, 0.0 }
 0x59d   :  { %23587 = vst [vmem:[#allocation86_spill] sm:$0xff] %v19073_v8  ;;  %v5202_v24 = vsel %vm26_vm1, %v19073_v8, 0.0 }
 0x59e   :  { %v5203_v48 = vadd.f32 %v5202_v24, %v5201_v23 }
 0x59f   :  { %v19079_v15 = vpop.f32.mrb[60].mxu0 }
 0x5a0   :  { %23588 = vst [vmem:[#allocation87_spill] sm:$0xff] %v19079_v15  ;;  %v19081_v16 = vpop.f32.mrb[61].mxu0  ;;  %v5205_v60 = vadd.f32 %v5204_v12, %v5203_v48  ;;  %v5208_v39 = vsel %vm26_vm1, %v19079_v15, 0.0 }
 0x5a1   :  { %23589 = vst [vmem:[#allocation88_spill] sm:$0xff] %v19081_v16  ;;  %v5206_v61 = vsel %vm26_vm1, %v19081_v16, 0.0 }
 0x5a2   :  { %v5207_v38 = vadd.f32 %v5206_v61, %v5205_v60 }
 0x5a3   :  { %v19087_v58 = vpop.f32.mrb[62].mxu0 }
 0x5a4   :  { %23590 = vst [vmem:[#allocation89_spill] sm:$0xff] %v19087_v58  ;;  %v19089_v59 = vpop.f32.mrb[63].mxu0  ;;  %v5209_v23 = vadd.f32 %v5208_v39, %v5207_v38  ;;  %v5212_v8 = vsel %vm26_vm1, %v19087_v58, 0.0 }
 0x5a5   :  { %v5210_v24 = vsel %vm26_vm1, %v19089_v59, 0.0 }
 0x5a6   :  { %v5211_v10 = vadd.f32 %v5210_v24, %v5209_v23 }
 0x5a8   :  { %v5213_v48 = vadd.f32 %v5212_v8, %v5211_v10 }
 0x5aa   :  { %v5214_v12 = vrot.slane %v5213_v48, 4 }
 0x5ac   :  { %v5215_v41 = vadd.f32 %v5214_v12, %v5213_v48 }
 0x5ae   :  { %v5216_v16 = vrot.slane %v5215_v41, 2 }
 0x5b0   :  { %v5217_v60 = vadd.f32 %v5216_v16, %v5215_v41 }
 0x5b2   :  { %v5218_v61 = vrot.slane %v5217_v60, 1 }
 0x5b4   :  { %v5219_v42 = vadd.f32 %v5218_v61, %v5217_v60 }
 0x5b6   :  { %v19095_v15 = vmul.f32 0.001953125, %v5219_v42 }
 0x5b8   :  { %v5221_v46 = vsub.f32 %v18843_v32, %v19095_v15  ;;  %v5222_v38 = vsub.f32 %v18839_v26, %v19095_v15  ;;  %v5223_v39 = vsub.f32 %v18849_v36, %v19095_v15  ;;  %v5224_v10 = vsub.f32 %v18847_v35, %v19095_v15 }
 0x5b9   :  { %v5225_v41 = vsub.f32 %v18857_v44, %v19095_v15  ;;  %v5226_v42 = vsub.f32 %v18855_v40, %v19095_v15  ;;  %v5227_v61 = vsub.f32 %v18865_v51, %v19095_v15  ;;  %v5228_v44 = vsub.f32 %v18863_v50, %v19095_v15 }
 0x5ba   :  { %v5285_v8 = vmul.f32 %v5221_v46, %v5221_v46  ;;  %v5286_v23 = vmul.f32 %v5222_v38, %v5222_v38  ;;  %v5287_v16 = vmul.f32 %v5223_v39, %v5223_v39  ;;  %v5288_v24 = vmul.f32 %v5224_v10, %v5224_v10 }
 0x5bb   :  { %v5289_v36 = vmul.f32 %v5225_v41, %v5225_v41  ;;  %v5290_v39 = vmul.f32 %v5226_v42, %v5226_v42  ;;  %v5229_v10 = vsub.f32 %v18873_v57, %v19095_v15  ;;  %v5230_v41 = vsub.f32 %v18871_v56, %v19095_v15 }
 0x5bc   :  { %v5349_v48 = vsel %vm26_vm1, %v5285_v8, 0.0  ;;  %v5350_v12 = vsel %vm26_vm1, %v5286_v23, 0.0  ;;  %v5352_v46 = vsel %vm26_vm1, %v5287_v16, 0.0  ;;  %v5354_v35 = vsel %vm26_vm1, %v5288_v24, 0.0 }
 0x5bd   :  { %v5351_v60 = vadd.f32 %v5350_v12, %v5349_v48  ;;  %v5291_v8 = vmul.f32 %v5227_v61, %v5227_v61  ;;  %v5356_v23 = vsel %vm26_vm1, %v5289_v36, 0.0  ;;  %v5292_v12 = vmul.f32 %v5228_v44, %v5228_v44 }
 0x5be   :  { %v5358_v16 = vsel %vm26_vm1, %v5290_v39, 0.0  ;;  %v5231_v42 = vsub.f32 %v18881_v63, %v19095_v15  ;;  %v5232_v61 = vsub.f32 %v18879_v62, %v19095_v15  ;;  %v5233_v44 = vsub.f32 %v18889_v28, %v19095_v15 }
 0x5bf   :  { %v5353_v38 = vadd.f32 %v5352_v46, %v5351_v60  ;;  %v5293_v46 = vmul.f32 %v5229_v10, %v5229_v10  ;;  %v5362_v36 = vsel %vm26_vm1, %v5292_v12, 0.0  ;;  %v5234_v10 = vsub.f32 %v18887_v25, %v19095_v15 }
 0x5c1   :  { %v5355_v40 = vadd.f32 %v5354_v35, %v5353_v38  ;;  %v5360_v35 = vsel %vm26_vm1, %v5291_v8, 0.0  ;;  %v5294_v38 = vmul.f32 %v5230_v41, %v5230_v41  ;;  %v5364_v39 = vsel %vm26_vm1, %v5293_v46, 0.0 }
 0x5c2   :  { %v5235_v41 = vsub.f32 %v18897_v31, %v19095_v15 }
 0x5c3   :  { %v5357_v48 = vadd.f32 %v5356_v23, %v5355_v40  ;;  %v5295_v23 = vmul.f32 %v5231_v42, %v5231_v42  ;;  %v5366_v8 = vsel %vm26_vm1, %v5294_v38, 0.0  ;;  %v5236_v42 = vsub.f32 %v18895_v30, %v19095_v15 }
 0x5c5   :  { %v5359_v60 = vadd.f32 %v5358_v16, %v5357_v48  ;;  %v5296_v16 = vmul.f32 %v5232_v61, %v5232_v61  ;;  %v5368_v12 = vsel %vm26_vm1, %v5295_v23, 0.0  ;;  %v5237_v61 = vsub.f32 %v18905_v4, %v19095_v15 }
 0x5c7   :  { %v5361_v24 = vadd.f32 %v5360_v35, %v5359_v60  ;;  %v5297_v35 = vmul.f32 %v5233_v44, %v5233_v44  ;;  %v5370_v46 = vsel %vm26_vm1, %v5296_v16, 0.0  ;;  %v5238_v44 = vsub.f32 %v18903_v11, %v19095_v15 }
 0x5c9   :  { %v5363_v40 = vadd.f32 %v5362_v36, %v5361_v24  ;;  %v5298_v36 = vmul.f32 %v5234_v10, %v5234_v10  ;;  %v5372_v38 = vsel %vm26_vm1, %v5297_v35, 0.0  ;;  %v5239_v10 = vsub.f32 %v18913_v14, %v19095_v15 }
 0x5cb   :  { %v5365_v48 = vadd.f32 %v5364_v39, %v5363_v40  ;;  %v5299_v39 = vmul.f32 %v5235_v41, %v5235_v41  ;;  %v5374_v23 = vsel %vm26_vm1, %v5298_v36, 0.0  ;;  %v5240_v41 = vsub.f32 %v18911_v13, %v19095_v15 }
 0x5cd   :  { %v5367_v60 = vadd.f32 %v5366_v8, %v5365_v48  ;;  %v5300_v8 = vmul.f32 %v5236_v42, %v5236_v42  ;;  %v5376_v16 = vsel %vm26_vm1, %v5299_v39, 0.0  ;;  %v5241_v42 = vsub.f32 %v18921_v20, %v19095_v15 }
 0x5cf   :  { %v5369_v24 = vadd.f32 %v5368_v12, %v5367_v60  ;;  %v5301_v12 = vmul.f32 %v5237_v61, %v5237_v61  ;;  %v5378_v35 = vsel %vm26_vm1, %v5300_v8, 0.0  ;;  %v5242_v61 = vsub.f32 %v18919_v19, %v19095_v15 }
 0x5d1   :  { %v5371_v40 = vadd.f32 %v5370_v46, %v5369_v24  ;;  %v5302_v46 = vmul.f32 %v5238_v44, %v5238_v44  ;;  %v5380_v36 = vsel %vm26_vm1, %v5301_v12, 0.0  ;;  %v5243_v44 = vsub.f32 %v18929_v33, %v19095_v15 }
 0x5d3   :  { %v5373_v48 = vadd.f32 %v5372_v38, %v5371_v40  ;;  %v5303_v38 = vmul.f32 %v5239_v10, %v5239_v10  ;;  %v5382_v39 = vsel %vm26_vm1, %v5302_v46, 0.0  ;;  %v5244_v10 = vsub.f32 %v18927_v27, %v19095_v15 }
 0x5d5   :  { %v5375_v60 = vadd.f32 %v5374_v23, %v5373_v48  ;;  %v5304_v23 = vmul.f32 %v5240_v41, %v5240_v41  ;;  %v5384_v8 = vsel %vm26_vm1, %v5303_v38, 0.0  ;;  %v5245_v41 = vsub.f32 %v18937_v45, %v19095_v15 }
 0x5d7   :  { %v5377_v24 = vadd.f32 %v5376_v16, %v5375_v60  ;;  %v5305_v16 = vmul.f32 %v5241_v42, %v5241_v42  ;;  %v5386_v12 = vsel %vm26_vm1, %v5304_v23, 0.0  ;;  %v5246_v42 = vsub.f32 %v18935_v43, %v19095_v15 }
 0x5d9   :  { %v5379_v40 = vadd.f32 %v5378_v35, %v5377_v24  ;;  %v5306_v35 = vmul.f32 %v5242_v61, %v5242_v61  ;;  %v5388_v46 = vsel %vm26_vm1, %v5305_v16, 0.0  ;;  %v5247_v61 = vsub.f32 %v18945_v55, %v19095_v15 }
 0x5db   :  { %v5381_v48 = vadd.f32 %v5380_v36, %v5379_v40  ;;  %v5307_v36 = vmul.f32 %v5243_v44, %v5243_v44  ;;  %v5390_v38 = vsel %vm26_vm1, %v5306_v35, 0.0  ;;  %v5248_v44 = vsub.f32 %v18943_v54, %v19095_v15 }
 0x5dd   :  { %v5383_v60 = vadd.f32 %v5382_v39, %v5381_v48  ;;  %v5308_v39 = vmul.f32 %v5244_v10, %v5244_v10  ;;  %v5392_v23 = vsel %vm26_vm1, %v5307_v36, 0.0  ;;  %v5249_v10 = vsub.f32 %v18953_v1, %v19095_v15 }
 0x5df   :  { %v5385_v24 = vadd.f32 %v5384_v8, %v5383_v60  ;;  %v5309_v8 = vmul.f32 %v5245_v41, %v5245_v41  ;;  %v5394_v16 = vsel %vm26_vm1, %v5308_v39, 0.0  ;;  %v5250_v41 = vsub.f32 %v18951_v0, %v19095_v15 }
 0x5e1   :  { %v5387_v40 = vadd.f32 %v5386_v12, %v5385_v24  ;;  %v5310_v12 = vmul.f32 %v5246_v42, %v5246_v42  ;;  %v5396_v35 = vsel %vm26_vm1, %v5309_v8, 0.0  ;;  %v5251_v42 = vsub.f32 %v18961_v29, %v19095_v15 }
 0x5e3   :  { %v5389_v48 = vadd.f32 %v5388_v46, %v5387_v40  ;;  %v5311_v46 = vmul.f32 %v5247_v61, %v5247_v61  ;;  %v5398_v36 = vsel %vm26_vm1, %v5310_v12, 0.0  ;;  %v5252_v61 = vsub.f32 %v18959_v5, %v19095_v15 }
 0x5e5   :  { %v5391_v60 = vadd.f32 %v5390_v38, %v5389_v48  ;;  %v5312_v38 = vmul.f32 %v5248_v44, %v5248_v44  ;;  %v5400_v39 = vsel %vm26_vm1, %v5311_v46, 0.0  ;;  %v5253_v44 = vsub.f32 %v18969_v47, %v19095_v15 }
 0x5e7   :  { %v5393_v24 = vadd.f32 %v5392_v23, %v5391_v60  ;;  %v5313_v23 = vmul.f32 %v5249_v10, %v5249_v10  ;;  %v5402_v8 = vsel %vm26_vm1, %v5312_v38, 0.0  ;;  %v5254_v10 = vsub.f32 %v18967_v2, %v19095_v15 }
 0x5e9   :  { %v5395_v40 = vadd.f32 %v5394_v16, %v5393_v24  ;;  %v5314_v16 = vmul.f32 %v5250_v41, %v5250_v41  ;;  %v5404_v12 = vsel %vm26_vm1, %v5313_v23, 0.0  ;;  %v5255_v41 = vsub.f32 %v18977_v18, %v19095_v15 }
 0x5eb   :  { %v5397_v48 = vadd.f32 %v5396_v35, %v5395_v40  ;;  %v5315_v35 = vmul.f32 %v5251_v42, %v5251_v42  ;;  %v5406_v46 = vsel %vm26_vm1, %v5314_v16, 0.0  ;;  %v5256_v42 = vsub.f32 %v18975_v17, %v19095_v15 }
 0x5ed   :  { %v5399_v60 = vadd.f32 %v5398_v36, %v5397_v48  ;;  %v5316_v36 = vmul.f32 %v5252_v61, %v5252_v61  ;;  %v5408_v38 = vsel %vm26_vm1, %v5315_v35, 0.0  ;;  %v5257_v61 = vsub.f32 %v18985_v37, %v19095_v15 }
 0x5ef   :  { %v5401_v24 = vadd.f32 %v5400_v39, %v5399_v60  ;;  %v5317_v39 = vmul.f32 %v5253_v44, %v5253_v44  ;;  %v5410_v23 = vsel %vm26_vm1, %v5316_v36, 0.0  ;;  %v5258_v44 = vsub.f32 %v18983_v34, %v19095_v15 }
 0x5f1   :  { %v5403_v40 = vadd.f32 %v5402_v8, %v5401_v24  ;;  %v5318_v8 = vmul.f32 %v5254_v10, %v5254_v10  ;;  %v5412_v16 = vsel %vm26_vm1, %v5317_v39, 0.0  ;;  %v5259_v10 = vsub.f32 %v18993_v53, %v19095_v15 }
 0x5f3   :  { %v5405_v48 = vadd.f32 %v5404_v12, %v5403_v40  ;;  %v5319_v12 = vmul.f32 %v5255_v41, %v5255_v41  ;;  %v5414_v35 = vsel %vm26_vm1, %v5318_v8, 0.0  ;;  %v5260_v41 = vsub.f32 %v18991_v52, %v19095_v15 }
 0x5f5   :  { %v5407_v60 = vadd.f32 %v5406_v46, %v5405_v48  ;;  %v5320_v46 = vmul.f32 %v5256_v42, %v5256_v42  ;;  %v5416_v36 = vsel %vm26_vm1, %v5319_v12, 0.0  ;;  %v5261_v42 = vsub.f32 %v19001_v6, %v19095_v15 }
 0x5f7   :  { %v5409_v24 = vadd.f32 %v5408_v38, %v5407_v60  ;;  %v5321_v38 = vmul.f32 %v5257_v61, %v5257_v61  ;;  %v5418_v39 = vsel %vm26_vm1, %v5320_v46, 0.0  ;;  %v5262_v61 = vsub.f32 %v18999_v3, %v19095_v15 }
 0x5f9   :  { %v5411_v40 = vadd.f32 %v5410_v23, %v5409_v24  ;;  %v5322_v23 = vmul.f32 %v5258_v44, %v5258_v44  ;;  %v5420_v8 = vsel %vm26_vm1, %v5321_v38, 0.0  ;;  %v5263_v44 = vsub.f32 %v19009_v9, %v19095_v15 }
 0x5fb   :  { %v5413_v48 = vadd.f32 %v5412_v16, %v5411_v40  ;;  %v5323_v16 = vmul.f32 %v5259_v10, %v5259_v10  ;;  %v5422_v12 = vsel %vm26_vm1, %v5322_v23, 0.0  ;;  %v5264_v10 = vsub.f32 %v19007_v7, %v19095_v15 }
 0x5fd   :  { %v5415_v60 = vadd.f32 %v5414_v35, %v5413_v48  ;;  %v5324_v35 = vmul.f32 %v5260_v41, %v5260_v41  ;;  %v5424_v46 = vsel %vm26_vm1, %v5323_v16, 0.0  ;;  %v5265_v41 = vsub.f32 %v19017_v22, %v19095_v15 }
 0x5ff   :  { %v5417_v24 = vadd.f32 %v5416_v36, %v5415_v60  ;;  %v5325_v36 = vmul.f32 %v5261_v42, %v5261_v42  ;;  %v5426_v38 = vsel %vm26_vm1, %v5324_v35, 0.0  ;;  %v5266_v42 = vsub.f32 %v19015_v21, %v19095_v15 }
 0x601   :  { %v5419_v40 = vadd.f32 %v5418_v39, %v5417_v24  ;;  %v5326_v39 = vmul.f32 %v5262_v61, %v5262_v61  ;;  %v5428_v23 = vsel %vm26_vm1, %v5325_v36, 0.0  ;;  %v5267_v61 = vsub.f32 %v19025_v49, %v19095_v15 }
 0x602   :  { %v5330_v22 = vmul.f32 %v5266_v42, %v5266_v42 }
 0x603   :  { %v5421_v48 = vadd.f32 %v5420_v8, %v5419_v40  ;;  %v5327_v8 = vmul.f32 %v5263_v44, %v5263_v44  ;;  %v5430_v16 = vsel %vm26_vm1, %v5326_v39, 0.0  ;;  %v5331_v21 = vmul.f32 %v5267_v61, %v5267_v61 }
 0x605   :  { %v5423_v60 = vadd.f32 %v5422_v12, %v5421_v48  ;;  %v5328_v12 = vmul.f32 %v5264_v10, %v5264_v10  ;;  %v5432_v35 = vsel %vm26_vm1, %v5327_v8, 0.0  ;;  %v5438_v8 = vsel %vm26_vm1, %v5330_v22, 0.0 }
 0x607   :  { %v5425_v24 = vadd.f32 %v5424_v46, %v5423_v60  ;;  %v5329_v46 = vmul.f32 %v5265_v41, %v5265_v41  ;;  %v5434_v36 = vsel %vm26_vm1, %v5328_v12, 0.0  ;;  %v5440_v12 = vsel %vm26_vm1, %v5331_v21, 0.0 }
 0x609   :  { %v5427_v40 = vadd.f32 %v5426_v38, %v5425_v24  ;;  %v23591_v38 = vld [vmem:[#allocation73_spill] sm:$0xff]  ;;  %v5436_v39 = vsel %vm26_vm1, %v5329_v46, 0.0 }
 0x60a   :  { %v5268_v44 = vsub.f32 %v23591_v38, %v19095_v15 }
 0x60b   :  { %v5429_v48 = vadd.f32 %v5428_v23, %v5427_v40  ;;  %v23592_v23 = vld [vmem:[#allocation76_spill] sm:$0xff] }
 0x60c   :  { %v5269_v10 = vsub.f32 %v23592_v23, %v19095_v15  ;;  %v5332_v49 = vmul.f32 %v5268_v44, %v5268_v44 }
 0x60d   :  { %v5431_v60 = vadd.f32 %v5430_v16, %v5429_v48  ;;  %v23593_v16 = vld [vmem:[#allocation75_spill] sm:$0xff] }
 0x60e   :  { %v5270_v41 = vsub.f32 %v23593_v16, %v19095_v15  ;;  %v5333_v38 = vmul.f32 %v5269_v10, %v5269_v10  ;;  %v5442_v46 = vsel %vm26_vm1, %v5332_v49, 0.0 }
 0x60f   :  { %v5433_v24 = vadd.f32 %v5432_v35, %v5431_v60  ;;  %v23594_v35 = vld [vmem:[#allocation78_spill] sm:$0xff] }
 0x610   :  { %v5271_v42 = vsub.f32 %v23594_v35, %v19095_v15  ;;  %v5334_v23 = vmul.f32 %v5270_v41, %v5270_v41  ;;  %v5444_v22 = vsel %vm26_vm1, %v5333_v38, 0.0 }
 0x611   :  { %v5435_v40 = vadd.f32 %v5434_v36, %v5433_v24  ;;  %v23595_v36 = vld [vmem:[#allocation77_spill] sm:$0xff] }
 0x612   :  { %v5272_v61 = vsub.f32 %v23595_v36, %v19095_v15  ;;  %v5335_v16 = vmul.f32 %v5271_v42, %v5271_v42  ;;  %v5446_v21 = vsel %vm26_vm1, %v5334_v23, 0.0 }
 0x613   :  { %v5437_v48 = vadd.f32 %v5436_v39, %v5435_v40  ;;  %v23596_v39 = vld [vmem:[#allocation80_spill] sm:$0xff] }
 0x614   :  { %v5273_v44 = vsub.f32 %v23596_v39, %v19095_v15  ;;  %v5336_v35 = vmul.f32 %v5272_v61, %v5272_v61  ;;  %v5448_v49 = vsel %vm26_vm1, %v5335_v16, 0.0 }
 0x615   :  { %v5439_v60 = vadd.f32 %v5438_v8, %v5437_v48  ;;  %v23597_v8 = vld [vmem:[#allocation79_spill] sm:$0xff] }
 0x616   :  { %v5274_v10 = vsub.f32 %v23597_v8, %v19095_v15  ;;  %v5337_v36 = vmul.f32 %v5273_v44, %v5273_v44  ;;  %v5450_v38 = vsel %vm26_vm1, %v5336_v35, 0.0 }
 0x617   :  { %v5441_v24 = vadd.f32 %v5440_v12, %v5439_v60  ;;  %v23598_v12 = vld [vmem:[#allocation82_spill] sm:$0xff] }
 0x618   :  { %v5275_v41 = vsub.f32 %v23598_v12, %v19095_v15  ;;  %v5338_v39 = vmul.f32 %v5274_v10, %v5274_v10  ;;  %v5452_v23 = vsel %vm26_vm1, %v5337_v36, 0.0 }
 0x619   :  { %v5443_v40 = vadd.f32 %v5442_v46, %v5441_v24  ;;  %v23599_v46 = vld [vmem:[#allocation81_spill] sm:$0xff] }
 0x61a   :  { %v5276_v42 = vsub.f32 %v23599_v46, %v19095_v15  ;;  %v5339_v8 = vmul.f32 %v5275_v41, %v5275_v41  ;;  %v5454_v16 = vsel %vm26_vm1, %v5338_v39, 0.0 }
 0x61b   :  { %v5445_v48 = vadd.f32 %v5444_v22, %v5443_v40  ;;  %v23600_v22 = vld [vmem:[#allocation84_spill] sm:$0xff] }
 0x61c   :  { %v5277_v61 = vsub.f32 %v23600_v22, %v19095_v15  ;;  %v5340_v12 = vmul.f32 %v5276_v42, %v5276_v42  ;;  %v5456_v35 = vsel %vm26_vm1, %v5339_v8, 0.0 }
 0x61d   :  { %v5447_v60 = vadd.f32 %v5446_v21, %v5445_v48  ;;  %v23601_v21 = vld [vmem:[#allocation83_spill] sm:$0xff] }
 0x61e   :  { %v5278_v44 = vsub.f32 %v23601_v21, %v19095_v15  ;;  %v5341_v46 = vmul.f32 %v5277_v61, %v5277_v61  ;;  %v5458_v36 = vsel %vm26_vm1, %v5340_v12, 0.0 }
 0x61f   :  { %v5449_v24 = vadd.f32 %v5448_v49, %v5447_v60  ;;  %v23602_v49 = vld [vmem:[#allocation86_spill] sm:$0xff] }
 0x620   :  { %v5279_v10 = vsub.f32 %v23602_v49, %v19095_v15  ;;  %v5342_v22 = vmul.f32 %v5278_v44, %v5278_v44  ;;  %v5460_v39 = vsel %vm26_vm1, %v5341_v46, 0.0  ;;  %v5283_v44 = vsub.f32 %v19089_v59, %v19095_v15 }
 0x621   :  { %v5451_v40 = vadd.f32 %v5450_v38, %v5449_v24  ;;  %v23603_v38 = vld [vmem:[#allocation85_spill] sm:$0xff] }
 0x622   :  { %v5280_v41 = vsub.f32 %v23603_v38, %v19095_v15  ;;  %v5343_v21 = vmul.f32 %v5279_v10, %v5279_v10  ;;  %v5462_v8 = vsel %vm26_vm1, %v5342_v22, 0.0  ;;  %v5284_v10 = vsub.f32 %v19087_v58, %v19095_v15  ;;  %v11985_v22 = vld [vmem:[%s23308_s2 + $0xc] sm:$0xf] }
 0x623   :  { %v5453_v48 = vadd.f32 %v5452_v23, %v5451_v40  ;;  %v23604_v23 = vld [vmem:[#allocation88_spill] sm:$0xff]  ;;  %14630 = vmatprep.subr.msk.mxu1 %vm23441_vm0, %v11985_v22 }
 0x624   :  { %v5281_v42 = vsub.f32 %v23604_v23, %v19095_v15  ;;  %v5344_v49 = vmul.f32 %v5280_v41, %v5280_v41  ;;  %v5464_v12 = vsel %vm26_vm1, %v5343_v21, 0.0  ;;  %v19292_v21 = vld [vmem:[%s23308_s2] sm:$0xf]  ;;  %14631 = vmatpush3.msk.msra.mxu1 %vm23441_vm0, %v11985_v22  ;;  %v5496_v22 = vlaneseq }
 0x625   :  { %v5455_v60 = vadd.f32 %v5454_v16, %v5453_v48  ;;  %v23605_v16 = vld [vmem:[#allocation87_spill] sm:$0xff]  ;;  %23606 = vst [vmem:[#allocation85_spill] sm:$0xff] %v19292_v21  ;;  %14728 = vmatprep.subr.msk.mxu1 %vm23441_vm0, %v19292_v21 }
 0x626   :  { %v5282_v61 = vsub.f32 %v23605_v16, %v19095_v15  ;;  %v5466_v46 = vsel %vm26_vm1, %v5344_v49, 0.0  ;;  %v5497_v23 = vshrl.u32 %v5496_v22, 7 }
 0x627   :  { %v5457_v24 = vadd.f32 %v5456_v35, %v5455_v60  ;;  %v5345_v35 = vmul.f32 %v5281_v42, %v5281_v42  ;;  %v5348_v42 = vmul.f32 %v5284_v10, %v5284_v10 }
 0x629   :  { %v5459_v40 = vadd.f32 %v5458_v36, %v5457_v24  ;;  %v5346_v36 = vmul.f32 %v5282_v61, %v5282_v61  ;;  %v5468_v41 = vsel %vm26_vm1, %v5345_v35, 0.0 }
 0x62b   :  { %v5461_v48 = vadd.f32 %v5460_v39, %v5459_v40  ;;  %v5347_v39 = vmul.f32 %v5283_v44, %v5283_v44 }
 0x62d   :  { %v5463_v60 = vadd.f32 %v5462_v8, %v5461_v48  ;;  %v5470_v48 = vsel %vm26_vm1, %v5346_v36, 0.0  ;;  %v5472_v61 = vsel %vm26_vm1, %v5347_v39, 0.0 }
 0x62f   :  { %v5465_v24 = vadd.f32 %v5464_v12, %v5463_v60  ;;  %v5474_v60 = vsel %vm26_vm1, %v5348_v42, 0.0  ;;  %v5490_v42 = vld [vmem:[%s23309_s3] sm:$0x1] }
 0x631   :  { %v5467_v40 = vadd.f32 %v5466_v46, %v5465_v24 }
 0x633   :  { %v5469_v16 = vadd.f32 %v5468_v41, %v5467_v40 }
 0x635   :  { %v5471_v49 = vadd.f32 %v5470_v48, %v5469_v16 }
 0x637   :  { %v5473_v8 = vadd.f32 %v5472_v61, %v5471_v49  ;;  %v19304_v61 = vsub.s32 0, %v5497_v23 }
 0x639   :  { %v5475_v44 = vadd.f32 %v5474_v60, %v5473_v8  ;;  %23607 = vst [vmem:[#allocation90_spill] sm:$0xff] %v19304_v61  ;;  %v5492_v60 = vld [vmem:[%s23310_s4] sm:$0x1] }
 0x63b   :  { %v5476_v35 = vrot.slane %v5475_v44, 4 }
 0x63d   :  { %v5477_v12 = vadd.f32 %v5476_v35, %v5475_v44 }
 0x63f   :  { %v5478_v24 = vrot.slane %v5477_v12, 2 }
 0x641   :  { %v5479_v10 = vadd.f32 %v5478_v24, %v5477_v12 }
 0x643   :  { %v5480_v46 = vrot.slane %v5479_v10, 1 }
 0x645   :  { %v5481_v36 = vadd.f32 %v5480_v46, %v5479_v10 }
 0x647   :  { %v5482_v40 = vmul.f32 0.001953125, %v5481_v36  ;;  %v23610_v36 = vld [vmem:[#allocation68_spill] sm:$0xff] }
 0x649   :  { %v5483_v41 = vadd.f32 1e-05, %v5482_v40 }
 0x64b   :  { %16537 = vrsqrt.f32 %v5483_v41  ;;  %v5485_v16 = vmul.f32 0.5, %v5483_v41 }
 0x655   :  { %v16538_v48 = vpop.eup %16537 }
 0x656   :  { %v5486_v39 = vmul.f32 %v16538_v48, %v5485_v16 }
 0x658   :  { %v5487_v58 = vmul.f32 %v16538_v48, %v5486_v39 }
 0x65a   :  { %v5488_v21 = vsub.f32 1.5, %v5487_v58 }
 0x65c   :  { %v5489_v49 = vmul.f32 %v16538_v48, %v5488_v21  ;;  %v23608_v21 = vld [vmem:[#allocation70_spill] sm:$0xff] }
 0x65e   :  { %v5491_v8 = vmul.f32 %v5490_v42, %v5489_v49 }
 0x660   :  { %v5493_v44 = vmul.f32 %v5491_v8, %v19095_v15  ;;  %v19311_v35 = vrot.slane %v5491_v8, %v19304_v61  ;;  %v23609_v15 = vld [vmem:[#allocation69_spill] sm:$0xff] }
 0x662   :  { %v5494_v12 = vsub.f32 %v5492_v60, %v5493_v44  ;;  %v5563_v58 = vmul.f32 %v19311_v35, %v19089_v59  ;;  %v19317_v24 = vmul.f32 %v19311_v35, %v18843_v32  ;;  %v19321_v23 = vmul.f32 %v18839_v26, %v19311_v35  ;;  %v23611_v59 = vld [vmem:[#allocation67_spill] sm:$0xff]  ;;  %v23612_v60 = vld [vmem:[#allocation72_spill] sm:$0xff] }
 0x663   :  { %v19325_v10 = vmul.f32 %v19311_v35, %v23608_v21  ;;  %v19329_v46 = vmul.f32 %v23609_v15, %v19311_v35  ;;  %v19333_v40 = vmul.f32 %v19311_v35, %v23610_v36  ;;  %v19337_v32 = vmul.f32 %v23611_v59, %v19311_v35  ;;  %v23613_v44 = vld [vmem:[#allocation71_spill] sm:$0xff]  ;;  %v23616_v21 = vld [vmem:[#allocation76_spill] sm:$0xff]  ;;  %v23618_v59 = vld [vmem:[#allocation78_spill] sm:$0xff] }
 0x664   :  { %v19340_v41 = vrot.slane %v5494_v12, %v19304_v61  ;;  %v19344_v26 = vmul.f32 %v19311_v35, %v18865_v51  ;;  %v19348_v16 = vmul.f32 %v18863_v50, %v19311_v35  ;;  %v19352_v22 = vmul.f32 %v19311_v35, %v18873_v57  ;;  %v23614_v12 = vld [vmem:[#allocation74_spill] sm:$0xff]  ;;  %v23617_v15 = vld [vmem:[#allocation75_spill] sm:$0xff]  ;;  %v23627_v61 = vld [vmem:[#allocation81_spill] sm:$0xff] }
 0x665   :  { %v19356_v48 = vmul.f32 %v18871_v56, %v19311_v35  ;;  %v19360_v39 = vmul.f32 %v19311_v35, %v18881_v63  ;;  %v19364_v51 = vmul.f32 %v18879_v62, %v19311_v35  ;;  %v19368_v50 = vmul.f32 %v19311_v35, %v18889_v28 }
 0x666   :  { %v5633_v42 = vadd.f32 %v19340_v41, %v5563_v58  ;;  %v19373_v57 = vmul.f32 %v18887_v25, %v19311_v35  ;;  %v19377_v56 = vmul.f32 %v19311_v35, %v18897_v31  ;;  %v19381_v63 = vmul.f32 %v18895_v30, %v19311_v35  ;;  %v23615_v58 = vld [vmem:[#allocation73_spill] sm:$0xff] }
 0x667   :  { %v19385_v62 = vmul.f32 %v19311_v35, %v18905_v4  ;;  %v19389_v28 = vmul.f32 %v18903_v11, %v19311_v35  ;;  %v19393_v25 = vmul.f32 %v19311_v35, %v18913_v14  ;;  %v19397_v31 = vmul.f32 %v18911_v13, %v19311_v35 }
 0x668   :  { %vm5697_vm3 = vcmp.ge.f32.partialorder %v5633_v42, 0.0  ;;  %v5761_v49 = vmul.f32 0.2, %v5633_v42  ;;  %v19401_v30 = vmul.f32 %v19311_v35, %v18921_v20  ;;  %v19405_v4 = vmul.f32 %v18919_v19, %v19311_v35 }
 0x669   :  { %v19409_v11 = vmul.f32 %v19311_v35, %v18929_v33  ;;  %v19413_v14 = vmul.f32 %v18927_v27, %v19311_v35  ;;  %v19417_v13 = vmul.f32 %v19311_v35, %v18937_v45  ;;  %v19421_v20 = vmul.f32 %v18935_v43, %v19311_v35 }
 0x66a   :  { %v5825_v8 = vsel %vm5697_vm3, %v5633_v42, %v5761_v49  ;;  %v19425_v19 = vmul.f32 %v19311_v35, %v18945_v55  ;;  %v19429_v33 = vmul.f32 %v18943_v54, %v19311_v35  ;;  %v19433_v27 = vmul.f32 %v19311_v35, %v18953_v1  ;;  %v23620_v49 = vld [vmem:[#allocation77_spill] sm:$0xff] }
 0x66b   :  { %5889 = vst.msk [vmem:[#allocation2 + $0x331] sm:$0xff] %vm26_vm1, %v5825_v8  ;;  %v19438_v45 = vmul.f32 %v18951_v0, %v19311_v35  ;;  %v19442_v43 = vmul.f32 %v19311_v35, %v18961_v29  ;;  %v19446_v55 = vmul.f32 %v18959_v5, %v19311_v35  ;;  %v19450_v54 = vmul.f32 %v19311_v35, %v18969_v47 }
 0x66c   :  { %v19454_v1 = vmul.f32 %v18967_v2, %v19311_v35  ;;  %v19458_v0 = vmul.f32 %v19311_v35, %v18977_v18  ;;  %v19462_v29 = vmul.f32 %v18975_v17, %v19311_v35  ;;  %v19466_v5 = vmul.f32 %v19311_v35, %v18985_v37 }
 0x66d   :  { %v19470_v47 = vmul.f32 %v18983_v34, %v19311_v35  ;;  %v19474_v2 = vmul.f32 %v19311_v35, %v18993_v53  ;;  %v19478_v18 = vmul.f32 %v18991_v52, %v19311_v35  ;;  %v19482_v17 = vmul.f32 %v19311_v35, %v19001_v6 }
 0x66e   :  { %v19486_v37 = vmul.f32 %v18999_v3, %v19311_v35  ;;  %v19490_v34 = vmul.f32 %v19311_v35, %v19009_v9  ;;  %v19494_v53 = vmul.f32 %v19007_v7, %v19311_v35  ;;  %v19498_v52 = vmul.f32 %v19311_v35, %v23612_v60  ;;  %v23622_v60 = vld [vmem:[#allocation80_spill] sm:$0xff] }
 0x66f   :  { %v19502_v6 = vmul.f32 %v23613_v44, %v19311_v35  ;;  %v19506_v3 = vmul.f32 %v19311_v35, %v23614_v12  ;;  %v19510_v9 = vmul.f32 %v23615_v58, %v19311_v35  ;;  %v19514_v7 = vmul.f32 %v19311_v35, %v23616_v21  ;;  %v23624_v12 = vld [vmem:[#allocation79_spill] sm:$0xff]  ;;  %v23625_v21 = vld [vmem:[#allocation82_spill] sm:$0xff] }
 0x670   :  { %v19518_v36 = vmul.f32 %v23617_v15, %v19311_v35  ;;  %v19522_v42 = vmul.f32 %v19311_v35, %v23618_v59  ;;  %v19526_v8 = vmul.f32 %v23620_v49, %v19311_v35  ;;  %v19530_v44 = vmul.f32 %v19311_v35, %v23622_v60 }
 0x671   :  { %v19534_v58 = vmul.f32 %v23624_v12, %v19311_v35  ;;  %v19538_v15 = vmul.f32 %v19311_v35, %v23625_v21  ;;  %v19542_v59 = vmul.f32 %v23627_v61, %v19311_v35  ;;  %v19558_v21 = vmul.f32 %v23603_v38, %v19311_v35 }
 0x672   :  { %23619 = vst [vmem:[#allocation70_spill] sm:$0xff] %v19522_v42  ;;  %23621 = vst [vmem:[#allocation69_spill] sm:$0xff] %v19526_v8  ;;  %v23629_v42 = vld [vmem:[#allocation84_spill] sm:$0xff]  ;;  %v23631_v8 = vld [vmem:[#allocation83_spill] sm:$0xff]  ;;  %v19578_v38 = vadd.f32 %v19340_v41, %v19321_v23  ;;  %v19598_v23 = vadd.f32 %v19340_v41, %v19344_v26  ;;  %v19618_v26 = vadd.f32 %v19340_v41, %v19364_v51 }
 0x673   :  { %23623 = vst [vmem:[#allocation68_spill] sm:$0xff] %v19530_v44  ;;  %23626 = vst [vmem:[#allocation67_spill] sm:$0xff] %v19538_v15  ;;  %v19546_v49 = vmul.f32 %v19311_v35, %v23629_v42  ;;  %v19550_v60 = vmul.f32 %v23631_v8, %v19311_v35  ;;  %v23632_v44 = vld [vmem:[#allocation86_spill] sm:$0xff]  ;;  %v23633_v15 = vld [vmem:[#allocation88_spill] sm:$0xff]  ;;  %v19638_v51 = vadd.f32 %v19340_v41, %v19385_v62 }
 0x674   :  { %23628 = vst [vmem:[#allocation72_spill] sm:$0xff] %v19542_v59  ;;  %v19554_v12 = vmul.f32 %v19311_v35, %v23632_v44  ;;  %v19562_v61 = vmul.f32 %v19311_v35, %v23633_v15  ;;  %v23634_v59 = vld [vmem:[#allocation87_spill] sm:$0xff]  ;;  %v19574_v44 = vadd.f32 %v19340_v41, %v19317_v24  ;;  %v19582_v15 = vadd.f32 %v19340_v41, %v19325_v10 }
 0x675   :  { %23630 = vst [vmem:[#allocation71_spill] sm:$0xff] %v19546_v49  ;;  %v19566_v42 = vmul.f32 %v23634_v59, %v19311_v35  ;;  %v23635_v49 = vld [vmem:[#allocation89_spill] sm:$0xff]  ;;  %v19586_v59 = vadd.f32 %v19340_v41, %v19329_v46  ;;  %v19594_v24 = vadd.f32 %v19340_v41, %v19337_v32  ;;  %v19602_v10 = vadd.f32 %v19340_v41, %v19348_v16 }
 0x676   :  { %v19570_v8 = vmul.f32 %v23635_v49, %v19311_v35  ;;  %v19590_v35 = vadd.f32 %v19340_v41, %v19333_v40  ;;  %v19606_v46 = vadd.f32 %v19340_v41, %v19352_v22  ;;  %v19610_v40 = vadd.f32 %v19340_v41, %v19356_v48 }
 0x677   :  { %v19614_v32 = vadd.f32 %v19340_v41, %v19360_v39  ;;  %v19622_v16 = vadd.f32 %v19340_v41, %v19368_v50  ;;  %v19626_v22 = vadd.f32 %v19340_v41, %v19373_v57  ;;  %v19630_v48 = vadd.f32 %v19340_v41, %v19377_v56 }
 0x678   :  { %v19634_v39 = vadd.f32 %v19340_v41, %v19381_v63  ;;  %v19642_v50 = vadd.f32 %v19340_v41, %v19389_v28  ;;  %v19646_v57 = vadd.f32 %v19340_v41, %v19393_v25  ;;  %v19650_v56 = vadd.f32 %v19340_v41, %v19397_v31 }
 0x679   :  { %v19654_v63 = vadd.f32 %v19340_v41, %v19401_v30  ;;  %v19658_v62 = vadd.f32 %v19340_v41, %v19405_v4  ;;  %v19662_v28 = vadd.f32 %v19340_v41, %v19409_v11  ;;  %v19666_v25 = vadd.f32 %v19340_v41, %v19413_v14  ;;  %v23641_v49 = vld [vmem:[#allocation70_spill] sm:$0xff] }
 0x67a   :  { %v19670_v31 = vadd.f32 %v19340_v41, %v19417_v13  ;;  %v19674_v30 = vadd.f32 %v19340_v41, %v19421_v20  ;;  %v19678_v4 = vadd.f32 %v19340_v41, %v19425_v19  ;;  %v19682_v11 = vadd.f32 %v19340_v41, %v19429_v33 }
 0x67b   :  { %v19686_v14 = vadd.f32 %v19340_v41, %v19433_v27  ;;  %v19690_v13 = vadd.f32 %v19340_v41, %v19438_v45  ;;  %v19694_v20 = vadd.f32 %v19340_v41, %v19442_v43  ;;  %v19698_v19 = vadd.f32 %v19340_v41, %v19446_v55 }
 0x67c   :  { %v19702_v33 = vadd.f32 %v19340_v41, %v19450_v54  ;;  %v19706_v27 = vadd.f32 %v19340_v41, %v19454_v1  ;;  %v19710_v45 = vadd.f32 %v19340_v41, %v19458_v0  ;;  %v19714_v43 = vadd.f32 %v19340_v41, %v19462_v29 }
 0x67d   :  { %v19718_v55 = vadd.f32 %v19340_v41, %v19466_v5  ;;  %v19722_v54 = vadd.f32 %v19340_v41, %v19470_v47  ;;  %v19726_v1 = vadd.f32 %v19340_v41, %v19474_v2  ;;  %v19730_v0 = vadd.f32 %v19340_v41, %v19478_v18 }
 0x67e   :  { %v19734_v29 = vadd.f32 %v19340_v41, %v19482_v17  ;;  %v19738_v5 = vadd.f32 %v19340_v41, %v19486_v37  ;;  %v19742_v47 = vadd.f32 %v19340_v41, %v19490_v34  ;;  %v19746_v2 = vadd.f32 %v19340_v41, %v19494_v53 }
 0x67f   :  { %v19750_v18 = vadd.f32 %v19340_v41, %v19498_v52  ;;  %v19754_v17 = vadd.f32 %v19340_v41, %v19502_v6  ;;  %v19758_v37 = vadd.f32 %v19340_v41, %v19506_v3  ;;  %v19762_v34 = vadd.f32 %v19340_v41, %v19510_v9 }
 0x680   :  { %23636 = vst [vmem:[#allocation74_spill] sm:$0xff] %v19742_v47  ;;  %v19766_v53 = vadd.f32 %v19340_v41, %v19514_v7  ;;  %v19770_v52 = vadd.f32 %v19340_v41, %v19518_v36  ;;  %v19774_v6 = vadd.f32 %v19340_v41, %v23641_v49  ;;  %v19786_v7 = vadd.f32 %v19340_v41, %v19534_v58 }
 0x681   :  { %23637 = vst [vmem:[#allocation73_spill] sm:$0xff] %v19754_v17  ;;  %23638 = vst [vmem:[#allocation76_spill] sm:$0xff] %v19758_v37  ;;  %v23643_v17 = vld [vmem:[#allocation69_spill] sm:$0xff]  ;;  %v23644_v37 = vld [vmem:[#allocation68_spill] sm:$0xff]  ;;  %v19806_v58 = vadd.f32 %v19340_v41, %v19554_v12  ;;  %vm5635_vm4 = vcmp.ge.f32.partialorder %v19574_v44, 0.0  ;;  %vm5636_vm5 = vcmp.ge.f32.partialorder %v19578_v38, 0.0 }
 0x682   :  { %23639 = vst [vmem:[#allocation75_spill] sm:$0xff] %v19766_v53  ;;  %23640 = vst [vmem:[#allocation78_spill] sm:$0xff] %v19770_v52  ;;  %v19778_v3 = vadd.f32 %v19340_v41, %v23643_v17  ;;  %v19782_v9 = vadd.f32 %v19340_v41, %v23644_v37  ;;  %v23647_v53 = vld [vmem:[#allocation67_spill] sm:$0xff]  ;;  %v23649_v52 = vld [vmem:[#allocation72_spill] sm:$0xff]  ;;  %v19802_v37 = vadd.f32 %v19340_v41, %v19550_v60  ;;  %vm5637_vm6 = vcmp.ge.f32.partialorder %v19582_v15, 0.0 }
 0x683   :  { %23642 = vst [vmem:[#allocation77_spill] sm:$0xff] %v19774_v6  ;;  %23646 = vst [vmem:[#allocation79_spill] sm:$0xff] %v19786_v7  ;;  %v19790_v36 = vadd.f32 %v19340_v41, %v23647_v53  ;;  %v19794_v49 = vadd.f32 %v19340_v41, %v23649_v52  ;;  %v23651_v6 = vld [vmem:[#allocation71_spill] sm:$0xff]  ;;  %v19810_v53 = vadd.f32 %v19340_v41, %v19558_v21  ;;  %vm5638_vm7 = vcmp.ge.f32.partialorder %v19586_v59, 0.0 }
 0x684   :  { %23645 = vst [vmem:[#allocation80_spill] sm:$0xff] %v19782_v9  ;;  %v19798_v17 = vadd.f32 %v19340_v41, %v23651_v6  ;;  %23653 = vst [vmem:[#allocation83_spill] sm:$0xff] %v19802_v37  ;;  %v19814_v52 = vadd.f32 %v19340_v41, %v19562_v61  ;;  %v19818_v6 = vadd.f32 %v19340_v41, %v19566_v42  ;;  %vm5639_vm8 = vcmp.ge.f32.partialorder %v19590_v35, 0.0 }
 0x685   :  { %23648 = vst [vmem:[#allocation82_spill] sm:$0xff] %v19790_v36  ;;  %23650 = vst [vmem:[#allocation81_spill] sm:$0xff] %v19794_v49  ;;  %v19822_v60 = vadd.f32 %v19340_v41, %v19570_v8  ;;  %vm5640_vm9 = vcmp.ge.f32.partialorder %v19594_v24, 0.0  ;;  %vm5641_vm10 = vcmp.ge.f32.partialorder %v19598_v23, 0.0  ;;  %vm5642_vm11 = vcmp.ge.f32.partialorder %v19602_v10, 0.0 }
 0x686   :  { %23652 = vst [vmem:[#allocation84_spill] sm:$0xff] %v19798_v17  ;;  %23654 = vst [vmem:[#allocation86_spill] sm:$0xff] %v19806_v58  ;;  %vm5643_vm12 = vcmp.ge.f32.partialorder %v19606_v46, 0.0  ;;  %vm5644_vm13 = vcmp.ge.f32.partialorder %v19610_v40, 0.0  ;;  %v5699_v41 = vmul.f32 0.2, %v19574_v44 }
 0x687   :  { %23655 = vst [vmem:[#allocation88_spill] sm:$0xff] %v19810_v53  ;;  %23656 = vst [vmem:[#allocation87_spill] sm:$0xff] %v19814_v52  ;;  %v5700_v12 = vmul.f32 0.2, %v19578_v38  ;;  %v5701_v21 = vmul.f32 0.2, %v19582_v15 }
 0x688   :  { %23657 = vst [vmem:[#allocation89_spill] sm:$0xff] %v19818_v6  ;;  %23658 = vst [vmem:[#allocation70_spill] sm:$0xff] %v19822_v60  ;;  %vm5645_vm14 = vcmp.ge.f32.partialorder %v19614_v32, 0.0  ;;  %v5702_v61 = vmul.f32 0.2, %v19586_v59  ;;  %vm5646_vm15 = vcmp.ge.f32.partialorder %v19618_v26, 0.0  ;;  %v5763_v53 = vsel %vm5635_vm4, %v19574_v44, %v5699_v41 }
 0x689   :  { %v5703_v42 = vmul.f32 0.2, %v19590_v35  ;;  %v5704_v8 = vmul.f32 0.2, %v19594_v24  ;;  %v5705_v60 = vmul.f32 0.2, %v19598_v23  ;;  %v5764_v49 = vsel %vm5636_vm5, %v19578_v38, %v5700_v12 }
 0x68a   :  { %v5706_v6 = vmul.f32 0.2, %v19602_v10  ;;  %v5707_v52 = vmul.f32 0.2, %v19606_v46  ;;  %vm5647_vm2 = vcmp.ge.f32.partialorder %v19622_v16, 0.0  ;;  %5827 = vst.msk [vmem:[#allocation2 + $0x19] sm:$0xff] %vm26_vm1, %v5763_v53  ;;  %v5765_v7 = vsel %vm5637_vm6, %v19582_v15, %v5701_v21 }
 0x68b   :  { %v5708_v58 = vmul.f32 0.2, %v19610_v40  ;;  %v19851_v37 = vmul.f32 0.2, %v19614_v32  ;;  %v19854_v17 = vmul.f32 0.2, %v19618_v26  ;;  %v5766_v9 = vsel %vm5638_vm7, %v19586_v59, %v5702_v61 }
 0x68c   :  { %vm5648_vm3 = vcmp.ge.f32.partialorder %v19626_v22, 0.0  ;;  %v19862_v44 = vmul.f32 0.2, %v19622_v16  ;;  %v19865_v41 = vmul.f32 0.2, %v19626_v22  ;;  %5828 = vst.msk [vmem:[#allocation2 + $0x21] sm:$0xff] %vm26_vm1, %v5764_v49 }
 0x68d   :  { %v19868_v36 = vmul.f32 0.2, %v19630_v48  ;;  %vm5649_vm4 = vcmp.ge.f32.partialorder %v19630_v48, 0.0  ;;  %v19876_v38 = vmul.f32 0.2, %v19634_v39  ;;  %5829 = vst.msk [vmem:[#allocation2 + $0x31] sm:$0xff] %vm26_vm1, %v5765_v7 }
 0x68e   :  { %v19879_v53 = vmul.f32 0.2, %v19638_v51  ;;  %v19882_v12 = vmul.f32 0.2, %v19642_v50  ;;  %vm5650_vm5 = vcmp.ge.f32.partialorder %v19634_v39, 0.0  ;;  %5830 = vst.msk [vmem:[#allocation2 + $0x39] sm:$0xff] %vm26_vm1, %v5766_v9 }
 0x68f   :  { %v19890_v15 = vmul.f32 0.2, %v19646_v57  ;;  %v19893_v49 = vmul.f32 0.2, %v19650_v56  ;;  %v19896_v21 = vmul.f32 0.2, %v19654_v63 }
 0x690   :  { %23659 = vst [vmem:[#allocation69_spill] sm:$0xff] %v19882_v12  ;;  %v5767_v12 = vsel %vm5639_vm8, %v19590_v35, %v5703_v42  ;;  %vm5651_vm6 = vcmp.ge.f32.partialorder %v19638_v51, 0.0  ;;  %v19904_v59 = vmul.f32 0.2, %v19658_v62  ;;  %v19907_v7 = vmul.f32 0.2, %v19662_v28 }
 0x691   :  { %23660 = vst [vmem:[#allocation68_spill] sm:$0xff] %v19896_v21  ;;  %v19910_v61 = vmul.f32 0.2, %v19666_v25  ;;  %v5768_v21 = vsel %vm5640_vm9, %v19594_v24, %v5704_v8  ;;  %5831 = vst.msk [vmem:[#allocation2 + $0x49] sm:$0xff] %vm26_vm1, %v5767_v12  ;;  %vm5652_vm7 = vcmp.ge.f32.partialorder %v19642_v50, 0.0  ;;  %vm5654_vm9 = vcmp.ge.f32.partialorder %v19650_v56, 0.0 }
 0x692   :  { %v19918_v35 = vmul.f32 0.2, %v19670_v31  ;;  %v19921_v9 = vmul.f32 0.2, %v19674_v30  ;;  %v19924_v42 = vmul.f32 0.2, %v19678_v4 }
 0x693   :  { %23661 = vst [vmem:[#allocation67_spill] sm:$0xff] %v19910_v61  ;;  %v5769_v61 = vsel %vm5641_vm10, %v19598_v23, %v5705_v60  ;;  %5832 = vst.msk [vmem:[#allocation2 + $0x51] sm:$0xff] %vm26_vm1, %v5768_v21  ;;  %v19932_v24 = vmul.f32 0.2, %v19682_v11  ;;  %v19935_v8 = vmul.f32 0.2, %v19686_v14 }
 0x694   :  { %23662 = vst [vmem:[#allocation72_spill] sm:$0xff] %v19924_v42  ;;  %v19938_v12 = vmul.f32 0.2, %v19690_v13  ;;  %v5770_v42 = vsel %vm5642_vm11, %v19602_v10, %v5706_v6  ;;  %5833 = vst.msk [vmem:[#allocation2 + $0x61] sm:$0xff] %vm26_vm1, %v5769_v61  ;;  %v19949_v23 = vmul.f32 0.2, %v19694_v20  ;;  %v5771_v10 = vsel %vm5643_vm12, %v19606_v46, %v5707_v52 }
 0x695   :  { %v19952_v60 = vmul.f32 0.2, %v19698_v19  ;;  %v19955_v21 = vmul.f32 0.2, %v19702_v33  ;;  %5834 = vst.msk [vmem:[#allocation2 + $0x69] sm:$0xff] %vm26_vm1, %v5770_v42  ;;  %vm5658_vm11 = vcmp.ge.f32.partialorder %v19666_v25, 0.0  ;;  %v5772_v46 = vsel %vm5644_vm13, %v19610_v40, %v5708_v58 }
 0x696   :  { %v19966_v6 = vmul.f32 0.2, %v19706_v27  ;;  %v19969_v61 = vmul.f32 0.2, %v19710_v45  ;;  %5835 = vst.msk [vmem:[#allocation2 + $0x79] sm:$0xff] %vm26_vm1, %v5771_v10  ;;  %vm5662_vm12 = vcmp.ge.f32.partialorder %v19682_v11, 0.0  ;;  %v5773_v40 = vsel %vm5645_vm14, %v19614_v32, %v19851_v37 }
 0x697   :  { %23663 = vst [vmem:[#allocation71_spill] sm:$0xff] %v19955_v21  ;;  %v19972_v21 = vmul.f32 0.2, %v19714_v43  ;;  %v19983_v52 = vmul.f32 0.2, %v19718_v55  ;;  %5836 = vst.msk [vmem:[#allocation2 + $0x81] sm:$0xff] %vm26_vm1, %v5772_v46  ;;  %v5774_v32 = vsel %vm5646_vm15, %v19618_v26, %v19854_v17  ;;  %v5775_v26 = vsel %vm5647_vm2, %v19622_v16, %v19862_v44 }
 0x698   :  { %v19986_v42 = vmul.f32 0.2, %v19722_v54  ;;  %vm5666_vm13 = vcmp.ge.f32.partialorder %v19698_v19, 0.0  ;;  %v20001_v58 = vmul.f32 0.2, %v19730_v0  ;;  %5837 = vst.msk [vmem:[#allocation2 + $0x91] sm:$0xff] %vm26_vm1, %v5773_v40  ;;  %v5776_v16 = vsel %vm5648_vm3, %v19626_v22, %v19865_v41 }
 0x699   :  { %23664 = vst [vmem:[#allocation91_spill] sm:$0xff] %v19972_v21  ;;  %v19989_v21 = vmul.f32 0.2, %v19726_v1  ;;  %v20004_v10 = vmul.f32 0.2, %v19734_v29  ;;  %vm5670_vm14 = vcmp.ge.f32.partialorder %v19714_v43, 0.0  ;;  %v5777_v22 = vsel %vm5649_vm4, %v19630_v48, %v19868_v36 }
 0x69a   :  { %v20019_v37 = vmul.f32 0.2, %v19742_v47  ;;  %v20022_v46 = vmul.f32 0.2, %v19746_v2  ;;  %5838 = vst.msk [vmem:[#allocation2 + $0x99] sm:$0xff] %vm26_vm1, %v5774_v32  ;;  %vm5674_vm15 = vcmp.ge.f32.partialorder %v19730_v0, 0.0  ;;  %v5778_v48 = vsel %vm5650_vm5, %v19634_v39, %v19876_v38 }
 0x69b   :  { %23665 = vst [vmem:[#allocation92_spill] sm:$0xff] %v19989_v21  ;;  %v20007_v21 = vmul.f32 0.2, %v19738_v5  ;;  %v23670_v17 = vld [vmem:[#allocation73_spill] sm:$0xff]  ;;  %5839 = vst.msk [vmem:[#allocation2 + $0xa9] sm:$0xff] %vm26_vm1, %v5775_v26  ;;  %vm5678_vm2 = vcmp.ge.f32.partialorder %v19746_v2, 0.0  ;;  %v5779_v39 = vsel %vm5651_vm6, %v19638_v51, %v19879_v53 }
 0x69c   :  { %23667 = vst [vmem:[#allocation94_spill] sm:$0xff] %v20019_v37  ;;  %23668 = vst [vmem:[#allocation95_spill] sm:$0xff] %v20022_v46  ;;  %v20037_v40 = vmul.f32 0.2, %v23670_v17  ;;  %v23672_v46 = vld [vmem:[#allocation76_spill] sm:$0xff]  ;;  %v23675_v44 = vld [vmem:[#allocation75_spill] sm:$0xff] }
 0x69d   :  { %23666 = vst [vmem:[#allocation93_spill] sm:$0xff] %v20007_v21  ;;  %v20025_v21 = vmul.f32 0.2, %v19750_v18  ;;  %v20043_v37 = vmul.f32 0.2, %v19762_v34  ;;  %5840 = vst.msk [vmem:[#allocation2 + $0xb1] sm:$0xff] %vm26_vm1, %v5776_v16 }
 0x69e   :  { %23671 = vst [vmem:[#allocation73_spill] sm:$0xff] %v20037_v40  ;;  %v20055_v32 = vmul.f32 0.2, %v23675_v44  ;;  %v23679_v40 = vld [vmem:[#allocation77_spill] sm:$0xff]  ;;  %vm5682_vm3 = vcmp.ge.f32.partialorder %v19762_v34, 0.0  ;;  %v23682_v26 = vld [vmem:[#allocation80_spill] sm:$0xff] }
 0x69f   :  { %23669 = vst [vmem:[#allocation96_spill] sm:$0xff] %v20025_v21  ;;  %v20040_v21 = vmul.f32 0.2, %v23672_v46  ;;  %23674 = vst [vmem:[#allocation97_spill] sm:$0xff] %v20043_v37  ;;  %v20061_v47 = vmul.f32 0.2, %v23679_v40 }
 0x6a0   :  { %23676 = vst [vmem:[#allocation75_spill] sm:$0xff] %v20055_v32  ;;  %v20073_v41 = vmul.f32 0.2, %v19778_v3  ;;  %5841 = vst.msk [vmem:[#allocation2 + $0xc1] sm:$0xff] %vm26_vm1, %v5777_v22  ;;  %vm5686_vm4 = vcmp.ge.f32.partialorder %v19778_v3, 0.0  ;;  %v23686_v36 = vld [vmem:[#allocation82_spill] sm:$0xff] }
 0x6a1   :  { %23673 = vst [vmem:[#allocation76_spill] sm:$0xff] %v20040_v21  ;;  %v23677_v21 = vld [vmem:[#allocation78_spill] sm:$0xff]  ;;  %23680 = vst [vmem:[#allocation98_spill] sm:$0xff] %v20061_v47  ;;  %v20076_v47 = vmul.f32 0.2, %v23682_v26  ;;  %v23692_v38 = vld [vmem:[#allocation83_spill] sm:$0xff] }
 0x6a2   :  { %v20058_v37 = vmul.f32 0.2, %v23677_v21  ;;  %23681 = vst [vmem:[#allocation99_spill] sm:$0xff] %v20073_v41  ;;  %v20091_v16 = vmul.f32 0.2, %v23686_v36  ;;  %v23690_v41 = vld [vmem:[#allocation84_spill] sm:$0xff] }
 0x6a3   :  { %23683 = vst [vmem:[#allocation80_spill] sm:$0xff] %v20076_v47  ;;  %v23688_v47 = vld [vmem:[#allocation81_spill] sm:$0xff]  ;;  %v20097_v40 = vmul.f32 0.2, %v23690_v41  ;;  %5842 = vst.msk [vmem:[#allocation2 + $0xc9] sm:$0xff] %vm26_vm1, %v5778_v48  ;;  %v23693_v22 = vld [vmem:[#allocation86_spill] sm:$0xff] }
 0x6a4   :  { %23678 = vst [vmem:[#allocation78_spill] sm:$0xff] %v20058_v37  ;;  %v23684_v37 = vld [vmem:[#allocation79_spill] sm:$0xff]  ;;  %23687 = vst [vmem:[#allocation100_spill] sm:$0xff] %v20091_v16  ;;  %vm5690_vm5 = vcmp.ge.f32.partialorder %v23688_v47, 0.0  ;;  %v23695_v36 = vld [vmem:[#allocation88_spill] sm:$0xff]  ;;  %vm23703_vm0 = vcmp.ge.f32.partialorder %v19654_v63, 0.0 }
 0x6a5   :  { %v20079_v32 = vmul.f32 0.2, %v23684_v37  ;;  %23691 = vst [vmem:[#allocation101_spill] sm:$0xff] %v20097_v40  ;;  %v20112_v40 = vmul.f32 0.2, %v23693_v22  ;;  %v23697_v51 = vld [vmem:[#allocation69_spill] sm:$0xff] }
 0x6a6   :  { %v20115_v16 = vmul.f32 0.2, %v23695_v36  ;;  %v5780_v53 = vsel %vm5652_vm7, %v19642_v50, %v23697_v51  ;;  %5843 = vst.msk [vmem:[#allocation2 + $0xd9] sm:$0xff] %vm26_vm1, %v5779_v39  ;;  %vm5694_vm6 = vcmp.ge.f32.partialorder %v23695_v36, 0.0  ;;  %v23698_v48 = vld [vmem:[#allocation87_spill] sm:$0xff]  ;;  %v23699_v41 = vld [vmem:[#allocation89_spill] sm:$0xff]  ;;  %v5782_v39 = vsel %vm5654_vm9, %v19650_v56, %v19893_v49 }
 0x6a7   :  { %23685 = vst [vmem:[#allocation79_spill] sm:$0xff] %v20079_v32  ;;  %v20094_v32 = vmul.f32 0.2, %v23688_v47  ;;  %23694 = vst [vmem:[#allocation102_spill] sm:$0xff] %v20112_v40  ;;  %vm5695_vm8 = vcmp.ge.f32.partialorder %v23698_v48, 0.0  ;;  %vm23701_vm7 = vcmp.ge.f32.partialorder %v19646_v57, 0.0 }
 0x6a8   :  { %23696 = vst [vmem:[#allocation88_spill] sm:$0xff] %v20115_v16  ;;  %v20127_v22 = vmul.f32 0.2, %v23698_v48  ;;  %v20130_v16 = vmul.f32 0.2, %v23699_v41  ;;  %v5781_v50 = vsel %vm23701_vm7, %v19646_v57, %v19890_v15  ;;  %5844 = vst.msk [vmem:[#allocation2 + $0xe1] sm:$0xff] %vm26_vm1, %v5780_v53 }
 0x6a9   :  { %23689 = vst [vmem:[#allocation81_spill] sm:$0xff] %v20094_v32  ;;  %v20109_v32 = vmul.f32 0.2, %v23692_v38  ;;  %v23700_v38 = vld [vmem:[#allocation70_spill] sm:$0xff]  ;;  %v23702_v51 = vld [vmem:[#allocation68_spill] sm:$0xff]  ;;  %vm23704_vm10 = vcmp.ge.f32.partialorder %v19658_v62, 0.0 }
 0x6aa   :  { %v20133_v40 = vmul.f32 0.2, %v23700_v38  ;;  %v5783_v41 = vsel %vm23703_vm0, %v19654_v63, %v23702_v51  ;;  %v5784_v38 = vsel %vm23704_vm10, %v19658_v62, %v19904_v59  ;;  %vm23705_vm7 = vcmp.ge.f32.partialorder %v19662_v28, 0.0  ;;  %5845 = vst.msk [vmem:[#allocation2 + $0xf1] sm:$0xff] %vm26_vm1, %v5781_v50  ;;  %v20157_v15 = vld [vmem:[#allocation2 + $0x18] sm:$0xff]  ;;  %v20159_v56 = vld [vmem:[#allocation2 + $0x20] sm:$0xff] }
 0x6ab   :  { %v5785_v57 = vsel %vm23705_vm7, %v19662_v28, %v19907_v7  ;;  %v23706_v49 = vld [vmem:[#allocation67_spill] sm:$0xff]  ;;  %vm23707_vm0 = vcmp.ge.f32.partialorder %v19670_v31, 0.0  ;;  %vm23708_vm9 = vcmp.ge.f32.partialorder %v19674_v30, 0.0  ;;  %v23709_v59 = vld [vmem:[#allocation72_spill] sm:$0xff]  ;;  %vm23710_vm10 = vcmp.ge.f32.partialorder %v19678_v4, 0.0  ;;  %5846 = vst.msk [vmem:[#allocation2 + $0xf9] sm:$0xff] %vm26_vm1, %v5782_v39  ;;  %14632 = vmatprep.mubr.msk.f32.mxu1 %vm26_vm1, %v20157_v15 }
 0x6ac   :  { %v5786_v63 = vsel %vm5658_vm11, %v19666_v25, %v23706_v49  ;;  %v5787_v62 = vsel %vm23707_vm0, %v19670_v31, %v19918_v35  ;;  %v5788_v28 = vsel %vm23708_vm9, %v19674_v30, %v19921_v9  ;;  %v5789_v7 = vsel %vm23710_vm10, %v19678_v4, %v23709_v59  ;;  %5847 = vst.msk [vmem:[#allocation2 + $0x109] sm:$0xff] %vm26_vm1, %v5783_v41  ;;  %v23720_v9 = vld [vmem:[#allocation91_spill] sm:$0xff]  ;;  %v23741_v50 = vld [vmem:[#allocation78_spill] sm:$0xff]  ;;  %v23751_v59 = vld [vmem:[#allocation100_spill] sm:$0xff] }
 0x6ad   :  { %5848 = vst.msk [vmem:[#allocation2 + $0x111] sm:$0xff] %vm26_vm1, %v5784_v38  ;;  %5849 = vst.msk [vmem:[#allocation2 + $0x121] sm:$0xff] %vm26_vm1, %v5785_v57  ;;  %v5790_v25 = vsel %vm5662_vm12, %v19682_v11, %v19932_v24  ;;  %vm23711_vm11 = vcmp.ge.f32.partialorder %v19686_v14, 0.0  ;;  %vm23712_vm7 = vcmp.ge.f32.partialorder %v19690_v13, 0.0  ;;  %vm23713_vm0 = vcmp.ge.f32.partialorder %v19694_v20, 0.0  ;;  %14633 = vmatmul.mubr.msk.f32.vlgmr.msra.gmra.mrb[0].mxu1 %vm26_vm1, %v20159_v56  ;;  %v23739_v38 = vld [vmem:[#allocation75_spill] sm:$0xff] }
 0x6ae   :  { %v5791_v31 = vsel %vm23711_vm11, %v19686_v14, %v19935_v8  ;;  %v5792_v30 = vsel %vm23712_vm7, %v19690_v13, %v19938_v12  ;;  %v5793_v4 = vsel %vm23713_vm0, %v19694_v20, %v19949_v23  ;;  %5850 = vst.msk [vmem:[#allocation2 + $0x129] sm:$0xff] %vm26_vm1, %v5786_v63  ;;  %5851 = vst.msk [vmem:[#allocation2 + $0x139] sm:$0xff] %vm26_vm1, %v5787_v62  ;;  %v23714_v14 = vld [vmem:[#allocation71_spill] sm:$0xff]  ;;  %vm23715_vm12 = vcmp.ge.f32.partialorder %v19702_v33, 0.0  ;;  %v23723_v8 = vld [vmem:[#allocation92_spill] sm:$0xff] }
 0x6af   :  { %5852 = vst.msk [vmem:[#allocation2 + $0x141] sm:$0xff] %vm26_vm1, %v5788_v28  ;;  %5853 = vst.msk [vmem:[#allocation2 + $0x151] sm:$0xff] %vm26_vm1, %v5789_v7  ;;  %v5794_v11 = vsel %vm5666_vm13, %v19698_v19, %v19952_v60  ;;  %v5795_v13 = vsel %vm23715_vm12, %v19702_v33, %v23714_v14  ;;  %vm23716_vm9 = vcmp.ge.f32.partialorder %v19706_v27, 0.0  ;;  %vm23717_vm10 = vcmp.ge.f32.partialorder %v19710_v45, 0.0  ;;  %v23718_v19 = vld [vmem:[#allocation85_spill] sm:$0xff]  ;;  %v23728_v23 = vld [vmem:[#allocation94_spill] sm:$0xff] }
 0x6b0   :  { %v5796_v20 = vsel %vm23716_vm9, %v19706_v27, %v19966_v6  ;;  %v5797_v35 = vsel %vm23717_vm10, %v19710_v45, %v19969_v61  ;;  %5854 = vst.msk [vmem:[#allocation2 + $0x159] sm:$0xff] %vm26_vm1, %v5790_v25  ;;  %5855 = vst.msk [vmem:[#allocation2 + $0x169] sm:$0xff] %vm26_vm1, %v5791_v31  ;;  %vm23719_vm13 = vcmask 1043456   ;;  %v20227_v33 = vld [vmem:[#allocation2 + $0x30] sm:$0xff]  ;;  %v5798_v27 = vsel %vm5670_vm14, %v19714_v43, %v23720_v9  ;;  %v23729_v60 = vld [vmem:[#allocation74_spill] sm:$0xff] }
 0x6b1   :  { %5856 = vst.msk [vmem:[#allocation2 + $0x171] sm:$0xff] %vm26_vm1, %v5792_v30  ;;  %5857 = vst.msk [vmem:[#allocation2 + $0x181] sm:$0xff] %vm26_vm1, %v5793_v4  ;;  %14729 = vmatpush3.msk.msra.mxu1 %vm23719_vm13, %v23718_v19  ;;  %vm23721_vm11 = vcmp.ge.f32.partialorder %v19718_v55, 0.0  ;;  %vm23722_vm7 = vcmp.ge.f32.partialorder %v19722_v54, 0.0  ;;  %vm23724_vm0 = vcmp.ge.f32.partialorder %v19726_v1, 0.0  ;;  %14635 = vmatprep.mubr.msk.f32.mxu1 %vm26_vm1, %v20227_v33  ;;  %v5802_v43 = vsel %vm5674_vm15, %v19730_v0, %v20001_v58  ;;  %v20271_v0 = vld [vmem:[#allocation2 + $0x38] sm:$0xff] }
 0x6b2   :  { %v5799_v45 = vsel %vm23721_vm11, %v19718_v55, %v19983_v52  ;;  %v5800_v24 = vsel %vm23722_vm7, %v19722_v54, %v19986_v42  ;;  %v5801_v12 = vsel %vm23724_vm0, %v19726_v1, %v23723_v8  ;;  %5858 = vst.msk [vmem:[#allocation2 + $0x189] sm:$0xff] %vm26_vm1, %v5794_v11  ;;  %5859 = vst.msk [vmem:[#allocation2 + $0x1c9] sm:$0xff] %vm26_vm1, %v5795_v13  ;;  %vm23725_vm14 = vcmp.ge.f32.partialorder %v19734_v29, 0.0  ;;  %v23726_v54 = vld [vmem:[#allocation93_spill] sm:$0xff]  ;;  %v23732_v61 = vld [vmem:[#allocation96_spill] sm:$0xff] }
 0x6b3   :  { %5860 = vst.msk [vmem:[#allocation2 + $0x1d1] sm:$0xff] %vm26_vm1, %v5796_v20  ;;  %5861 = vst.msk [vmem:[#allocation2 + $0x1e1] sm:$0xff] %vm26_vm1, %v5797_v35  ;;  %v5803_v55 = vsel %vm23725_vm14, %v19734_v29, %v20004_v10  ;;  %vm23727_vm12 = vcmp.ge.f32.partialorder %v19738_v5, 0.0  ;;  %vm23730_vm9 = vcmp.ge.f32.partialorder %v23729_v60, 0.0  ;;  %v23731_v29 = vld [vmem:[#allocation95_spill] sm:$0xff]  ;;  %vm23733_vm15 = vcmp.ge.f32.partialorder %v19750_v18, 0.0  ;;  %14636 = vmatmul.mubr.msk.f32.gmra.mrb[2].mxu1 %vm26_vm1, %v20271_v0 }
 0x6b4   :  { %v5804_v1 = vsel %vm23727_vm12, %v19738_v5, %v23726_v54  ;;  %v5805_v6 = vsel %vm23730_vm9, %v23729_v60, %v23728_v23  ;;  %5862 = vst.msk [vmem:[#allocation2 + $0x1e9] sm:$0xff] %vm26_vm1, %v5798_v27  ;;  %5863 = vst.msk [vmem:[#allocation2 + $0x1f9] sm:$0xff] %vm26_vm1, %v5799_v45  ;;  %v5806_v5 = vsel %vm5678_vm2, %v19746_v2, %v23731_v29  ;;  %v23734_v42 = vld [vmem:[#allocation73_spill] sm:$0xff]  ;;  %vm23735_vm10 = vcmp.ge.f32.partialorder %v23670_v17, 0.0  ;;  %v23736_v10 = vld [vmem:[#allocation76_spill] sm:$0xff] }
 0x6b5   :  { %5864 = vst.msk [vmem:[#allocation2 + $0x201] sm:$0xff] %vm26_vm1, %v5800_v24  ;;  %5865 = vst.msk [vmem:[#allocation2 + $0x211] sm:$0xff] %vm26_vm1, %v5801_v12  ;;  %v5807_v52 = vsel %vm23733_vm15, %v19750_v18, %v23732_v61  ;;  %v5808_v58 = vsel %vm23735_vm10, %v23670_v17, %v23734_v42  ;;  %vm23737_vm13 = vcmp.ge.f32.partialorder %v23672_v46, 0.0  ;;  %v20295_v2 = vld [vmem:[#allocation2 + $0x48] sm:$0xff]  ;;  %v20300_v18 = vld [vmem:[%s23308_s2 + $0x18] sm:$0xf]  ;;  %v5823_v19 = vsel %vm5695_vm8, %v23698_v48, %v20127_v22 }
 0x6b6   :  { %v5809_v41 = vsel %vm23737_vm13, %v23672_v46, %v23736_v10  ;;  %5866 = vst.msk [vmem:[#allocation2 + $0x219] sm:$0xff] %vm26_vm1, %v5802_v43  ;;  %5867 = vst.msk [vmem:[#allocation2 + $0x229] sm:$0xff] %vm26_vm1, %v5803_v55  ;;  %v23738_v17 = vld [vmem:[#allocation97_spill] sm:$0xff]  ;;  %vm23740_vm2 = vcmp.ge.f32.partialorder %v23675_v44, 0.0  ;;  %vm23742_vm11 = vcmp.ge.f32.partialorder %v23677_v21, 0.0  ;;  %v23743_v51 = vld [vmem:[#allocation98_spill] sm:$0xff]  ;;  %14638 = vmatprep.mubr.msk.f32.mxu1 %vm26_vm1, %v20295_v2 }
 0x6b7   :  { %5868 = vst.msk [vmem:[#allocation2 + $0x231] sm:$0xff] %vm26_vm1, %v5804_v1  ;;  %5869 = vst.msk [vmem:[#allocation2 + $0x241] sm:$0xff] %vm26_vm1, %v5805_v6  ;;  %v5810_v46 = vsel %vm5682_vm3, %v19762_v34, %v23738_v17  ;;  %v5811_v53 = vsel %vm23740_vm2, %v23675_v44, %v23739_v38  ;;  %v5812_v39 = vsel %vm23742_vm11, %v23677_v21, %v23741_v50  ;;  %v23744_v57 = vld [vmem:[#allocation77_spill] sm:$0xff]  ;;  %v23746_v34 = vld [vmem:[#allocation99_spill] sm:$0xff]  ;;  %vm23748_vm3 = vcmp.ge.f32.partialorder %v23682_v26, 0.0 }
 0x6b8   :  { %vm23745_vm7 = vcmp.ge.f32.partialorder %v23744_v57, 0.0  ;;  %5870 = vst.msk [vmem:[#allocation2 + $0x249] sm:$0xff] %vm26_vm1, %v5806_v5  ;;  %5871 = vst.msk [vmem:[#allocation2 + $0x259] sm:$0xff] %vm26_vm1, %v5807_v52  ;;  %v5814_v21 = vsel %vm5686_vm4, %v19778_v3, %v23746_v34  ;;  %v23747_v44 = vld [vmem:[#allocation80_spill] sm:$0xff]  ;;  %v23749_v62 = vld [vmem:[#allocation79_spill] sm:$0xff]  ;;  %vm23750_vm0 = vcmp.ge.f32.partialorder %v23684_v37, 0.0 }
 0x6b9   :  { %v5813_v49 = vsel %vm23745_vm7, %v23744_v57, %v23743_v51  ;;  %5872 = vst.msk [vmem:[#allocation2 + $0x261] sm:$0xff] %vm26_vm1, %v5808_v58  ;;  %5873 = vst.msk [vmem:[#allocation2 + $0x271] sm:$0xff] %vm26_vm1, %v5809_v41  ;;  %v5815_v63 = vsel %vm23748_vm3, %v23682_v26, %v23747_v44  ;;  %v5816_v28 = vsel %vm23750_vm0, %v23684_v37, %v23749_v62  ;;  %v23752_v7 = vld [vmem:[#allocation82_spill] sm:$0xff]  ;;  %vm23754_vm4 = vcmask 1043456   ;;  %v23755_v3 = vld [vmem:[#allocation81_spill] sm:$0xff] }
 0x6ba   :  { %vm23753_vm14 = vcmp.ge.f32.partialorder %v23752_v7, 0.0  ;;  %5874 = vst.msk [vmem:[#allocation2 + $0x279] sm:$0xff] %vm26_vm1, %v5810_v46  ;;  %5875 = vst.msk [vmem:[#allocation2 + $0x289] sm:$0xff] %vm26_vm1, %v5811_v53  ;;  %14826 = vmatprep.subr.msk.mxu1 %vm23754_vm4, %v20300_v18  ;;  %v5818_v37 = vsel %vm5690_vm5, %v23688_v47, %v23755_v3  ;;  %v23756_v26 = vld [vmem:[#allocation101_spill] sm:$0xff]  ;;  %v23757_v31 = vld [vmem:[#allocation84_spill] sm:$0xff] }
 0x6bb   :  { %v5817_v25 = vsel %vm23753_vm14, %v23752_v7, %v23751_v59  ;;  %5876 = vst.msk [vmem:[#allocation2 + $0x291] sm:$0xff] %vm26_vm1, %v5812_v39  ;;  %5877 = vst.msk [vmem:[#allocation2 + $0x2a1] sm:$0xff] %vm26_vm1, %v5813_v49  ;;  %vm23758_vm12 = vcmp.ge.f32.partialorder %v23757_v31, 0.0  ;;  %v23759_v4 = vld [vmem:[#allocation83_spill] sm:$0xff]  ;;  %v23761_v14 = vld [vmem:[#allocation102_spill] sm:$0xff] }
 0x6bc   :  { %v5819_v30 = vsel %vm23758_vm12, %v23757_v31, %v23756_v26  ;;  %vm23760_vm9 = vcmp.ge.f32.partialorder %v23759_v4, 0.0  ;;  %v23762_v13 = vld [vmem:[#allocation86_spill] sm:$0xff]  ;;  %5878 = vst.msk [vmem:[#allocation2 + $0x2a9] sm:$0xff] %vm26_vm1, %v5814_v21  ;;  %5879 = vst.msk [vmem:[#allocation2 + $0x2b9] sm:$0xff] %vm26_vm1, %v5815_v63  ;;  %v20366_v47 = vld [vmem:[#allocation2 + $0x50] sm:$0xff] }
 0x6bd   :  { %v5820_v11 = vsel %vm23760_vm9, %v23759_v4, %v20109_v32  ;;  %vm23763_vm15 = vcmp.ge.f32.partialorder %v23762_v13, 0.0  ;;  %5880 = vst.msk [vmem:[#allocation2 + $0x2c1] sm:$0xff] %vm26_vm1, %v5816_v28  ;;  %5881 = vst.msk [vmem:[#allocation2 + $0x2d1] sm:$0xff] %vm26_vm1, %v5817_v25  ;;  %v23764_v35 = vld [vmem:[#allocation88_spill] sm:$0xff]  ;;  %v23765_v9 = vld [vmem:[#allocation89_spill] sm:$0xff]  ;;  %14639 = vmatmul.mubr.msk.f32.gmra.mrb[4].mxu1 %vm26_vm1, %v20366_v47 }
 0x6be   :  { %v5821_v20 = vsel %vm23763_vm15, %v23762_v13, %v23761_v14  ;;  %v5822_v32 = vsel %vm5694_vm6, %v23695_v36, %v23764_v35  ;;  %vm23766_vm5 = vcmp.ge.f32.partialorder %v23765_v9, 0.0  ;;  %v23767_v45 = vld [vmem:[#allocation70_spill] sm:$0xff]  ;;  %5882 = vst.msk [vmem:[#allocation2 + $0x2d9] sm:$0xff] %vm26_vm1, %v5818_v37  ;;  %5883 = vst.msk [vmem:[#allocation2 + $0x2e9] sm:$0xff] %vm26_vm1, %v5819_v30  ;;  %v20390_v36 = vld [vmem:[#allocation2 + $0x60] sm:$0xff] }
 0x6bf   :  { %v5824_v27 = vsel %vm23766_vm5, %v23765_v9, %v20130_v16  ;;  %vm23768_vm10 = vcmp.ge.f32.partialorder %v23767_v45, 0.0  ;;  %5884 = vst.msk [vmem:[#allocation2 + $0x2f1] sm:$0xff] %vm26_vm1, %v5820_v11  ;;  %5885 = vst.msk [vmem:[#allocation2 + $0x301] sm:$0xff] %vm26_vm1, %v5821_v20  ;;  %14641 = vmatprep.mubr.msk.f32.mxu1 %vm26_vm1, %v20390_v36  ;;  %v20402_v16 = vld [vmem:[#allocation2 + $0x78] sm:$0xff]  ;;  %v20406_v22 = vld [vmem:[#allocation2 + $0x80] sm:$0xff] }
 0x6c0   :  { %v5826_v24 = vsel %vm23768_vm10, %v23767_v45, %v20133_v40  ;;  %5886 = vst.msk [vmem:[#allocation2 + $0x309] sm:$0xff] %vm26_vm1, %v5822_v32  ;;  %5887 = vst.msk [vmem:[#allocation2 + $0x319] sm:$0xff] %vm26_vm1, %v5823_v19  ;;  %v20398_v40 = vld [vmem:[#allocation2 + $0x68] sm:$0xff]  ;;  %v20410_v48 = vld [vmem:[#allocation2 + $0x90] sm:$0xff] }
 0x6c1   :  { %5888 = vst.msk [vmem:[#allocation2 + $0x321] sm:$0xff] %vm26_vm1, %v5824_v27  ;;  %5890 = vst.msk [vmem:[#allocation2 + $0x339] sm:$0xff] %vm26_vm1, %v5826_v24  ;;  %14642 = vmatmul.mubr.msk.f32.gmra.mrb[6].mxu1 %vm26_vm1, %v20398_v40  ;;  %v20414_v8 = vld [vmem:[#allocation2 + $0x98] sm:$0xff]  ;;  %v20418_v12 = vld [vmem:[#allocation2 + $0xa8] sm:$0xff] }
 0x6c2   :  { %14644 = vmatprep.mubr.msk.f32.mxu1 %vm26_vm1, %v20402_v16  ;;  %v20422_v43 = vld [vmem:[#allocation2 + $0xb0] sm:$0xff]  ;;  %v20426_v55 = vld [vmem:[#allocation2 + $0xc0] sm:$0xff]  ;;  %v20430_v54 = vld [vmem:[#allocation2 + $0xc8] sm:$0xff] }
 0x6c3   :  { %v20434_v1 = vld [vmem:[#allocation2 + $0xd8] sm:$0xff]  ;;  %v20438_v23 = vld [vmem:[#allocation2 + $0xe0] sm:$0xff]  ;;  %v20442_v60 = vld [vmem:[#allocation2 + $0xf0] sm:$0xff] }
 0x6c4   :  { %v20446_v6 = vld [vmem:[#allocation2 + $0xf8] sm:$0xff]  ;;  %v20450_v29 = vld [vmem:[#allocation2 + $0x108] sm:$0xff]  ;;  %v20454_v5 = vld [vmem:[#allocation2 + $0x110] sm:$0xff] }
 0x6c5   :  { %14645 = vmatmul.mubr.msk.f32.gmra.mrb[8].mxu1 %vm26_vm1, %v20406_v22  ;;  %v20458_v61 = vld [vmem:[#allocation2 + $0x120] sm:$0xff]  ;;  %v20462_v52 = vld [vmem:[#allocation2 + $0x128] sm:$0xff]  ;;  %v20466_v42 = vld [vmem:[#allocation2 + $0x138] sm:$0xff] }
 0x6c6   :  { %14647 = vmatprep.mubr.msk.f32.mxu1 %vm26_vm1, %v20410_v48  ;;  %v20470_v58 = vld [vmem:[#allocation2 + $0x140] sm:$0xff]  ;;  %v20474_v10 = vld [vmem:[#allocation2 + $0x150] sm:$0xff]  ;;  %v20478_v41 = vld [vmem:[#allocation2 + $0x158] sm:$0xff] }
 0x6c7   :  { %v20482_v17 = vld [vmem:[#allocation2 + $0x168] sm:$0xff]  ;;  %v20486_v46 = vld [vmem:[#allocation2 + $0x170] sm:$0xff]  ;;  %v20490_v38 = vld [vmem:[#allocation2 + $0x180] sm:$0xff] }
 0x6c8   :  { %23769 = vst [vmem:[#allocation69_spill] sm:$0xff] %v20490_v38  ;;  %v20494_v53 = vld [vmem:[#allocation2 + $0x188] sm:$0xff]  ;;  %v20502_v39 = vld [vmem:[#allocation2 + $0x1d0] sm:$0xff]  ;;  %v20506_v51 = vld [vmem:[#allocation2 + $0x1e0] sm:$0xff] }
 0x6c9   :  { %14648 = vmatmul.mubr.msk.f32.gmra.mrb[10].mxu1 %vm26_vm1, %v20414_v8  ;;  %23770 = vst [vmem:[#allocation87_spill] sm:$0xff] %v20494_v53  ;;  %v20498_v50 = vld [vmem:[#allocation2 + $0x1c8] sm:$0xff]  ;;  %v20514_v49 = vld [vmem:[#allocation2 + $0x1f8] sm:$0xff]  ;;  %v20518_v34 = vld [vmem:[#allocation2 + $0x200] sm:$0xff] }
 0x6ca   :  { %14650 = vmatprep.mubr.msk.f32.mxu1 %vm26_vm1, %v20418_v12  ;;  %v20510_v57 = vld [vmem:[#allocation2 + $0x1e8] sm:$0xff]  ;;  %v20522_v21 = vld [vmem:[#allocation2 + $0x210] sm:$0xff]  ;;  %v20526_v44 = vld [vmem:[#allocation2 + $0x218] sm:$0xff] }
 0x6cb   :  { %v20530_v63 = vld [vmem:[#allocation2 + $0x228] sm:$0xff]  ;;  %v20534_v62 = vld [vmem:[#allocation2 + $0x230] sm:$0xff]  ;;  %v20538_v28 = vld [vmem:[#allocation2 + $0x240] sm:$0xff] }
 0x6cc   :  { %v20542_v59 = vld [vmem:[#allocation2 + $0x248] sm:$0xff]  ;;  %v20546_v7 = vld [vmem:[#allocation2 + $0x258] sm:$0xff]  ;;  %v20550_v25 = vld [vmem:[#allocation2 + $0x260] sm:$0xff] }
 0x6cd   :  { %14651 = vmatmul.mubr.msk.f32.gmra.mrb[12].mxu1 %vm26_vm1, %v20422_v43  ;;  %v20554_v3 = vld [vmem:[#allocation2 + $0x270] sm:$0xff]  ;;  %v20558_v37 = vld [vmem:[#allocation2 + $0x278] sm:$0xff]  ;;  %v20562_v26 = vld [vmem:[#allocation2 + $0x288] sm:$0xff] }
 0x6ce   :  { %14653 = vmatprep.mubr.msk.f32.mxu1 %vm26_vm1, %v20426_v55  ;;  %v20566_v31 = vld [vmem:[#allocation2 + $0x290] sm:$0xff]  ;;  %v20570_v30 = vld [vmem:[#allocation2 + $0x2a0] sm:$0xff]  ;;  %v20574_v4 = vld [vmem:[#allocation2 + $0x2a8] sm:$0xff] }
 0x6cf   :  { %v20578_v11 = vld [vmem:[#allocation2 + $0x2b8] sm:$0xff]  ;;  %v20582_v14 = vld [vmem:[#allocation2 + $0x2c0] sm:$0xff]  ;;  %v20586_v13 = vld [vmem:[#allocation2 + $0x2d0] sm:$0xff] }
 0x6d0   :  { %v20590_v20 = vld [vmem:[#allocation2 + $0x2d8] sm:$0xff]  ;;  %v20594_v35 = vld [vmem:[#allocation2 + $0x2e8] sm:$0xff]  ;;  %v20598_v32 = vld [vmem:[#allocation2 + $0x2f0] sm:$0xff] }
 0x6d1   :  { %14654 = vmatmul.mubr.msk.f32.gmra.mrb[14].mxu1 %vm26_vm1, %v20430_v54  ;;  %v20602_v19 = vld [vmem:[#allocation2 + $0x300] sm:$0xff]  ;;  %v20606_v9 = vld [vmem:[#allocation2 + $0x308] sm:$0xff]  ;;  %v20610_v27 = vld [vmem:[#allocation2 + $0x318] sm:$0xff] }
 0x6d2   :  { %14656 = vmatprep.mubr.msk.f32.mxu1 %vm26_vm1, %v20434_v1  ;;  %23771 = vst [vmem:[#allocation68_spill] sm:$0xff] %v20606_v9  ;;  %23772 = vst [vmem:[#allocation67_spill] sm:$0xff] %v20610_v27  ;;  %v20614_v45 = vld [vmem:[#allocation2 + $0x320] sm:$0xff]  ;;  %v20618_v24 = vld [vmem:[#allocation2 + $0x330] sm:$0xff] }
 0x6d3   :  { %vm23773_vm8 = vmmov %vm23754_vm4 }
 0x6d4   :  { %vm23774_vm6 = vmmov %vm23754_vm4 }
 0x6d5   :  { %14657 = vmatmul.mubr.msk.f32.gmra.mrb[16].mxu1 %vm26_vm1, %v20438_v23  ;;  %vm23777_vm13 = vmmov %vm23754_vm4 }
 0x6d6   :  { %14659 = vmatprep.mubr.msk.f32.mxu1 %vm26_vm1, %v20442_v60  ;;  %vm23778_vm2 = vmmov %vm23754_vm4 }
 0x6d7   :  { %vm23781_vm11 = vmmov %vm23778_vm2 }
 0x6d8   :  { %vm23782_vm7 = vmmov %vm23778_vm2 }
 0x6d9   :  { %14660 = vmatmul.mubr.msk.f32.gmra.mrb[18].mxu1 %vm26_vm1, %v20446_v6  ;;  %vm23783_vm3 = vmmov %vm23778_vm2 }
 0x6da   :  { %14662 = vmatprep.mubr.msk.f32.mxu1 %vm26_vm1, %v20450_v29  ;;  %vm23784_vm0 = vmmov %vm23778_vm2 }
 0x6db   :  { %vm23785_vm14 = vmmov %vm23784_vm0 }
 0x6dc   :  { %vm23786_vm4 = vmmov %vm23784_vm0 }
 0x6dd   :  { %14663 = vmatmul.mubr.msk.f32.gmra.mrb[20].mxu1 %vm26_vm1, %v20454_v5  ;;  %vm23787_vm12 = vmmov %vm23784_vm0 }
 0x6de   :  { %14665 = vmatprep.mubr.msk.f32.mxu1 %vm26_vm1, %v20458_v61  ;;  %vm23788_vm9 = vmmov %vm23784_vm0 }
 0x6df   :  { %vm23789_vm15 = vmmov %vm23784_vm0 }
 0x6e1   :  { %14666 = vmatmul.mubr.msk.f32.gmra.mrb[22].mxu1 %vm26_vm1, %v20462_v52 }
 0x6e2   :  { %14668 = vmatprep.mubr.msk.f32.mxu1 %vm26_vm1, %v20466_v42 }
 0x6e5   :  { %14669 = vmatmul.mubr.msk.f32.gmra.mrb[24].mxu1 %vm26_vm1, %v20470_v58 }
 0x6e6   :  { %14671 = vmatprep.mubr.msk.f32.mxu1 %vm26_vm1, %v20474_v10 }
 0x6e9   :  { %14672 = vmatmul.mubr.msk.f32.gmra.mrb[26].mxu1 %vm26_vm1, %v20478_v41 }
 0x6ea   :  { %14674 = vmatprep.mubr.msk.f32.mxu1 %vm26_vm1, %v20482_v17 }
 0x6ed   :  { %14675 = vmatmul.mubr.msk.f32.gmra.mrb[28].mxu1 %vm26_vm1, %v20486_v46 }
 0x6ee   :  { %14677 = vmatprep.mubr.msk.f32.mxu1 %vm26_vm1, %v20490_v38  ;;  %v20622_v38 = vld [vmem:[#allocation2 + $0x338] sm:$0xff] }
 0x6f1   :  { %14678 = vmatmul.mubr.msk.f32.gmra.mrb[30].mxu1 %vm26_vm1, %v20494_v53  ;;  %v5891_v53 = vld [vmem:[#allocation2] sm:$0xff] }
 0x6f2   :  { %14680 = vmatprep.mubr.msk.f32.mxu1 %vm26_vm1, %v20498_v50 }
 0x6f5   :  { %14681 = vmatmul.mubr.msk.f32.gmra.mrb[32].mxu1 %vm26_vm1, %v20502_v39 }
 0x6f6   :  { %14683 = vmatprep.mubr.msk.f32.mxu1 %vm26_vm1, %v20506_v51 }
 0x6f9   :  { %14684 = vmatmul.mubr.msk.f32.gmra.mrb[34].mxu1 %vm26_vm1, %v20510_v57 }
 0x6fa   :  { %14686 = vmatprep.mubr.msk.f32.mxu1 %vm26_vm1, %v20514_v49 }
 0x6fd   :  { %14687 = vmatmul.mubr.msk.f32.gmra.mrb[36].mxu1 %vm26_vm1, %v20518_v34 }
 0x6fe   :  { %14689 = vmatprep.mubr.msk.f32.mxu1 %vm26_vm1, %v20522_v21 }
 0x701   :  { %14690 = vmatmul.mubr.msk.f32.gmra.mrb[38].mxu1 %vm26_vm1, %v20526_v44 }
 0x702   :  { %14692 = vmatprep.mubr.msk.f32.mxu1 %vm26_vm1, %v20530_v63 }
 0x705   :  { %14693 = vmatmul.mubr.msk.f32.gmra.mrb[40].mxu1 %vm26_vm1, %v20534_v62 }
 0x706   :  { %14695 = vmatprep.mubr.msk.f32.mxu1 %vm26_vm1, %v20538_v28 }
 0x709   :  { %14696 = vmatmul.mubr.msk.f32.gmra.mrb[42].mxu1 %vm26_vm1, %v20542_v59 }
 0x70a   :  { %14698 = vmatprep.mubr.msk.f32.mxu1 %vm26_vm1, %v20546_v7 }
 0x70d   :  { %14699 = vmatmul.mubr.msk.f32.gmra.mrb[44].mxu1 %vm26_vm1, %v20550_v25 }
 0x70e   :  { %14701 = vmatprep.mubr.msk.f32.mxu1 %vm26_vm1, %v20554_v3 }
 0x711   :  { %14702 = vmatmul.mubr.msk.f32.gmra.mrb[46].mxu1 %vm26_vm1, %v20558_v37 }
 0x712   :  { %14704 = vmatprep.mubr.msk.f32.mxu1 %vm26_vm1, %v20562_v26 }
 0x715   :  { %14705 = vmatmul.mubr.msk.f32.gmra.mrb[48].mxu1 %vm26_vm1, %v20566_v31 }
 0x716   :  { %14707 = vmatprep.mubr.msk.f32.mxu1 %vm26_vm1, %v20570_v30 }
 0x719   :  { %14708 = vmatmul.mubr.msk.f32.gmra.mrb[50].mxu1 %vm26_vm1, %v20574_v4 }
 0x71a   :  { %14710 = vmatprep.mubr.msk.f32.mxu1 %vm26_vm1, %v20578_v11 }
 0x71d   :  { %14711 = vmatmul.mubr.msk.f32.gmra.mrb[52].mxu1 %vm26_vm1, %v20582_v14 }
 0x71e   :  { %14713 = vmatprep.mubr.msk.f32.mxu1 %vm26_vm1, %v20586_v13 }
 0x721   :  { %14714 = vmatmul.mubr.msk.f32.gmra.mrb[54].mxu1 %vm26_vm1, %v20590_v20 }
 0x722   :  { %14716 = vmatprep.mubr.msk.f32.mxu1 %vm26_vm1, %v20594_v35 }
 0x725   :  { %14717 = vmatmul.mubr.msk.f32.gmra.mrb[56].mxu1 %vm26_vm1, %v20598_v32 }
 0x726   :  { %14719 = vmatprep.mubr.msk.f32.mxu1 %vm26_vm1, %v20602_v19 }
 0x729   :  { %14720 = vmatmul.mubr.msk.f32.gmra.mrb[58].mxu1 %vm26_vm1, %v20606_v9  ;;  %v5892_v9 = vld [vmem:[#allocation2 + $0x8] sm:$0xff] }
 0x72a   :  { %14722 = vmatprep.mubr.msk.f32.mxu1 %vm26_vm1, %v20610_v27  ;;  %v20630_v27 = vld [vmem:[%s23308_s2 + $0x4] sm:$0xf] }
 0x72d   :  { %14723 = vmatmul.mubr.msk.f32.gmra.mrb[60].mxu1 %vm26_vm1, %v20614_v45 }
 0x72e   :  { %14725 = vmatprep.mubr.msk.f32.mxu1 %vm26_vm1, %v20618_v24 }
 0x731   :  { %14726 = vmatmul.mubr.msk.f32.gmra.mrb[62].mxu1 %vm26_vm1, %v20622_v38 }
 0x732   :  { %14730 = vmatprep.mubr.msk.f32.mxu1 %vm26_vm1, %v5891_v53  ;;  %v23776_v53 = vld [vmem:[#allocation67_spill] sm:$0xff] }
 0x735   :  { %14731 = vmatmul.mubr.msk.f32.vlgmr.msra.gmra.mrb[0].mxu1 %vm26_vm1, %v5892_v9  ;;  %v21081_v9 = vld [vmem:[#allocation2 + $0x271] sm:$0xff] }
 0x736   :  { %14827 = vmatpush3.msk.msra.mxu1 %vm23773_vm8, %v20300_v18  ;;  %14733 = vmatprep.mubr.msk.f32.mxu1 %vm26_vm1, %v20157_v15  ;;  %v5927_v15 = vld [vmem:[#allocation2 + $0x1b0] sm:$0xff]  ;;  %v23775_v18 = vld [vmem:[#allocation68_spill] sm:$0xff] }
 0x737   :  { %14924 = vmatprep.subr.msk.mxu1 %vm23774_vm6, %v20630_v27 }
 0x739   :  { %14734 = vmatmul.mubr.msk.f32.gmra.mrb[2].mxu1 %vm26_vm1, %v20159_v56  ;;  %v5928_v56 = vld [vmem:[#allocation2 + $0x1b8] sm:$0xff] }
 0x73a   :  { %14736 = vmatprep.mubr.msk.f32.mxu1 %vm26_vm1, %v20227_v33 }
 0x73d   :  { %14737 = vmatmul.mubr.msk.f32.gmra.mrb[4].mxu1 %vm26_vm1, %v20271_v0 }
 0x73e   :  { %14739 = vmatprep.mubr.msk.f32.mxu1 %vm26_vm1, %v20295_v2 }
 0x741   :  { %14740 = vmatmul.mubr.msk.f32.gmra.mrb[6].mxu1 %vm26_vm1, %v20366_v47 }
 0x742   :  { %14742 = vmatprep.mubr.msk.f32.mxu1 %vm26_vm1, %v20390_v36 }
 0x745   :  { %14743 = vmatmul.mubr.msk.f32.gmra.mrb[8].mxu1 %vm26_vm1, %v20398_v40 }
 0x746   :  { %14745 = vmatprep.mubr.msk.f32.mxu1 %vm26_vm1, %v20402_v16 }
 0x749   :  { %14746 = vmatmul.mubr.msk.f32.gmra.mrb[10].mxu1 %vm26_vm1, %v20406_v22 }
 0x74a   :  { %14748 = vmatprep.mubr.msk.f32.mxu1 %vm26_vm1, %v20410_v48 }
 0x74d   :  { %14749 = vmatmul.mubr.msk.f32.gmra.mrb[12].mxu1 %vm26_vm1, %v20414_v8 }
 0x74e   :  { %14751 = vmatprep.mubr.msk.f32.mxu1 %vm26_vm1, %v20418_v12 }
 0x751   :  { %14752 = vmatmul.mubr.msk.f32.gmra.mrb[14].mxu1 %vm26_vm1, %v20422_v43 }
 0x752   :  { %14754 = vmatprep.mubr.msk.f32.mxu1 %vm26_vm1, %v20426_v55 }
 0x755   :  { %14755 = vmatmul.mubr.msk.f32.gmra.mrb[16].mxu1 %vm26_vm1, %v20430_v54 }
 0x756   :  { %14757 = vmatprep.mubr.msk.f32.mxu1 %vm26_vm1, %v20434_v1 }
 0x759   :  { %14758 = vmatmul.mubr.msk.f32.gmra.mrb[18].mxu1 %vm26_vm1, %v20438_v23 }
 0x75a   :  { %14760 = vmatprep.mubr.msk.f32.mxu1 %vm26_vm1, %v20442_v60 }
 0x75d   :  { %14761 = vmatmul.mubr.msk.f32.gmra.mrb[20].mxu1 %vm26_vm1, %v20446_v6 }
 0x75e   :  { %14763 = vmatprep.mubr.msk.f32.mxu1 %vm26_vm1, %v20450_v29 }
 0x761   :  { %14764 = vmatmul.mubr.msk.f32.gmra.mrb[22].mxu1 %vm26_vm1, %v20454_v5 }
 0x762   :  { %14766 = vmatprep.mubr.msk.f32.mxu1 %vm26_vm1, %v20458_v61 }
 0x765   :  { %14767 = vmatmul.mubr.msk.f32.gmra.mrb[24].mxu1 %vm26_vm1, %v20462_v52 }
 0x766   :  { %14769 = vmatprep.mubr.msk.f32.mxu1 %vm26_vm1, %v20466_v42 }
 0x769   :  { %14770 = vmatmul.mubr.msk.f32.gmra.mrb[26].mxu1 %vm26_vm1, %v20470_v58 }
 0x76a   :  { %14772 = vmatprep.mubr.msk.f32.mxu1 %vm26_vm1, %v20474_v10 }
 0x76d   :  { %14773 = vmatmul.mubr.msk.f32.gmra.mrb[28].mxu1 %vm26_vm1, %v20478_v41 }
 0x76e   :  { %14775 = vmatprep.mubr.msk.f32.mxu1 %vm26_vm1, %v20482_v17 }
 0x771   :  { %14776 = vmatmul.mubr.msk.f32.gmra.mrb[30].mxu1 %vm26_vm1, %v20486_v46 }
 0x772   :  { %14778 = vmatprep.mubr.msk.f32.mxu1 %vm26_vm1, %v5927_v15  ;;  %v21097_v15 = vld [vmem:[#allocation2 + $0x2a1] sm:$0xff] }
 0x775   :  { %14779 = vmatmul.mubr.msk.f32.gmra.mrb[32].mxu1 %vm26_vm1, %v5928_v56  ;;  %v21101_v56 = vld [vmem:[#allocation2 + $0x2a9] sm:$0xff] }
 0x776   :  { %14781 = vmatprep.mubr.msk.f32.mxu1 %vm26_vm1, %v20498_v50  ;;  %v20764_v50 = vld [vmem:[%s23308_s2 + $0x10] sm:$0xf] }
 0x779   :  { %14782 = vmatmul.mubr.msk.f32.gmra.mrb[34].mxu1 %vm26_vm1, %v20502_v39  ;;  %v20983_v39 = vld [vmem:[#allocation2 + $0x109] sm:$0xff] }
 0x77a   :  { %14784 = vmatprep.mubr.msk.f32.mxu1 %vm26_vm1, %v20506_v51 }
 0x77d   :  { %14785 = vmatmul.mubr.msk.f32.gmra.mrb[36].mxu1 %vm26_vm1, %v20510_v57 }
 0x77e   :  { %14787 = vmatprep.mubr.msk.f32.mxu1 %vm26_vm1, %v20514_v49 }
 0x781   :  { %14788 = vmatmul.mubr.msk.f32.gmra.mrb[38].mxu1 %vm26_vm1, %v20518_v34 }
 0x782   :  { %14790 = vmatprep.mubr.msk.f32.mxu1 %vm26_vm1, %v20522_v21 }
 0x785   :  { %14791 = vmatmul.mubr.msk.f32.gmra.mrb[40].mxu1 %vm26_vm1, %v20526_v44 }
 0x786   :  { %14793 = vmatprep.mubr.msk.f32.mxu1 %vm26_vm1, %v20530_v63 }
 0x789   :  { %14794 = vmatmul.mubr.msk.f32.gmra.mrb[42].mxu1 %vm26_vm1, %v20534_v62 }
 0x78a   :  { %14796 = vmatprep.mubr.msk.f32.mxu1 %vm26_vm1, %v20538_v28 }
 0x78d   :  { %14797 = vmatmul.mubr.msk.f32.gmra.mrb[44].mxu1 %vm26_vm1, %v20542_v59 }
 0x78e   :  { %14799 = vmatprep.mubr.msk.f32.mxu1 %vm26_vm1, %v20546_v7 }
 0x791   :  { %14800 = vmatmul.mubr.msk.f32.gmra.mrb[46].mxu1 %vm26_vm1, %v20550_v25 }
 0x792   :  { %14802 = vmatprep.mubr.msk.f32.mxu1 %vm26_vm1, %v20554_v3 }
 0x795   :  { %14803 = vmatmul.mubr.msk.f32.gmra.mrb[48].mxu1 %vm26_vm1, %v20558_v37 }
 0x796   :  { %14805 = vmatprep.mubr.msk.f32.mxu1 %vm26_vm1, %v20562_v26 }
 0x799   :  { %14806 = vmatmul.mubr.msk.f32.gmra.mrb[50].mxu1 %vm26_vm1, %v20566_v31 }
 0x79a   :  { %14808 = vmatprep.mubr.msk.f32.mxu1 %vm26_vm1, %v20570_v30 }
 0x79d   :  { %14809 = vmatmul.mubr.msk.f32.gmra.mrb[52].mxu1 %vm26_vm1, %v20574_v4 }
 0x79e   :  { %14811 = vmatprep.mubr.msk.f32.mxu1 %vm26_vm1, %v20578_v11 }
 0x7a1   :  { %14812 = vmatmul.mubr.msk.f32.gmra.mrb[54].mxu1 %vm26_vm1, %v20582_v14 }
 0x7a2   :  { %14814 = vmatprep.mubr.msk.f32.mxu1 %vm26_vm1, %v20586_v13 }
 0x7a5   :  { %14815 = vmatmul.mubr.msk.f32.gmra.mrb[56].mxu1 %vm26_vm1, %v20590_v20 }
 0x7a6   :  { %14817 = vmatprep.mubr.msk.f32.mxu1 %vm26_vm1, %v20594_v35 }
 0x7a9   :  { %14818 = vmatmul.mubr.msk.f32.gmra.mrb[58].mxu1 %vm26_vm1, %v20598_v32 }
 0x7aa   :  { %14820 = vmatprep.mubr.msk.f32.mxu1 %vm26_vm1, %v20602_v19 }
 0x7ad   :  { %14821 = vmatmul.mubr.msk.f32.gmra.mrb[60].mxu1 %vm26_vm1, %v23775_v18 }
 0x7ae   :  { %14823 = vmatprep.mubr.msk.f32.mxu1 %vm26_vm1, %v23776_v53 }
 0x7b1   :  { %14824 = vmatmul.mubr.msk.f32.gmra.mrb[62].mxu1 %vm26_vm1, %v20614_v45 }
 0x7b2   :  { %14828 = vmatprep.mubr.msk.f32.mxu1 %vm26_vm1, %v20227_v33  ;;  %v23779_v33 = vld [vmem:[#allocation69_spill] sm:$0xff] }
 0x7b5   :  { %14829 = vmatmul.mubr.msk.f32.vlgmr.msra.gmra.mrb[0].mxu1 %vm26_vm1, %v20271_v0  ;;  %v5925_v0 = vld [vmem:[#allocation2 + $0x198] sm:$0xff] }
 0x7b6   :  { %14925 = vmatpush3.msk.msra.mxu1 %vm23777_vm13, %v20630_v27  ;;  %14831 = vmatprep.mubr.msk.f32.mxu1 %vm26_vm1, %v20295_v2  ;;  %v23780_v2 = vld [vmem:[#allocation87_spill] sm:$0xff] }
 0x7b7   :  { %15022 = vmatprep.subr.msk.mxu1 %vm23778_vm2, %v20764_v50  ;;  %v21085_v27 = vld [vmem:[#allocation2 + $0x279] sm:$0xff] }
 0x7b9   :  { %14832 = vmatmul.mubr.msk.f32.gmra.mrb[2].mxu1 %vm26_vm1, %v20366_v47  ;;  %v5926_v47 = vld [vmem:[#allocation2 + $0x1a0] sm:$0xff] }
 0x7ba   :  { %14834 = vmatprep.mubr.msk.f32.mxu1 %vm26_vm1, %v20390_v36  ;;  %v5961_v36 = vld [vmem:[#allocation2 + $0x348] sm:$0xff] }
 0x7bd   :  { %14835 = vmatmul.mubr.msk.f32.gmra.mrb[4].mxu1 %vm26_vm1, %v20398_v40  ;;  %v5962_v40 = vld [vmem:[#allocation2 + $0x350] sm:$0xff] }
 0x7be   :  { %14837 = vmatprep.mubr.msk.f32.mxu1 %vm26_vm1, %v20402_v16  ;;  %v7412_v16 = vld [vmem:[#allocation2 + $0x1] sm:$0xff] }
 0x7c1   :  { %14838 = vmatmul.mubr.msk.f32.gmra.mrb[6].mxu1 %vm26_vm1, %v20406_v22  ;;  %v7413_v22 = vld [vmem:[#allocation2 + $0x9] sm:$0xff] }
 0x7c2   :  { %14840 = vmatprep.mubr.msk.f32.mxu1 %vm26_vm1, %v20410_v48  ;;  %v20896_v48 = vld [vmem:[%s23308_s2 + $0x1c] sm:$0xf] }
 0x7c5   :  { %14841 = vmatmul.mubr.msk.f32.gmra.mrb[8].mxu1 %vm26_vm1, %v20414_v8  ;;  %v20899_v8 = vld [vmem:[#allocation2 + $0x19] sm:$0xff] }
 0x7c6   :  { %14843 = vmatprep.mubr.msk.f32.mxu1 %vm26_vm1, %v20418_v12  ;;  %v20907_v12 = vld [vmem:[#allocation2 + $0x21] sm:$0xff] }
 0x7c9   :  { %14844 = vmatmul.mubr.msk.f32.gmra.mrb[10].mxu1 %vm26_vm1, %v20422_v43  ;;  %v20911_v43 = vld [vmem:[#allocation2 + $0x31] sm:$0xff] }
 0x7ca   :  { %14846 = vmatprep.mubr.msk.f32.mxu1 %vm26_vm1, %v20426_v55  ;;  %v20915_v55 = vld [vmem:[#allocation2 + $0x39] sm:$0xff] }
 0x7cd   :  { %14847 = vmatmul.mubr.msk.f32.gmra.mrb[12].mxu1 %vm26_vm1, %v20430_v54  ;;  %v20919_v54 = vld [vmem:[#allocation2 + $0x49] sm:$0xff] }
 0x7ce   :  { %14849 = vmatprep.mubr.msk.f32.mxu1 %vm26_vm1, %v20434_v1  ;;  %v20923_v1 = vld [vmem:[#allocation2 + $0x51] sm:$0xff] }
 0x7d1   :  { %14850 = vmatmul.mubr.msk.f32.gmra.mrb[14].mxu1 %vm26_vm1, %v20438_v23  ;;  %v20927_v23 = vld [vmem:[#allocation2 + $0x61] sm:$0xff] }
 0x7d2   :  { %14852 = vmatprep.mubr.msk.f32.mxu1 %vm26_vm1, %v20442_v60  ;;  %v20931_v60 = vld [vmem:[#allocation2 + $0x69] sm:$0xff] }
 0x7d5   :  { %14853 = vmatmul.mubr.msk.f32.gmra.mrb[16].mxu1 %vm26_vm1, %v20446_v6  ;;  %v20935_v6 = vld [vmem:[#allocation2 + $0x79] sm:$0xff] }
 0x7d6   :  { %14855 = vmatprep.mubr.msk.f32.mxu1 %vm26_vm1, %v20450_v29  ;;  %v20939_v29 = vld [vmem:[#allocation2 + $0x81] sm:$0xff] }
 0x7d9   :  { %14856 = vmatmul.mubr.msk.f32.gmra.mrb[18].mxu1 %vm26_vm1, %v20454_v5  ;;  %v20943_v5 = vld [vmem:[#allocation2 + $0x91] sm:$0xff] }
 0x7da   :  { %14858 = vmatprep.mubr.msk.f32.mxu1 %vm26_vm1, %v20458_v61  ;;  %v20947_v61 = vld [vmem:[#allocation2 + $0x99] sm:$0xff] }
 0x7dd   :  { %14859 = vmatmul.mubr.msk.f32.gmra.mrb[20].mxu1 %vm26_vm1, %v20462_v52  ;;  %v20951_v52 = vld [vmem:[#allocation2 + $0xa9] sm:$0xff] }
 0x7de   :  { %14861 = vmatprep.mubr.msk.f32.mxu1 %vm26_vm1, %v20466_v42  ;;  %v20955_v42 = vld [vmem:[#allocation2 + $0xb1] sm:$0xff] }
 0x7e1   :  { %14862 = vmatmul.mubr.msk.f32.gmra.mrb[22].mxu1 %vm26_vm1, %v20470_v58  ;;  %v20959_v58 = vld [vmem:[#allocation2 + $0xc1] sm:$0xff] }
 0x7e2   :  { %14864 = vmatprep.mubr.msk.f32.mxu1 %vm26_vm1, %v20474_v10  ;;  %v20963_v10 = vld [vmem:[#allocation2 + $0xc9] sm:$0xff] }
 0x7e5   :  { %14865 = vmatmul.mubr.msk.f32.gmra.mrb[24].mxu1 %vm26_vm1, %v20478_v41  ;;  %v20967_v41 = vld [vmem:[#allocation2 + $0xd9] sm:$0xff] }
 0x7e6   :  { %14867 = vmatprep.mubr.msk.f32.mxu1 %vm26_vm1, %v20482_v17  ;;  %v20971_v17 = vld [vmem:[#allocation2 + $0xe1] sm:$0xff] }
 0x7e9   :  { %14868 = vmatmul.mubr.msk.f32.gmra.mrb[26].mxu1 %vm26_vm1, %v20486_v46  ;;  %v20975_v46 = vld [vmem:[#allocation2 + $0xf1] sm:$0xff] }
 0x7ea   :  { %14870 = vmatprep.mubr.msk.f32.mxu1 %vm26_vm1, %v23779_v33  ;;  %v21117_v33 = vld [vmem:[#allocation2 + $0x2d9] sm:$0xff] }
 0x7ed   :  { %14871 = vmatmul.mubr.msk.f32.gmra.mrb[28].mxu1 %vm26_vm1, %v23780_v2  ;;  %v21125_v2 = vld [vmem:[#allocation2 + $0x2f1] sm:$0xff] }
 0x7ee   :  { %14873 = vmatprep.mubr.msk.f32.mxu1 %vm26_vm1, %v5925_v0  ;;  %v21121_v0 = vld [vmem:[#allocation2 + $0x2e9] sm:$0xff] }
 0x7f1   :  { %14874 = vmatmul.mubr.msk.f32.gmra.mrb[30].mxu1 %vm26_vm1, %v5926_v47  ;;  %v21129_v47 = vld [vmem:[#allocation2 + $0x301] sm:$0xff] }
 0x7f2   :  { %14876 = vmatprep.mubr.msk.f32.mxu1 %vm26_vm1, %v20506_v51  ;;  %v20987_v51 = vld [vmem:[#allocation2 + $0x111] sm:$0xff] }
 0x7f5   :  { %14877 = vmatmul.mubr.msk.f32.gmra.mrb[32].mxu1 %vm26_vm1, %v20510_v57  ;;  %v20991_v57 = vld [vmem:[#allocation2 + $0x121] sm:$0xff] }
 0x7f6   :  { %14879 = vmatprep.mubr.msk.f32.mxu1 %vm26_vm1, %v20514_v49  ;;  %v20995_v49 = vld [vmem:[#allocation2 + $0x129] sm:$0xff] }
 0x7f9   :  { %14880 = vmatmul.mubr.msk.f32.gmra.mrb[34].mxu1 %vm26_vm1, %v20518_v34  ;;  %v20999_v34 = vld [vmem:[#allocation2 + $0x139] sm:$0xff] }
 0x7fa   :  { %14882 = vmatprep.mubr.msk.f32.mxu1 %vm26_vm1, %v20522_v21  ;;  %v21003_v21 = vld [vmem:[#allocation2 + $0x141] sm:$0xff] }
 0x7fd   :  { %14883 = vmatmul.mubr.msk.f32.gmra.mrb[36].mxu1 %vm26_vm1, %v20526_v44  ;;  %v21007_v44 = vld [vmem:[#allocation2 + $0x151] sm:$0xff] }
 0x7fe   :  { %14885 = vmatprep.mubr.msk.f32.mxu1 %vm26_vm1, %v20530_v63  ;;  %v21011_v63 = vld [vmem:[#allocation2 + $0x159] sm:$0xff] }
 0x801   :  { %14886 = vmatmul.mubr.msk.f32.gmra.mrb[38].mxu1 %vm26_vm1, %v20534_v62  ;;  %v21015_v62 = vld [vmem:[#allocation2 + $0x169] sm:$0xff] }
 0x802   :  { %14888 = vmatprep.mubr.msk.f32.mxu1 %vm26_vm1, %v20538_v28  ;;  %v7448_v28 = vld [vmem:[#allocation2 + $0x1b1] sm:$0xff] }
 0x805   :  { %14889 = vmatmul.mubr.msk.f32.gmra.mrb[40].mxu1 %vm26_vm1, %v20542_v59  ;;  %v21019_v59 = vld [vmem:[#allocation2 + $0x171] sm:$0xff] }
 0x806   :  { %14891 = vmatprep.mubr.msk.f32.mxu1 %vm26_vm1, %v20546_v7  ;;  %v7449_v7 = vld [vmem:[#allocation2 + $0x1b9] sm:$0xff] }
 0x809   :  { %14892 = vmatmul.mubr.msk.f32.gmra.mrb[42].mxu1 %vm26_vm1, %v20550_v25  ;;  %v21025_v25 = vld [vmem:[#allocation2 + $0x1c9] sm:$0xff] }
 0x80a   :  { %14894 = vmatprep.mubr.msk.f32.mxu1 %vm26_vm1, %v20554_v3  ;;  %v21029_v3 = vld [vmem:[#allocation2 + $0x1d1] sm:$0xff] }
 0x80d   :  { %14895 = vmatmul.mubr.msk.f32.gmra.mrb[44].mxu1 %vm26_vm1, %v20558_v37  ;;  %v21033_v37 = vld [vmem:[#allocation2 + $0x1e1] sm:$0xff] }
 0x80e   :  { %14897 = vmatprep.mubr.msk.f32.mxu1 %vm26_vm1, %v20562_v26  ;;  %v21037_v26 = vld [vmem:[#allocation2 + $0x1e9] sm:$0xff] }
 0x811   :  { %14898 = vmatmul.mubr.msk.f32.gmra.mrb[46].mxu1 %vm26_vm1, %v20566_v31  ;;  %v21041_v31 = vld [vmem:[#allocation2 + $0x1f9] sm:$0xff] }
 0x812   :  { %14900 = vmatprep.mubr.msk.f32.mxu1 %vm26_vm1, %v20570_v30  ;;  %v21045_v30 = vld [vmem:[#allocation2 + $0x201] sm:$0xff] }
 0x815   :  { %14901 = vmatmul.mubr.msk.f32.gmra.mrb[48].mxu1 %vm26_vm1, %v20574_v4  ;;  %v21049_v4 = vld [vmem:[#allocation2 + $0x211] sm:$0xff] }
 0x816   :  { %14903 = vmatprep.mubr.msk.f32.mxu1 %vm26_vm1, %v20578_v11  ;;  %v21053_v11 = vld [vmem:[#allocation2 + $0x219] sm:$0xff] }
 0x819   :  { %14904 = vmatmul.mubr.msk.f32.gmra.mrb[50].mxu1 %vm26_vm1, %v20582_v14  ;;  %v21057_v14 = vld [vmem:[#allocation2 + $0x229] sm:$0xff] }
 0x81a   :  { %14906 = vmatprep.mubr.msk.f32.mxu1 %vm26_vm1, %v20586_v13  ;;  %v21061_v13 = vld [vmem:[#allocation2 + $0x231] sm:$0xff] }
 0x81d   :  { %14907 = vmatmul.mubr.msk.f32.gmra.mrb[52].mxu1 %vm26_vm1, %v20590_v20  ;;  %v21065_v20 = vld [vmem:[#allocation2 + $0x241] sm:$0xff] }
 0x81e   :  { %14909 = vmatprep.mubr.msk.f32.mxu1 %vm26_vm1, %v20594_v35  ;;  %v21069_v35 = vld [vmem:[#allocation2 + $0x249] sm:$0xff] }
 0x821   :  { %14910 = vmatmul.mubr.msk.f32.gmra.mrb[54].mxu1 %vm26_vm1, %v20598_v32  ;;  %v21073_v32 = vld [vmem:[#allocation2 + $0x259] sm:$0xff] }
 0x822   :  { %14912 = vmatprep.mubr.msk.f32.mxu1 %vm26_vm1, %v20602_v19  ;;  %v21077_v19 = vld [vmem:[#allocation2 + $0x261] sm:$0xff] }
 0x825   :  { %14913 = vmatmul.mubr.msk.f32.gmra.mrb[56].mxu1 %vm26_vm1, %v23775_v18  ;;  %v21105_v18 = vld [vmem:[#allocation2 + $0x2b9] sm:$0xff] }
 0x826   :  { %14915 = vmatprep.mubr.msk.f32.mxu1 %vm26_vm1, %v23776_v53  ;;  %v21109_v53 = vld [vmem:[#allocation2 + $0x2c1] sm:$0xff] }
 0x829   :  { %14916 = vmatmul.mubr.msk.f32.gmra.mrb[58].mxu1 %vm26_vm1, %v20614_v45  ;;  %v21089_v45 = vld [vmem:[#allocation2 + $0x289] sm:$0xff] }
 0x82a   :  { %14918 = vmatprep.mubr.msk.f32.mxu1 %vm26_vm1, %v20618_v24  ;;  %v21093_v24 = vld [vmem:[#allocation2 + $0x291] sm:$0xff] }
 0x82d   :  { %14919 = vmatmul.mubr.msk.f32.gmra.mrb[60].mxu1 %vm26_vm1, %v20622_v38  ;;  %v20979_v38 = vld [vmem:[#allocation2 + $0xf9] sm:$0xff] }
 0x82e   :  { %14921 = vmatprep.mubr.msk.f32.mxu1 %vm26_vm1, %v5961_v36  ;;  %v21133_v36 = vld [vmem:[#allocation2 + $0x309] sm:$0xff] }
 0x831   :  { %14922 = vmatmul.mubr.msk.f32.gmra.mrb[62].mxu1 %vm26_vm1, %v5962_v40  ;;  %v21137_v40 = vld [vmem:[#allocation2 + $0x319] sm:$0xff] }
 0x832   :  { %14926 = vmatprep.mubr.msk.f32.mxu1 %vm26_vm1, %v7412_v16  ;;  %v21141_v16 = vld [vmem:[#allocation2 + $0x321] sm:$0xff] }
 0x835   :  { %14927 = vmatmul.mubr.msk.f32.vlgmr.msra.gmra.mrb[0].mxu1 %vm26_vm1, %v7413_v22  ;;  %v21150_v22 = vld [vmem:[%s23308_s2 + $0x8] sm:$0xf] }
 0x836   :  { %15023 = vmatpush3.msk.msra.mxu1 %vm23781_vm11, %v20764_v50  ;;  %14929 = vmatprep.mubr.msk.f32.mxu1 %vm26_vm1, %v20899_v8  ;;  %v21113_v50 = vld [vmem:[#allocation2 + $0x2d1] sm:$0xff] }
 0x837   :  { %15120 = vmatprep.subr.msk.mxu1 %vm23782_vm7, %v20896_v48 }
 0x839   :  { %14930 = vmatmul.mubr.msk.f32.gmra.mrb[2].mxu1 %vm26_vm1, %v20907_v12 }
 0x83a   :  { %14932 = vmatprep.mubr.msk.f32.mxu1 %vm26_vm1, %v20911_v43 }
 0x83d   :  { %14933 = vmatmul.mubr.msk.f32.gmra.mrb[4].mxu1 %vm26_vm1, %v20915_v55 }
 0x83e   :  { %14935 = vmatprep.mubr.msk.f32.mxu1 %vm26_vm1, %v20919_v54 }
 0x841   :  { %14936 = vmatmul.mubr.msk.f32.gmra.mrb[6].mxu1 %vm26_vm1, %v20923_v1 }
 0x842   :  { %14938 = vmatprep.mubr.msk.f32.mxu1 %vm26_vm1, %v20927_v23 }
 0x845   :  { %14939 = vmatmul.mubr.msk.f32.gmra.mrb[8].mxu1 %vm26_vm1, %v20931_v60 }
 0x846   :  { %14941 = vmatprep.mubr.msk.f32.mxu1 %vm26_vm1, %v20935_v6 }
 0x849   :  { %14942 = vmatmul.mubr.msk.f32.gmra.mrb[10].mxu1 %vm26_vm1, %v20939_v29 }
 0x84a   :  { %14944 = vmatprep.mubr.msk.f32.mxu1 %vm26_vm1, %v20943_v5 }
 0x84d   :  { %14945 = vmatmul.mubr.msk.f32.gmra.mrb[12].mxu1 %vm26_vm1, %v20947_v61 }
 0x84e   :  { %14947 = vmatprep.mubr.msk.f32.mxu1 %vm26_vm1, %v20951_v52 }
 0x851   :  { %14948 = vmatmul.mubr.msk.f32.gmra.mrb[14].mxu1 %vm26_vm1, %v20955_v42 }
 0x852   :  { %14950 = vmatprep.mubr.msk.f32.mxu1 %vm26_vm1, %v20959_v58 }
 0x855   :  { %14951 = vmatmul.mubr.msk.f32.gmra.mrb[16].mxu1 %vm26_vm1, %v20963_v10 }
 0x856   :  { %14953 = vmatprep.mubr.msk.f32.mxu1 %vm26_vm1, %v20967_v41 }
 0x859   :  { %14954 = vmatmul.mubr.msk.f32.gmra.mrb[18].mxu1 %vm26_vm1, %v20971_v17 }
 0x85a   :  { %14956 = vmatprep.mubr.msk.f32.mxu1 %vm26_vm1, %v20975_v46 }
 0x85d   :  { %14957 = vmatmul.mubr.msk.f32.gmra.mrb[20].mxu1 %vm26_vm1, %v20979_v38 }
 0x85e   :  { %14959 = vmatprep.mubr.msk.f32.mxu1 %vm26_vm1, %v20983_v39 }
 0x861   :  { %14960 = vmatmul.mubr.msk.f32.gmra.mrb[22].mxu1 %vm26_vm1, %v20987_v51 }
 0x862   :  { %14962 = vmatprep.mubr.msk.f32.mxu1 %vm26_vm1, %v20991_v57 }
 0x865   :  { %14963 = vmatmul.mubr.msk.f32.gmra.mrb[24].mxu1 %vm26_vm1, %v20995_v49 }
 0x866   :  { %14965 = vmatprep.mubr.msk.f32.mxu1 %vm26_vm1, %v20999_v34 }
 0x869   :  { %14966 = vmatmul.mubr.msk.f32.gmra.mrb[26].mxu1 %vm26_vm1, %v21003_v21 }
 0x86a   :  { %14968 = vmatprep.mubr.msk.f32.mxu1 %vm26_vm1, %v21007_v44 }
 0x86d   :  { %14969 = vmatmul.mubr.msk.f32.gmra.mrb[28].mxu1 %vm26_vm1, %v21011_v63 }
 0x86e   :  { %14971 = vmatprep.mubr.msk.f32.mxu1 %vm26_vm1, %v21015_v62 }
 0x871   :  { %14972 = vmatmul.mubr.msk.f32.gmra.mrb[30].mxu1 %vm26_vm1, %v21019_v59 }
 0x872   :  { %14974 = vmatprep.mubr.msk.f32.mxu1 %vm26_vm1, %v7448_v28  ;;  %v21286_v28 = vld [vmem:[#allocation2 + $0x339] sm:$0xff] }
 0x875   :  { %14975 = vmatmul.mubr.msk.f32.gmra.mrb[32].mxu1 %vm26_vm1, %v7449_v7  ;;  %v21295_v7 = vld [vmem:[%s23308_s2 + $0x14] sm:$0xf] }
 0x876   :  { %14977 = vmatprep.mubr.msk.f32.mxu1 %vm26_vm1, %v21025_v25 }
 0x879   :  { %14978 = vmatmul.mubr.msk.f32.gmra.mrb[34].mxu1 %vm26_vm1, %v21029_v3 }
 0x87a   :  { %14980 = vmatprep.mubr.msk.f32.mxu1 %vm26_vm1, %v21033_v37 }
 0x87d   :  { %14981 = vmatmul.mubr.msk.f32.gmra.mrb[36].mxu1 %vm26_vm1, %v21037_v26 }
 0x87e   :  { %14983 = vmatprep.mubr.msk.f32.mxu1 %vm26_vm1, %v21041_v31 }
 0x881   :  { %14984 = vmatmul.mubr.msk.f32.gmra.mrb[38].mxu1 %vm26_vm1, %v21045_v30 }
 0x882   :  { %14986 = vmatprep.mubr.msk.f32.mxu1 %vm26_vm1, %v21049_v4 }
 0x885   :  { %14987 = vmatmul.mubr.msk.f32.gmra.mrb[40].mxu1 %vm26_vm1, %v21053_v11 }
 0x886   :  { %14989 = vmatprep.mubr.msk.f32.mxu1 %vm26_vm1, %v21057_v14 }
 0x889   :  { %14990 = vmatmul.mubr.msk.f32.gmra.mrb[42].mxu1 %vm26_vm1, %v21061_v13 }
 0x88a   :  { %14992 = vmatprep.mubr.msk.f32.mxu1 %vm26_vm1, %v21065_v20 }
 0x88d   :  { %14993 = vmatmul.mubr.msk.f32.gmra.mrb[44].mxu1 %vm26_vm1, %v21069_v35 }
 0x88e   :  { %14995 = vmatprep.mubr.msk.f32.mxu1 %vm26_vm1, %v21073_v32 }
 0x891   :  { %14996 = vmatmul.mubr.msk.f32.gmra.mrb[46].mxu1 %vm26_vm1, %v21077_v19 }
 0x892   :  { %14998 = vmatprep.mubr.msk.f32.mxu1 %vm26_vm1, %v21081_v9 }
 0x895   :  { %14999 = vmatmul.mubr.msk.f32.gmra.mrb[48].mxu1 %vm26_vm1, %v21085_v27 }
 0x896   :  { %15001 = vmatprep.mubr.msk.f32.mxu1 %vm26_vm1, %v21089_v45 }
 0x899   :  { %15002 = vmatmul.mubr.msk.f32.gmra.mrb[50].mxu1 %vm26_vm1, %v21093_v24 }
 0x89a   :  { %15004 = vmatprep.mubr.msk.f32.mxu1 %vm26_vm1, %v21097_v15 }
 0x89d   :  { %15005 = vmatmul.mubr.msk.f32.gmra.mrb[52].mxu1 %vm26_vm1, %v21101_v56 }
 0x89e   :  { %15007 = vmatprep.mubr.msk.f32.mxu1 %vm26_vm1, %v21105_v18 }
 0x8a1   :  { %15008 = vmatmul.mubr.msk.f32.gmra.mrb[54].mxu1 %vm26_vm1, %v21109_v53 }
 0x8a2   :  { %15010 = vmatprep.mubr.msk.f32.mxu1 %vm26_vm1, %v21113_v50 }
 0x8a5   :  { %15011 = vmatmul.mubr.msk.f32.gmra.mrb[56].mxu1 %vm26_vm1, %v21117_v33 }
 0x8a6   :  { %15013 = vmatprep.mubr.msk.f32.mxu1 %vm26_vm1, %v21121_v0 }
 0x8a9   :  { %15014 = vmatmul.mubr.msk.f32.gmra.mrb[58].mxu1 %vm26_vm1, %v21125_v2 }
 0x8aa   :  { %15016 = vmatprep.mubr.msk.f32.mxu1 %vm26_vm1, %v21129_v47 }
 0x8ad   :  { %15017 = vmatmul.mubr.msk.f32.gmra.mrb[60].mxu1 %vm26_vm1, %v21133_v36 }
 0x8ae   :  { %15019 = vmatprep.mubr.msk.f32.mxu1 %vm26_vm1, %v21137_v40 }
 0x8b1   :  { %15020 = vmatmul.mubr.msk.f32.gmra.mrb[62].mxu1 %vm26_vm1, %v21141_v16 }
 0x8b2   :  { %15024 = vmatprep.mubr.msk.f32.mxu1 %vm26_vm1, %v20899_v8  ;;  %v21218_v8 = vld [vmem:[#allocation2 + $0x189] sm:$0xff] }
 0x8b5   :  { %15025 = vmatmul.mubr.msk.f32.vlgmr.msra.gmra.mrb[0].mxu1 %vm26_vm1, %v20907_v12  ;;  %v21282_v12 = vld [vmem:[#allocation2 + $0x331] sm:$0xff] }
 0x8b6   :  { %15121 = vmatpush3.msk.msra.mxu1 %vm23783_vm3, %v20896_v48  ;;  %15027 = vmatprep.mubr.msk.f32.mxu1 %vm26_vm1, %v20911_v43  ;;  %v21214_v48 = vld [vmem:[#allocation2 + $0x181] sm:$0xff] }
 0x8b7   :  { %15218 = vmatprep.subr.msk.mxu1 %vm23784_vm0, %v21150_v22 }
 0x8b9   :  { %15028 = vmatmul.mubr.msk.f32.gmra.mrb[2].mxu1 %vm26_vm1, %v20915_v55 }
 0x8ba   :  { %15030 = vmatprep.mubr.msk.f32.mxu1 %vm26_vm1, %v20919_v54 }
 0x8bd   :  { %15031 = vmatmul.mubr.msk.f32.gmra.mrb[4].mxu1 %vm26_vm1, %v20923_v1 }
 0x8be   :  { %15033 = vmatprep.mubr.msk.f32.mxu1 %vm26_vm1, %v20927_v23 }
 0x8c1   :  { %15034 = vmatmul.mubr.msk.f32.gmra.mrb[6].mxu1 %vm26_vm1, %v20931_v60 }
 0x8c2   :  { %15036 = vmatprep.mubr.msk.f32.mxu1 %vm26_vm1, %v20935_v6 }
 0x8c5   :  { %15037 = vmatmul.mubr.msk.f32.gmra.mrb[8].mxu1 %vm26_vm1, %v20939_v29 }
 0x8c6   :  { %15039 = vmatprep.mubr.msk.f32.mxu1 %vm26_vm1, %v20943_v5 }
 0x8c9   :  { %15040 = vmatmul.mubr.msk.f32.gmra.mrb[10].mxu1 %vm26_vm1, %v20947_v61 }
 0x8ca   :  { %15042 = vmatprep.mubr.msk.f32.mxu1 %vm26_vm1, %v20951_v52 }
 0x8cd   :  { %15043 = vmatmul.mubr.msk.f32.gmra.mrb[12].mxu1 %vm26_vm1, %v20955_v42 }
 0x8ce   :  { %15045 = vmatprep.mubr.msk.f32.mxu1 %vm26_vm1, %v20959_v58 }
 0x8d1   :  { %15046 = vmatmul.mubr.msk.f32.gmra.mrb[14].mxu1 %vm26_vm1, %v20963_v10 }
 0x8d2   :  { %15048 = vmatprep.mubr.msk.f32.mxu1 %vm26_vm1, %v20967_v41 }
 0x8d5   :  { %15049 = vmatmul.mubr.msk.f32.gmra.mrb[16].mxu1 %vm26_vm1, %v20971_v17 }
 0x8d6   :  { %15051 = vmatprep.mubr.msk.f32.mxu1 %vm26_vm1, %v20975_v46 }
 0x8d9   :  { %15052 = vmatmul.mubr.msk.f32.gmra.mrb[18].mxu1 %vm26_vm1, %v20979_v38 }
 0x8da   :  { %15054 = vmatprep.mubr.msk.f32.mxu1 %vm26_vm1, %v20983_v39 }
 0x8dd   :  { %15055 = vmatmul.mubr.msk.f32.gmra.mrb[20].mxu1 %vm26_vm1, %v20987_v51 }
 0x8de   :  { %15057 = vmatprep.mubr.msk.f32.mxu1 %vm26_vm1, %v20991_v57 }
 0x8e1   :  { %15058 = vmatmul.mubr.msk.f32.gmra.mrb[22].mxu1 %vm26_vm1, %v20995_v49 }
 0x8e2   :  { %15060 = vmatprep.mubr.msk.f32.mxu1 %vm26_vm1, %v20999_v34 }
 0x8e5   :  { %15061 = vmatmul.mubr.msk.f32.gmra.mrb[24].mxu1 %vm26_vm1, %v21003_v21 }
 0x8e6   :  { %15063 = vmatprep.mubr.msk.f32.mxu1 %vm26_vm1, %v21007_v44 }
 0x8e9   :  { %15064 = vmatmul.mubr.msk.f32.gmra.mrb[26].mxu1 %vm26_vm1, %v21011_v63 }
 0x8ea   :  { %15066 = vmatprep.mubr.msk.f32.mxu1 %vm26_vm1, %v21015_v62 }
 0x8ed   :  { %15067 = vmatmul.mubr.msk.f32.gmra.mrb[28].mxu1 %vm26_vm1, %v21019_v59 }
 0x8ee   :  { %15069 = vmatprep.mubr.msk.f32.mxu1 %vm26_vm1, %v21214_v48 }
 0x8f1   :  { %15070 = vmatmul.mubr.msk.f32.gmra.mrb[30].mxu1 %vm26_vm1, %v21218_v8 }
 0x8f2   :  { %15072 = vmatprep.mubr.msk.f32.mxu1 %vm26_vm1, %v21025_v25  ;;  %v21518_v25 = vld [vmem:[#allocation2 + $0x112] sm:$0xff] }
 0x8f5   :  { %15073 = vmatmul.mubr.msk.f32.gmra.mrb[32].mxu1 %vm26_vm1, %v21029_v3  ;;  %v21522_v3 = vld [vmem:[#allocation2 + $0x122] sm:$0xff] }
 0x8f6   :  { %15075 = vmatprep.mubr.msk.f32.mxu1 %vm26_vm1, %v21033_v37 }
 0x8f9   :  { %15076 = vmatmul.mubr.msk.f32.gmra.mrb[34].mxu1 %vm26_vm1, %v21037_v26 }
 0x8fa   :  { %15078 = vmatprep.mubr.msk.f32.mxu1 %vm26_vm1, %v21041_v31 }
 0x8fd   :  { %15079 = vmatmul.mubr.msk.f32.gmra.mrb[36].mxu1 %vm26_vm1, %v21045_v30 }
 0x8fe   :  { %15081 = vmatprep.mubr.msk.f32.mxu1 %vm26_vm1, %v21049_v4 }
 0x901   :  { %15082 = vmatmul.mubr.msk.f32.gmra.mrb[38].mxu1 %vm26_vm1, %v21053_v11 }
 0x902   :  { %15084 = vmatprep.mubr.msk.f32.mxu1 %vm26_vm1, %v21057_v14 }
 0x905   :  { %15085 = vmatmul.mubr.msk.f32.gmra.mrb[40].mxu1 %vm26_vm1, %v21061_v13 }
 0x906   :  { %15087 = vmatprep.mubr.msk.f32.mxu1 %vm26_vm1, %v21065_v20 }
 0x909   :  { %15088 = vmatmul.mubr.msk.f32.gmra.mrb[42].mxu1 %vm26_vm1, %v21069_v35 }
 0x90a   :  { %15090 = vmatprep.mubr.msk.f32.mxu1 %vm26_vm1, %v21073_v32 }
 0x90d   :  { %15091 = vmatmul.mubr.msk.f32.gmra.mrb[44].mxu1 %vm26_vm1, %v21077_v19 }
 0x90e   :  { %15093 = vmatprep.mubr.msk.f32.mxu1 %vm26_vm1, %v21081_v9 }
 0x911   :  { %15094 = vmatmul.mubr.msk.f32.gmra.mrb[46].mxu1 %vm26_vm1, %v21085_v27 }
 0x912   :  { %15096 = vmatprep.mubr.msk.f32.mxu1 %vm26_vm1, %v21089_v45 }
 0x915   :  { %15097 = vmatmul.mubr.msk.f32.gmra.mrb[48].mxu1 %vm26_vm1, %v21093_v24 }
 0x916   :  { %15099 = vmatprep.mubr.msk.f32.mxu1 %vm26_vm1, %v21097_v15 }
 0x919   :  { %15100 = vmatmul.mubr.msk.f32.gmra.mrb[50].mxu1 %vm26_vm1, %v21101_v56 }
 0x91a   :  { %15102 = vmatprep.mubr.msk.f32.mxu1 %vm26_vm1, %v21105_v18 }
 0x91d   :  { %15103 = vmatmul.mubr.msk.f32.gmra.mrb[52].mxu1 %vm26_vm1, %v21109_v53 }
 0x91e   :  { %15105 = vmatprep.mubr.msk.f32.mxu1 %vm26_vm1, %v21113_v50 }
 0x921   :  { %15106 = vmatmul.mubr.msk.f32.gmra.mrb[54].mxu1 %vm26_vm1, %v21117_v33 }
 0x922   :  { %15108 = vmatprep.mubr.msk.f32.mxu1 %vm26_vm1, %v21121_v0 }
 0x925   :  { %15109 = vmatmul.mubr.msk.f32.gmra.mrb[56].mxu1 %vm26_vm1, %v21125_v2 }
 0x926   :  { %15111 = vmatprep.mubr.msk.f32.mxu1 %vm26_vm1, %v21129_v47 }
 0x929   :  { %15112 = vmatmul.mubr.msk.f32.gmra.mrb[58].mxu1 %vm26_vm1, %v21133_v36 }
 0x92a   :  { %15114 = vmatprep.mubr.msk.f32.mxu1 %vm26_vm1, %v21137_v40 }
 0x92d   :  { %15115 = vmatmul.mubr.msk.f32.gmra.mrb[60].mxu1 %vm26_vm1, %v21141_v16 }
 0x92e   :  { %15117 = vmatprep.mubr.msk.f32.mxu1 %vm26_vm1, %v21282_v12 }
 0x931   :  { %15118 = vmatmul.mubr.msk.f32.gmra.mrb[62].mxu1 %vm26_vm1, %v21286_v28 }
 0x932   :  { %15122 = vmatprep.mubr.msk.f32.mxu1 %vm26_vm1, %v20911_v43  ;;  %v7446_v43 = vld [vmem:[#allocation2 + $0x199] sm:$0xff] }
 0x935   :  { %15123 = vmatmul.mubr.msk.f32.vlgmr.msra.gmra.mrb[0].mxu1 %vm26_vm1, %v20915_v55  ;;  %v7447_v55 = vld [vmem:[#allocation2 + $0x1a1] sm:$0xff] }
 0x936   :  { %15219 = vmatpush3.msk.msra.mxu1 %vm23785_vm14, %v21150_v22  ;;  %15125 = vmatprep.mubr.msk.f32.mxu1 %vm26_vm1, %v20919_v54  ;;  %v7482_v54 = vld [vmem:[#allocation2 + $0x349] sm:$0xff] }
 0x937   :  { %15316 = vmatprep.subr.msk.mxu1 %vm23786_vm4, %v21295_v7  ;;  %v21632_v22 = vld [vmem:[#allocation2 + $0x2aa] sm:$0xff] }
 0x939   :  { %15126 = vmatmul.mubr.msk.f32.gmra.mrb[2].mxu1 %vm26_vm1, %v20923_v1  ;;  %v7483_v1 = vld [vmem:[#allocation2 + $0x351] sm:$0xff] }
 0x93a   :  { %15128 = vmatprep.mubr.msk.f32.mxu1 %vm26_vm1, %v20927_v23  ;;  %v9062_v23 = vld [vmem:[#allocation2 + $0x2] sm:$0xff] }
 0x93d   :  { %15129 = vmatmul.mubr.msk.f32.gmra.mrb[4].mxu1 %vm26_vm1, %v20931_v60  ;;  %v9063_v60 = vld [vmem:[#allocation2 + $0xa] sm:$0xff] }
 0x93e   :  { %15131 = vmatprep.mubr.msk.f32.mxu1 %vm26_vm1, %v20935_v6  ;;  %v21427_v6 = vld [vmem:[%s23308_s2 + $0x20] sm:$0xf] }
 0x941   :  { %15132 = vmatmul.mubr.msk.f32.gmra.mrb[6].mxu1 %vm26_vm1, %v20939_v29  ;;  %v21430_v29 = vld [vmem:[#allocation2 + $0x1a] sm:$0xff] }
 0x942   :  { %15134 = vmatprep.mubr.msk.f32.mxu1 %vm26_vm1, %v20943_v5  ;;  %v21438_v5 = vld [vmem:[#allocation2 + $0x22] sm:$0xff] }
 0x945   :  { %15135 = vmatmul.mubr.msk.f32.gmra.mrb[8].mxu1 %vm26_vm1, %v20947_v61  ;;  %v21442_v61 = vld [vmem:[#allocation2 + $0x32] sm:$0xff] }
 0x946   :  { %15137 = vmatprep.mubr.msk.f32.mxu1 %vm26_vm1, %v20951_v52  ;;  %v21446_v52 = vld [vmem:[#allocation2 + $0x3a] sm:$0xff] }
 0x949   :  { %15138 = vmatmul.mubr.msk.f32.gmra.mrb[10].mxu1 %vm26_vm1, %v20955_v42  ;;  %v21450_v42 = vld [vmem:[#allocation2 + $0x4a] sm:$0xff] }
 0x94a   :  { %15140 = vmatprep.mubr.msk.f32.mxu1 %vm26_vm1, %v20959_v58  ;;  %v21454_v58 = vld [vmem:[#allocation2 + $0x52] sm:$0xff] }
 0x94d   :  { %15141 = vmatmul.mubr.msk.f32.gmra.mrb[12].mxu1 %vm26_vm1, %v20963_v10  ;;  %v21458_v10 = vld [vmem:[#allocation2 + $0x62] sm:$0xff] }
 0x94e   :  { %15143 = vmatprep.mubr.msk.f32.mxu1 %vm26_vm1, %v20967_v41  ;;  %v21462_v41 = vld [vmem:[#allocation2 + $0x6a] sm:$0xff] }
 0x951   :  { %15144 = vmatmul.mubr.msk.f32.gmra.mrb[14].mxu1 %vm26_vm1, %v20971_v17  ;;  %v21466_v17 = vld [vmem:[#allocation2 + $0x7a] sm:$0xff] }
 0x952   :  { %15146 = vmatprep.mubr.msk.f32.mxu1 %vm26_vm1, %v20975_v46  ;;  %v21470_v46 = vld [vmem:[#allocation2 + $0x82] sm:$0xff] }
 0x955   :  { %15147 = vmatmul.mubr.msk.f32.gmra.mrb[16].mxu1 %vm26_vm1, %v20979_v38  ;;  %v21474_v38 = vld [vmem:[#allocation2 + $0x92] sm:$0xff] }
 0x956   :  { %15149 = vmatprep.mubr.msk.f32.mxu1 %vm26_vm1, %v20983_v39  ;;  %v21478_v39 = vld [vmem:[#allocation2 + $0x9a] sm:$0xff] }
 0x959   :  { %15150 = vmatmul.mubr.msk.f32.gmra.mrb[18].mxu1 %vm26_vm1, %v20987_v51  ;;  %v21482_v51 = vld [vmem:[#allocation2 + $0xaa] sm:$0xff] }
 0x95a   :  { %15152 = vmatprep.mubr.msk.f32.mxu1 %vm26_vm1, %v20991_v57  ;;  %v21486_v57 = vld [vmem:[#allocation2 + $0xb2] sm:$0xff] }
 0x95d   :  { %15153 = vmatmul.mubr.msk.f32.gmra.mrb[20].mxu1 %vm26_vm1, %v20995_v49  ;;  %v21490_v49 = vld [vmem:[#allocation2 + $0xc2] sm:$0xff] }
 0x95e   :  { %15155 = vmatprep.mubr.msk.f32.mxu1 %vm26_vm1, %v20999_v34  ;;  %v21494_v34 = vld [vmem:[#allocation2 + $0xca] sm:$0xff] }
 0x961   :  { %15156 = vmatmul.mubr.msk.f32.gmra.mrb[22].mxu1 %vm26_vm1, %v21003_v21  ;;  %v21498_v21 = vld [vmem:[#allocation2 + $0xda] sm:$0xff] }
 0x962   :  { %15158 = vmatprep.mubr.msk.f32.mxu1 %vm26_vm1, %v21007_v44  ;;  %v21502_v44 = vld [vmem:[#allocation2 + $0xe2] sm:$0xff] }
 0x965   :  { %15159 = vmatmul.mubr.msk.f32.gmra.mrb[24].mxu1 %vm26_vm1, %v21011_v63  ;;  %v21506_v63 = vld [vmem:[#allocation2 + $0xf2] sm:$0xff] }
 0x966   :  { %15161 = vmatprep.mubr.msk.f32.mxu1 %vm26_vm1, %v21015_v62  ;;  %v21510_v62 = vld [vmem:[#allocation2 + $0xfa] sm:$0xff] }
 0x969   :  { %15162 = vmatmul.mubr.msk.f32.gmra.mrb[26].mxu1 %vm26_vm1, %v21019_v59  ;;  %v21514_v59 = vld [vmem:[#allocation2 + $0x10a] sm:$0xff] }
 0x96a   :  { %15164 = vmatprep.mubr.msk.f32.mxu1 %vm26_vm1, %v21214_v48  ;;  %v21636_v48 = vld [vmem:[#allocation2 + $0x2ba] sm:$0xff] }
 0x96d   :  { %15165 = vmatmul.mubr.msk.f32.gmra.mrb[28].mxu1 %vm26_vm1, %v21218_v8  ;;  %v21640_v8 = vld [vmem:[#allocation2 + $0x2c2] sm:$0xff] }
 0x96e   :  { %15167 = vmatprep.mubr.msk.f32.mxu1 %vm26_vm1, %v7446_v43  ;;  %v21656_v43 = vld [vmem:[#allocation2 + $0x2f2] sm:$0xff] }
 0x971   :  { %15168 = vmatmul.mubr.msk.f32.gmra.mrb[30].mxu1 %vm26_vm1, %v7447_v55  ;;  %v21660_v55 = vld [vmem:[#allocation2 + $0x302] sm:$0xff] }
 0x972   :  { %15170 = vmatprep.mubr.msk.f32.mxu1 %vm26_vm1, %v21033_v37  ;;  %v21526_v37 = vld [vmem:[#allocation2 + $0x12a] sm:$0xff] }
 0x975   :  { %15171 = vmatmul.mubr.msk.f32.gmra.mrb[32].mxu1 %vm26_vm1, %v21037_v26  ;;  %v21530_v26 = vld [vmem:[#allocation2 + $0x13a] sm:$0xff] }
 0x976   :  { %15173 = vmatprep.mubr.msk.f32.mxu1 %vm26_vm1, %v21041_v31  ;;  %v21534_v31 = vld [vmem:[#allocation2 + $0x142] sm:$0xff] }
 0x979   :  { %15174 = vmatmul.mubr.msk.f32.gmra.mrb[34].mxu1 %vm26_vm1, %v21045_v30  ;;  %v21538_v30 = vld [vmem:[#allocation2 + $0x152] sm:$0xff] }
 0x97a   :  { %15176 = vmatprep.mubr.msk.f32.mxu1 %vm26_vm1, %v21049_v4  ;;  %v21542_v4 = vld [vmem:[#allocation2 + $0x15a] sm:$0xff] }
 0x97d   :  { %15177 = vmatmul.mubr.msk.f32.gmra.mrb[36].mxu1 %vm26_vm1, %v21053_v11  ;;  %v21546_v11 = vld [vmem:[#allocation2 + $0x16a] sm:$0xff] }
 0x97e   :  { %15179 = vmatprep.mubr.msk.f32.mxu1 %vm26_vm1, %v21057_v14  ;;  %v9098_v14 = vld [vmem:[#allocation2 + $0x1b2] sm:$0xff] }
 0x981   :  { %15180 = vmatmul.mubr.msk.f32.gmra.mrb[38].mxu1 %vm26_vm1, %v21061_v13  ;;  %v21550_v13 = vld [vmem:[#allocation2 + $0x172] sm:$0xff] }
 0x982   :  { %15182 = vmatprep.mubr.msk.f32.mxu1 %vm26_vm1, %v21065_v20  ;;  %v9099_v20 = vld [vmem:[#allocation2 + $0x1ba] sm:$0xff] }
 0x985   :  { %15183 = vmatmul.mubr.msk.f32.gmra.mrb[40].mxu1 %vm26_vm1, %v21069_v35  ;;  %v21556_v35 = vld [vmem:[#allocation2 + $0x1ca] sm:$0xff] }
 0x986   :  { %15185 = vmatprep.mubr.msk.f32.mxu1 %vm26_vm1, %v21073_v32  ;;  %v21560_v32 = vld [vmem:[#allocation2 + $0x1d2] sm:$0xff] }
 0x989   :  { %15186 = vmatmul.mubr.msk.f32.gmra.mrb[42].mxu1 %vm26_vm1, %v21077_v19  ;;  %v21564_v19 = vld [vmem:[#allocation2 + $0x1e2] sm:$0xff] }
 0x98a   :  { %15188 = vmatprep.mubr.msk.f32.mxu1 %vm26_vm1, %v21081_v9  ;;  %v21568_v9 = vld [vmem:[#allocation2 + $0x1ea] sm:$0xff] }
 0x98d   :  { %15189 = vmatmul.mubr.msk.f32.gmra.mrb[44].mxu1 %vm26_vm1, %v21085_v27  ;;  %v21572_v27 = vld [vmem:[#allocation2 + $0x1fa] sm:$0xff] }
 0x98e   :  { %15191 = vmatprep.mubr.msk.f32.mxu1 %vm26_vm1, %v21089_v45  ;;  %v21576_v45 = vld [vmem:[#allocation2 + $0x202] sm:$0xff] }
 0x991   :  { %15192 = vmatmul.mubr.msk.f32.gmra.mrb[46].mxu1 %vm26_vm1, %v21093_v24  ;;  %v21580_v24 = vld [vmem:[#allocation2 + $0x212] sm:$0xff] }
 0x992   :  { %15194 = vmatprep.mubr.msk.f32.mxu1 %vm26_vm1, %v21097_v15  ;;  %v21584_v15 = vld [vmem:[#allocation2 + $0x21a] sm:$0xff] }
 0x995   :  { %15195 = vmatmul.mubr.msk.f32.gmra.mrb[48].mxu1 %vm26_vm1, %v21101_v56  ;;  %v21588_v56 = vld [vmem:[#allocation2 + $0x22a] sm:$0xff] }
 0x996   :  { %15197 = vmatprep.mubr.msk.f32.mxu1 %vm26_vm1, %v21105_v18  ;;  %v21592_v18 = vld [vmem:[#allocation2 + $0x232] sm:$0xff] }
 0x999   :  { %15198 = vmatmul.mubr.msk.f32.gmra.mrb[50].mxu1 %vm26_vm1, %v21109_v53  ;;  %v21596_v53 = vld [vmem:[#allocation2 + $0x242] sm:$0xff] }
 0x99a   :  { %15200 = vmatprep.mubr.msk.f32.mxu1 %vm26_vm1, %v21113_v50  ;;  %v21600_v50 = vld [vmem:[#allocation2 + $0x24a] sm:$0xff] }
 0x99d   :  { %15201 = vmatmul.mubr.msk.f32.gmra.mrb[52].mxu1 %vm26_vm1, %v21117_v33  ;;  %v21604_v33 = vld [vmem:[#allocation2 + $0x25a] sm:$0xff] }
 0x99e   :  { %15203 = vmatprep.mubr.msk.f32.mxu1 %vm26_vm1, %v21121_v0  ;;  %v21608_v0 = vld [vmem:[#allocation2 + $0x262] sm:$0xff] }
 0x9a1   :  { %15204 = vmatmul.mubr.msk.f32.gmra.mrb[54].mxu1 %vm26_vm1, %v21125_v2  ;;  %v21612_v2 = vld [vmem:[#allocation2 + $0x272] sm:$0xff] }
 0x9a2   :  { %15206 = vmatprep.mubr.msk.f32.mxu1 %vm26_vm1, %v21129_v47  ;;  %v21616_v47 = vld [vmem:[#allocation2 + $0x27a] sm:$0xff] }
 0x9a5   :  { %15207 = vmatmul.mubr.msk.f32.gmra.mrb[56].mxu1 %vm26_vm1, %v21133_v36  ;;  %v21620_v36 = vld [vmem:[#allocation2 + $0x28a] sm:$0xff] }
 0x9a6   :  { %15209 = vmatprep.mubr.msk.f32.mxu1 %vm26_vm1, %v21137_v40  ;;  %v21624_v40 = vld [vmem:[#allocation2 + $0x292] sm:$0xff] }
 0x9a9   :  { %15210 = vmatmul.mubr.msk.f32.gmra.mrb[58].mxu1 %vm26_vm1, %v21141_v16  ;;  %v21628_v16 = vld [vmem:[#allocation2 + $0x2a2] sm:$0xff] }
 0x9aa   :  { %15212 = vmatprep.mubr.msk.f32.mxu1 %vm26_vm1, %v21282_v12  ;;  %v21644_v12 = vld [vmem:[#allocation2 + $0x2d2] sm:$0xff] }
 0x9ad   :  { %15213 = vmatmul.mubr.msk.f32.gmra.mrb[60].mxu1 %vm26_vm1, %v21286_v28  ;;  %v21648_v28 = vld [vmem:[#allocation2 + $0x2da] sm:$0xff] }
 0x9ae   :  { %15215 = vmatprep.mubr.msk.f32.mxu1 %vm26_vm1, %v7482_v54  ;;  %v21664_v54 = vld [vmem:[#allocation2 + $0x30a] sm:$0xff] }
 0x9b1   :  { %15216 = vmatmul.mubr.msk.f32.gmra.mrb[62].mxu1 %vm26_vm1, %v7483_v1  ;;  %v21668_v1 = vld [vmem:[#allocation2 + $0x31a] sm:$0xff] }
 0x9b2   :  { %15220 = vmatprep.mubr.msk.f32.mxu1 %vm26_vm1, %v9062_v23  ;;  %v21672_v23 = vld [vmem:[#allocation2 + $0x322] sm:$0xff] }
 0x9b5   :  { %15221 = vmatmul.mubr.msk.f32.vlgmr.msra.gmra.mrb[0].mxu1 %vm26_vm1, %v9063_v60  ;;  %v21738_v60 = vld [vmem:[#allocation2 + $0x182] sm:$0xff] }
 0x9b6   :  { %15317 = vmatpush3.msk.msra.mxu1 %vm23787_vm12, %v21295_v7  ;;  %15223 = vmatprep.mubr.msk.f32.mxu1 %vm26_vm1, %v21430_v29  ;;  %v21652_v7 = vld [vmem:[#allocation2 + $0x2ea] sm:$0xff] }
 0x9b7   :  { %15414 = vmatprep.subr.msk.mxu1 %vm23788_vm9, %v21427_v6 }
 0x9b9   :  { %15224 = vmatmul.mubr.msk.f32.gmra.mrb[2].mxu1 %vm26_vm1, %v21438_v5 }
 0x9ba   :  { %15226 = vmatprep.mubr.msk.f32.mxu1 %vm26_vm1, %v21442_v61 }
 0x9bd   :  { %15227 = vmatmul.mubr.msk.f32.gmra.mrb[4].mxu1 %vm26_vm1, %v21446_v52 }
 0x9be   :  { %15229 = vmatprep.mubr.msk.f32.mxu1 %vm26_vm1, %v21450_v42 }
 0x9c1   :  { %15230 = vmatmul.mubr.msk.f32.gmra.mrb[6].mxu1 %vm26_vm1, %v21454_v58 }
 0x9c2   :  { %15232 = vmatprep.mubr.msk.f32.mxu1 %vm26_vm1, %v21458_v10 }
 0x9c5   :  { %15233 = vmatmul.mubr.msk.f32.gmra.mrb[8].mxu1 %vm26_vm1, %v21462_v41 }
 0x9c6   :  { %15235 = vmatprep.mubr.msk.f32.mxu1 %vm26_vm1, %v21466_v17 }
 0x9c9   :  { %15236 = vmatmul.mubr.msk.f32.gmra.mrb[10].mxu1 %vm26_vm1, %v21470_v46 }
 0x9ca   :  { %15238 = vmatprep.mubr.msk.f32.mxu1 %vm26_vm1, %v21474_v38 }
 0x9cd   :  { %15239 = vmatmul.mubr.msk.f32.gmra.mrb[12].mxu1 %vm26_vm1, %v21478_v39 }
 0x9ce   :  { %15241 = vmatprep.mubr.msk.f32.mxu1 %vm26_vm1, %v21482_v51 }
 0x9d1   :  { %15242 = vmatmul.mubr.msk.f32.gmra.mrb[14].mxu1 %vm26_vm1, %v21486_v57 }
 0x9d2   :  { %15244 = vmatprep.mubr.msk.f32.mxu1 %vm26_vm1, %v21490_v49 }
 0x9d5   :  { %15245 = vmatmul.mubr.msk.f32.gmra.mrb[16].mxu1 %vm26_vm1, %v21494_v34 }
 0x9d6   :  { %15247 = vmatprep.mubr.msk.f32.mxu1 %vm26_vm1, %v21498_v21 }
 0x9d9   :  { %15248 = vmatmul.mubr.msk.f32.gmra.mrb[18].mxu1 %vm26_vm1, %v21502_v44 }
 0x9da   :  { %15250 = vmatprep.mubr.msk.f32.mxu1 %vm26_vm1, %v21506_v63 }
 0x9dd   :  { %15251 = vmatmul.mubr.msk.f32.gmra.mrb[20].mxu1 %vm26_vm1, %v21510_v62 }
 0x9de   :  { %15253 = vmatprep.mubr.msk.f32.mxu1 %vm26_vm1, %v21514_v59 }
 0x9e1   :  { %15254 = vmatmul.mubr.msk.f32.gmra.mrb[22].mxu1 %vm26_vm1, %v21518_v25 }
 0x9e2   :  { %15256 = vmatprep.mubr.msk.f32.mxu1 %vm26_vm1, %v21522_v3 }
 0x9e5   :  { %15257 = vmatmul.mubr.msk.f32.gmra.mrb[24].mxu1 %vm26_vm1, %v21526_v37 }
 0x9e6   :  { %15259 = vmatprep.mubr.msk.f32.mxu1 %vm26_vm1, %v21530_v26 }
 0x9e9   :  { %15260 = vmatmul.mubr.msk.f32.gmra.mrb[26].mxu1 %vm26_vm1, %v21534_v31 }
 0x9ea   :  { %15262 = vmatprep.mubr.msk.f32.mxu1 %vm26_vm1, %v21538_v30 }
 0x9ed   :  { %15263 = vmatmul.mubr.msk.f32.gmra.mrb[28].mxu1 %vm26_vm1, %v21542_v4 }
 0x9ee   :  { %15265 = vmatprep.mubr.msk.f32.mxu1 %vm26_vm1, %v21546_v11 }
 0x9f1   :  { %15266 = vmatmul.mubr.msk.f32.gmra.mrb[30].mxu1 %vm26_vm1, %v21550_v13 }
 0x9f2   :  { %15268 = vmatprep.mubr.msk.f32.mxu1 %vm26_vm1, %v9098_v14 }
 0x9f5   :  { %15269 = vmatmul.mubr.msk.f32.gmra.mrb[32].mxu1 %vm26_vm1, %v9099_v20 }
 0x9f6   :  { %15271 = vmatprep.mubr.msk.f32.mxu1 %vm26_vm1, %v21556_v35 }
 0x9f9   :  { %15272 = vmatmul.mubr.msk.f32.gmra.mrb[34].mxu1 %vm26_vm1, %v21560_v32 }
 0x9fa   :  { %15274 = vmatprep.mubr.msk.f32.mxu1 %vm26_vm1, %v21564_v19 }
 0x9fd   :  { %15275 = vmatmul.mubr.msk.f32.gmra.mrb[36].mxu1 %vm26_vm1, %v21568_v9 }
 0x9fe   :  { %15277 = vmatprep.mubr.msk.f32.mxu1 %vm26_vm1, %v21572_v27 }
 0xa01   :  { %15278 = vmatmul.mubr.msk.f32.gmra.mrb[38].mxu1 %vm26_vm1, %v21576_v45 }
 0xa02   :  { %15280 = vmatprep.mubr.msk.f32.mxu1 %vm26_vm1, %v21580_v24 }
 0xa05   :  { %15281 = vmatmul.mubr.msk.f32.gmra.mrb[40].mxu1 %vm26_vm1, %v21584_v15 }
 0xa06   :  { %15283 = vmatprep.mubr.msk.f32.mxu1 %vm26_vm1, %v21588_v56 }
 0xa09   :  { %15284 = vmatmul.mubr.msk.f32.gmra.mrb[42].mxu1 %vm26_vm1, %v21592_v18 }
 0xa0a   :  { %15286 = vmatprep.mubr.msk.f32.mxu1 %vm26_vm1, %v21596_v53 }
 0xa0d   :  { %15287 = vmatmul.mubr.msk.f32.gmra.mrb[44].mxu1 %vm26_vm1, %v21600_v50 }
 0xa0e   :  { %15289 = vmatprep.mubr.msk.f32.mxu1 %vm26_vm1, %v21604_v33 }
 0xa11   :  { %15290 = vmatmul.mubr.msk.f32.gmra.mrb[46].mxu1 %vm26_vm1, %v21608_v0 }
 0xa12   :  { %15292 = vmatprep.mubr.msk.f32.mxu1 %vm26_vm1, %v21612_v2 }
 0xa15   :  { %15293 = vmatmul.mubr.msk.f32.gmra.mrb[48].mxu1 %vm26_vm1, %v21616_v47 }
 0xa16   :  { %15295 = vmatprep.mubr.msk.f32.mxu1 %vm26_vm1, %v21620_v36 }
 0xa19   :  { %15296 = vmatmul.mubr.msk.f32.gmra.mrb[50].mxu1 %vm26_vm1, %v21624_v40 }
 0xa1a   :  { %15298 = vmatprep.mubr.msk.f32.mxu1 %vm26_vm1, %v21628_v16 }
 0xa1d   :  { %15299 = vmatmul.mubr.msk.f32.gmra.mrb[52].mxu1 %vm26_vm1, %v21632_v22 }
 0xa1e   :  { %15301 = vmatprep.mubr.msk.f32.mxu1 %vm26_vm1, %v21636_v48 }
 0xa21   :  { %15302 = vmatmul.mubr.msk.f32.gmra.mrb[54].mxu1 %vm26_vm1, %v21640_v8 }
 0xa22   :  { %15304 = vmatprep.mubr.msk.f32.mxu1 %vm26_vm1, %v21644_v12 }
 0xa25   :  { %15305 = vmatmul.mubr.msk.f32.gmra.mrb[56].mxu1 %vm26_vm1, %v21648_v28 }
 0xa26   :  { %15307 = vmatprep.mubr.msk.f32.mxu1 %vm26_vm1, %v21652_v7 }
 0xa29   :  { %15308 = vmatmul.mubr.msk.f32.gmra.mrb[58].mxu1 %vm26_vm1, %v21656_v43 }
 0xa2a   :  { %15310 = vmatprep.mubr.msk.f32.mxu1 %vm26_vm1, %v21660_v55 }
 0xa2d   :  { %15311 = vmatmul.mubr.msk.f32.gmra.mrb[60].mxu1 %vm26_vm1, %v21664_v54 }
 0xa2e   :  { %15313 = vmatprep.mubr.msk.f32.mxu1 %vm26_vm1, %v21668_v1 }
 0xa31   :  { %15314 = vmatmul.mubr.msk.f32.gmra.mrb[62].mxu1 %vm26_vm1, %v21672_v23 }
 0xa32   :  { %15318 = vmatprep.mubr.msk.f32.mxu1 %vm26_vm1, %v21430_v29  ;;  %v21806_v29 = vld [vmem:[#allocation2 + $0x332] sm:$0xff] }
 0xa35   :  { %15319 = vmatmul.mubr.msk.f32.vlgmr.msra.gmra.mrb[0].mxu1 %vm26_vm1, %v21438_v5  ;;  %v21810_v5 = vld [vmem:[#allocation2 + $0x33a] sm:$0xff] }
 0xa36   :  { %15415 = vmatpush3.msk.msra.mxu1 %vm23789_vm15, %v21427_v6  ;;  %15321 = vmatprep.mubr.msk.f32.mxu1 %vm26_vm1, %v21442_v61  ;;  %v21742_v6 = vld [vmem:[#allocation2 + $0x18a] sm:$0xff] }
 0xa39   :  { %15322 = vmatmul.mubr.msk.f32.gmra.mrb[2].mxu1 %vm26_vm1, %v21446_v52 }
 0xa3a   :  { %15324 = vmatprep.mubr.msk.f32.mxu1 %vm26_vm1, %v21450_v42 }
 0xa3d   :  { %15325 = vmatmul.mubr.msk.f32.gmra.mrb[4].mxu1 %vm26_vm1, %v21454_v58 }
 0xa3e   :  { %15327 = vmatprep.mubr.msk.f32.mxu1 %vm26_vm1, %v21458_v10 }
 0xa41   :  { %15328 = vmatmul.mubr.msk.f32.gmra.mrb[6].mxu1 %vm26_vm1, %v21462_v41 }
 0xa42   :  { %15330 = vmatprep.mubr.msk.f32.mxu1 %vm26_vm1, %v21466_v17 }
 0xa45   :  { %15331 = vmatmul.mubr.msk.f32.gmra.mrb[8].mxu1 %vm26_vm1, %v21470_v46 }
 0xa46   :  { %15333 = vmatprep.mubr.msk.f32.mxu1 %vm26_vm1, %v21474_v38 }
 0xa49   :  { %15334 = vmatmul.mubr.msk.f32.gmra.mrb[10].mxu1 %vm26_vm1, %v21478_v39 }
 0xa4a   :  { %15336 = vmatprep.mubr.msk.f32.mxu1 %vm26_vm1, %v21482_v51 }
 0xa4d   :  { %15337 = vmatmul.mubr.msk.f32.gmra.mrb[12].mxu1 %vm26_vm1, %v21486_v57 }
 0xa4e   :  { %15339 = vmatprep.mubr.msk.f32.mxu1 %vm26_vm1, %v21490_v49 }
 0xa51   :  { %15340 = vmatmul.mubr.msk.f32.gmra.mrb[14].mxu1 %vm26_vm1, %v21494_v34 }
 0xa52   :  { %15342 = vmatprep.mubr.msk.f32.mxu1 %vm26_vm1, %v21498_v21 }
 0xa55   :  { %15343 = vmatmul.mubr.msk.f32.gmra.mrb[16].mxu1 %vm26_vm1, %v21502_v44 }
 0xa56   :  { %15345 = vmatprep.mubr.msk.f32.mxu1 %vm26_vm1, %v21506_v63 }
 0xa59   :  { %15346 = vmatmul.mubr.msk.f32.gmra.mrb[18].mxu1 %vm26_vm1, %v21510_v62 }
 0xa5a   :  { %15348 = vmatprep.mubr.msk.f32.mxu1 %vm26_vm1, %v21514_v59 }
 0xa5d   :  { %15349 = vmatmul.mubr.msk.f32.gmra.mrb[20].mxu1 %vm26_vm1, %v21518_v25 }
 0xa5e   :  { %15351 = vmatprep.mubr.msk.f32.mxu1 %vm26_vm1, %v21522_v3 }
 0xa61   :  { %15352 = vmatmul.mubr.msk.f32.gmra.mrb[22].mxu1 %vm26_vm1, %v21526_v37 }
 0xa62   :  { %15354 = vmatprep.mubr.msk.f32.mxu1 %vm26_vm1, %v21530_v26 }
 0xa65   :  { %15355 = vmatmul.mubr.msk.f32.gmra.mrb[24].mxu1 %vm26_vm1, %v21534_v31 }
 0xa66   :  { %15357 = vmatprep.mubr.msk.f32.mxu1 %vm26_vm1, %v21538_v30 }
 0xa69   :  { %15358 = vmatmul.mubr.msk.f32.gmra.mrb[26].mxu1 %vm26_vm1, %v21542_v4 }
 0xa6a   :  { %15360 = vmatprep.mubr.msk.f32.mxu1 %vm26_vm1, %v21546_v11 }
 0xa6d   :  { %15361 = vmatmul.mubr.msk.f32.gmra.mrb[28].mxu1 %vm26_vm1, %v21550_v13 }
 0xa6e   :  { %15363 = vmatprep.mubr.msk.f32.mxu1 %vm26_vm1, %v21738_v60 }
 0xa71   :  { %15364 = vmatmul.mubr.msk.f32.gmra.mrb[30].mxu1 %vm26_vm1, %v21742_v6 }
 0xa72   :  { %15366 = vmatprep.mubr.msk.f32.mxu1 %vm26_vm1, %v21556_v35 }
 0xa75   :  { %15367 = vmatmul.mubr.msk.f32.gmra.mrb[32].mxu1 %vm26_vm1, %v21560_v32 }
 0xa76   :  { %15369 = vmatprep.mubr.msk.f32.mxu1 %vm26_vm1, %v21564_v19 }
 0xa79   :  { %15370 = vmatmul.mubr.msk.f32.gmra.mrb[34].mxu1 %vm26_vm1, %v21568_v9 }
 0xa7a   :  { %15372 = vmatprep.mubr.msk.f32.mxu1 %vm26_vm1, %v21572_v27 }
 0xa7d   :  { %15373 = vmatmul.mubr.msk.f32.gmra.mrb[36].mxu1 %vm26_vm1, %v21576_v45 }
 0xa7e   :  { %15375 = vmatprep.mubr.msk.f32.mxu1 %vm26_vm1, %v21580_v24 }
 0xa81   :  { %15376 = vmatmul.mubr.msk.f32.gmra.mrb[38].mxu1 %vm26_vm1, %v21584_v15 }
 0xa82   :  { %15378 = vmatprep.mubr.msk.f32.mxu1 %vm26_vm1, %v21588_v56 }
 0xa85   :  { %15379 = vmatmul.mubr.msk.f32.gmra.mrb[40].mxu1 %vm26_vm1, %v21592_v18 }
 0xa86   :  { %15381 = vmatprep.mubr.msk.f32.mxu1 %vm26_vm1, %v21596_v53 }
 0xa89   :  { %15382 = vmatmul.mubr.msk.f32.gmra.mrb[42].mxu1 %vm26_vm1, %v21600_v50 }
 0xa8a   :  { %15384 = vmatprep.mubr.msk.f32.mxu1 %vm26_vm1, %v21604_v33 }
 0xa8d   :  { %15385 = vmatmul.mubr.msk.f32.gmra.mrb[44].mxu1 %vm26_vm1, %v21608_v0 }
 0xa8e   :  { %15387 = vmatprep.mubr.msk.f32.mxu1 %vm26_vm1, %v21612_v2 }
 0xa91   :  { %15388 = vmatmul.mubr.msk.f32.gmra.mrb[46].mxu1 %vm26_vm1, %v21616_v47 }
 0xa92   :  { %15390 = vmatprep.mubr.msk.f32.mxu1 %vm26_vm1, %v21620_v36 }
 0xa95   :  { %15391 = vmatmul.mubr.msk.f32.gmra.mrb[48].mxu1 %vm26_vm1, %v21624_v40 }
 0xa96   :  { %15393 = vmatprep.mubr.msk.f32.mxu1 %vm26_vm1, %v21628_v16 }
 0xa99   :  { %15394 = vmatmul.mubr.msk.f32.gmra.mrb[50].mxu1 %vm26_vm1, %v21632_v22 }
 0xa9a   :  { %15396 = vmatprep.mubr.msk.f32.mxu1 %vm26_vm1, %v21636_v48 }
 0xa9d   :  { %15397 = vmatmul.mubr.msk.f32.gmra.mrb[52].mxu1 %vm26_vm1, %v21640_v8 }
 0xa9e   :  { %15399 = vmatprep.mubr.msk.f32.mxu1 %vm26_vm1, %v21644_v12 }
 0xaa1   :  { %15400 = vmatmul.mubr.msk.f32.gmra.mrb[54].mxu1 %vm26_vm1, %v21648_v28 }
 0xaa2   :  { %15402 = vmatprep.mubr.msk.f32.mxu1 %vm26_vm1, %v21652_v7 }
 0xaa5   :  { %15403 = vmatmul.mubr.msk.f32.gmra.mrb[56].mxu1 %vm26_vm1, %v21656_v43 }
 0xaa6   :  { %15405 = vmatprep.mubr.msk.f32.mxu1 %vm26_vm1, %v21660_v55 }
 0xaa9   :  { %15406 = vmatmul.mubr.msk.f32.gmra.mrb[58].mxu1 %vm26_vm1, %v21664_v54 }
 0xaaa   :  { %15408 = vmatprep.mubr.msk.f32.mxu1 %vm26_vm1, %v21668_v1 }
 0xaad   :  { %15409 = vmatmul.mubr.msk.f32.gmra.mrb[60].mxu1 %vm26_vm1, %v21672_v23 }
 0xaae   :  { %15411 = vmatprep.mubr.msk.f32.mxu1 %vm26_vm1, %v21806_v29 }
 0xab1   :  { %15412 = vmatmul.mubr.msk.f32.gmra.mrb[62].mxu1 %vm26_vm1, %v21810_v5 }
 0xab2   :  { %15416 = vmatprep.mubr.msk.f32.mxu1 %vm26_vm1, %v21442_v61  ;;  %v9096_v61 = vld [vmem:[#allocation2 + $0x19a] sm:$0xff] }
 0xab5   :  { %15417 = vmatmul.mubr.msk.f32.vlgmr.msra.gmra.mrb[0].mxu1 %vm26_vm1, %v21446_v52  ;;  %v9097_v52 = vld [vmem:[#allocation2 + $0x1a2] sm:$0xff] }
 0xab6   :  { %15419 = vmatprep.mubr.msk.f32.mxu1 %vm26_vm1, %v21450_v42  ;;  %v9132_v42 = vld [vmem:[#allocation2 + $0x34a] sm:$0xff] }
 0xab9   :  { %15420 = vmatmul.mubr.msk.f32.gmra.mrb[2].mxu1 %vm26_vm1, %v21454_v58  ;;  %v9133_v58 = vld [vmem:[#allocation2 + $0x352] sm:$0xff] }
 0xaba   :  { %15422 = vmatprep.mubr.msk.f32.mxu1 %vm26_vm1, %v21458_v10 }
 0xabd   :  { %15423 = vmatmul.mubr.msk.f32.gmra.mrb[4].mxu1 %vm26_vm1, %v21462_v41 }
 0xabe   :  { %15425 = vmatprep.mubr.msk.f32.mxu1 %vm26_vm1, %v21466_v17 }
 0xac1   :  { %15426 = vmatmul.mubr.msk.f32.gmra.mrb[6].mxu1 %vm26_vm1, %v21470_v46 }
 0xac2   :  { %15428 = vmatprep.mubr.msk.f32.mxu1 %vm26_vm1, %v21474_v38 }
 0xac5   :  { %15429 = vmatmul.mubr.msk.f32.gmra.mrb[8].mxu1 %vm26_vm1, %v21478_v39 }
 0xac6   :  { %15431 = vmatprep.mubr.msk.f32.mxu1 %vm26_vm1, %v21482_v51 }
 0xac9   :  { %15432 = vmatmul.mubr.msk.f32.gmra.mrb[10].mxu1 %vm26_vm1, %v21486_v57 }
 0xaca   :  { %15434 = vmatprep.mubr.msk.f32.mxu1 %vm26_vm1, %v21490_v49 }
 0xacd   :  { %15435 = vmatmul.mubr.msk.f32.gmra.mrb[12].mxu1 %vm26_vm1, %v21494_v34 }
 0xace   :  { %15437 = vmatprep.mubr.msk.f32.mxu1 %vm26_vm1, %v21498_v21 }
 0xad1   :  { %15438 = vmatmul.mubr.msk.f32.gmra.mrb[14].mxu1 %vm26_vm1, %v21502_v44 }
 0xad2   :  { %15440 = vmatprep.mubr.msk.f32.mxu1 %vm26_vm1, %v21506_v63 }
 0xad5   :  { %15441 = vmatmul.mubr.msk.f32.gmra.mrb[16].mxu1 %vm26_vm1, %v21510_v62 }
 0xad6   :  { %15443 = vmatprep.mubr.msk.f32.mxu1 %vm26_vm1, %v21514_v59 }
 0xad9   :  { %15444 = vmatmul.mubr.msk.f32.gmra.mrb[18].mxu1 %vm26_vm1, %v21518_v25 }
 0xada   :  { %15446 = vmatprep.mubr.msk.f32.mxu1 %vm26_vm1, %v21522_v3 }
 0xadd   :  { %15447 = vmatmul.mubr.msk.f32.gmra.mrb[20].mxu1 %vm26_vm1, %v21526_v37 }
 0xade   :  { %15449 = vmatprep.mubr.msk.f32.mxu1 %vm26_vm1, %v21530_v26 }
 0xae1   :  { %15450 = vmatmul.mubr.msk.f32.gmra.mrb[22].mxu1 %vm26_vm1, %v21534_v31 }
 0xae2   :  { %15452 = vmatprep.mubr.msk.f32.mxu1 %vm26_vm1, %v21538_v30 }
 0xae5   :  { %15453 = vmatmul.mubr.msk.f32.gmra.mrb[24].mxu1 %vm26_vm1, %v21542_v4 }
 0xae6   :  { %15455 = vmatprep.mubr.msk.f32.mxu1 %vm26_vm1, %v21546_v11 }
 0xae9   :  { %15456 = vmatmul.mubr.msk.f32.gmra.mrb[26].mxu1 %vm26_vm1, %v21550_v13 }
 0xaea   :  { %15458 = vmatprep.mubr.msk.f32.mxu1 %vm26_vm1, %v21738_v60 }
 0xaed   :  { %15459 = vmatmul.mubr.msk.f32.gmra.mrb[28].mxu1 %vm26_vm1, %v21742_v6 }
 0xaee   :  { %15461 = vmatprep.mubr.msk.f32.mxu1 %vm26_vm1, %v9096_v61 }
 0xaf1   :  { %15462 = vmatmul.mubr.msk.f32.gmra.mrb[30].mxu1 %vm26_vm1, %v9097_v52 }
 0xaf2   :  { %15464 = vmatprep.mubr.msk.f32.mxu1 %vm26_vm1, %v21564_v19 }
 0xaf5   :  { %15465 = vmatmul.mubr.msk.f32.gmra.mrb[32].mxu1 %vm26_vm1, %v21568_v9 }
 0xaf6   :  { %15467 = vmatprep.mubr.msk.f32.mxu1 %vm26_vm1, %v21572_v27 }
 0xaf9   :  { %15468 = vmatmul.mubr.msk.f32.gmra.mrb[34].mxu1 %vm26_vm1, %v21576_v45 }
 0xafa   :  { %15470 = vmatprep.mubr.msk.f32.mxu1 %vm26_vm1, %v21580_v24 }
 0xafd   :  { %15471 = vmatmul.mubr.msk.f32.gmra.mrb[36].mxu1 %vm26_vm1, %v21584_v15 }
 0xafe   :  { %15473 = vmatprep.mubr.msk.f32.mxu1 %vm26_vm1, %v21588_v56 }
 0xb01   :  { %15474 = vmatmul.mubr.msk.f32.gmra.mrb[38].mxu1 %vm26_vm1, %v21592_v18 }
 0xb02   :  { %15476 = vmatprep.mubr.msk.f32.mxu1 %vm26_vm1, %v21596_v53 }
 0xb05   :  { %15477 = vmatmul.mubr.msk.f32.gmra.mrb[40].mxu1 %vm26_vm1, %v21600_v50 }
 0xb06   :  { %15479 = vmatprep.mubr.msk.f32.mxu1 %vm26_vm1, %v21604_v33 }
 0xb09   :  { %15480 = vmatmul.mubr.msk.f32.gmra.mrb[42].mxu1 %vm26_vm1, %v21608_v0 }
 0xb0a   :  { %15482 = vmatprep.mubr.msk.f32.mxu1 %vm26_vm1, %v21612_v2 }
 0xb0d   :  { %15483 = vmatmul.mubr.msk.f32.gmra.mrb[44].mxu1 %vm26_vm1, %v21616_v47 }
 0xb0e   :  { %15485 = vmatprep.mubr.msk.f32.mxu1 %vm26_vm1, %v21620_v36 }
 0xb11   :  { %15486 = vmatmul.mubr.msk.f32.gmra.mrb[46].mxu1 %vm26_vm1, %v21624_v40 }
 0xb12   :  { %15488 = vmatprep.mubr.msk.f32.mxu1 %vm26_vm1, %v21628_v16 }
 0xb15   :  { %15489 = vmatmul.mubr.msk.f32.gmra.mrb[48].mxu1 %vm26_vm1, %v21632_v22 }
 0xb16   :  { %15491 = vmatprep.mubr.msk.f32.mxu1 %vm26_vm1, %v21636_v48 }
 0xb19   :  { %15492 = vmatmul.mubr.msk.f32.gmra.mrb[50].mxu1 %vm26_vm1, %v21640_v8 }
 0xb1a   :  { %15494 = vmatprep.mubr.msk.f32.mxu1 %vm26_vm1, %v21644_v12 }
 0xb1d   :  { %15495 = vmatmul.mubr.msk.f32.gmra.mrb[52].mxu1 %vm26_vm1, %v21648_v28 }
 0xb1e   :  { %15497 = vmatprep.mubr.msk.f32.mxu1 %vm26_vm1, %v21652_v7 }
 0xb21   :  { %15498 = vmatmul.mubr.msk.f32.gmra.mrb[54].mxu1 %vm26_vm1, %v21656_v43 }
 0xb22   :  { %15500 = vmatprep.mubr.msk.f32.mxu1 %vm26_vm1, %v21660_v55 }
 0xb25   :  { %15501 = vmatmul.mubr.msk.f32.gmra.mrb[56].mxu1 %vm26_vm1, %v21664_v54 }
 0xb26   :  { %15503 = vmatprep.mubr.msk.f32.mxu1 %vm26_vm1, %v21668_v1 }
 0xb29   :  { %15504 = vmatmul.mubr.msk.f32.gmra.mrb[58].mxu1 %vm26_vm1, %v21672_v23 }
 0xb2a   :  { %15506 = vmatprep.mubr.msk.f32.mxu1 %vm26_vm1, %v21806_v29 }
 0xb2d   :  { %15507 = vmatmul.mubr.msk.f32.gmra.mrb[60].mxu1 %vm26_vm1, %v21810_v5 }
 0xb2e   :  { %15509 = vmatprep.mubr.msk.f32.mxu1 %vm26_vm1, %v9132_v42 }
 0xb31   :  { %15510 = vmatmul.mubr.msk.f32.gmra.mrb[62].mxu1 %vm26_vm1, %v9133_v58 }
 0xb88   :  { %v21938_v10 = vpop.f32.mrb[0].mxu1 }
 0xb89   :  { %v10713_v41 = vsel %vm26_vm1, %v21938_v10, 0.0  ;;  %v21942_v17 = vpop.f32.mrb[1].mxu1 }
 0xb8a   :  { %v10712_v46 = vsel %vm26_vm1, %v21942_v17, 0.0 }
 0xb8b   :  { %v10714_v38 = vadd.f32 %v10713_v41, %v10712_v46 }
 0xb8c   :  { %v21946_v39 = vpop.f32.mrb[2].mxu1 }
 0xb8d   :  { %23790 = vst [vmem:[#allocation72_spill] sm:$0xff] %v21946_v39  ;;  %v21948_v51 = vpop.f32.mrb[3].mxu1  ;;  %v10717_v34 = vsel %vm26_vm1, %v21946_v39, 0.0 }
 0xb8e   :  { %23791 = vst [vmem:[#allocation71_spill] sm:$0xff] %v21948_v51  ;;  %v10715_v57 = vsel %vm26_vm1, %v21948_v51, 0.0 }
 0xb8f   :  { %v10716_v49 = vadd.f32 %v10715_v57, %v10714_v38 }
 0xb90   :  { %v21954_v21 = vpop.f32.mrb[4].mxu1 }
 0xb91   :  { %23792 = vst [vmem:[#allocation85_spill] sm:$0xff] %v21954_v21  ;;  %v10718_v44 = vadd.f32 %v10717_v34, %v10716_v49  ;;  %v21956_v63 = vpop.f32.mrb[5].mxu1  ;;  %v10721_v25 = vsel %vm26_vm1, %v21954_v21, 0.0 }
 0xb92   :  { %23793 = vst [vmem:[#allocation91_spill] sm:$0xff] %v21956_v63  ;;  %v10719_v62 = vsel %vm26_vm1, %v21956_v63, 0.0 }
 0xb93   :  { %v10720_v59 = vadd.f32 %v10719_v62, %v10718_v44 }
 0xb94   :  { %v21962_v3 = vpop.f32.mrb[6].mxu1 }
 0xb95   :  { %v21964_v37 = vpop.f32.mrb[7].mxu1  ;;  %v10722_v26 = vadd.f32 %v10721_v25, %v10720_v59  ;;  %v10725_v4 = vsel %vm26_vm1, %v21962_v3, 0.0 }
 0xb96   :  { %v10723_v31 = vsel %vm26_vm1, %v21964_v37, 0.0 }
 0xb97   :  { %v10724_v30 = vadd.f32 %v10723_v31, %v10722_v26 }
 0xb98   :  { %v21970_v11 = vpop.f32.mrb[8].mxu1 }
 0xb99   :  { %v21972_v14 = vpop.f32.mrb[9].mxu1  ;;  %v10726_v13 = vadd.f32 %v10725_v4, %v10724_v30  ;;  %v10729_v32 = vsel %vm26_vm1, %v21970_v11, 0.0 }
 0xb9a   :  { %v10727_v20 = vsel %vm26_vm1, %v21972_v14, 0.0 }
 0xb9b   :  { %v10728_v35 = vadd.f32 %v10727_v20, %v10726_v13 }
 0xb9c   :  { %v21978_v19 = vpop.f32.mrb[10].mxu1 }
 0xb9d   :  { %v21980_v9 = vpop.f32.mrb[11].mxu1  ;;  %v10730_v27 = vadd.f32 %v10729_v32, %v10728_v35  ;;  %v10733_v15 = vsel %vm26_vm1, %v21978_v19, 0.0 }
 0xb9e   :  { %v10731_v45 = vsel %vm26_vm1, %v21980_v9, 0.0 }
 0xb9f   :  { %v10732_v24 = vadd.f32 %v10731_v45, %v10730_v27 }
 0xba0   :  { %v21986_v56 = vpop.f32.mrb[12].mxu1 }
 0xba1   :  { %v21988_v18 = vpop.f32.mrb[13].mxu1  ;;  %v10734_v53 = vadd.f32 %v10733_v15, %v10732_v24  ;;  %v10737_v0 = vsel %vm26_vm1, %v21986_v56, 0.0 }
 0xba2   :  { %v10735_v50 = vsel %vm26_vm1, %v21988_v18, 0.0 }
 0xba3   :  { %v10736_v33 = vadd.f32 %v10735_v50, %v10734_v53 }
 0xba4   :  { %v21994_v2 = vpop.f32.mrb[14].mxu1 }
 0xba5   :  { %v21996_v47 = vpop.f32.mrb[15].mxu1  ;;  %v10738_v36 = vadd.f32 %v10737_v0, %v10736_v33  ;;  %v10741_v22 = vsel %vm26_vm1, %v21994_v2, 0.0 }
 0xba6   :  { %v10739_v40 = vsel %vm26_vm1, %v21996_v47, 0.0 }
 0xba7   :  { %v10740_v16 = vadd.f32 %v10739_v40, %v10738_v36 }
 0xba8   :  { %v22002_v48 = vpop.f32.mrb[16].mxu1 }
 0xba9   :  { %v22004_v8 = vpop.f32.mrb[17].mxu1  ;;  %v10742_v12 = vadd.f32 %v10741_v22, %v10740_v16  ;;  %v10745_v43 = vsel %vm26_vm1, %v22002_v48, 0.0 }
 0xbaa   :  { %v10743_v28 = vsel %vm26_vm1, %v22004_v8, 0.0 }
 0xbab   :  { %v10744_v7 = vadd.f32 %v10743_v28, %v10742_v12 }
 0xbac   :  { %v22010_v55 = vpop.f32.mrb[18].mxu1 }
 0xbad   :  { %v22012_v54 = vpop.f32.mrb[19].mxu1  ;;  %v10746_v1 = vadd.f32 %v10745_v43, %v10744_v7  ;;  %v10749_v6 = vsel %vm26_vm1, %v22010_v55, 0.0 }
 0xbae   :  { %v10747_v23 = vsel %vm26_vm1, %v22012_v54, 0.0 }
 0xbaf   :  { %v10748_v60 = vadd.f32 %v10747_v23, %v10746_v1 }
 0xbb0   :  { %v22018_v29 = vpop.f32.mrb[20].mxu1 }
 0xbb1   :  { %v22020_v5 = vpop.f32.mrb[21].mxu1  ;;  %v10750_v61 = vadd.f32 %v10749_v6, %v10748_v60  ;;  %v10753_v58 = vsel %vm26_vm1, %v22018_v29, 0.0 }
 0xbb2   :  { %v10751_v52 = vsel %vm26_vm1, %v22020_v5, 0.0 }
 0xbb3   :  { %v10752_v42 = vadd.f32 %v10751_v52, %v10750_v61 }
 0xbb4   :  { %v22026_v41 = vpop.f32.mrb[22].mxu1 }
 0xbb5   :  { %v22028_v46 = vpop.f32.mrb[23].mxu1  ;;  %v10754_v38 = vadd.f32 %v10753_v58, %v10752_v42  ;;  %v10757_v34 = vsel %vm26_vm1, %v22026_v41, 0.0 }
 0xbb6   :  { %v10755_v57 = vsel %vm26_vm1, %v22028_v46, 0.0 }
 0xbb7   :  { %v10756_v49 = vadd.f32 %v10755_v57, %v10754_v38 }
 0xbb8   :  { %v22034_v44 = vpop.f32.mrb[24].mxu1 }
 0xbb9   :  { %v22036_v62 = vpop.f32.mrb[25].mxu1  ;;  %v10758_v59 = vadd.f32 %v10757_v34, %v10756_v49  ;;  %v10761_v31 = vsel %vm26_vm1, %v22034_v44, 0.0 }
 0xbba   :  { %v10759_v25 = vsel %vm26_vm1, %v22036_v62, 0.0 }
 0xbbb   :  { %v10760_v26 = vadd.f32 %v10759_v25, %v10758_v59 }
 0xbbc   :  { %v22042_v30 = vpop.f32.mrb[26].mxu1 }
 0xbbd   :  { %v22044_v4 = vpop.f32.mrb[27].mxu1  ;;  %v10762_v13 = vadd.f32 %v10761_v31, %v10760_v26  ;;  %v10765_v32 = vsel %vm26_vm1, %v22042_v30, 0.0 }
 0xbbe   :  { %v10763_v20 = vsel %vm26_vm1, %v22044_v4, 0.0 }
 0xbbf   :  { %v10764_v35 = vadd.f32 %v10763_v20, %v10762_v13 }
 0xbc0   :  { %v22050_v27 = vpop.f32.mrb[28].mxu1 }
 0xbc1   :  { %v22052_v45 = vpop.f32.mrb[29].mxu1  ;;  %v10766_v24 = vadd.f32 %v10765_v32, %v10764_v35  ;;  %v10769_v50 = vsel %vm26_vm1, %v22050_v27, 0.0 }
 0xbc2   :  { %v10767_v15 = vsel %vm26_vm1, %v22052_v45, 0.0 }
 0xbc3   :  { %v10768_v53 = vadd.f32 %v10767_v15, %v10766_v24 }
 0xbc4   :  { %v22058_v33 = vpop.f32.mrb[30].mxu1 }
 0xbc5   :  { %v22060_v0 = vpop.f32.mrb[31].mxu1  ;;  %v10770_v36 = vadd.f32 %v10769_v50, %v10768_v53  ;;  %v10773_v22 = vsel %vm26_vm1, %v22058_v33, 0.0 }
 0xbc6   :  { %v10771_v40 = vsel %vm26_vm1, %v22060_v0, 0.0 }
 0xbc7   :  { %v10772_v16 = vadd.f32 %v10771_v40, %v10770_v36 }
 0xbc8   :  { %v22066_v12 = vpop.f32.mrb[32].mxu1 }
 0xbc9   :  { %v22068_v28 = vpop.f32.mrb[33].mxu1  ;;  %v10774_v7 = vadd.f32 %v10773_v22, %v10772_v16  ;;  %v10777_v23 = vsel %vm26_vm1, %v22066_v12, 0.0 }
 0xbca   :  { %v10775_v43 = vsel %vm26_vm1, %v22068_v28, 0.0 }
 0xbcb   :  { %v10776_v1 = vadd.f32 %v10775_v43, %v10774_v7 }
 0xbcc   :  { %v22074_v60 = vpop.f32.mrb[34].mxu1 }
 0xbcd   :  { %v22076_v6 = vpop.f32.mrb[35].mxu1  ;;  %v10778_v61 = vadd.f32 %v10777_v23, %v10776_v1  ;;  %v10781_v58 = vsel %vm26_vm1, %v22074_v60, 0.0 }
 0xbce   :  { %v10779_v52 = vsel %vm26_vm1, %v22076_v6, 0.0 }
 0xbcf   :  { %v10780_v42 = vadd.f32 %v10779_v52, %v10778_v61 }
 0xbd0   :  { %v22082_v38 = vpop.f32.mrb[36].mxu1 }
 0xbd1   :  { %v22084_v57 = vpop.f32.mrb[37].mxu1  ;;  %v10782_v49 = vadd.f32 %v10781_v58, %v10780_v42  ;;  %v10785_v25 = vsel %vm26_vm1, %v22082_v38, 0.0 }
 0xbd2   :  { %v10783_v34 = vsel %vm26_vm1, %v22084_v57, 0.0 }
 0xbd3   :  { %v10784_v59 = vadd.f32 %v10783_v34, %v10782_v49 }
 0xbd4   :  { %v22090_v26 = vpop.f32.mrb[38].mxu1 }
 0xbd5   :  { %v22092_v31 = vpop.f32.mrb[39].mxu1  ;;  %v10786_v13 = vadd.f32 %v10785_v25, %v10784_v59  ;;  %v10789_v32 = vsel %vm26_vm1, %v22090_v26, 0.0 }
 0xbd6   :  { %v10787_v20 = vsel %vm26_vm1, %v22092_v31, 0.0 }
 0xbd7   :  { %v10788_v35 = vadd.f32 %v10787_v20, %v10786_v13 }
 0xbd8   :  { %v22098_v24 = vpop.f32.mrb[40].mxu1 }
 0xbd9   :  { %v22100_v15 = vpop.f32.mrb[41].mxu1  ;;  %v10790_v53 = vadd.f32 %v10789_v32, %v10788_v35  ;;  %v10793_v40 = vsel %vm26_vm1, %v22098_v24, 0.0 }
 0xbda   :  { %v10791_v50 = vsel %vm26_vm1, %v22100_v15, 0.0 }
 0xbdb   :  { %v10792_v36 = vadd.f32 %v10791_v50, %v10790_v53 }
 0xbdc   :  { %v22106_v16 = vpop.f32.mrb[42].mxu1 }
 0xbdd   :  { %v22108_v22 = vpop.f32.mrb[43].mxu1  ;;  %v10794_v7 = vadd.f32 %v10793_v40, %v10792_v36  ;;  %v10797_v23 = vsel %vm26_vm1, %v22106_v16, 0.0 }
 0xbde   :  { %v10795_v43 = vsel %vm26_vm1, %v22108_v22, 0.0 }
 0xbdf   :  { %v10796_v1 = vadd.f32 %v10795_v43, %v10794_v7 }
 0xbe0   :  { %v22114_v61 = vpop.f32.mrb[44].mxu1 }
 0xbe1   :  { %23794 = vst [vmem:[#allocation92_spill] sm:$0xff] %v22114_v61  ;;  %v22116_v52 = vpop.f32.mrb[45].mxu1  ;;  %v10798_v42 = vadd.f32 %v10797_v23, %v10796_v1  ;;  %v10801_v34 = vsel %vm26_vm1, %v22114_v61, 0.0 }
 0xbe2   :  { %23795 = vst [vmem:[#allocation93_spill] sm:$0xff] %v22116_v52  ;;  %v10799_v58 = vsel %vm26_vm1, %v22116_v52, 0.0 }
 0xbe3   :  { %v10800_v49 = vadd.f32 %v10799_v58, %v10798_v42 }
 0xbe4   :  { %v22122_v59 = vpop.f32.mrb[46].mxu1 }
 0xbe5   :  { %23796 = vst [vmem:[#allocation94_spill] sm:$0xff] %v22122_v59  ;;  %v22124_v25 = vpop.f32.mrb[47].mxu1  ;;  %v10802_v13 = vadd.f32 %v10801_v34, %v10800_v49  ;;  %v10805_v32 = vsel %vm26_vm1, %v22122_v59, 0.0 }
 0xbe6   :  { %23797 = vst [vmem:[#allocation74_spill] sm:$0xff] %v22124_v25  ;;  %v10803_v20 = vsel %vm26_vm1, %v22124_v25, 0.0 }
 0xbe7   :  { %v10804_v35 = vadd.f32 %v10803_v20, %v10802_v13 }
 0xbe8   :  { %v22130_v53 = vpop.f32.mrb[48].mxu1 }
 0xbe9   :  { %23798 = vst [vmem:[#allocation95_spill] sm:$0xff] %v22130_v53  ;;  %v22132_v50 = vpop.f32.mrb[49].mxu1  ;;  %v10806_v36 = vadd.f32 %v10805_v32, %v10804_v35  ;;  %v10809_v43 = vsel %vm26_vm1, %v22130_v53, 0.0 }
 0xbea   :  { %23799 = vst [vmem:[#allocation96_spill] sm:$0xff] %v22132_v50  ;;  %v10807_v40 = vsel %vm26_vm1, %v22132_v50, 0.0 }
 0xbeb   :  { %v10808_v7 = vadd.f32 %v10807_v40, %v10806_v36 }
 0xbec   :  { %v22138_v1 = vpop.f32.mrb[50].mxu1 }
 0xbed   :  { %23800 = vst [vmem:[#allocation73_spill] sm:$0xff] %v22138_v1  ;;  %v22140_v23 = vpop.f32.mrb[51].mxu1  ;;  %v10810_v42 = vadd.f32 %v10809_v43, %v10808_v7  ;;  %v10813_v34 = vsel %vm26_vm1, %v22138_v1, 0.0 }
 0xbee   :  { %23801 = vst [vmem:[#allocation76_spill] sm:$0xff] %v22140_v23  ;;  %v10811_v58 = vsel %vm26_vm1, %v22140_v23, 0.0 }
 0xbef   :  { %v10812_v49 = vadd.f32 %v10811_v58, %v10810_v42 }
 0xbf0   :  { %v22146_v13 = vpop.f32.mrb[52].mxu1 }
 0xbf1   :  { %23802 = vst [vmem:[#allocation97_spill] sm:$0xff] %v22146_v13  ;;  %v22148_v20 = vpop.f32.mrb[53].mxu1  ;;  %v10814_v35 = vadd.f32 %v10813_v34, %v10812_v49  ;;  %v10817_v40 = vsel %vm26_vm1, %v22146_v13, 0.0 }
 0xbf2   :  { %23803 = vst [vmem:[#allocation75_spill] sm:$0xff] %v22148_v20  ;;  %v10815_v32 = vsel %vm26_vm1, %v22148_v20, 0.0 }
 0xbf3   :  { %v10816_v36 = vadd.f32 %v10815_v32, %v10814_v35 }
 0xbf4   :  { %v22154_v7 = vpop.f32.mrb[54].mxu1 }
 0xbf5   :  { %23804 = vst [vmem:[#allocation78_spill] sm:$0xff] %v22154_v7  ;;  %v22156_v43 = vpop.f32.mrb[55].mxu1  ;;  %v10818_v42 = vadd.f32 %v10817_v40, %v10816_v36  ;;  %v10821_v23 = vsel %vm26_vm1, %v22154_v7, 0.0 }
 0xbf6   :  { %23805 = vst [vmem:[#allocation98_spill] sm:$0xff] %v22156_v43  ;;  %v10819_v58 = vsel %vm26_vm1, %v22156_v43, 0.0 }
 0xbf7   :  { %v10820_v1 = vadd.f32 %v10819_v58, %v10818_v42 }
 0xbf8   :  { %v22162_v49 = vpop.f32.mrb[56].mxu1 }
 0xbf9   :  { %23806 = vst [vmem:[#allocation77_spill] sm:$0xff] %v22162_v49  ;;  %v22164_v34 = vpop.f32.mrb[57].mxu1  ;;  %v10822_v35 = vadd.f32 %v10821_v23, %v10820_v1  ;;  %v10825_v20 = vsel %vm26_vm1, %v22162_v49, 0.0 }
 0xbfa   :  { %23807 = vst [vmem:[#allocation99_spill] sm:$0xff] %v22164_v34  ;;  %v10823_v32 = vsel %vm26_vm1, %v22164_v34, 0.0 }
 0xbfb   :  { %v10824_v13 = vadd.f32 %v10823_v32, %v10822_v35 }
 0xbfc   :  { %v22170_v36 = vpop.f32.mrb[58].mxu1 }
 0xbfd   :  { %23808 = vst [vmem:[#allocation80_spill] sm:$0xff] %v22170_v36  ;;  %v22172_v40 = vpop.f32.mrb[59].mxu1  ;;  %v10826_v42 = vadd.f32 %v10825_v20, %v10824_v13  ;;  %v10829_v43 = vsel %vm26_vm1, %v22170_v36, 0.0 }
 0xbfe   :  { %23809 = vst [vmem:[#allocation79_spill] sm:$0xff] %v22172_v40  ;;  %v10827_v58 = vsel %vm26_vm1, %v22172_v40, 0.0 }
 0xbff   :  { %v10828_v7 = vadd.f32 %v10827_v58, %v10826_v42 }
 0xc00   :  { %v22178_v1 = vpop.f32.mrb[60].mxu1 }
 0xc01   :  { %23810 = vst [vmem:[#allocation100_spill] sm:$0xff] %v22178_v1  ;;  %v22180_v23 = vpop.f32.mrb[61].mxu1  ;;  %v10830_v35 = vadd.f32 %v10829_v43, %v10828_v7  ;;  %v10833_v34 = vsel %vm26_vm1, %v22178_v1, 0.0 }
 0xc02   :  { %23811 = vst [vmem:[#allocation82_spill] sm:$0xff] %v22180_v23  ;;  %v10831_v32 = vsel %vm26_vm1, %v22180_v23, 0.0 }
 0xc03   :  { %v10832_v49 = vadd.f32 %v10831_v32, %v10830_v35 }
 0xc04   :  { %v22186_v13 = vpop.f32.mrb[62].mxu1 }
 0xc05   :  { %23812 = vst [vmem:[#allocation81_spill] sm:$0xff] %v22186_v13  ;;  %v22188_v20 = vpop.f32.mrb[63].mxu1  ;;  %v10834_v42 = vadd.f32 %v10833_v34, %v10832_v49  ;;  %v10837_v40 = vsel %vm26_vm1, %v22186_v13, 0.0 }
 0xc06   :  { %23813 = vst [vmem:[#allocation101_spill] sm:$0xff] %v22188_v20  ;;  %v10835_v58 = vsel %vm26_vm1, %v22188_v20, 0.0 }
 0xc07   :  { %v10836_v36 = vadd.f32 %v10835_v58, %v10834_v42 }
 0xc09   :  { %v10838_v7 = vadd.f32 %v10837_v40, %v10836_v36 }
 0xc0b   :  { %v10839_v43 = vrot.slane %v10838_v7, 4 }
 0xc0d   :  { %v10840_v53 = vadd.f32 %v10839_v43, %v10838_v7 }
 0xc0f   :  { %v10841_v23 = vrot.slane %v10840_v53, 2 }
 0xc11   :  { %v10842_v35 = vadd.f32 %v10841_v23, %v10840_v53 }
 0xc13   :  { %v10843_v32 = vrot.slane %v10842_v35, 1 }
 0xc15   :  { %v10844_v50 = vadd.f32 %v10843_v32, %v10842_v35 }
 0xc17   :  { %v22194_v1 = vmul.f32 0.001953125, %v10844_v50 }
 0xc19   :  { %v10846_v59 = vsub.f32 %v21942_v17, %v22194_v1  ;;  %v10847_v49 = vsub.f32 %v21938_v10, %v22194_v1  ;;  %v10848_v34 = vsub.f32 %v21948_v51, %v22194_v1  ;;  %v10849_v36 = vsub.f32 %v21946_v39, %v22194_v1 }
 0xc1a   :  { %v10850_v53 = vsub.f32 %v21956_v63, %v22194_v1  ;;  %v10851_v50 = vsub.f32 %v21954_v21, %v22194_v1  ;;  %v10852_v32 = vsub.f32 %v21964_v37, %v22194_v1  ;;  %v10853_v63 = vsub.f32 %v21962_v3, %v22194_v1 }
 0xc1b   :  { %v10910_v40 = vmul.f32 %v10846_v59, %v10846_v59  ;;  %v10911_v42 = vmul.f32 %v10847_v49, %v10847_v49  ;;  %v10912_v23 = vmul.f32 %v10848_v34, %v10848_v34  ;;  %v10913_v58 = vmul.f32 %v10849_v36, %v10849_v36 }
 0xc1c   :  { %v10914_v51 = vmul.f32 %v10850_v53, %v10850_v53  ;;  %v10915_v34 = vmul.f32 %v10851_v50, %v10851_v50  ;;  %v10854_v36 = vsub.f32 %v21972_v14, %v22194_v1  ;;  %v10855_v53 = vsub.f32 %v21970_v11, %v22194_v1 }
 0xc1d   :  { %v10974_v7 = vsel %vm26_vm1, %v10910_v40, 0.0  ;;  %v10975_v43 = vsel %vm26_vm1, %v10911_v42, 0.0  ;;  %v10977_v59 = vsel %vm26_vm1, %v10912_v23, 0.0  ;;  %v10979_v39 = vsel %vm26_vm1, %v10913_v58, 0.0 }
 0xc1e   :  { %v10976_v35 = vadd.f32 %v10975_v43, %v10974_v7  ;;  %v10916_v40 = vmul.f32 %v10852_v32, %v10852_v32  ;;  %v10981_v42 = vsel %vm26_vm1, %v10914_v51, 0.0  ;;  %v10917_v43 = vmul.f32 %v10853_v63, %v10853_v63 }
 0xc1f   :  { %v10983_v23 = vsel %vm26_vm1, %v10915_v34, 0.0  ;;  %v10856_v50 = vsub.f32 %v21980_v9, %v22194_v1  ;;  %v10857_v32 = vsub.f32 %v21978_v19, %v22194_v1  ;;  %v10858_v63 = vsub.f32 %v21988_v18, %v22194_v1 }
 0xc20   :  { %v10978_v49 = vadd.f32 %v10977_v59, %v10976_v35  ;;  %v10918_v59 = vmul.f32 %v10854_v36, %v10854_v36  ;;  %v10987_v51 = vsel %vm26_vm1, %v10917_v43, 0.0  ;;  %v10859_v36 = vsub.f32 %v21986_v56, %v22194_v1 }
 0xc22   :  { %v10980_v21 = vadd.f32 %v10979_v39, %v10978_v49  ;;  %v10985_v39 = vsel %vm26_vm1, %v10916_v40, 0.0  ;;  %v10919_v49 = vmul.f32 %v10855_v53, %v10855_v53  ;;  %v10989_v34 = vsel %vm26_vm1, %v10918_v59, 0.0 }
 0xc23   :  { %v10860_v53 = vsub.f32 %v21996_v47, %v22194_v1 }
 0xc24   :  { %v10982_v7 = vadd.f32 %v10981_v42, %v10980_v21  ;;  %v10920_v42 = vmul.f32 %v10856_v50, %v10856_v50  ;;  %v10991_v40 = vsel %vm26_vm1, %v10919_v49, 0.0  ;;  %v10861_v50 = vsub.f32 %v21994_v2, %v22194_v1 }
 0xc26   :  { %v10984_v35 = vadd.f32 %v10983_v23, %v10982_v7  ;;  %v10921_v23 = vmul.f32 %v10857_v32, %v10857_v32  ;;  %v10993_v43 = vsel %vm26_vm1, %v10920_v42, 0.0  ;;  %v10862_v32 = vsub.f32 %v22004_v8, %v22194_v1 }
 0xc28   :  { %v10986_v58 = vadd.f32 %v10985_v39, %v10984_v35  ;;  %v10922_v39 = vmul.f32 %v10858_v63, %v10858_v63  ;;  %v10995_v59 = vsel %vm26_vm1, %v10921_v23, 0.0  ;;  %v10863_v63 = vsub.f32 %v22002_v48, %v22194_v1 }
 0xc2a   :  { %v10988_v21 = vadd.f32 %v10987_v51, %v10986_v58  ;;  %v10923_v51 = vmul.f32 %v10859_v36, %v10859_v36  ;;  %v10997_v49 = vsel %vm26_vm1, %v10922_v39, 0.0  ;;  %v10864_v36 = vsub.f32 %v22012_v54, %v22194_v1 }
 0xc2c   :  { %v10990_v7 = vadd.f32 %v10989_v34, %v10988_v21  ;;  %v10924_v34 = vmul.f32 %v10860_v53, %v10860_v53  ;;  %v10999_v42 = vsel %vm26_vm1, %v10923_v51, 0.0  ;;  %v10865_v53 = vsub.f32 %v22010_v55, %v22194_v1 }
 0xc2e   :  { %v10992_v35 = vadd.f32 %v10991_v40, %v10990_v7  ;;  %v10925_v40 = vmul.f32 %v10861_v50, %v10861_v50  ;;  %v11001_v23 = vsel %vm26_vm1, %v10924_v34, 0.0  ;;  %v10866_v50 = vsub.f32 %v22020_v5, %v22194_v1 }
 0xc30   :  { %v10994_v58 = vadd.f32 %v10993_v43, %v10992_v35  ;;  %v10926_v43 = vmul.f32 %v10862_v32, %v10862_v32  ;;  %v11003_v39 = vsel %vm26_vm1, %v10925_v40, 0.0  ;;  %v10867_v32 = vsub.f32 %v22018_v29, %v22194_v1 }
 0xc32   :  { %v10996_v21 = vadd.f32 %v10995_v59, %v10994_v58  ;;  %v10927_v59 = vmul.f32 %v10863_v63, %v10863_v63  ;;  %v11005_v51 = vsel %vm26_vm1, %v10926_v43, 0.0  ;;  %v10868_v63 = vsub.f32 %v22028_v46, %v22194_v1 }
 0xc34   :  { %v10998_v7 = vadd.f32 %v10997_v49, %v10996_v21  ;;  %v10928_v49 = vmul.f32 %v10864_v36, %v10864_v36  ;;  %v11007_v34 = vsel %vm26_vm1, %v10927_v59, 0.0  ;;  %v10869_v36 = vsub.f32 %v22026_v41, %v22194_v1 }
 0xc36   :  { %v11000_v35 = vadd.f32 %v10999_v42, %v10998_v7  ;;  %v10929_v42 = vmul.f32 %v10865_v53, %v10865_v53  ;;  %v11009_v40 = vsel %vm26_vm1, %v10928_v49, 0.0  ;;  %v10870_v53 = vsub.f32 %v22036_v62, %v22194_v1 }
 0xc38   :  { %v11002_v58 = vadd.f32 %v11001_v23, %v11000_v35  ;;  %v10930_v23 = vmul.f32 %v10866_v50, %v10866_v50  ;;  %v11011_v43 = vsel %vm26_vm1, %v10929_v42, 0.0  ;;  %v10871_v50 = vsub.f32 %v22034_v44, %v22194_v1 }
 0xc3a   :  { %v11004_v21 = vadd.f32 %v11003_v39, %v11002_v58  ;;  %v10931_v39 = vmul.f32 %v10867_v32, %v10867_v32  ;;  %v11013_v59 = vsel %vm26_vm1, %v10930_v23, 0.0  ;;  %v10872_v32 = vsub.f32 %v22044_v4, %v22194_v1 }
 0xc3c   :  { %v11006_v7 = vadd.f32 %v11005_v51, %v11004_v21  ;;  %v10932_v51 = vmul.f32 %v10868_v63, %v10868_v63  ;;  %v11015_v49 = vsel %vm26_vm1, %v10931_v39, 0.0  ;;  %v10873_v63 = vsub.f32 %v22042_v30, %v22194_v1 }
 0xc3e   :  { %v11008_v35 = vadd.f32 %v11007_v34, %v11006_v7  ;;  %v10933_v34 = vmul.f32 %v10869_v36, %v10869_v36  ;;  %v11017_v42 = vsel %vm26_vm1, %v10932_v51, 0.0  ;;  %v10874_v36 = vsub.f32 %v22052_v45, %v22194_v1 }
 0xc40   :  { %v11010_v58 = vadd.f32 %v11009_v40, %v11008_v35  ;;  %v10934_v40 = vmul.f32 %v10870_v53, %v10870_v53  ;;  %v11019_v23 = vsel %vm26_vm1, %v10933_v34, 0.0  ;;  %v10875_v53 = vsub.f32 %v22050_v27, %v22194_v1 }
 0xc42   :  { %v11012_v21 = vadd.f32 %v11011_v43, %v11010_v58  ;;  %v10935_v43 = vmul.f32 %v10871_v50, %v10871_v50  ;;  %v11021_v39 = vsel %vm26_vm1, %v10934_v40, 0.0  ;;  %v10876_v50 = vsub.f32 %v22060_v0, %v22194_v1 }
 0xc44   :  { %v11014_v7 = vadd.f32 %v11013_v59, %v11012_v21  ;;  %v10936_v59 = vmul.f32 %v10872_v32, %v10872_v32  ;;  %v11023_v51 = vsel %vm26_vm1, %v10935_v43, 0.0  ;;  %v10877_v32 = vsub.f32 %v22058_v33, %v22194_v1 }
 0xc46   :  { %v11016_v35 = vadd.f32 %v11015_v49, %v11014_v7  ;;  %v10937_v49 = vmul.f32 %v10873_v63, %v10873_v63  ;;  %v11025_v34 = vsel %vm26_vm1, %v10936_v59, 0.0  ;;  %v10878_v63 = vsub.f32 %v22068_v28, %v22194_v1 }
 0xc48   :  { %v11018_v58 = vadd.f32 %v11017_v42, %v11016_v35  ;;  %v10938_v42 = vmul.f32 %v10874_v36, %v10874_v36  ;;  %v11027_v40 = vsel %vm26_vm1, %v10937_v49, 0.0  ;;  %v10879_v36 = vsub.f32 %v22066_v12, %v22194_v1 }
 0xc4a   :  { %v11020_v21 = vadd.f32 %v11019_v23, %v11018_v58  ;;  %v10939_v23 = vmul.f32 %v10875_v53, %v10875_v53  ;;  %v11029_v43 = vsel %vm26_vm1, %v10938_v42, 0.0  ;;  %v10880_v53 = vsub.f32 %v22076_v6, %v22194_v1 }
 0xc4c   :  { %v11022_v7 = vadd.f32 %v11021_v39, %v11020_v21  ;;  %v10940_v39 = vmul.f32 %v10876_v50, %v10876_v50  ;;  %v11031_v59 = vsel %vm26_vm1, %v10939_v23, 0.0  ;;  %v10881_v50 = vsub.f32 %v22074_v60, %v22194_v1 }
 0xc4e   :  { %v11024_v35 = vadd.f32 %v11023_v51, %v11022_v7  ;;  %v10941_v51 = vmul.f32 %v10877_v32, %v10877_v32  ;;  %v11033_v49 = vsel %vm26_vm1, %v10940_v39, 0.0  ;;  %v10882_v32 = vsub.f32 %v22084_v57, %v22194_v1 }
 0xc50   :  { %v11026_v58 = vadd.f32 %v11025_v34, %v11024_v35  ;;  %v10942_v34 = vmul.f32 %v10878_v63, %v10878_v63  ;;  %v11035_v42 = vsel %vm26_vm1, %v10941_v51, 0.0  ;;  %v10883_v63 = vsub.f32 %v22082_v38, %v22194_v1 }
 0xc52   :  { %v11028_v21 = vadd.f32 %v11027_v40, %v11026_v58  ;;  %v10943_v40 = vmul.f32 %v10879_v36, %v10879_v36  ;;  %v11037_v23 = vsel %vm26_vm1, %v10942_v34, 0.0  ;;  %v10884_v36 = vsub.f32 %v22092_v31, %v22194_v1 }
 0xc54   :  { %v11030_v7 = vadd.f32 %v11029_v43, %v11028_v21  ;;  %v10944_v43 = vmul.f32 %v10880_v53, %v10880_v53  ;;  %v11039_v39 = vsel %vm26_vm1, %v10943_v40, 0.0  ;;  %v10885_v53 = vsub.f32 %v22090_v26, %v22194_v1 }
 0xc56   :  { %v11032_v35 = vadd.f32 %v11031_v59, %v11030_v7  ;;  %v10945_v59 = vmul.f32 %v10881_v50, %v10881_v50  ;;  %v11041_v51 = vsel %vm26_vm1, %v10944_v43, 0.0  ;;  %v10886_v50 = vsub.f32 %v22100_v15, %v22194_v1 }
 0xc58   :  { %v11034_v58 = vadd.f32 %v11033_v49, %v11032_v35  ;;  %v10946_v49 = vmul.f32 %v10882_v32, %v10882_v32  ;;  %v11043_v34 = vsel %vm26_vm1, %v10945_v59, 0.0  ;;  %v10887_v32 = vsub.f32 %v22098_v24, %v22194_v1 }
 0xc5a   :  { %v11036_v21 = vadd.f32 %v11035_v42, %v11034_v58  ;;  %v10947_v42 = vmul.f32 %v10883_v63, %v10883_v63  ;;  %v11045_v40 = vsel %vm26_vm1, %v10946_v49, 0.0  ;;  %v10888_v63 = vsub.f32 %v22108_v22, %v22194_v1 }
 0xc5c   :  { %v11038_v7 = vadd.f32 %v11037_v23, %v11036_v21  ;;  %v10948_v23 = vmul.f32 %v10884_v36, %v10884_v36  ;;  %v11047_v43 = vsel %vm26_vm1, %v10947_v42, 0.0  ;;  %v10889_v36 = vsub.f32 %v22106_v16, %v22194_v1 }
 0xc5e   :  { %v11040_v35 = vadd.f32 %v11039_v39, %v11038_v7  ;;  %v10949_v39 = vmul.f32 %v10885_v53, %v10885_v53  ;;  %v11049_v59 = vsel %vm26_vm1, %v10948_v23, 0.0  ;;  %v10890_v53 = vsub.f32 %v22116_v52, %v22194_v1 }
 0xc60   :  { %v11042_v58 = vadd.f32 %v11041_v51, %v11040_v35  ;;  %v10950_v51 = vmul.f32 %v10886_v50, %v10886_v50  ;;  %v11051_v49 = vsel %vm26_vm1, %v10949_v39, 0.0  ;;  %v10891_v50 = vsub.f32 %v22114_v61, %v22194_v1 }
 0xc62   :  { %v11044_v21 = vadd.f32 %v11043_v34, %v11042_v58  ;;  %v10951_v34 = vmul.f32 %v10887_v32, %v10887_v32  ;;  %v11053_v42 = vsel %vm26_vm1, %v10950_v51, 0.0  ;;  %v10892_v32 = vsub.f32 %v22124_v25, %v22194_v1 }
 0xc63   :  { %v10955_v52 = vmul.f32 %v10891_v50, %v10891_v50 }
 0xc64   :  { %v11046_v7 = vadd.f32 %v11045_v40, %v11044_v21  ;;  %v10952_v40 = vmul.f32 %v10888_v63, %v10888_v63  ;;  %v11055_v23 = vsel %vm26_vm1, %v10951_v34, 0.0  ;;  %v10956_v61 = vmul.f32 %v10892_v32, %v10892_v32 }
 0xc66   :  { %v11048_v35 = vadd.f32 %v11047_v43, %v11046_v7  ;;  %v10953_v43 = vmul.f32 %v10889_v36, %v10889_v36  ;;  %v11057_v39 = vsel %vm26_vm1, %v10952_v40, 0.0  ;;  %v11063_v40 = vsel %vm26_vm1, %v10955_v52, 0.0 }
 0xc68   :  { %v11050_v58 = vadd.f32 %v11049_v59, %v11048_v35  ;;  %v10954_v59 = vmul.f32 %v10890_v53, %v10890_v53  ;;  %v11059_v51 = vsel %vm26_vm1, %v10953_v43, 0.0  ;;  %v11065_v43 = vsel %vm26_vm1, %v10956_v61, 0.0 }
 0xc6a   :  { %v11052_v21 = vadd.f32 %v11051_v49, %v11050_v58  ;;  %v23814_v49 = vld [vmem:[#allocation94_spill] sm:$0xff]  ;;  %v11061_v34 = vsel %vm26_vm1, %v10954_v59, 0.0 }
 0xc6b   :  { %v10893_v63 = vsub.f32 %v23814_v49, %v22194_v1 }
 0xc6c   :  { %v11054_v7 = vadd.f32 %v11053_v42, %v11052_v21  ;;  %v23815_v42 = vld [vmem:[#allocation96_spill] sm:$0xff] }
 0xc6d   :  { %v10894_v36 = vsub.f32 %v23815_v42, %v22194_v1  ;;  %v10957_v25 = vmul.f32 %v10893_v63, %v10893_v63 }
 0xc6e   :  { %v11056_v35 = vadd.f32 %v11055_v23, %v11054_v7  ;;  %v23816_v23 = vld [vmem:[#allocation95_spill] sm:$0xff] }
 0xc6f   :  { %v10895_v53 = vsub.f32 %v23816_v23, %v22194_v1  ;;  %v10958_v49 = vmul.f32 %v10894_v36, %v10894_v36  ;;  %v11067_v59 = vsel %vm26_vm1, %v10957_v25, 0.0 }
 0xc70   :  { %v11058_v58 = vadd.f32 %v11057_v39, %v11056_v35  ;;  %v23817_v39 = vld [vmem:[#allocation76_spill] sm:$0xff] }
 0xc71   :  { %v10896_v50 = vsub.f32 %v23817_v39, %v22194_v1  ;;  %v10959_v42 = vmul.f32 %v10895_v53, %v10895_v53  ;;  %v11069_v52 = vsel %vm26_vm1, %v10958_v49, 0.0 }
 0xc72   :  { %v11060_v21 = vadd.f32 %v11059_v51, %v11058_v58  ;;  %v23818_v51 = vld [vmem:[#allocation73_spill] sm:$0xff] }
 0xc73   :  { %v10897_v32 = vsub.f32 %v23818_v51, %v22194_v1  ;;  %v10960_v23 = vmul.f32 %v10896_v50, %v10896_v50  ;;  %v11071_v61 = vsel %vm26_vm1, %v10959_v42, 0.0 }
 0xc74   :  { %v11062_v7 = vadd.f32 %v11061_v34, %v11060_v21  ;;  %v23819_v34 = vld [vmem:[#allocation75_spill] sm:$0xff] }
 0xc75   :  { %v10898_v63 = vsub.f32 %v23819_v34, %v22194_v1  ;;  %v10961_v39 = vmul.f32 %v10897_v32, %v10897_v32  ;;  %v11073_v25 = vsel %vm26_vm1, %v10960_v23, 0.0 }
 0xc76   :  { %v11064_v35 = vadd.f32 %v11063_v40, %v11062_v7  ;;  %v23820_v40 = vld [vmem:[#allocation97_spill] sm:$0xff] }
 0xc77   :  { %v10899_v36 = vsub.f32 %v23820_v40, %v22194_v1  ;;  %v10962_v51 = vmul.f32 %v10898_v63, %v10898_v63  ;;  %v11075_v49 = vsel %vm26_vm1, %v10961_v39, 0.0 }
 0xc78   :  { %v11066_v58 = vadd.f32 %v11065_v43, %v11064_v35  ;;  %v23821_v43 = vld [vmem:[#allocation98_spill] sm:$0xff] }
 0xc79   :  { %v10900_v53 = vsub.f32 %v23821_v43, %v22194_v1  ;;  %v10963_v34 = vmul.f32 %v10899_v36, %v10899_v36  ;;  %v11077_v42 = vsel %vm26_vm1, %v10962_v51, 0.0 }
 0xc7a   :  { %v11068_v21 = vadd.f32 %v11067_v59, %v11066_v58  ;;  %v23822_v59 = vld [vmem:[#allocation78_spill] sm:$0xff] }
 0xc7b   :  { %v10901_v50 = vsub.f32 %v23822_v59, %v22194_v1  ;;  %v10964_v40 = vmul.f32 %v10900_v53, %v10900_v53  ;;  %v11079_v23 = vsel %vm26_vm1, %v10963_v34, 0.0 }
 0xc7c   :  { %v11070_v7 = vadd.f32 %v11069_v52, %v11068_v21  ;;  %v23823_v52 = vld [vmem:[#allocation99_spill] sm:$0xff] }
 0xc7d   :  { %v10902_v32 = vsub.f32 %v23823_v52, %v22194_v1  ;;  %v10965_v43 = vmul.f32 %v10901_v50, %v10901_v50  ;;  %v11081_v39 = vsel %vm26_vm1, %v10964_v40, 0.0 }
 0xc7e   :  { %v11072_v35 = vadd.f32 %v11071_v61, %v11070_v7  ;;  %v23824_v61 = vld [vmem:[#allocation77_spill] sm:$0xff] }
 0xc7f   :  { %v10903_v63 = vsub.f32 %v23824_v61, %v22194_v1  ;;  %v10966_v59 = vmul.f32 %v10902_v32, %v10902_v32  ;;  %v11083_v51 = vsel %vm26_vm1, %v10965_v43, 0.0 }
 0xc80   :  { %v11074_v58 = vadd.f32 %v11073_v25, %v11072_v35  ;;  %v23825_v25 = vld [vmem:[#allocation79_spill] sm:$0xff] }
 0xc81   :  { %v10904_v36 = vsub.f32 %v23825_v25, %v22194_v1  ;;  %v10967_v52 = vmul.f32 %v10903_v63, %v10903_v63  ;;  %v11085_v34 = vsel %vm26_vm1, %v10966_v59, 0.0  ;;  %v10908_v63 = vsub.f32 %v22188_v20, %v22194_v1 }
 0xc82   :  { %v11076_v21 = vadd.f32 %v11075_v49, %v11074_v58  ;;  %v23826_v49 = vld [vmem:[#allocation80_spill] sm:$0xff] }
 0xc83   :  { %v10905_v53 = vsub.f32 %v23826_v49, %v22194_v1  ;;  %v10968_v61 = vmul.f32 %v10904_v36, %v10904_v36  ;;  %v11087_v40 = vsel %vm26_vm1, %v10967_v52, 0.0  ;;  %v10909_v36 = vsub.f32 %v22186_v13, %v22194_v1 }
 0xc84   :  { %v11078_v7 = vadd.f32 %v11077_v42, %v11076_v21  ;;  %v23827_v42 = vld [vmem:[#allocation82_spill] sm:$0xff] }
 0xc85   :  { %v10906_v50 = vsub.f32 %v23827_v42, %v22194_v1  ;;  %v10969_v25 = vmul.f32 %v10905_v53, %v10905_v53  ;;  %v11089_v43 = vsel %vm26_vm1, %v10968_v61, 0.0  ;;  %v10973_v52 = vmul.f32 %v10909_v36, %v10909_v36 }
 0xc86   :  { %v11080_v35 = vadd.f32 %v11079_v23, %v11078_v7  ;;  %v23828_v23 = vld [vmem:[#allocation100_spill] sm:$0xff] }
 0xc87   :  { %v10907_v32 = vsub.f32 %v23828_v23, %v22194_v1  ;;  %v11091_v59 = vsel %vm26_vm1, %v10969_v25, 0.0  ;;  %v11099_v61 = vsel %vm26_vm1, %v10973_v52, 0.0  ;;  %v23829_v52 = vld [vmem:[#allocation90_spill] sm:$0xff] }
 0xc88   :  { %v11082_v58 = vadd.f32 %v11081_v39, %v11080_v35  ;;  %v10970_v39 = vmul.f32 %v10906_v50, %v10906_v50 }
 0xc8a   :  { %v11084_v21 = vadd.f32 %v11083_v51, %v11082_v58  ;;  %v10971_v51 = vmul.f32 %v10907_v32, %v10907_v32  ;;  %v11093_v53 = vsel %vm26_vm1, %v10970_v39, 0.0 }
 0xc8c   :  { %v11086_v7 = vadd.f32 %v11085_v34, %v11084_v21  ;;  %v10972_v34 = vmul.f32 %v10908_v63, %v10908_v63 }
 0xc8e   :  { %v11088_v35 = vadd.f32 %v11087_v40, %v11086_v7  ;;  %v11095_v7 = vsel %vm26_vm1, %v10971_v51, 0.0  ;;  %v11097_v50 = vsel %vm26_vm1, %v10972_v34, 0.0  ;;  %v11115_v34 = vld [vmem:[%s23311_s5] sm:$0x1] }
 0xc90   :  { %v11090_v58 = vadd.f32 %v11089_v43, %v11088_v35 }
 0xc92   :  { %v11092_v21 = vadd.f32 %v11091_v59, %v11090_v58 }
 0xc94   :  { %v11094_v23 = vadd.f32 %v11093_v53, %v11092_v21 }
 0xc96   :  { %v11096_v40 = vadd.f32 %v11095_v7, %v11094_v23 }
 0xc98   :  { %v11098_v20 = vadd.f32 %v11097_v50, %v11096_v40  ;;  %v23848_v40 = vld [vmem:[#allocation97_spill] sm:$0xff] }
 0xc9a   :  { %v11100_v35 = vadd.f32 %v11099_v61, %v11098_v20 }
 0xc9c   :  { %v11101_v43 = vrot.slane %v11100_v35, 4 }
 0xc9e   :  { %v11102_v13 = vadd.f32 %v11101_v43, %v11100_v35  ;;  %v23830_v35 = vld [vmem:[#allocation71_spill] sm:$0xff] }
 0xca0   :  { %v11103_v32 = vrot.slane %v11102_v13, 2 }
 0xca2   :  { %v11104_v42 = vadd.f32 %v11103_v32, %v11102_v13  ;;  %v22394_v13 = vld [vmem:[%s23312_s6] sm:$0x1] }
 0xca4   :  { %v11105_v25 = vrot.slane %v11104_v42, 1 }
 0xca6   :  { %v11106_v58 = vadd.f32 %v11105_v25, %v11104_v42  ;;  %v23832_v25 = vld [vmem:[#allocation91_spill] sm:$0xff] }
 0xca8   :  { %v11107_v63 = vmul.f32 0.001953125, %v11106_v58 }
 0xcaa   :  { %v11108_v59 = vadd.f32 1e-05, %v11107_v63  ;;  %v23833_v63 = vld [vmem:[#allocation85_spill] sm:$0xff] }
 0xcac   :  { %16539 = vrsqrt.f32 %v11108_v59  ;;  %v11110_v39 = vmul.f32 0.5, %v11108_v59 }
 0xcb6   :  { %v16540_v36 = vpop.eup %16539 }
 0xcb7   :  { %v11111_v21 = vmul.f32 %v16540_v36, %v11110_v39 }
 0xcb9   :  { %v11112_v51 = vmul.f32 %v16540_v36, %v11111_v21 }
 0xcbb   :  { %v11113_v23 = vsub.f32 1.5, %v11112_v51  ;;  %v23834_v51 = vld [vmem:[#allocation93_spill] sm:$0xff] }
 0xcbd   :  { %v11114_v53 = vmul.f32 %v16540_v36, %v11113_v23  ;;  %v23835_v23 = vld [vmem:[#allocation92_spill] sm:$0xff] }
 0xcbf   :  { %v11116_v20 = vmul.f32 %v11115_v34, %v11114_v53  ;;  %v23836_v34 = vld [vmem:[#allocation74_spill] sm:$0xff] }
 0xcc0   :  { %v23837_v53 = vld [vmem:[#allocation94_spill] sm:$0xff] }
 0xcc1   :  { %v22397_v42 = vmul.f32 %v11116_v20, %v22194_v1  ;;  %v22400_v7 = vrot.slane %v11116_v20, %v23829_v52  ;;  %v23831_v1 = vld [vmem:[#allocation72_spill] sm:$0xff] }
 0xcc2   :  { %v23838_v20 = vld [vmem:[#allocation96_spill] sm:$0xff] }
 0xcc3   :  { %v22406_v50 = vmul.f32 %v22400_v7, %v21942_v17  ;;  %v22410_v61 = vmul.f32 %v21938_v10, %v22400_v7  ;;  %v22414_v43 = vmul.f32 %v22400_v7, %v23830_v35  ;;  %v22418_v32 = vmul.f32 %v23831_v1, %v22400_v7  ;;  %v23840_v35 = vld [vmem:[#allocation95_spill] sm:$0xff] }
 0xcc4   :  { %v22422_v58 = vmul.f32 %v22400_v7, %v23832_v25  ;;  %v22426_v17 = vmul.f32 %v23833_v63, %v22400_v7  ;;  %v22430_v10 = vmul.f32 %v22400_v7, %v21964_v37  ;;  %v22434_v59 = vmul.f32 %v21962_v3, %v22400_v7  ;;  %v23842_v25 = vld [vmem:[#allocation76_spill] sm:$0xff] }
 0xcc5   :  { %v22438_v39 = vmul.f32 %v22400_v7, %v21972_v14  ;;  %v22442_v36 = vmul.f32 %v21970_v11, %v22400_v7  ;;  %v22446_v21 = vmul.f32 %v22400_v7, %v21980_v9  ;;  %v22450_v37 = vmul.f32 %v21978_v19, %v22400_v7 }
 0xcc6   :  { %v22454_v3 = vmul.f32 %v22400_v7, %v21988_v18  ;;  %v22458_v14 = vmul.f32 %v21986_v56, %v22400_v7  ;;  %v22462_v11 = vmul.f32 %v22400_v7, %v21996_v47  ;;  %v22466_v9 = vmul.f32 %v21994_v2, %v22400_v7 }
 0xcc7   :  { %v22470_v19 = vmul.f32 %v22400_v7, %v22004_v8  ;;  %v22474_v18 = vmul.f32 %v22002_v48, %v22400_v7  ;;  %v22478_v56 = vmul.f32 %v22400_v7, %v22012_v54  ;;  %v22482_v47 = vmul.f32 %v22010_v55, %v22400_v7 }
 0xcc8   :  { %v22486_v2 = vmul.f32 %v22400_v7, %v22020_v5  ;;  %v22490_v8 = vmul.f32 %v22018_v29, %v22400_v7  ;;  %v22494_v48 = vmul.f32 %v22400_v7, %v22028_v46  ;;  %v22498_v54 = vmul.f32 %v22026_v41, %v22400_v7 }
 0xcc9   :  { %v22502_v55 = vmul.f32 %v22400_v7, %v22036_v62  ;;  %v22506_v5 = vmul.f32 %v22034_v44, %v22400_v7  ;;  %v22510_v29 = vmul.f32 %v22400_v7, %v22044_v4  ;;  %v22514_v46 = vmul.f32 %v22042_v30, %v22400_v7 }
 0xcca   :  { %v22518_v41 = vmul.f32 %v22400_v7, %v22052_v45  ;;  %v22522_v62 = vmul.f32 %v22050_v27, %v22400_v7  ;;  %v22526_v44 = vmul.f32 %v22400_v7, %v22060_v0  ;;  %v22530_v4 = vmul.f32 %v22058_v33, %v22400_v7 }
 0xccb   :  { %v22534_v30 = vmul.f32 %v22400_v7, %v22068_v28  ;;  %v22538_v45 = vmul.f32 %v22066_v12, %v22400_v7  ;;  %v22542_v27 = vmul.f32 %v22400_v7, %v22076_v6  ;;  %v22546_v0 = vmul.f32 %v22074_v60, %v22400_v7 }
 0xccc   :  { %v22550_v33 = vmul.f32 %v22400_v7, %v22084_v57  ;;  %v22554_v28 = vmul.f32 %v22082_v38, %v22400_v7  ;;  %v22558_v12 = vmul.f32 %v22400_v7, %v22092_v31  ;;  %v22562_v6 = vmul.f32 %v22090_v26, %v22400_v7 }
 0xccd   :  { %v22566_v60 = vmul.f32 %v22400_v7, %v22100_v15  ;;  %v22570_v57 = vmul.f32 %v22098_v24, %v22400_v7  ;;  %v22574_v38 = vmul.f32 %v22400_v7, %v22108_v22  ;;  %v22578_v31 = vmul.f32 %v22106_v16, %v22400_v7 }
 0xcce   :  { %v22582_v26 = vmul.f32 %v22400_v7, %v23834_v51  ;;  %v22586_v15 = vmul.f32 %v23835_v23, %v22400_v7  ;;  %v22590_v24 = vmul.f32 %v22400_v7, %v23836_v34  ;;  %v22594_v22 = vmul.f32 %v23837_v53, %v22400_v7  ;;  %v23844_v51 = vld [vmem:[#allocation73_spill] sm:$0xff]  ;;  %v23846_v34 = vld [vmem:[#allocation75_spill] sm:$0xff] }
 0xccf   :  { %v22598_v16 = vmul.f32 %v22400_v7, %v23838_v20  ;;  %v22602_v1 = vmul.f32 %v23840_v35, %v22400_v7  ;;  %v22606_v63 = vmul.f32 %v22400_v7, %v23842_v25  ;;  %v22610_v23 = vmul.f32 %v23844_v51, %v22400_v7 }
 0xcd0   :  { %v22614_v53 = vmul.f32 %v22400_v7, %v23846_v34  ;;  %v22618_v20 = vmul.f32 %v23848_v40, %v22400_v7 }
 0xcd1   :  { %23839 = vst [vmem:[#allocation84_spill] sm:$0xff] %v22598_v16  ;;  %23841 = vst [vmem:[#allocation83_spill] sm:$0xff] %v22602_v1  ;;  %v23849_v16 = vld [vmem:[#allocation98_spill] sm:$0xff] }
 0xcd2   :  { %23843 = vst [vmem:[#allocation102_spill] sm:$0xff] %v22606_v63  ;;  %23845 = vst [vmem:[#allocation86_spill] sm:$0xff] %v22610_v23  ;;  %v22622_v35 = vmul.f32 %v22400_v7, %v23849_v16  ;;  %v23851_v1 = vld [vmem:[#allocation78_spill] sm:$0xff]  ;;  %v23853_v63 = vld [vmem:[#allocation99_spill] sm:$0xff]  ;;  %v22642_v16 = vmul.f32 %v23826_v49, %v22400_v7  ;;  %v23863_v49 = vsub.f32 %v22394_v13, %v22397_v42 }
 0xcd3   :  { %23847 = vst [vmem:[#allocation88_spill] sm:$0xff] %v22614_v53  ;;  %v22626_v25 = vmul.f32 %v23851_v1, %v22400_v7  ;;  %v22630_v51 = vmul.f32 %v22400_v7, %v23853_v63  ;;  %v23855_v23 = vld [vmem:[#allocation77_spill] sm:$0xff]  ;;  %v23857_v53 = vld [vmem:[#allocation79_spill] sm:$0xff] }
 0xcd4   :  { %23850 = vst [vmem:[#allocation89_spill] sm:$0xff] %v22622_v35  ;;  %v22634_v34 = vmul.f32 %v23855_v23, %v22400_v7  ;;  %v22638_v40 = vmul.f32 %v22400_v7, %v23857_v53  ;;  %23858 = vst [vmem:[#allocation69_spill] sm:$0xff] %v22642_v16  ;;  %v23859_v35 = vld [vmem:[#allocation82_spill] sm:$0xff]  ;;  %v22664_v16 = vrot.slane %v23863_v49, %v23829_v52 }
 0xcd5   :  { %23852 = vst [vmem:[#allocation70_spill] sm:$0xff] %v22626_v25  ;;  %23854 = vst [vmem:[#allocation68_spill] sm:$0xff] %v22630_v51  ;;  %v22646_v1 = vmul.f32 %v22400_v7, %v23859_v35  ;;  %v23860_v25 = vld [vmem:[#allocation100_spill] sm:$0xff]  ;;  %v23861_v51 = vld [vmem:[#allocation101_spill] sm:$0xff] }
 0xcd6   :  { %23856 = vst [vmem:[#allocation67_spill] sm:$0xff] %v22634_v34  ;;  %v22650_v63 = vmul.f32 %v23860_v25, %v22400_v7  ;;  %v22654_v23 = vmul.f32 %v22400_v7, %v23861_v51  ;;  %v23862_v34 = vld [vmem:[#allocation81_spill] sm:$0xff]  ;;  %v22668_v35 = vadd.f32 %v22664_v16, %v22406_v50  ;;  %v22672_v25 = vadd.f32 %v22664_v16, %v22410_v61 }
 0xcd7   :  { %v22658_v53 = vmul.f32 %v23862_v34, %v22400_v7  ;;  %v22676_v51 = vadd.f32 %v22664_v16, %v22414_v43  ;;  %v22680_v7 = vadd.f32 %v22664_v16, %v22418_v32  ;;  %v22684_v13 = vadd.f32 %v22664_v16, %v22422_v58 }
 0xcd8   :  { %v22688_v42 = vadd.f32 %v22664_v16, %v22426_v17  ;;  %v22692_v52 = vadd.f32 %v22664_v16, %v22430_v10  ;;  %v22696_v50 = vadd.f32 %v22664_v16, %v22434_v59  ;;  %v22700_v61 = vadd.f32 %v22664_v16, %v22438_v39 }
 0xcd9   :  { %v22704_v43 = vadd.f32 %v22664_v16, %v22442_v36  ;;  %v22708_v32 = vadd.f32 %v22664_v16, %v22446_v21  ;;  %v22712_v58 = vadd.f32 %v22664_v16, %v22450_v37  ;;  %v22716_v17 = vadd.f32 %v22664_v16, %v22454_v3  ;;  %v23869_v34 = vld [vmem:[#allocation102_spill] sm:$0xff] }
 0xcda   :  { %v22720_v10 = vadd.f32 %v22664_v16, %v22458_v14  ;;  %v22724_v59 = vadd.f32 %v22664_v16, %v22462_v11  ;;  %v22728_v39 = vadd.f32 %v22664_v16, %v22466_v9  ;;  %v22732_v36 = vadd.f32 %v22664_v16, %v22470_v19  ;;  %v23871_v49 = vld [vmem:[#allocation86_spill] sm:$0xff] }
 0xcdb   :  { %v22736_v21 = vadd.f32 %v22664_v16, %v22474_v18  ;;  %v22740_v37 = vadd.f32 %v22664_v16, %v22478_v56  ;;  %v22744_v3 = vadd.f32 %v22664_v16, %v22482_v47  ;;  %v22748_v14 = vadd.f32 %v22664_v16, %v22486_v2 }
 0xcdc   :  { %v22752_v11 = vadd.f32 %v22664_v16, %v22490_v8  ;;  %v22756_v9 = vadd.f32 %v22664_v16, %v22494_v48  ;;  %v22760_v19 = vadd.f32 %v22664_v16, %v22498_v54  ;;  %v22764_v18 = vadd.f32 %v22664_v16, %v22502_v55 }
 0xcdd   :  { %v22768_v56 = vadd.f32 %v22664_v16, %v22506_v5  ;;  %v22772_v47 = vadd.f32 %v22664_v16, %v22510_v29  ;;  %v22776_v2 = vadd.f32 %v22664_v16, %v22514_v46  ;;  %v22780_v8 = vadd.f32 %v22664_v16, %v22518_v41 }
 0xcde   :  { %v22784_v48 = vadd.f32 %v22664_v16, %v22522_v62  ;;  %v22788_v54 = vadd.f32 %v22664_v16, %v22526_v44  ;;  %v22792_v55 = vadd.f32 %v22664_v16, %v22530_v4  ;;  %v22796_v5 = vadd.f32 %v22664_v16, %v22534_v30 }
 0xcdf   :  { %v22800_v29 = vadd.f32 %v22664_v16, %v22538_v45  ;;  %v22804_v46 = vadd.f32 %v22664_v16, %v22542_v27  ;;  %v22808_v41 = vadd.f32 %v22664_v16, %v22546_v0  ;;  %v22812_v62 = vadd.f32 %v22664_v16, %v22550_v33 }
 0xce0   :  { %v22816_v44 = vadd.f32 %v22664_v16, %v22554_v28  ;;  %v22820_v4 = vadd.f32 %v22664_v16, %v22558_v12  ;;  %v22824_v30 = vadd.f32 %v22664_v16, %v22562_v6  ;;  %v22828_v45 = vadd.f32 %v22664_v16, %v22566_v60 }
 0xce1   :  { %v22832_v27 = vadd.f32 %v22664_v16, %v22570_v57  ;;  %v22836_v0 = vadd.f32 %v22664_v16, %v22574_v38  ;;  %v22840_v33 = vadd.f32 %v22664_v16, %v22578_v31  ;;  %v22844_v28 = vadd.f32 %v22664_v16, %v22582_v26  ;;  %v23865_v57 = vld [vmem:[#allocation84_spill] sm:$0xff]  ;;  %v23867_v31 = vld [vmem:[#allocation83_spill] sm:$0xff] }
 0xce2   :  { %v22848_v12 = vadd.f32 %v22664_v16, %v22586_v15  ;;  %v22852_v6 = vadd.f32 %v22664_v16, %v22590_v24  ;;  %v22856_v60 = vadd.f32 %v22664_v16, %v22594_v22  ;;  %v22860_v38 = vadd.f32 %v22664_v16, %v23865_v57 }
 0xce3   :  { %v22864_v26 = vadd.f32 %v22664_v16, %v23867_v31  ;;  %v22868_v15 = vadd.f32 %v22664_v16, %v23869_v34  ;;  %v22872_v24 = vadd.f32 %v22664_v16, %v23871_v49  ;;  %v22880_v57 = vadd.f32 %v22664_v16, %v22618_v20 }
 0xce4   :  { %23864 = vst [vmem:[#allocation87_spill] sm:$0xff] %v22852_v6  ;;  %23866 = vst [vmem:[#allocation80_spill] sm:$0xff] %v22860_v38  ;;  %v23873_v6 = vld [vmem:[#allocation88_spill] sm:$0xff]  ;;  %v23875_v38 = vld [vmem:[#allocation89_spill] sm:$0xff]  ;;  %v22900_v20 = vadd.f32 %v22664_v16, %v22638_v40  ;;  %v22920_v40 = vadd.f32 %v22664_v16, %v22658_v53 }
 0xce5   :  { %23868 = vst [vmem:[#allocation90_spill] sm:$0xff] %v22864_v26  ;;  %23870 = vst [vmem:[#allocation71_spill] sm:$0xff] %v22868_v15  ;;  %v22876_v22 = vadd.f32 %v22664_v16, %v23873_v6  ;;  %v22884_v31 = vadd.f32 %v22664_v16, %v23875_v38  ;;  %v23876_v26 = vld [vmem:[#allocation70_spill] sm:$0xff]  ;;  %v23878_v15 = vld [vmem:[#allocation68_spill] sm:$0xff] }
 0xce6   :  { %23872 = vst [vmem:[#allocation72_spill] sm:$0xff] %v22872_v24  ;;  %23874 = vst [vmem:[#allocation91_spill] sm:$0xff] %v22880_v57  ;;  %v22888_v34 = vadd.f32 %v22664_v16, %v23876_v26  ;;  %v22892_v49 = vadd.f32 %v22664_v16, %v23878_v15  ;;  %v23880_v24 = vld [vmem:[#allocation67_spill] sm:$0xff]  ;;  %v23883_v57 = vld [vmem:[#allocation69_spill] sm:$0xff]  ;;  %v22908_v26 = vadd.f32 %v22664_v16, %v22646_v1 }
 0xce7   :  { %v22896_v6 = vadd.f32 %v22664_v16, %v23880_v24  ;;  %23882 = vst [vmem:[#allocation74_spill] sm:$0xff] %v22900_v20  ;;  %v22904_v38 = vadd.f32 %v22664_v16, %v23883_v57  ;;  %v22912_v15 = vadd.f32 %v22664_v16, %v22650_v63  ;;  %v22916_v24 = vadd.f32 %v22664_v16, %v22654_v23  ;;  %v23889_v20 = vld [vmem:[#allocation3_spill] sm:$0xff]  ;;  %v23891_v1 = vld [vmem:[#allocation5_spill] sm:$0xff] }
 0xce8   :  { %23877 = vst [vmem:[#allocation85_spill] sm:$0xff] %v22888_v34  ;;  %23879 = vst [vmem:[#allocation93_spill] sm:$0xff] %v22892_v49  ;;  %v11260_v57 = vadd.f32 %v22668_v35, %v23889_v20  ;;  %v23892_v49 = vld [vmem:[#allocation6_spill] sm:$0xff]  ;;  %v23895_v16 = vld [vmem:[#allocation9_spill] sm:$0xff] }
 0xce9   :  { %23881 = vst [vmem:[#allocation92_spill] sm:$0xff] %v22896_v6  ;;  %23884 = vst [vmem:[#allocation94_spill] sm:$0xff] %v22904_v38  ;;  %v23890_v38 = vld [vmem:[#allocation4_spill] sm:$0xff]  ;;  %v11263_v63 = vadd.f32 %v22680_v7, %v23892_v49  ;;  %v11266_v53 = vadd.f32 %v22692_v52, %v23895_v16  ;;  %v23897_v20 = vld [vmem:[#allocation11_spill] sm:$0xff] }
 0xcea   :  { %23885 = vst [vmem:[#allocation96_spill] sm:$0xff] %v22908_v26  ;;  %23886 = vst [vmem:[#allocation95_spill] sm:$0xff] %v22912_v15  ;;  %v11261_v6 = vadd.f32 %v22672_v25, %v23890_v38  ;;  %v11262_v26 = vadd.f32 %v22676_v51, %v23891_v1  ;;  %v23893_v15 = vld [vmem:[#allocation7_spill] sm:$0xff]  ;;  %v11268_v25 = vadd.f32 %v22700_v61, %v23897_v20  ;;  %v23898_v38 = vld [vmem:[#allocation12_spill] sm:$0xff] }
 0xceb   :  { %23887 = vst [vmem:[#allocation76_spill] sm:$0xff] %v22916_v24  ;;  %23888 = vst [vmem:[#allocation73_spill] sm:$0xff] %v22920_v40  ;;  %v11264_v23 = vadd.f32 %v22684_v13, %v23893_v15  ;;  %v23894_v24 = vld [vmem:[#allocation8_spill] sm:$0xff]  ;;  %v23896_v40 = vld [vmem:[#allocation10_spill] sm:$0xff]  ;;  %v11269_v51 = vadd.f32 %v22704_v43, %v23898_v38 }
 0xcec   :  { %v11265_v34 = vadd.f32 %v22688_v42, %v23894_v24  ;;  %v11267_v35 = vadd.f32 %v22696_v50, %v23896_v40  ;;  %v23899_v1 = vld [vmem:[#allocation13_spill] sm:$0xff]  ;;  %v23900_v49 = vld [vmem:[#allocation14_spill] sm:$0xff]  ;;  %11324 = vst.msk [vmem:[%s23313_s7] sm:$0xff] %vm26_vm1, %v11260_v57  ;;  %11325 = vst.msk [vmem:[%s23313_s7 + $0x8] sm:$0xff] %vm26_vm1, %v11261_v6 }
 0xced   :  { %v11270_v7 = vadd.f32 %v22708_v32, %v23899_v1  ;;  %v11271_v13 = vadd.f32 %v22712_v58, %v23900_v49  ;;  %11326 = vst.msk [vmem:[%s23313_s7 + $0x10] sm:$0xff] %vm26_vm1, %v11262_v26  ;;  %11327 = vst.msk [vmem:[%s23313_s7 + $0x18] sm:$0xff] %vm26_vm1, %v11263_v63  ;;  %v23901_v42 = vld [vmem:[#allocation15_spill] sm:$0xff]  ;;  %v23902_v50 = vld [vmem:[#allocation16_spill] sm:$0xff] }
 0xcee   :  { %v11272_v52 = vadd.f32 %v22716_v17, %v23901_v42  ;;  %v11273_v61 = vadd.f32 %v22720_v10, %v23902_v50  ;;  %v23903_v43 = vld [vmem:[#allocation17_spill] sm:$0xff]  ;;  %v23904_v58 = vld [vmem:[#allocation18_spill] sm:$0xff]  ;;  %11328 = vst.msk [vmem:[%s23313_s7 + $0x20] sm:$0xff] %vm26_vm1, %v11264_v23  ;;  %11329 = vst.msk [vmem:[%s23313_s7 + $0x28] sm:$0xff] %vm26_vm1, %v11265_v34 }
 0xcef   :  { %v11274_v32 = vadd.f32 %v22724_v59, %v23903_v43  ;;  %v11275_v6 = vadd.f32 %v22728_v39, %v23904_v58  ;;  %11330 = vst.msk [vmem:[%s23313_s7 + $0x30] sm:$0xff] %vm26_vm1, %v11266_v53  ;;  %11331 = vst.msk [vmem:[%s23313_s7 + $0x38] sm:$0xff] %vm26_vm1, %v11267_v35  ;;  %v23905_v17 = vld [vmem:[#allocation19_spill] sm:$0xff]  ;;  %v23906_v59 = vld [vmem:[#allocation20_spill] sm:$0xff] }
 0xcf0   :  { %v11276_v10 = vadd.f32 %v22732_v36, %v23905_v17  ;;  %v11277_v39 = vadd.f32 %v22736_v21, %v23906_v59  ;;  %v23907_v26 = vld [vmem:[#allocation21_spill] sm:$0xff]  ;;  %v23908_v34 = vld [vmem:[#allocation22_spill] sm:$0xff]  ;;  %11332 = vst.msk [vmem:[%s23313_s7 + $0x40] sm:$0xff] %vm26_vm1, %v11268_v25  ;;  %11333 = vst.msk [vmem:[%s23313_s7 + $0x48] sm:$0xff] %vm26_vm1, %v11269_v51 }
 0xcf1   :  { %v11278_v15 = vadd.f32 %v22740_v37, %v23907_v26  ;;  %v11279_v24 = vadd.f32 %v22744_v3, %v23908_v34  ;;  %11334 = vst.msk [vmem:[%s23313_s7 + $0x50] sm:$0xff] %vm26_vm1, %v11270_v7  ;;  %11335 = vst.msk [vmem:[%s23313_s7 + $0x58] sm:$0xff] %vm26_vm1, %v11271_v13  ;;  %v23909_v36 = vld [vmem:[#allocation23_spill] sm:$0xff]  ;;  %v23910_v37 = vld [vmem:[#allocation24_spill] sm:$0xff] }
 0xcf2   :  { %v11280_v21 = vadd.f32 %v22748_v14, %v23909_v36  ;;  %v11281_v3 = vadd.f32 %v22752_v11, %v23910_v37  ;;  %v23911_v40 = vld [vmem:[#allocation25_spill] sm:$0xff]  ;;  %v23912_v63 = vld [vmem:[#allocation26_spill] sm:$0xff]  ;;  %11336 = vst.msk [vmem:[%s23313_s7 + $0x60] sm:$0xff] %vm26_vm1, %v11272_v52  ;;  %11337 = vst.msk [vmem:[%s23313_s7 + $0x68] sm:$0xff] %vm26_vm1, %v11273_v61 }
 0xcf3   :  { %v11282_v57 = vadd.f32 %v22756_v9, %v23911_v40  ;;  %v11283_v23 = vadd.f32 %v22760_v19, %v23912_v63  ;;  %11338 = vst.msk [vmem:[%s23313_s7 + $0x70] sm:$0xff] %vm26_vm1, %v11274_v32  ;;  %11339 = vst.msk [vmem:[%s23313_s7 + $0x78] sm:$0xff] %vm26_vm1, %v11275_v6  ;;  %v23913_v14 = vld [vmem:[#allocation27_spill] sm:$0xff]  ;;  %v23914_v9 = vld [vmem:[#allocation28_spill] sm:$0xff] }
 0xcf4   :  { %v11284_v11 = vadd.f32 %v22764_v18, %v23913_v14  ;;  %v11285_v19 = vadd.f32 %v22768_v56, %v23914_v9  ;;  %v23915_v16 = vld [vmem:[#allocation29_spill] sm:$0xff]  ;;  %v23916_v35 = vld [vmem:[#allocation30_spill] sm:$0xff]  ;;  %11340 = vst.msk [vmem:[%s23313_s7 + $0x80] sm:$0xff] %vm26_vm1, %v11276_v10  ;;  %11341 = vst.msk [vmem:[%s23313_s7 + $0x88] sm:$0xff] %vm26_vm1, %v11277_v39 }
 0xcf5   :  { %v11286_v53 = vadd.f32 %v22772_v47, %v23915_v16  ;;  %v11287_v20 = vadd.f32 %v22776_v2, %v23916_v35  ;;  %11342 = vst.msk [vmem:[%s23313_s7 + $0x90] sm:$0xff] %vm26_vm1, %v11278_v15  ;;  %11343 = vst.msk [vmem:[%s23313_s7 + $0x98] sm:$0xff] %vm26_vm1, %v11279_v24  ;;  %v23917_v18 = vld [vmem:[#allocation31_spill] sm:$0xff]  ;;  %v23918_v47 = vld [vmem:[#allocation32_spill] sm:$0xff] }
 0xcf6   :  { %v11288_v56 = vadd.f32 %v22780_v8, %v23917_v18  ;;  %v11289_v2 = vadd.f32 %v22784_v48, %v23918_v47  ;;  %v23919_v25 = vld [vmem:[#allocation33_spill] sm:$0xff]  ;;  %v23920_v51 = vld [vmem:[#allocation34_spill] sm:$0xff]  ;;  %11344 = vst.msk [vmem:[%s23313_s7 + $0xa0] sm:$0xff] %vm26_vm1, %v11280_v21  ;;  %11345 = vst.msk [vmem:[%s23313_s7 + $0xa8] sm:$0xff] %vm26_vm1, %v11281_v3 }
 0xcf7   :  { %v11290_v38 = vadd.f32 %v22788_v54, %v23919_v25  ;;  %v11291_v1 = vadd.f32 %v22792_v55, %v23920_v51  ;;  %11346 = vst.msk [vmem:[%s23313_s7 + $0xb0] sm:$0xff] %vm26_vm1, %v11282_v57  ;;  %11347 = vst.msk [vmem:[%s23313_s7 + $0xb8] sm:$0xff] %vm26_vm1, %v11283_v23  ;;  %v23921_v8 = vld [vmem:[#allocation35_spill] sm:$0xff]  ;;  %v23922_v54 = vld [vmem:[#allocation36_spill] sm:$0xff] }
 0xcf8   :  { %v11292_v48 = vadd.f32 %v22796_v5, %v23921_v8  ;;  %v11293_v55 = vadd.f32 %v22800_v29, %v23922_v54  ;;  %v23923_v7 = vld [vmem:[#allocation37_spill] sm:$0xff]  ;;  %v23924_v13 = vld [vmem:[#allocation38_spill] sm:$0xff]  ;;  %11348 = vst.msk [vmem:[%s23313_s7 + $0xc0] sm:$0xff] %vm26_vm1, %v11284_v11  ;;  %11349 = vst.msk [vmem:[%s23313_s7 + $0xc8] sm:$0xff] %vm26_vm1, %v11285_v19 }
 0xcf9   :  { %v11294_v49 = vadd.f32 %v22804_v46, %v23923_v7  ;;  %v11295_v42 = vadd.f32 %v22808_v41, %v23924_v13  ;;  %11350 = vst.msk [vmem:[%s23313_s7 + $0xd0] sm:$0xff] %vm26_vm1, %v11286_v53  ;;  %11351 = vst.msk [vmem:[%s23313_s7 + $0xd8] sm:$0xff] %vm26_vm1, %v11287_v20  ;;  %v23925_v5 = vld [vmem:[#allocation39_spill] sm:$0xff]  ;;  %v23926_v46 = vld [vmem:[#allocation40_spill] sm:$0xff] }
 0xcfa   :  { %v11296_v29 = vadd.f32 %v22812_v62, %v23925_v5  ;;  %v11297_v41 = vadd.f32 %v22816_v44, %v23926_v46  ;;  %v23927_v52 = vld [vmem:[#allocation41_spill] sm:$0xff]  ;;  %v23928_v61 = vld [vmem:[#allocation42_spill] sm:$0xff]  ;;  %11352 = vst.msk [vmem:[%s23313_s7 + $0xe0] sm:$0xff] %vm26_vm1, %v11288_v56  ;;  %11353 = vst.msk [vmem:[%s23313_s7 + $0xe8] sm:$0xff] %vm26_vm1, %v11289_v2 }
 0xcfb   :  { %v11298_v50 = vadd.f32 %v22820_v4, %v23927_v52  ;;  %v11299_v43 = vadd.f32 %v22824_v30, %v23928_v61  ;;  %11354 = vst.msk [vmem:[%s23313_s7 + $0xf0] sm:$0xff] %vm26_vm1, %v11290_v38  ;;  %11355 = vst.msk [vmem:[%s23313_s7 + $0xf8] sm:$0xff] %vm26_vm1, %v11291_v1  ;;  %v23929_v62 = vld [vmem:[#allocation43_spill] sm:$0xff]  ;;  %v23930_v4 = vld [vmem:[#allocation44_spill] sm:$0xff] }
 0xcfc   :  { %v11300_v44 = vadd.f32 %v22828_v45, %v23929_v62  ;;  %v11301_v30 = vadd.f32 %v22832_v27, %v23930_v4  ;;  %v23931_v32 = vld [vmem:[#allocation45_spill] sm:$0xff]  ;;  %v23932_v6 = vld [vmem:[#allocation46_spill] sm:$0xff]  ;;  %11356 = vst.msk [vmem:[%s23313_s7 + $0x100] sm:$0xff] %vm26_vm1, %v11292_v48  ;;  %11357 = vst.msk [vmem:[%s23313_s7 + $0x108] sm:$0xff] %vm26_vm1, %v11293_v55 }
 0xcfd   :  { %v11302_v58 = vadd.f32 %v22836_v0, %v23931_v32  ;;  %v11303_v17 = vadd.f32 %v22840_v33, %v23932_v6  ;;  %11358 = vst.msk [vmem:[%s23313_s7 + $0x110] sm:$0xff] %vm26_vm1, %v11294_v49  ;;  %11359 = vst.msk [vmem:[%s23313_s7 + $0x118] sm:$0xff] %vm26_vm1, %v11295_v42  ;;  %v23933_v45 = vld [vmem:[#allocation47_spill] sm:$0xff]  ;;  %v23934_v0 = vld [vmem:[#allocation48_spill] sm:$0xff] }
 0xcfe   :  { %v11304_v27 = vadd.f32 %v22844_v28, %v23933_v45  ;;  %v11305_v33 = vadd.f32 %v22848_v12, %v23934_v0  ;;  %v23935_v10 = vld [vmem:[#allocation49_spill] sm:$0xff]  ;;  %v23936_v59 = vld [vmem:[#allocation87_spill] sm:$0xff]  ;;  %v23937_v26 = vld [vmem:[#allocation50_spill] sm:$0xff]  ;;  %11360 = vst.msk [vmem:[%s23313_s7 + $0x120] sm:$0xff] %vm26_vm1, %v11296_v29 }
 0xcff   :  { %v11306_v39 = vadd.f32 %v23936_v59, %v23935_v10  ;;  %v11307_v15 = vadd.f32 %v22856_v60, %v23937_v26  ;;  %11361 = vst.msk [vmem:[%s23313_s7 + $0x128] sm:$0xff] %vm26_vm1, %v11297_v41  ;;  %11362 = vst.msk [vmem:[%s23313_s7 + $0x130] sm:$0xff] %vm26_vm1, %v11298_v50  ;;  %v23938_v28 = vld [vmem:[#allocation51_spill] sm:$0xff]  ;;  %v23939_v12 = vld [vmem:[#allocation80_spill] sm:$0xff] }
 0xd00   :  { %11363 = vst.msk [vmem:[%s23313_s7 + $0x138] sm:$0xff] %vm26_vm1, %v11299_v43  ;;  %v11308_v60 = vadd.f32 %v23939_v12, %v23938_v28  ;;  %v23940_v34 = vld [vmem:[#allocation52_spill] sm:$0xff]  ;;  %v23941_v24 = vld [vmem:[#allocation90_spill] sm:$0xff]  ;;  %v23942_v21 = vld [vmem:[#allocation53_spill] sm:$0xff] }
 0xd01   :  { %v11309_v36 = vadd.f32 %v23941_v24, %v23940_v34  ;;  %v23943_v37 = vld [vmem:[#allocation71_spill] sm:$0xff]  ;;  %v23944_v40 = vld [vmem:[#allocation54_spill] sm:$0xff]  ;;  %v23945_v57 = vld [vmem:[#allocation72_spill] sm:$0xff]  ;;  %11364 = vst.msk [vmem:[%s23313_s7 + $0x140] sm:$0xff] %vm26_vm1, %v11300_v44 }
 0xd02   :  { %v11310_v3 = vadd.f32 %v23943_v37, %v23942_v21  ;;  %v11311_v63 = vadd.f32 %v23945_v57, %v23944_v40  ;;  %11365 = vst.msk [vmem:[%s23313_s7 + $0x148] sm:$0xff] %vm26_vm1, %v11301_v30  ;;  %11366 = vst.msk [vmem:[%s23313_s7 + $0x150] sm:$0xff] %vm26_vm1, %v11302_v58  ;;  %v23946_v23 = vld [vmem:[#allocation55_spill] sm:$0xff]  ;;  %v23947_v11 = vld [vmem:[#allocation56_spill] sm:$0xff] }
 0xd03   :  { %11367 = vst.msk [vmem:[%s23313_s7 + $0x158] sm:$0xff] %vm26_vm1, %v11303_v17  ;;  %v11312_v14 = vadd.f32 %v22876_v22, %v23946_v23  ;;  %v23948_v9 = vld [vmem:[#allocation91_spill] sm:$0xff]  ;;  %v23949_v16 = vld [vmem:[#allocation57_spill] sm:$0xff]  ;;  %v23950_v35 = vld [vmem:[#allocation58_spill] sm:$0xff] }
 0xd04   :  { %v11313_v19 = vadd.f32 %v23948_v9, %v23947_v11  ;;  %v11314_v53 = vadd.f32 %v22884_v31, %v23949_v16  ;;  %v23951_v20 = vld [vmem:[#allocation85_spill] sm:$0xff]  ;;  %11368 = vst.msk [vmem:[%s23313_s7 + $0x160] sm:$0xff] %vm26_vm1, %v11304_v27  ;;  %11369 = vst.msk [vmem:[%s23313_s7 + $0x168] sm:$0xff] %vm26_vm1, %v11305_v33  ;;  %v23952_v22 = vld [vmem:[#allocation59_spill] sm:$0xff] }
 0xd05   :  { %v11315_v18 = vadd.f32 %v23951_v20, %v23950_v35  ;;  %11370 = vst.msk [vmem:[%s23313_s7 + $0x170] sm:$0xff] %vm26_vm1, %v11306_v39  ;;  %11371 = vst.msk [vmem:[%s23313_s7 + $0x178] sm:$0xff] %vm26_vm1, %v11307_v15  ;;  %v23953_v31 = vld [vmem:[#allocation93_spill] sm:$0xff]  ;;  %v23954_v47 = vld [vmem:[#allocation60_spill] sm:$0xff] }
 0xd06   :  { %v11316_v56 = vadd.f32 %v23953_v31, %v23952_v22  ;;  %v23955_v2 = vld [vmem:[#allocation92_spill] sm:$0xff]  ;;  %v23956_v38 = vld [vmem:[#allocation61_spill] sm:$0xff]  ;;  %v23957_v51 = vld [vmem:[#allocation74_spill] sm:$0xff]  ;;  %11372 = vst.msk [vmem:[%s23313_s7 + $0x180] sm:$0xff] %vm26_vm1, %v11308_v60 }
 0xd07   :  { %v11317_v25 = vadd.f32 %v23955_v2, %v23954_v47  ;;  %v11318_v1 = vadd.f32 %v23957_v51, %v23956_v38  ;;  %v23958_v8 = vld [vmem:[#allocation62_spill] sm:$0xff]  ;;  %11373 = vst.msk [vmem:[%s23313_s7 + $0x188] sm:$0xff] %vm26_vm1, %v11309_v36  ;;  %11374 = vst.msk [vmem:[%s23313_s7 + $0x190] sm:$0xff] %vm26_vm1, %v11310_v3  ;;  %v23960_v55 = vld [vmem:[#allocation63_spill] sm:$0xff] }
 0xd08   :  { %v23959_v48 = vld [vmem:[#allocation94_spill] sm:$0xff]  ;;  %11375 = vst.msk [vmem:[%s23313_s7 + $0x198] sm:$0xff] %vm26_vm1, %v11311_v63  ;;  %v23961_v7 = vld [vmem:[#allocation96_spill] sm:$0xff]  ;;  %v23963_v42 = vld [vmem:[#allocation95_spill] sm:$0xff] }
 0xd09   :  { %v11319_v54 = vadd.f32 %v23959_v48, %v23958_v8  ;;  %v11320_v49 = vadd.f32 %v23961_v7, %v23960_v55  ;;  %v23962_v13 = vld [vmem:[#allocation64_spill] sm:$0xff]  ;;  %v23964_v29 = vld [vmem:[#allocation65_spill] sm:$0xff]  ;;  %v23966_v52 = vld [vmem:[#allocation66_spill] sm:$0xff]  ;;  %11376 = vst.msk [vmem:[%s23313_s7 + $0x1a0] sm:$0xff] %vm26_vm1, %v11312_v14 }
 0xd0a   :  { %v11321_v5 = vadd.f32 %v23963_v42, %v23962_v13  ;;  %v23965_v46 = vld [vmem:[#allocation76_spill] sm:$0xff]  ;;  %v23967_v50 = vld [vmem:[#allocation73_spill] sm:$0xff]  ;;  %11377 = vst.msk [vmem:[%s23313_s7 + $0x1a8] sm:$0xff] %vm26_vm1, %v11313_v19  ;;  %11378 = vst.msk [vmem:[%s23313_s7 + $0x1b0] sm:$0xff] %vm26_vm1, %v11314_v53 }
 0xd0b   :  { %v11322_v41 = vadd.f32 %v23965_v46, %v23964_v29  ;;  %v11323_v61 = vadd.f32 %v23967_v50, %v23966_v52  ;;  %11379 = vst.msk [vmem:[%s23313_s7 + $0x1b8] sm:$0xff] %vm26_vm1, %v11315_v18  ;;  %11380 = vst.msk [vmem:[%s23313_s7 + $0x1c0] sm:$0xff] %vm26_vm1, %v11316_v56 }
 0xd0c   :  { %11381 = vst.msk [vmem:[%s23313_s7 + $0x1c8] sm:$0xff] %vm26_vm1, %v11317_v25  ;;  %11382 = vst.msk [vmem:[%s23313_s7 + $0x1d0] sm:$0xff] %vm26_vm1, %v11318_v1 }
 0xd0d   :  { %11383 = vst.msk [vmem:[%s23313_s7 + $0x1d8] sm:$0xff] %vm26_vm1, %v11319_v54  ;;  %11384 = vst.msk [vmem:[%s23313_s7 + $0x1e0] sm:$0xff] %vm26_vm1, %v11320_v49 }
 0xd0e   :  { %11385 = vst.msk [vmem:[%s23313_s7 + $0x1e8] sm:$0xff] %vm26_vm1, %v11321_v5  ;;  %11386 = vst.msk [vmem:[%s23313_s7 + $0x1f0] sm:$0xff] %vm26_vm1, %v11322_v41 }
 0xd0f   :  { %11387 = vst.msk [vmem:[%s23313_s7 + $0x1f8] sm:$0xff] %vm26_vm1, %v11323_v61 }

</bundles_post_ra>
